<compile_context>
chip_gen: v7x
topology: tpu7x:2x2x1
jax: 0.10.0
libtpu: 0.0.40
codegen_flags: <defaults>
</compile_context>

<pallas_src>
import functools

import jax
import jax.numpy as jnp
from jax.experimental import pallas as pl
from jax.experimental.pallas import tpu as pltpu


# ----------------------------------------------------------------------------
# Fused kernel: convs + pool + fc for one group of `imgs` images per grid step.
# refs layout:
#   inputs : x, w_0, b_0, ..., w_{L-1}, b_{L-1}, fc_w, fc_b
#   outputs: out (pred | pooled | zero-pad, lane-dense)
#   scratch: pad  (imgs, H+2, W+2, Cmax) bf16 (zero halo)
#            xcol (imgs*H*W, 9*Cmax)     bf16 (im2col buffer)
# ----------------------------------------------------------------------------
def _gch_fused_kernel(*refs, num_convs):
    x_ref = refs[0]
    conv_w = [refs[1 + 2 * l] for l in range(num_convs)]   # (9*Cin_l, Cout) bf16
    conv_b = [refs[2 + 2 * l] for l in range(num_convs)]   # (1, Cout)       f32
    fcw_ref = refs[1 + 2 * num_convs]                       # (Cout, ncls)    bf16
    fcb_ref = refs[2 + 2 * num_convs]                       # (1, ncls)       f32
    out_ref = refs[3 + 2 * num_convs]                       # (1, imgs, Dpad) f32
    pad_ref = refs[4 + 2 * num_convs]                       # (imgs,H+2,W+2,Cmax) bf16
    xcol_ref = refs[5 + 2 * num_convs]                      # (imgs*H*W, 9*Cmax)  bf16

    imgs, H, W, cin0 = x_ref.shape
    cout = conv_b[0].shape[-1]
    ncls = fcb_ref.shape[-1]
    cmax = pad_ref.shape[-1]
    out_pad = out_ref.shape[-1] - (ncls + cout)

    # --- Zero ONLY the 1-wide halo (every step; interior is always rewritten) ---
    zrow = jnp.zeros((imgs, 1, W + 2, cmax), pad_ref.dtype)
    zcol = jnp.zeros((imgs, H, 1, cmax), pad_ref.dtype)
    pad_ref[:, 0:1, :, :] = zrow
    pad_ref[:, H + 1:H + 2, :, :] = zrow
    pad_ref[:, 1:H + 1, 0:1, :] = zcol
    pad_ref[:, 1:H + 1, W + 1:W + 2, :] = zcol

    # Place the input group in the interior (bf16 already -> direct store).
    pad_ref[:, 1:H + 1, 1:W + 1, :cin0] = x_ref[...]

    M = imgs * H * W
    for l in range(num_convs):
        cin = cin0 if l == 0 else cout

        # im2col: store each of the 9 shifted taps straight into its column slot
        # of the VMEM xcol scratch (no concatenates, no temporaries).
        t = 0
        for dy in range(3):
            for dx in range(3):
                tap = pad_ref[:, dy:dy + H, dx:dx + W, :cin]       # (imgs,H,W,cin) bf16
                xcol_ref[:, t * cin:(t + 1) * cin] = tap.reshape(M, cin)
                t += 1

        # One big-K MXU matmul for the whole image group; accumulate in f32.
        acc = jnp.dot(xcol_ref[:, :9 * cin], conv_w[l][...],
                      preferred_element_type=jnp.float32)           # (M, Cout) f32
        acc = jnp.maximum(acc + conv_b[l][...], 0.0)                 # bias + ReLU (f32)

        if l < num_convs - 1:
            # Write activation back into the (still zero-haloed) scratch as bf16.
            pad_ref[:, 1:H + 1, 1:W + 1, :cout] = (
                acc.reshape(imgs, H, W, cout).astype(pad_ref.dtype))
        else:
            # Fused epilogue: global average pool + fc, single lane-dense store.
            pooled = jnp.mean(acc.reshape(imgs, H * W, cout), axis=1)   # (imgs, Cout) f32
            pred = jnp.dot(pooled.astype(jnp.bfloat16), fcw_ref[...],
                           preferred_element_type=jnp.float32) + fcb_ref[...]
            parts = [pred, pooled]
            if out_pad > 0:
                parts.append(jnp.zeros((imgs, out_pad), jnp.float32))
            out_ref[0, :, :] = jnp.concatenate(parts, axis=-1)


# ----------------------------------------------------------------------------
# Parameter prep (layout / dtype work hoisted out of the forward hot path)
# ----------------------------------------------------------------------------
def prepare_global_context_head_params(conv_ws, conv_bs, fc_w, fc_b):
    """conv_ws[i]: (3,3,Cin_i,Cout); conv_bs[i]: (Cout,); fc_w: (ncls,C); fc_b: (ncls,)."""
    ws = tuple(w.reshape(-1, w.shape[-1]).astype(jnp.bfloat16) for w in conv_ws)  # (9*Cin, Cout)
    bs = tuple(jnp.asarray(b, jnp.float32).reshape(1, -1) for b in conv_bs)       # (1, Cout)
    fcw = jnp.transpose(jnp.asarray(fc_w)).astype(jnp.bfloat16)                   # (C, ncls)
    fcb = jnp.asarray(fc_b, jnp.float32).reshape(1, -1)                           # (1, ncls)
    return ws, bs, fcw, fcb


# ----------------------------------------------------------------------------
# GlobalContextHead forward
# ----------------------------------------------------------------------------
def global_context_head_forward(feats_nchw, params, *, images_per_step=4):
    """
    feats_nchw: tuple/list of NCHW feature maps (only the last one is used).
    params: output of prepare_global_context_head_params.
    Returns (mc_pred (N, num_classes), pooled (N, C, 1, 1)).
    """
    conv_ws, conv_bs, fc_w_t, fc_b = params
    num_convs = len(conv_ws)
    assert num_convs >= 1

    # Glue: NCHW -> NHWC so channels sit on the lane axis; store in bf16 so the
    # kernel input DMA and scratch traffic are half-width (MXU consumes bf16).
    x = jnp.transpose(feats_nchw[-1], (0, 2, 3, 1)).astype(jnp.bfloat16)
    N, H, W, cin0 = x.shape
    cout = conv_ws[0].shape[-1]
    ncls = fc_w_t.shape[-1]
    cmax = max(cin0, cout)

    imgs = images_per_step if (images_per_step >= 1 and N % images_per_step == 0) else 1
    groups = N // imgs

    # Lane-dense combined output: [pred | pooled | zero-pad], last dim % 128 == 0.
    out_dim = ncls + cout
    out_dim_pad = ((out_dim + 127) // 128) * 128

    in_specs = [pl.BlockSpec((imgs, H, W, cin0), lambda n: (n, 0, 0, 0))]
    flat_weights = []
    for w, b in zip(conv_ws, conv_bs):
        in_specs.append(pl.BlockSpec(w.shape, lambda n: (0, 0)))   # constant block
        in_specs.append(pl.BlockSpec(b.shape, lambda n: (0, 0)))
        flat_weights += [w, b]
    in_specs.append(pl.BlockSpec(fc_w_t.shape, lambda n: (0, 0)))
    in_specs.append(pl.BlockSpec(fc_b.shape, lambda n: (0, 0)))

    out_specs = pl.BlockSpec((1, imgs, out_dim_pad), lambda n: (n, 0, 0))
    out_shape = jax.ShapeDtypeStruct((groups, imgs, out_dim_pad), jnp.float32)

    kernel = functools.partial(_gch_fused_kernel, num_convs=num_convs)
    fused = pl.pallas_call(
        kernel,
        out_shape=out_shape,
        grid=(groups,),
        in_specs=in_specs,
        out_specs=out_specs,
        scratch_shapes=[
            pltpu.VMEM((imgs, H + 2, W + 2, cmax), jnp.bfloat16),   # padded activations
            pltpu.VMEM((imgs * H * W, 9 * cmax), jnp.bfloat16),     # im2col buffer
        ],
        compiler_params=pltpu.CompilerParams(
            dimension_semantics=("parallel",),
            # 48 MiB is safe on all of v5e/v6e/v7x; raise toward ~100 MiB on
            # v5e/v6e (128 MiB physical) for production-sized blocks.
            vmem_limit_bytes=48 * 1024 * 1024,
        ),
    )(x, *flat_weights, fc_w_t, fc_b)

    mc_pred = fused[..., :ncls].reshape(N, ncls)
    pooled = fused[..., ncls:ncls + cout].reshape(N, cout, 1, 1)
    return mc_pred, pooled


# ----------------------------------------------------------------------------
# Pure-JAX reference (f32) for correctness checking.
# ----------------------------------------------------------------------------
def _reference_forward(feats_nchw, conv_ws, conv_bs, fc_w, fc_b):
    x = jnp.transpose(feats_nchw[-1], (0, 2, 3, 1))
    for w, b in zip(conv_ws, conv_bs):
        x = jax.lax.conv_general_dilated(
            x, w, window_strides=(1, 1), padding="SAME",
            dimension_numbers=("NHWC", "HWIO", "NHWC"))
        x = jnp.maximum(x + b.reshape(1, 1, 1, -1), 0.0)
    pooled = jnp.mean(x, axis=(1, 2))                       # (N, C)
    pred = pooled @ fc_w.T + fc_b
    return pred, pooled.reshape(pooled.shape[0], -1, 1, 1)


if __name__ == "__main__":
    # Small, deterministic configuration (module defaults scaled down).
    num_ins = 2
    num_convs = 2
    in_channels = 32
    conv_out_channels = 32
    num_classes = 16
    N, H, W = 8, 8, 8

    key = jax.random.PRNGKey(0)
    keys = jax.random.split(key, 2 + 2 * num_convs)

    # Input feature maps (NCHW, like PyTorch); only feats[-1] is consumed.
    feats = tuple(
        (i + 1.0) * jax.random.normal(keys[0], (N, in_channels, H, W), jnp.float32)
        for i in range(num_ins)
    )

    # Conv weights/biases (HWIO layout, deterministic synthetic init).
    conv_ws, conv_bs = [], []
    for i in range(num_convs):
        cin = in_channels if i == 0 else conv_out_channels
        conv_ws.append(0.05 * jax.random.normal(
            keys[1 + 2 * i], (3, 3, cin, conv_out_channels), jnp.float32))
        conv_bs.append(0.01 * jax.random.normal(
            keys[2 + 2 * i], (conv_out_channels,), jnp.float32))

    # fc init per init_weights(): weight ~ N(0, 0.01), bias = 0.
    fc_w = 0.01 * jax.random.normal(keys[-1], (num_classes, conv_out_channels), jnp.float32)
    fc_b = jnp.zeros((num_classes,), jnp.float32)

    params = prepare_global_context_head_params(conv_ws, conv_bs, fc_w, fc_b)
    mc_pred, pooled = global_context_head_forward(feats, params, images_per_step=4)
    jax.block_until_ready((mc_pred, pooled))

    # Correctness vs. pure-JAX reference (bf16 MXU operands -> loose-ish tolerances).
    ref_pred, ref_pool = _reference_forward(feats, conv_ws, conv_bs, fc_w, fc_b)

    assert mc_pred.shape == (N, num_classes)
    assert pooled.shape == (N, conv_out_channels, 1, 1)
    assert jnp.all(jnp.isfinite(mc_pred)) and jnp.all(jnp.isfinite(pooled))
    assert jnp.allclose(mc_pred, ref_pred, rtol=5e-2, atol=5e-3), "mc_pred mismatch"
    assert jnp.allclose(pooled, ref_pool, rtol=5e-2, atol=2e-2), "pooled mismatch"
    print("KERNEL_OK")
</pallas_src>

<mosaic_0001>
module attributes {stable_mosaic.version = 11 : i64} {
  func.func @_gch_fused_kernel(%arg0: i32, %arg1: memref<4x8x8x32xbf16, #tpu.memory_space<vmem>>, %arg2: memref<288x32xbf16, #tpu.memory_space<vmem>>, %arg3: memref<1x32xf32, #tpu.memory_space<vmem>>, %arg4: memref<288x32xbf16, #tpu.memory_space<vmem>>, %arg5: memref<1x32xf32, #tpu.memory_space<vmem>>, %arg6: memref<32x16xbf16, #tpu.memory_space<vmem>>, %arg7: memref<1x16xf32, #tpu.memory_space<vmem>>, %arg8: memref<1x4x128xf32, #tpu.memory_space<vmem>>, %arg9: memref<4x10x10x32xbf16, #tpu.memory_space<vmem>>, %arg10: memref<256x288xbf16, #tpu.memory_space<vmem>>) attributes {dimension_semantics = [#tpu.dimension_semantics<parallel>], iteration_bounds = array<i64: 2>, scalar_prefetch = 0 : i64, scratch_operands = 2 : i64, tpu.core_type = #tpu.core_type<tc>, window_params = [{transform_indices = @transform_0, window_bounds = array<i64: 4, 8, 8, 32>}, {pipeline_mode = #tpu.pipeline_mode<synchronous>, transform_indices = @transform_1, window_bounds = array<i64: 288, 32>}, {pipeline_mode = #tpu.pipeline_mode<synchronous>, transform_indices = @transform_2, window_bounds = array<i64: 1, 32>}, {pipeline_mode = #tpu.pipeline_mode<synchronous>, transform_indices = @transform_3, window_bounds = array<i64: 288, 32>}, {pipeline_mode = #tpu.pipeline_mode<synchronous>, transform_indices = @transform_4, window_bounds = array<i64: 1, 32>}, {pipeline_mode = #tpu.pipeline_mode<synchronous>, transform_indices = @transform_5, window_bounds = array<i64: 32, 16>}, {pipeline_mode = #tpu.pipeline_mode<synchronous>, transform_indices = @transform_6, window_bounds = array<i64: 1, 16>}, {transform_indices = @transform_7, window_bounds = array<i64: 1, 4, 128>}]} {
    %cst = arith.constant 0.000000e+00 : bf16
    %0 = vector.broadcast %cst : bf16 to vector<4x1x10x32xbf16>
    %cst_0 = arith.constant 0.000000e+00 : bf16
    %1 = vector.broadcast %cst_0 : bf16 to vector<4x8x1x32xbf16>
    %c0 = arith.constant 0 : index
    %c0_1 = arith.constant 0 : index
    %c0_2 = arith.constant 0 : index
    %c0_3 = arith.constant 0 : index
    %2 = vector.load %arg9[%c0, %c0_1, %c0_2, %c0_3] : memref<4x10x10x32xbf16, #tpu.memory_space<vmem>>, vector<4x1x10x32xbf16>
    tpu.vector_store %arg9[%c0, %c0_1, %c0_2, %c0_3], %0 {strides = array<i32>} : memref<4x10x10x32xbf16, #tpu.memory_space<vmem>>, vector<4x1x10x32xbf16>,
    %c0_4 = arith.constant 0 : index
    %c9 = arith.constant 9 : index
    %c0_5 = arith.constant 0 : index
    %c0_6 = arith.constant 0 : index
    %3 = vector.load %arg9[%c0_4, %c9, %c0_5, %c0_6] : memref<4x10x10x32xbf16, #tpu.memory_space<vmem>>, vector<4x1x10x32xbf16>
    tpu.vector_store %arg9[%c0_4, %c9, %c0_5, %c0_6], %0 {strides = array<i32>} : memref<4x10x10x32xbf16, #tpu.memory_space<vmem>>, vector<4x1x10x32xbf16>,
    %c0_7 = arith.constant 0 : index
    %c1 = arith.constant 1 : index
    %c0_8 = arith.constant 0 : index
    %c0_9 = arith.constant 0 : index
    %4 = vector.load %arg9[%c0_7, %c1, %c0_8, %c0_9] : memref<4x10x10x32xbf16, #tpu.memory_space<vmem>>, vector<4x8x1x32xbf16>
    tpu.vector_store %arg9[%c0_7, %c1, %c0_8, %c0_9], %1 {strides = array<i32>} : memref<4x10x10x32xbf16, #tpu.memory_space<vmem>>, vector<4x8x1x32xbf16>,
    %c0_10 = arith.constant 0 : index
    %c1_11 = arith.constant 1 : index
    %c9_12 = arith.constant 9 : index
    %c0_13 = arith.constant 0 : index
    %5 = vector.load %arg9[%c0_10, %c1_11, %c9_12, %c0_13] : memref<4x10x10x32xbf16, #tpu.memory_space<vmem>>, vector<4x8x1x32xbf16>
    tpu.vector_store %arg9[%c0_10, %c1_11, %c9_12, %c0_13], %1 {strides = array<i32>} : memref<4x10x10x32xbf16, #tpu.memory_space<vmem>>, vector<4x8x1x32xbf16>,
    %c0_14 = arith.constant 0 : index
    %c0_15 = arith.constant 0 : index
    %c0_16 = arith.constant 0 : index
    %c0_17 = arith.constant 0 : index
    %6 = vector.load %arg1[%c0_14, %c0_15, %c0_16, %c0_17] : memref<4x8x8x32xbf16, #tpu.memory_space<vmem>>, vector<4x8x8x32xbf16>
    %c0_18 = arith.constant 0 : index
    %c1_19 = arith.constant 1 : index
    %c1_20 = arith.constant 1 : index
    %c0_21 = arith.constant 0 : index
    %7 = vector.load %arg9[%c0_18, %c1_19, %c1_20, %c0_21] : memref<4x10x10x32xbf16, #tpu.memory_space<vmem>>, vector<4x8x8x32xbf16>
    tpu.vector_store %arg9[%c0_18, %c1_19, %c1_20, %c0_21], %6 {strides = array<i32>} : memref<4x10x10x32xbf16, #tpu.memory_space<vmem>>, vector<4x8x8x32xbf16>,
    %c0_22 = arith.constant 0 : index
    %c0_23 = arith.constant 0 : index
    %c0_24 = arith.constant 0 : index
    %c0_25 = arith.constant 0 : index
    %8 = vector.load %arg9[%c0_22, %c0_23, %c0_24, %c0_25] : memref<4x10x10x32xbf16, #tpu.memory_space<vmem>>, vector<4x8x8x32xbf16>
    %9 = vector.shape_cast %8 : vector<4x8x8x32xbf16> to vector<256x32xbf16>
    %c0_26 = arith.constant 0 : index
    %c0_27 = arith.constant 0 : index
    %10 = vector.load %arg10[%c0_26, %c0_27] : memref<256x288xbf16, #tpu.memory_space<vmem>>, vector<256x32xbf16>
    tpu.vector_store %arg10[%c0_26, %c0_27], %9 {strides = array<i32>} : memref<256x288xbf16, #tpu.memory_space<vmem>>, vector<256x32xbf16>,
    %c0_28 = arith.constant 0 : index
    %c0_29 = arith.constant 0 : index
    %c1_30 = arith.constant 1 : index
    %c0_31 = arith.constant 0 : index
    %11 = vector.load %arg9[%c0_28, %c0_29, %c1_30, %c0_31] : memref<4x10x10x32xbf16, #tpu.memory_space<vmem>>, vector<4x8x8x32xbf16>
    %12 = vector.shape_cast %11 : vector<4x8x8x32xbf16> to vector<256x32xbf16>
    %c0_32 = arith.constant 0 : index
    %c32 = arith.constant 32 : index
    %13 = vector.load %arg10[%c0_32, %c32] : memref<256x288xbf16, #tpu.memory_space<vmem>>, vector<256x32xbf16>
    tpu.vector_store %arg10[%c0_32, %c32], %12 {strides = array<i32>} : memref<256x288xbf16, #tpu.memory_space<vmem>>, vector<256x32xbf16>,
    %c0_33 = arith.constant 0 : index
    %c0_34 = arith.constant 0 : index
    %c2 = arith.constant 2 : index
    %c0_35 = arith.constant 0 : index
    %14 = vector.load %arg9[%c0_33, %c0_34, %c2, %c0_35] : memref<4x10x10x32xbf16, #tpu.memory_space<vmem>>, vector<4x8x8x32xbf16>
    %15 = vector.shape_cast %14 : vector<4x8x8x32xbf16> to vector<256x32xbf16>
    %c0_36 = arith.constant 0 : index
    %c64 = arith.constant 64 : index
    %16 = vector.load %arg10[%c0_36, %c64] : memref<256x288xbf16, #tpu.memory_space<vmem>>, vector<256x32xbf16>
    tpu.vector_store %arg10[%c0_36, %c64], %15 {strides = array<i32>} : memref<256x288xbf16, #tpu.memory_space<vmem>>, vector<256x32xbf16>,
    %c0_37 = arith.constant 0 : index
    %c1_38 = arith.constant 1 : index
    %c0_39 = arith.constant 0 : index
    %c0_40 = arith.constant 0 : index
    %17 = vector.load %arg9[%c0_37, %c1_38, %c0_39, %c0_40] : memref<4x10x10x32xbf16, #tpu.memory_space<vmem>>, vector<4x8x8x32xbf16>
    %18 = vector.shape_cast %17 : vector<4x8x8x32xbf16> to vector<256x32xbf16>
    %c0_41 = arith.constant 0 : index
    %c96 = arith.constant 96 : index
    %19 = vector.load %arg10[%c0_41, %c96] : memref<256x288xbf16, #tpu.memory_space<vmem>>, vector<256x32xbf16>
    tpu.vector_store %arg10[%c0_41, %c96], %18 {strides = array<i32>} : memref<256x288xbf16, #tpu.memory_space<vmem>>, vector<256x32xbf16>,
    %c0_42 = arith.constant 0 : index
    %c1_43 = arith.constant 1 : index
    %c1_44 = arith.constant 1 : index
    %c0_45 = arith.constant 0 : index
    %20 = vector.load %arg9[%c0_42, %c1_43, %c1_44, %c0_45] : memref<4x10x10x32xbf16, #tpu.memory_space<vmem>>, vector<4x8x8x32xbf16>
    %21 = vector.shape_cast %20 : vector<4x8x8x32xbf16> to vector<256x32xbf16>
    %c0_46 = arith.constant 0 : index
    %c128 = arith.constant 128 : index
    %22 = vector.load %arg10[%c0_46, %c128] : memref<256x288xbf16, #tpu.memory_space<vmem>>, vector<256x32xbf16>
    tpu.vector_store %arg10[%c0_46, %c128], %21 {strides = array<i32>} : memref<256x288xbf16, #tpu.memory_space<vmem>>, vector<256x32xbf16>,
    %c0_47 = arith.constant 0 : index
    %c1_48 = arith.constant 1 : index
    %c2_49 = arith.constant 2 : index
    %c0_50 = arith.constant 0 : index
    %23 = vector.load %arg9[%c0_47, %c1_48, %c2_49, %c0_50] : memref<4x10x10x32xbf16, #tpu.memory_space<vmem>>, vector<4x8x8x32xbf16>
    %24 = vector.shape_cast %23 : vector<4x8x8x32xbf16> to vector<256x32xbf16>
    %c0_51 = arith.constant 0 : index
    %c160 = arith.constant 160 : index
    %25 = vector.load %arg10[%c0_51, %c160] : memref<256x288xbf16, #tpu.memory_space<vmem>>, vector<256x32xbf16>
    tpu.vector_store %arg10[%c0_51, %c160], %24 {strides = array<i32>} : memref<256x288xbf16, #tpu.memory_space<vmem>>, vector<256x32xbf16>,
    %c0_52 = arith.constant 0 : index
    %c2_53 = arith.constant 2 : index
    %c0_54 = arith.constant 0 : index
    %c0_55 = arith.constant 0 : index
    %26 = vector.load %arg9[%c0_52, %c2_53, %c0_54, %c0_55] : memref<4x10x10x32xbf16, #tpu.memory_space<vmem>>, vector<4x8x8x32xbf16>
    %27 = vector.shape_cast %26 : vector<4x8x8x32xbf16> to vector<256x32xbf16>
    %c0_56 = arith.constant 0 : index
    %c192 = arith.constant 192 : index
    %28 = vector.load %arg10[%c0_56, %c192] : memref<256x288xbf16, #tpu.memory_space<vmem>>, vector<256x32xbf16>
    tpu.vector_store %arg10[%c0_56, %c192], %27 {strides = array<i32>} : memref<256x288xbf16, #tpu.memory_space<vmem>>, vector<256x32xbf16>,
    %c0_57 = arith.constant 0 : index
    %c2_58 = arith.constant 2 : index
    %c1_59 = arith.constant 1 : index
    %c0_60 = arith.constant 0 : index
    %29 = vector.load %arg9[%c0_57, %c2_58, %c1_59, %c0_60] : memref<4x10x10x32xbf16, #tpu.memory_space<vmem>>, vector<4x8x8x32xbf16>
    %30 = vector.shape_cast %29 : vector<4x8x8x32xbf16> to vector<256x32xbf16>
    %c0_61 = arith.constant 0 : index
    %c224 = arith.constant 224 : index
    %31 = vector.load %arg10[%c0_61, %c224] : memref<256x288xbf16, #tpu.memory_space<vmem>>, vector<256x32xbf16>
    tpu.vector_store %arg10[%c0_61, %c224], %30 {strides = array<i32>} : memref<256x288xbf16, #tpu.memory_space<vmem>>, vector<256x32xbf16>,
    %c0_62 = arith.constant 0 : index
    %c2_63 = arith.constant 2 : index
    %c2_64 = arith.constant 2 : index
    %c0_65 = arith.constant 0 : index
    %32 = vector.load %arg9[%c0_62, %c2_63, %c2_64, %c0_65] : memref<4x10x10x32xbf16, #tpu.memory_space<vmem>>, vector<4x8x8x32xbf16>
    %33 = vector.shape_cast %32 : vector<4x8x8x32xbf16> to vector<256x32xbf16>
    %c0_66 = arith.constant 0 : index
    %c256 = arith.constant 256 : index
    %34 = vector.load %arg10[%c0_66, %c256] : memref<256x288xbf16, #tpu.memory_space<vmem>>, vector<256x32xbf16>
    tpu.vector_store %arg10[%c0_66, %c256], %33 {strides = array<i32>} : memref<256x288xbf16, #tpu.memory_space<vmem>>, vector<256x32xbf16>,
    %c0_67 = arith.constant 0 : index
    %c0_68 = arith.constant 0 : index
    %35 = vector.load %arg10[%c0_67, %c0_68] : memref<256x288xbf16, #tpu.memory_space<vmem>>, vector<256x288xbf16>
    %c0_69 = arith.constant 0 : index
    %c0_70 = arith.constant 0 : index
    %36 = vector.load %arg2[%c0_69, %c0_70] : memref<288x32xbf16, #tpu.memory_space<vmem>>, vector<288x32xbf16>
    %cst_71 = arith.constant dense<0.000000e+00> : vector<256x32xf32>
    %37 = tpu.matmul %35, %36, %cst_71 {dimension_numbers = #tpu.dot_dimension_numbers<[1], [0], [0], [1], [0, 0, 1, 1], [], []>} : vector<256x288xbf16>, vector<288x32xbf16>, vector<256x32xf32> -> vector<256x32xf32>
    %c0_72 = arith.constant 0 : index
    %c0_73 = arith.constant 0 : index
    %38 = vector.load %arg3[%c0_72, %c0_73] : memref<1x32xf32, #tpu.memory_space<vmem>>, vector<1x32xf32>
    %39 = vector.broadcast %38 : vector<1x32xf32> to vector<256x32xf32>
    %40 = arith.addf %37, %39 : vector<256x32xf32>
    %cst_74 = arith.constant 0.000000e+00 : f32
    %41 = vector.broadcast %cst_74 : f32 to vector<256x32xf32>
    %42 = arith.maximumf %40, %41 : vector<256x32xf32>
    %43 = vector.shape_cast %42 : vector<256x32xf32> to vector<4x8x8x32xf32>
    %44 = arith.truncf %43 : vector<4x8x8x32xf32> to vector<4x8x8x32xbf16>
    %c0_75 = arith.constant 0 : index
    %c1_76 = arith.constant 1 : index
    %c1_77 = arith.constant 1 : index
    %c0_78 = arith.constant 0 : index
    %45 = vector.load %arg9[%c0_75, %c1_76, %c1_77, %c0_78] : memref<4x10x10x32xbf16, #tpu.memory_space<vmem>>, vector<4x8x8x32xbf16>
    tpu.vector_store %arg9[%c0_75, %c1_76, %c1_77, %c0_78], %44 {strides = array<i32>} : memref<4x10x10x32xbf16, #tpu.memory_space<vmem>>, vector<4x8x8x32xbf16>,
    %c0_79 = arith.constant 0 : index
    %c0_80 = arith.constant 0 : index
    %c0_81 = arith.constant 0 : index
    %c0_82 = arith.constant 0 : index
    %46 = vector.load %arg9[%c0_79, %c0_80, %c0_81, %c0_82] : memref<4x10x10x32xbf16, #tpu.memory_space<vmem>>, vector<4x8x8x32xbf16>
    %47 = vector.shape_cast %46 : vector<4x8x8x32xbf16> to vector<256x32xbf16>
    %c0_83 = arith.constant 0 : index
    %c0_84 = arith.constant 0 : index
    %48 = vector.load %arg10[%c0_83, %c0_84] : memref<256x288xbf16, #tpu.memory_space<vmem>>, vector<256x32xbf16>
    tpu.vector_store %arg10[%c0_83, %c0_84], %47 {strides = array<i32>} : memref<256x288xbf16, #tpu.memory_space<vmem>>, vector<256x32xbf16>,
    %c0_85 = arith.constant 0 : index
    %c0_86 = arith.constant 0 : index
    %c1_87 = arith.constant 1 : index
    %c0_88 = arith.constant 0 : index
    %49 = vector.load %arg9[%c0_85, %c0_86, %c1_87, %c0_88] : memref<4x10x10x32xbf16, #tpu.memory_space<vmem>>, vector<4x8x8x32xbf16>
    %50 = vector.shape_cast %49 : vector<4x8x8x32xbf16> to vector<256x32xbf16>
    %c0_89 = arith.constant 0 : index
    %c32_90 = arith.constant 32 : index
    %51 = vector.load %arg10[%c0_89, %c32_90] : memref<256x288xbf16, #tpu.memory_space<vmem>>, vector<256x32xbf16>
    tpu.vector_store %arg10[%c0_89, %c32_90], %50 {strides = array<i32>} : memref<256x288xbf16, #tpu.memory_space<vmem>>, vector<256x32xbf16>,
    %c0_91 = arith.constant 0 : index
    %c0_92 = arith.constant 0 : index
    %c2_93 = arith.constant 2 : index
    %c0_94 = arith.constant 0 : index
    %52 = vector.load %arg9[%c0_91, %c0_92, %c2_93, %c0_94] : memref<4x10x10x32xbf16, #tpu.memory_space<vmem>>, vector<4x8x8x32xbf16>
    %53 = vector.shape_cast %52 : vector<4x8x8x32xbf16> to vector<256x32xbf16>
    %c0_95 = arith.constant 0 : index
    %c64_96 = arith.constant 64 : index
    %54 = vector.load %arg10[%c0_95, %c64_96] : memref<256x288xbf16, #tpu.memory_space<vmem>>, vector<256x32xbf16>
    tpu.vector_store %arg10[%c0_95, %c64_96], %53 {strides = array<i32>} : memref<256x288xbf16, #tpu.memory_space<vmem>>, vector<256x32xbf16>,
    %c0_97 = arith.constant 0 : index
    %c1_98 = arith.constant 1 : index
    %c0_99 = arith.constant 0 : index
    %c0_100 = arith.constant 0 : index
    %55 = vector.load %arg9[%c0_97, %c1_98, %c0_99, %c0_100] : memref<4x10x10x32xbf16, #tpu.memory_space<vmem>>, vector<4x8x8x32xbf16>
    %56 = vector.shape_cast %55 : vector<4x8x8x32xbf16> to vector<256x32xbf16>
    %c0_101 = arith.constant 0 : index
    %c96_102 = arith.constant 96 : index
    %57 = vector.load %arg10[%c0_101, %c96_102] : memref<256x288xbf16, #tpu.memory_space<vmem>>, vector<256x32xbf16>
    tpu.vector_store %arg10[%c0_101, %c96_102], %56 {strides = array<i32>} : memref<256x288xbf16, #tpu.memory_space<vmem>>, vector<256x32xbf16>,
    %c0_103 = arith.constant 0 : index
    %c1_104 = arith.constant 1 : index
    %c1_105 = arith.constant 1 : index
    %c0_106 = arith.constant 0 : index
    %58 = vector.load %arg9[%c0_103, %c1_104, %c1_105, %c0_106] : memref<4x10x10x32xbf16, #tpu.memory_space<vmem>>, vector<4x8x8x32xbf16>
    %59 = vector.shape_cast %58 : vector<4x8x8x32xbf16> to vector<256x32xbf16>
    %c0_107 = arith.constant 0 : index
    %c128_108 = arith.constant 128 : index
    %60 = vector.load %arg10[%c0_107, %c128_108] : memref<256x288xbf16, #tpu.memory_space<vmem>>, vector<256x32xbf16>
    tpu.vector_store %arg10[%c0_107, %c128_108], %59 {strides = array<i32>} : memref<256x288xbf16, #tpu.memory_space<vmem>>, vector<256x32xbf16>,
    %c0_109 = arith.constant 0 : index
    %c1_110 = arith.constant 1 : index
    %c2_111 = arith.constant 2 : index
    %c0_112 = arith.constant 0 : index
    %61 = vector.load %arg9[%c0_109, %c1_110, %c2_111, %c0_112] : memref<4x10x10x32xbf16, #tpu.memory_space<vmem>>, vector<4x8x8x32xbf16>
    %62 = vector.shape_cast %61 : vector<4x8x8x32xbf16> to vector<256x32xbf16>
    %c0_113 = arith.constant 0 : index
    %c160_114 = arith.constant 160 : index
    %63 = vector.load %arg10[%c0_113, %c160_114] : memref<256x288xbf16, #tpu.memory_space<vmem>>, vector<256x32xbf16>
    tpu.vector_store %arg10[%c0_113, %c160_114], %62 {strides = array<i32>} : memref<256x288xbf16, #tpu.memory_space<vmem>>, vector<256x32xbf16>,
    %c0_115 = arith.constant 0 : index
    %c2_116 = arith.constant 2 : index
    %c0_117 = arith.constant 0 : index
    %c0_118 = arith.constant 0 : index
    %64 = vector.load %arg9[%c0_115, %c2_116, %c0_117, %c0_118] : memref<4x10x10x32xbf16, #tpu.memory_space<vmem>>, vector<4x8x8x32xbf16>
    %65 = vector.shape_cast %64 : vector<4x8x8x32xbf16> to vector<256x32xbf16>
    %c0_119 = arith.constant 0 : index
    %c192_120 = arith.constant 192 : index
    %66 = vector.load %arg10[%c0_119, %c192_120] : memref<256x288xbf16, #tpu.memory_space<vmem>>, vector<256x32xbf16>
    tpu.vector_store %arg10[%c0_119, %c192_120], %65 {strides = array<i32>} : memref<256x288xbf16, #tpu.memory_space<vmem>>, vector<256x32xbf16>,
    %c0_121 = arith.constant 0 : index
    %c2_122 = arith.constant 2 : index
    %c1_123 = arith.constant 1 : index
    %c0_124 = arith.constant 0 : index
    %67 = vector.load %arg9[%c0_121, %c2_122, %c1_123, %c0_124] : memref<4x10x10x32xbf16, #tpu.memory_space<vmem>>, vector<4x8x8x32xbf16>
    %68 = vector.shape_cast %67 : vector<4x8x8x32xbf16> to vector<256x32xbf16>
    %c0_125 = arith.constant 0 : index
    %c224_126 = arith.constant 224 : index
    %69 = vector.load %arg10[%c0_125, %c224_126] : memref<256x288xbf16, #tpu.memory_space<vmem>>, vector<256x32xbf16>
    tpu.vector_store %arg10[%c0_125, %c224_126], %68 {strides = array<i32>} : memref<256x288xbf16, #tpu.memory_space<vmem>>, vector<256x32xbf16>,
    %c0_127 = arith.constant 0 : index
    %c2_128 = arith.constant 2 : index
    %c2_129 = arith.constant 2 : index
    %c0_130 = arith.constant 0 : index
    %70 = vector.load %arg9[%c0_127, %c2_128, %c2_129, %c0_130] : memref<4x10x10x32xbf16, #tpu.memory_space<vmem>>, vector<4x8x8x32xbf16>
    %71 = vector.shape_cast %70 : vector<4x8x8x32xbf16> to vector<256x32xbf16>
    %c0_131 = arith.constant 0 : index
    %c256_132 = arith.constant 256 : index
    %72 = vector.load %arg10[%c0_131, %c256_132] : memref<256x288xbf16, #tpu.memory_space<vmem>>, vector<256x32xbf16>
    tpu.vector_store %arg10[%c0_131, %c256_132], %71 {strides = array<i32>} : memref<256x288xbf16, #tpu.memory_space<vmem>>, vector<256x32xbf16>,
    %c0_133 = arith.constant 0 : index
    %c0_134 = arith.constant 0 : index
    %73 = vector.load %arg10[%c0_133, %c0_134] : memref<256x288xbf16, #tpu.memory_space<vmem>>, vector<256x288xbf16>
    %c0_135 = arith.constant 0 : index
    %c0_136 = arith.constant 0 : index
    %74 = vector.load %arg4[%c0_135, %c0_136] : memref<288x32xbf16, #tpu.memory_space<vmem>>, vector<288x32xbf16>
    %cst_137 = arith.constant dense<0.000000e+00> : vector<256x32xf32>
    %75 = tpu.matmul %73, %74, %cst_137 {dimension_numbers = #tpu.dot_dimension_numbers<[1], [0], [0], [1], [0, 0, 1, 1], [], []>} : vector<256x288xbf16>, vector<288x32xbf16>, vector<256x32xf32> -> vector<256x32xf32>
    %c0_138 = arith.constant 0 : index
    %c0_139 = arith.constant 0 : index
    %76 = vector.load %arg5[%c0_138, %c0_139] : memref<1x32xf32, #tpu.memory_space<vmem>>, vector<1x32xf32>
    %77 = vector.broadcast %76 : vector<1x32xf32> to vector<256x32xf32>
    %78 = arith.addf %75, %77 : vector<256x32xf32>
    %cst_140 = arith.constant 0.000000e+00 : f32
    %79 = vector.broadcast %cst_140 : f32 to vector<256x32xf32>
    %80 = arith.maximumf %78, %79 : vector<256x32xf32>
    %81 = vector.shape_cast %80 : vector<256x32xf32> to vector<4x64x32xf32>
    %cst_141 = arith.constant dense<0.000000e+00> : vector<4x32xf32>
    %82 = vector.multi_reduction <add>, %81, %cst_141 [1] : vector<4x64x32xf32> to vector<4x32xf32>
    %cst_142 = arith.constant 6.400000e+01 : f32
    %83 = vector.broadcast %cst_142 : f32 to vector<4x32xf32>
    %84 = arith.divf %82, %83 : vector<4x32xf32>
    %85 = arith.truncf %84 : vector<4x32xf32> to vector<4x32xbf16>
    %c0_143 = arith.constant 0 : index
    %c0_144 = arith.constant 0 : index
    %86 = vector.load %arg6[%c0_143, %c0_144] : memref<32x16xbf16, #tpu.memory_space<vmem>>, vector<32x16xbf16>
    %cst_145 = arith.constant dense<0.000000e+00> : vector<4x16xf32>
    %87 = tpu.matmul %85, %86, %cst_145 {dimension_numbers = #tpu.dot_dimension_numbers<[1], [0], [0], [1], [0, 0, 1, 1], [], []>} : vector<4x32xbf16>, vector<32x16xbf16>, vector<4x16xf32> -> vector<4x16xf32>
    %c0_146 = arith.constant 0 : index
    %c0_147 = arith.constant 0 : index
    %88 = vector.load %arg7[%c0_146, %c0_147] : memref<1x16xf32, #tpu.memory_space<vmem>>, vector<1x16xf32>
    %89 = vector.broadcast %88 : vector<1x16xf32> to vector<4x16xf32>
    %90 = arith.addf %87, %89 : vector<4x16xf32>
    %cst_148 = arith.constant 0.000000e+00 : f32
    %91 = vector.broadcast %cst_148 : f32 to vector<4x80xf32>
    %92 = tpu.concatenate %90, %84, %91 in 1 : vector<4x16xf32>, vector<4x32xf32>, vector<4x80xf32> -> vector<4x128xf32>
    %c0_149 = arith.constant 0 : index
    %c0_150 = arith.constant 0 : index
    %c0_151 = arith.constant 0 : index
    %93 = vector.load %arg8[%c0_149, %c0_150, %c0_151] : memref<1x4x128xf32, #tpu.memory_space<vmem>>, vector<1x4x128xf32>
    %94 = vector.shape_cast %93 : vector<1x4x128xf32> to vector<4x128xf32>
    %95 = vector.shape_cast %92 : vector<4x128xf32> to vector<1x4x128xf32>
    tpu.vector_store %arg8[%c0_149, %c0_150, %c0_151], %95 {strides = array<i32>} : memref<1x4x128xf32, #tpu.memory_space<vmem>>, vector<1x4x128xf32>,
    return
  }
  func.func @transform_0(%arg0: i32) -> (i32, i32, i32, i32) {
    %c0_i32 = arith.constant 0 : i32
    %c0_i32_0 = arith.constant 0 : i32
    %c0_i32_1 = arith.constant 0 : i32
    %c0_i32_2 = arith.constant 0 : i32
    return %arg0, %c0_i32, %c0_i32_0, %c0_i32_1 : i32, i32, i32, i32
  }
  func.func @transform_1(%arg0: i32) -> (i32, i32) {
    %c0_i32 = arith.constant 0 : i32
    %c0_i32_0 = arith.constant 0 : i32
    %c0_i32_1 = arith.constant 0 : i32
    return %c0_i32, %c0_i32_0 : i32, i32
  }
  func.func @transform_2(%arg0: i32) -> (i32, i32) {
    %c0_i32 = arith.constant 0 : i32
    %c0_i32_0 = arith.constant 0 : i32
    %c0_i32_1 = arith.constant 0 : i32
    return %c0_i32, %c0_i32_0 : i32, i32
  }
  func.func @transform_3(%arg0: i32) -> (i32, i32) {
    %c0_i32 = arith.constant 0 : i32
    %c0_i32_0 = arith.constant 0 : i32
    %c0_i32_1 = arith.constant 0 : i32
    return %c0_i32, %c0_i32_0 : i32, i32
  }
  func.func @transform_4(%arg0: i32) -> (i32, i32) {
    %c0_i32 = arith.constant 0 : i32
    %c0_i32_0 = arith.constant 0 : i32
    %c0_i32_1 = arith.constant 0 : i32
    return %c0_i32, %c0_i32_0 : i32, i32
  }
  func.func @transform_5(%arg0: i32) -> (i32, i32) {
    %c0_i32 = arith.constant 0 : i32
    %c0_i32_0 = arith.constant 0 : i32
    %c0_i32_1 = arith.constant 0 : i32
    return %c0_i32, %c0_i32_0 : i32, i32
  }
  func.func @transform_6(%arg0: i32) -> (i32, i32) {
    %c0_i32 = arith.constant 0 : i32
    %c0_i32_0 = arith.constant 0 : i32
    %c0_i32_1 = arith.constant 0 : i32
    return %c0_i32, %c0_i32_0 : i32, i32
  }
  func.func @transform_7(%arg0: i32) -> (i32, i32, i32) {
    %c0_i32 = arith.constant 0 : i32
    %c0_i32_0 = arith.constant 0 : i32
    %c0_i32_1 = arith.constant 0 : i32
    return %arg0, %c0_i32, %c0_i32_0 : i32, i32, i32
  }
}

</mosaic_0001>

<bundles_post_ra>
// kernel: tpu_custom_call.1
= control target key start
LH: loop header
LB: loop body
LE: loop exit
PB: predicated region body
PF: predicated region fallthrough
CT: control target
= control target key end

     0   :  { %12 = vsyncpa [#allocation5], 0  ;;  %s14413_s0 = inlined_call_operand.vmem [shape: bf16[8,8,8,32], index: 0, kind: input, shape index: {}]   ;;  %s14414_s1 = inlined_call_operand.vmem [shape: bf16[288,32], index: 1, kind: input, shape index: {}]   ;;  %s14415_s2 = inlined_call_operand.vmem [shape: f32[1,32], index: 2, kind: input, shape index: {}]   ;;  %s14416_s3 = inlined_call_operand.vmem [shape: bf16[288,32], index: 3, kind: input, shape index: {}]   ;;  %s14417_s4 = inlined_call_operand.vmem [shape: f32[1,32], index: 4, kind: input, shape index: {}]   ;;  %s14418_s5 = inlined_call_operand.vmem [shape: bf16[32,16], index: 5, kind: input, shape index: {}]   ;;  %s14419_s6 = inlined_call_operand.vmem [shape: f32[1,16], index: 6, kind: input, shape index: {}]   ;;  %s14420_s7 = inlined_call_operand.hbm [shape: f32[2,4,128], index: 7, kind: output, shape index: {}]  }
   0x1   :  { %14 = vsyncpa [#allocation5 + $0x1], 0  ;;  %s11252_s24 = smov 0   ;;  %s11254_s25 = smov 0  }
   0x2   :  { %s11256_s26 = smov 0   ;;  %s11258_s27 = smov 0  }
   0x3 LB: > { %s11273_s28 = sadd.s32 4294967295, %s11202_s27   ;;  %s9977_s29 = sadd.s32 4294967294, %s11202_s27   ;;  %s11202_s27 = sphi %s11258_s27, %s14436_s27   ;;  %s11198_s26 = sphi %s11256_s26, %s14435_s26   ;;  %s11194_s25 = sphi %s11254_s25, %s14434_s25   ;;  %s11190_s24 = sphi %s11252_s24, %s14433_s24  }
   0x4   : > { %s11277_s30 = sadd.s32 1, %s11202_s27   ;;  %s179_s8 = sadd.s32 1, %s11198_s26 }
   0x5   : > { %s176_s9 = ssub.s32 %s11202_s27, %s11277_s30  ;;  %p189_p0 = scmp.ne.s32.totalorder %s11198_s26, %s11194_s25 }
   0x6   : > { %p177_p1 = scmp.eq.s32.totalorder %s176_s9, 0  ;;  %p190_p2 = scmp.eq.s32.totalorder %s11273_s28, 1 }
   0x7   : > { %p195_p3 = scmp.ne.s32.totalorder %s11194_s25, %s11190_s24  ;;  %p196_p4 = scmp.eq.s32.totalorder %s9977_s29, 1 }
   0x8   : > { %s11288_s10 = scalar_select %p177_p1, %s11198_s26, %s179_s8  }
   0x9   : > { %p11290_p5 = por %p190_p2, %p189_p0  ;;  %p11294_p6 = por %p196_p4, %p195_p3 }
   0xa   : > { %p9980_p7 = scmp.ge.s32.totalorder %s11202_s27, 1  ;;  %p242_p8 = scmp.lt.s32.totalorder %s11202_s27, 3 }
   0xc   : > { %p243_p9 = pnand %p9980_p7, %p242_p8 }
   0xd   : > { %s9982_s13 = sshll.u32 (!%p243_p9), %s11273_s28, 2  ;;  %vm285_vm0 = vcmask (!%p243_p9), 253952   ;;  %vm304_vm1 = vsmask.f32 (!%p243_p9), 256  ;;  %v315_v1 = vld [vmem:[#allocation2 + $0x20] sm:$0x1] (!%p243_p9) }
   0xe   : > { %246 = sbr.rel (%p243_p9) target bundleno = 1540 (0x604), region = 48  ;;  %p276_p10 = scmp.lt.s32.totalorder (!%p243_p9), %s9982_s13, 7  ;;  %vm11302_vm2 = vmand (!%p243_p9), %vm285_vm0, %vm304_vm1  ;;  %v318_v2 = vld [vmem:[#allocation2 + $0x28] sm:$0x1] (!%p243_p9)  ;;  %vm402_vm3 = vsmask.f32 (!%p243_p9), 7938 }
   0xf   : > { %v316_v3 = vsel (!%p243_p9), %vm11302_vm2, 0, %v315_v1  ;;  %v319_v4 = vsel (!%p243_p9), %vm11302_vm2, 0, %v318_v2  ;;  %v309_v5 = vld [vmem:[#allocation2 + $0x10] sm:$0x1] (!%p243_p9)  ;;  %v312_v7 = vld [vmem:[#allocation2 + $0x18] sm:$0x1] (!%p243_p9)  ;;  %vm11318_vm4 = vmand (!%p243_p9), %vm285_vm0, %vm402_vm3 }
  0x10   : > { %317 = vst [vmem:[#allocation2 + $0x20] sm:$0x1] (!%p243_p9), %v316_v3  ;;  %320 = vst [vmem:[#allocation2 + $0x28] sm:$0x1] (!%p243_p9), %v319_v4  ;;  %v310_v6 = vsel (!%p243_p9), %vm11302_vm2, 0, %v309_v5  ;;  %v313_v9 = vsel (!%p243_p9), %vm11302_vm2, 0, %v312_v7 }
  0x11   : > { %v321_v8 = vld [vmem:[#allocation2 + $0x30] sm:$0x1] (!%p243_p9)  ;;  %311 = vst [vmem:[#allocation2 + $0x10] sm:$0x1] (!%p243_p9), %v310_v6  ;;  %v324_v11 = vld [vmem:[#allocation2 + $0x38] sm:$0x1] (!%p243_p9) }
  0x12   : > { %v322_v10 = vsel (!%p243_p9), %vm11302_vm2, 0, %v321_v8  ;;  %v306_v12 = vld [vmem:[#allocation2 + $0x8] sm:$0x1] (!%p243_p9)  ;;  %314 = vst [vmem:[#allocation2 + $0x18] sm:$0x1] (!%p243_p9), %v313_v9  ;;  %v325_v14 = vsel (!%p243_p9), %vm11302_vm2, 0, %v324_v11 }
  0x13   : > { %323 = vst [vmem:[#allocation2 + $0x30] sm:$0x1] (!%p243_p9), %v322_v10  ;;  %v307_v15 = vsel (!%p243_p9), %vm11302_vm2, 0, %v306_v12  ;;  %v404_v16 = vld [vmem:[#allocation2 + $0xc] sm:$0x1] (!%p243_p9)  ;;  %vm283_vm5 = vcmask (!%p243_p9), 257024  }
  0x14   : > { %326 = vst [vmem:[#allocation2 + $0x38] sm:$0x1] (!%p243_p9), %v325_v14  ;;  %308 = vst [vmem:[#allocation2 + $0x8] sm:$0x1] (!%p243_p9), %v307_v15  ;;  %v405_v17 = vsel (!%p243_p9), %vm11318_vm4, 0, %v404_v16  ;;  %v11204_v21 = vmov (!%p243_p9), 0  }
  0x15   : > { %s14438_s13 = smov (!%p276_p10, %s9982_s13), 7  ;;  %406 = vst [vmem:[#allocation2 + $0xc] sm:$0x1] %v405_v17  ;;  %284 = vst.msk [vmem:[#allocation2] sm:$0xf] %vm283_vm5, %v11204_v21  ;;  %vm1947_vm7 = vcmask 1042432  }
  0x16   : > { %s10575_s14 = sshll.u32 %s14438_s13, 5  ;;  %286 = vst.msk [vmem:[#allocation2 + $0x4] sm:$0x1] %vm285_vm0, %v11204_v21  ;;  %288 = vst.msk [vmem:[#allocation2 + $0x54] sm:$0x1] %vm285_vm0, %v11204_v21  ;;  %vm1948_vm8 = vcmask 1046532  }
  0x17   : > { %s11329_s17 = scalar_lea.vmem %s14413_s0, %s10575_s14  ;;  %287 = vst.msk [vmem:[#allocation2 + $0x50] sm:$0xf] %vm283_vm5, %v11204_v21  ;;  %289 = vst.msk [vmem:[#allocation2 + $0xa0] sm:$0xf] %vm283_vm5, %v11204_v21  ;;  %v872_v35 = vld [vmem:[#allocation2 + $0x20] sm:$0xf] }
  0x18   : > { %v503_v18 = vld [vmem:[%s11329_s17 + $0xc] sm:$0xf]  ;;  %v504_v19 = vld [vmem:[%s11329_s17 + $0x10] sm:$0xf]  ;;  %v501_v20 = vld [vmem:[%s11329_s17 + $0x4] sm:$0xf] }
  0x19   : > { %290 = vst.msk [vmem:[#allocation2 + $0xa4] sm:$0x1] %vm285_vm0, %v11204_v21  ;;  %292 = vst.msk [vmem:[#allocation2 + $0xf4] sm:$0x1] %vm285_vm0, %v11204_v21  ;;  %v557_v22 = vshrl.u32 %v503_v18, 16  ;;  %v560_v23 = vshll.u32 %v503_v18, 16 }
  0x1a   : > { %291 = vst.msk [vmem:[#allocation2 + $0xf0] sm:$0xf] %vm283_vm5, %v11204_v21  ;;  %294 = vst.msk [vmem:[#allocation2 + $0x48] sm:$0xf] %vm283_vm5, %v11204_v21  ;;  %v565_v24 = vshrl.u32 %v504_v19, 16  ;;  %v568_v25 = vshll.u32 %v504_v19, 16 }
  0x1b   : > { %295 = vst.msk [vmem:[#allocation2 + $0x4c] sm:$0x1] %vm285_vm0, %v11204_v21  ;;  %297 = vst.msk [vmem:[#allocation2 + $0x9c] sm:$0x1] %vm285_vm0, %v11204_v21  ;;  %v502_v26 = vld [vmem:[%s11329_s17 + $0x8] sm:$0xf] }
  0x1c   : > { %296 = vst.msk [vmem:[#allocation2 + $0x98] sm:$0xf] %vm283_vm5, %v11204_v21  ;;  %298 = vst.msk [vmem:[#allocation2 + $0xe8] sm:$0xf] %vm283_vm5, %v11204_v21  ;;  %v541_v27 = vshrl.u32 %v501_v20, 16  ;;  %v544_v28 = vshll.u32 %v501_v20, 16 }
  0x1d   : > { %299 = vst.msk [vmem:[#allocation2 + $0xec] sm:$0x1] %vm285_vm0, %v11204_v21  ;;  %301 = vst.msk [vmem:[#allocation2 + $0x13c] sm:$0x1] %vm285_vm0, %v11204_v21  ;;  %v549_v29 = vshrl.u32 %v502_v26, 16  ;;  %v552_v30 = vshll.u32 %v502_v26, 16 }
  0x1e   : > { %300 = vst.msk [vmem:[#allocation2 + $0x138] sm:$0xf] %vm283_vm5, %v11204_v21  ;;  %v11353_v31 = vrot.slane %v557_v22, 7  ;;  %v11355_v32 = vrot.slane %v565_v24, 7  ;;  %v505_v33 = vld [vmem:[%s11329_s17 + $0x14] sm:$0xf]  ;;  %vm11360_vm6 = vmand %vm283_vm5, %vm402_vm3 }
  0x1f   : > { %v878_v36 = vld [vmem:[#allocation2 + $0x28] sm:$0xf]  ;;  %v11364_v37 = vrot.slane %v541_v27, 7  ;;  %v11366_v38 = vrot.slane %v549_v29, 7  ;;  %v860_v41 = vld [vmem:[#allocation2 + $0x10] sm:$0xf]  ;;  %vm11432_vm11 = vmor %vm1947_vm7, %vm1948_vm8 }
  0x20   : > { %v562_v39 = vor.u32 %v560_v23, %v11353_v31  ;;  %v570_v40 = vor.u32 %v568_v25, %v11355_v32  ;;  %v866_v42 = vld [vmem:[#allocation2 + $0x18] sm:$0xf]  ;;  %v500_v46 = vld [vmem:[%s11329_s17] sm:$0xf]  ;;  %v407_v47 = vld [vmem:[#allocation2 + $0x14] sm:$0x1] }
  0x21   : > { %v506_v43 = vld [vmem:[%s11329_s17 + $0x18] sm:$0xf]  ;;  %v546_v44 = vor.u32 %v544_v28, %v11364_v37  ;;  %v554_v45 = vor.u32 %v552_v30, %v11366_v38  ;;  %v573_v50 = vshrl.u32 %v505_v33, 16  ;;  %v576_v51 = vshll.u32 %v505_v33, 16  ;;  %v884_v56 = vld [vmem:[#allocation2 + $0x30] sm:$0xf] }
  0x22   : > { %v873_v48 = vsel %vm11360_vm6, %v562_v39, %v872_v35  ;;  %v879_v49 = vsel %vm11360_vm6, %v570_v40, %v878_v36  ;;  %v581_v54 = vshrl.u32 %v506_v43, 16  ;;  %v584_v55 = vshll.u32 %v506_v43, 16  ;;  %v410_v57 = vld [vmem:[#allocation2 + $0x1c] sm:$0x1]  ;;  %v413_v58 = vld [vmem:[#allocation2 + $0x24] sm:$0x1] }
  0x23   : > { %874 = vst [vmem:[#allocation2 + $0x20] sm:$0xf] %v873_v48  ;;  %880 = vst [vmem:[#allocation2 + $0x28] sm:$0xf] %v879_v49  ;;  %v861_v52 = vsel %vm11360_vm6, %v546_v44, %v860_v41  ;;  %v867_v53 = vsel %vm11360_vm6, %v554_v45, %v866_v42  ;;  %v11382_v59 = vrot.slane %v573_v50, 7  ;;  %v533_v60 = vshrl.u32 %v500_v46, 16 }
  0x24   : > { %862 = vst [vmem:[#allocation2 + $0x10] sm:$0xf] %v861_v52  ;;  %868 = vst [vmem:[#allocation2 + $0x18] sm:$0xf] %v867_v53  ;;  %v536_v61 = vshll.u32 %v500_v46, 16  ;;  %v408_v62 = vsel %vm11318_vm4, 0, %v407_v47 }
  0x25   : > { %v416_v63 = vld [vmem:[#allocation2 + $0x2c] sm:$0x1]  ;;  %v11386_v1 = vrot.slane %v581_v54, 7  ;;  %409 = vst [vmem:[#allocation2 + $0x14] sm:$0x1] %v408_v62  ;;  %v411_v2 = vsel %vm11318_vm4, 0, %v410_v57  ;;  %v578_v7 = vor.u32 %v576_v51, %v11382_v59 }
  0x26   : > { %v414_v3 = vsel %vm11318_vm4, 0, %v413_v58  ;;  %v417_v4 = vsel %vm11318_vm4, 0, %v416_v63  ;;  %v419_v5 = vld [vmem:[#allocation2 + $0x34] sm:$0x1]  ;;  %v563_v6 = vrot.slane %v11353_v31, 4  ;;  %v535_v9 = vrot.slane %v533_v60, 7 }
  0x27   : > { %v890_v8 = vld [vmem:[#allocation2 + $0x38] sm:$0xf]  ;;  %412 = vst [vmem:[#allocation2 + $0x1c] sm:$0x1] %v411_v2  ;;  %415 = vst [vmem:[#allocation2 + $0x24] sm:$0x1] %v414_v3  ;;  %v586_v14 = vor.u32 %v584_v55, %v11386_v1  ;;  %v885_v18 = vsel %vm11360_vm6, %v578_v7, %v884_v56 }
  0x28   : > { %418 = vst [vmem:[#allocation2 + $0x2c] sm:$0x1] %v417_v4  ;;  %v420_v10 = vsel %vm11318_vm4, 0, %v419_v5  ;;  %v571_v11 = vrot.slane %v11355_v32, 4  ;;  %v547_v12 = vrot.slane %v11364_v37, 4  ;;  %v555_v17 = vrot.slane %v11366_v38, 4 }
  0x29   : > { %v854_v15 = vld [vmem:[#allocation2 + $0x8] sm:$0xf]  ;;  %v857_v16 = vld [vmem:[#allocation2 + $0xc] sm:$0x1]  ;;  %421 = vst [vmem:[#allocation2 + $0x34] sm:$0x1] %v420_v10  ;;  %v538_v19 = vor.u32 %v536_v61, %v535_v9  ;;  %v891_v21 = vsel %vm11360_vm6, %v586_v14, %v890_v8 }
  0x2a   : > { %v539_v20 = vrot.slane %v535_v9, 4  ;;  %886 = vst [vmem:[#allocation2 + $0x30] sm:$0xf] %v885_v18  ;;  %v11406_v22 = vld [vmem:[#allocation2] sm:$0xe]  ;;  %s11205_s18 = smov 64  }
  0x2b   : > { %v11408_v23 = vld [vmem:[#allocation2 + $0x4] sm:$0x1]  ;;  %v1191_v24 = vld [vmem:[#allocation2] sm:$0xf]  ;;  %892 = vst [vmem:[#allocation2 + $0x38] sm:$0xf] %v891_v21  ;;  %v855_v26 = vsel %vm11360_vm6, %v538_v19, %v854_v15 }
  0x2c   : > { %v11001_v25 = vld [vmem:[#allocation2 + $0x20] ss:$8 sps:$4 sm:$0xff]   ;;  %v858_v27 = vsel %vm11302_vm2, %v539_v20, %v857_v16  ;;  %v11002_v28 = vld [vmem:[#allocation2 + $0x10] ss:$8 sps:$4 sm:$0xff]   ;;  %856 = vst [vmem:[#allocation2 + $0x8] sm:$0xf] %v855_v26 }
  0x2d   : > { %859 = vst [vmem:[#allocation2 + $0xc] sm:$0x1] %v858_v27  ;;  %3443 = vrot.lane.b32.xlu0 %v11001_v25, %s11205_s18  ;;  %v579_v29 = vrot.slane %v11382_v59, 4  ;;  %v863_v30 = vld [vmem:[#allocation2 + $0x14] sm:$0x1]  ;;  %v1259_v31 = vshrl.u32 %v1191_v24, 16  ;;  %3441 = vrot.lane.b32.xlu1 %v11002_v28, %s11205_s18 }
  0x2e   : > { %v864_v33 = vsel %vm11302_vm2, %v547_v12, %v863_v30  ;;  %v2962_v35 = vld [vmem:[#allocation2 + $0x10] sm:$0xe]  ;;  %v869_v36 = vld [vmem:[#allocation2 + $0x1c] sm:$0x1]  ;;  %v875_v37 = vld [vmem:[#allocation2 + $0x24] sm:$0x1] }
  0x2f   : > { %865 = vst [vmem:[#allocation2 + $0x14] sm:$0x1] %v864_v33  ;;  %v10017_v38 = vrot.slane %v11406_v22, 9  ;;  %v1952_v39 = vrot.slane %v11408_v23, 5  ;;  %v870_v40 = vsel %vm11302_vm2, %v555_v17, %v869_v36  ;;  %v876_v41 = vsel %vm11302_vm2, %v563_v6, %v875_v37  ;;  %v2964_v42 = vld [vmem:[#allocation2 + $0x18] sm:$0xe] }
  0x30   : > { %v2966_v43 = vld [vmem:[#allocation2 + $0x20] sm:$0xe]  ;;  %v11425_v44 = vld [vmem:[#allocation2 + $0x4] sm:$0x1]  ;;  %v10098_v45 = vrot.slane %v2962_v35, 9  ;;  %v11427_v46 = vrot.slane %v1259_v31, 4 }
  0x31   : > { %871 = vst [vmem:[#allocation2 + $0x1c] sm:$0x1] %v870_v40  ;;  %877 = vst [vmem:[#allocation2 + $0x24] sm:$0x1] %v876_v41  ;;  %v10099_v48 = vrot.slane %v2964_v42, 9  ;;  %v10100_v49 = vrot.slane %v2966_v43, 9  ;;  %v1953_v14 = vsel %vm11432_vm11, %v10017_v38, %v1952_v39 }
  0x32   : > { %v11003_v47 = vld [vmem:[#allocation2 + $0x30] ss:$8 sps:$4 sm:$0xff]   ;;  %vm1255_vm9 = vsmask.f32 3328  ;;  %vm1256_vm10 = vsmask.f32 7440 }
  0x33   : > { %v11004_v50 = vld [vmem:[#allocation2 + $0x8] ss:$8 sps:$4 sm:$0xff]   ;;  %v11005_v52 = vld [vmem:[#allocation2 + $0x18] ss:$8 sps:$4 sm:$0xff]   ;;  %3445 = vrot.lane.b32.xlu0 %v11003_v47, %s11205_s18  ;;  %v881_v56 = vld [vmem:[#allocation2 + $0x2c] sm:$0x1] }
  0x34   : > { %v2960_v51 = vld [vmem:[#allocation2 + $0x8] sm:$0xe]  ;;  %v2961_v54 = vld [vmem:[#allocation2 + $0xc] sm:$0x1]  ;;  %v1262_v57 = vshll.u32 %v1191_v24, 16  ;;  %s11206_s19 = smov 96   ;;  %v882_v59 = vsel %vm11302_vm2, %v571_v11, %v881_v56  ;;  %vm11470_vm12 = vmor %vm1255_vm9, %vm1256_vm10 }
  0x35   : > { %v10097_v55 = vrot.slane %v2960_v51, 9  ;;  %2303 = vrot.lane.b32.xlu1 %v11004_v50, %s11206_s19  ;;  %v3090_v58 = vrot.slane %v2961_v54, 5  ;;  %v887_v60 = vld [vmem:[#allocation2 + $0x34] sm:$0x1]  ;;  %v11441_v61 = vld [vmem:[#allocation2 + $0x28] sm:$0xe] }
  0x36   : > { %v1268_v62 = vshll.u32 %v11425_v44, 16  ;;  %v2963_v63 = vld [vmem:[#allocation2 + $0x14] sm:$0x1]  ;;  %883 = vst [vmem:[#allocation2 + $0x2c] sm:$0x1] %v882_v59  ;;  %v888_v2 = vsel %vm11302_vm2, %v579_v29, %v887_v60  ;;  %v10101_v4 = vrot.slane %v11441_v61, 9 }
  0x37   : > { %v11446_v3 = vld [vmem:[#allocation2 + $0x30] sm:$0xe]  ;;  %v1264_v5 = vrot.slane %v1262_v57, 5  ;;  %v3091_v32 = vsel %vm11432_vm11, %v10097_v55, %v3090_v58  ;;  %v3094_v6 = vrot.slane %v2963_v63, 5  ;;  %889 = vst [vmem:[#allocation2 + $0x34] sm:$0x1] %v888_v2 }
  0x38   : > { %v11006_v7 = vld [vmem:[#allocation2 + $0x28] ss:$8 sps:$4 sm:$0xff]   ;;  %v10102_v8 = vrot.slane %v11446_v3, 9  ;;  %v1822_v10 = vld [vmem:[#allocation2 + $0xc] sm:$0x1]  ;;  %s11207_s20 = smov 32  }
  0x39   : > { %v1821_v9 = vld [vmem:[#allocation2 + $0x8] sm:$0xe]  ;;  %v2965_v11 = vld [vmem:[#allocation2 + $0x1c] sm:$0x1]  ;;  %v2967_v12 = vld [vmem:[#allocation2 + $0x24] sm:$0x1]  ;;  %v1265_v17 = vor.u32 %v1264_v5, %v11427_v46  ;;  %v3095_v18 = vsel %vm11432_vm11, %v10098_v45, %v3094_v6  ;;  %2305 = vrot.lane.b32.xlu1 %v11005_v52, %s11206_s19 }
  0x3a   : > { %v10018_v15 = vrot.slane %v1821_v9, 9  ;;  %v1956_v16 = vrot.slane %v1822_v10, 5  ;;  %v3098_v19 = vrot.slane %v2965_v11, 5  ;;  %v3102_v20 = vrot.slane %v2967_v12, 5  ;;  %v1823_v21 = vld [vmem:[#allocation2 + $0x10] sm:$0xe] }
  0x3b   : > { %v1824_v22 = vld [vmem:[#allocation2 + $0x14] sm:$0x1]  ;;  %v10129_v23 = vcombine.low %v3091_v32, %v3095_v18  ;;  %v1825_v25 = vld [vmem:[#allocation2 + $0x18] sm:$0xe]  ;;  %v1826_v26 = vld [vmem:[#allocation2 + $0x1c] sm:$0x1] }
  0x3c   : > { %v1957_v24 = vsel %vm11432_vm11, %v10018_v15, %v1956_v16  ;;  %v10019_v27 = vrot.slane %v1823_v21, 9  ;;  %v1960_v28 = vrot.slane %v1824_v22, 5  ;;  %v3099_v29 = vsel %vm11432_vm11, %v10099_v48, %v3098_v19  ;;  %v1193_v35 = vld [vmem:[#allocation2 + $0x8] sm:$0xf]  ;;  %v1194_v36 = vld [vmem:[#allocation2 + $0xc] sm:$0x1] }
  0x3d   : > { %v3103_v30 = vsel %vm11432_vm11, %v10100_v49, %v3102_v20  ;;  %v10049_v31 = vcombine.low %v1953_v14, %v1957_v24  ;;  %v10020_v33 = vrot.slane %v1825_v25, 9  ;;  %3264 = vrot.lane.b32.xlu0 %v10129_v23, %s11207_s20  ;;  %v1964_v39 = vrot.slane %v1826_v26, 5  ;;  %v1827_v41 = vld [vmem:[#allocation2 + $0x20] sm:$0xe]  ;;  %v1828_v42 = vld [vmem:[#allocation2 + $0x24] sm:$0x1]  ;;  %2307 = vrot.lane.b32.xlu1 %v11006_v7, %s11206_s19 }
  0x3e   : > { %v10130_v37 = vcombine.low %v3099_v29, %v3103_v30  ;;  %v1961_v38 = vsel %vm11432_vm11, %v10019_v27, %v1960_v28  ;;  %v1266_v40 = vrot.slane %v1265_v17, 4  ;;  %v2969_v43 = vld [vmem:[#allocation2 + $0x2c] sm:$0x1]  ;;  %v1270_v45 = vrot.slane %v1268_v62, 5  ;;  %v2971_v49 = vld [vmem:[#allocation2 + $0x34] sm:$0x1] }
  0x3f   : > { %v1273_v46 = vshrl.u32 %v1193_v35, 16  ;;  %v1276_v47 = vshll.u32 %v1193_v35, 16  ;;  %v1282_v48 = vshll.u32 %v1194_v36, 16  ;;  %v3106_v50 = vrot.slane %v2969_v43, 5  ;;  %v1829_v52 = vld [vmem:[#allocation2 + $0x28] sm:$0xe] }
  0x40   : > { %v1965_v51 = vsel %vm11432_vm11, %v10020_v33, %v1964_v39  ;;  %v10021_v54 = vrot.slane %v1827_v41, 9  ;;  %v3110_v55 = vrot.slane %v2971_v49, 5  ;;  %v1830_v58 = vld [vmem:[#allocation2 + $0x2c] sm:$0x1]  ;;  %v3505_v59 = vld [vmem:[#allocation2 + $0x10] sm:$0xf]  ;;  %v1271_v61 = vsel %vm11470_vm12, %v1266_v40, %v1270_v45 }
  0x41   : > { %v10050_v56 = vcombine.low %v1961_v38, %v1965_v51  ;;  %v1275_v57 = vrot.slane %v1273_v46, 4  ;;  %3266 = vrot.lane.b32.xlu0 %v10130_v37, %s11207_s20  ;;  %v3107_v60 = vsel %vm11432_vm11, %v10101_v4, %v3106_v50  ;;  %v1278_v62 = vrot.slane %v1276_v47, 5  ;;  %v3506_v2 = vld [vmem:[#allocation2 + $0x14] sm:$0x1]  ;;  %2126 = vrot.lane.b32.xlu1 %v10049_v31, %s11205_s18  ;;  %v3507_v7 = vld [vmem:[#allocation2 + $0x18] sm:$0xf] }
  0x42   : > { %v1968_v63 = vrot.slane %v1828_v42, 5  ;;  %v3111_v3 = vsel %vm11432_vm11, %v10102_v8, %v3110_v55  ;;  %v1284_v5 = vrot.slane %v1282_v48, 5  ;;  %v10022_v32 = vrot.slane %v1829_v52, 9  ;;  %v3508_v11 = vld [vmem:[#allocation2 + $0x1c] sm:$0x1]  ;;  %s11210_s23 = smov 16  }
  0x43   : > { %v1972_v6 = vrot.slane %v1830_v58, 5  ;;  %v10131_v9 = vcombine.low %v3107_v60, %v3111_v3  ;;  %v1279_v10 = vor.u32 %v1278_v62, %v1275_v57  ;;  %v3570_v12 = vshrl.u32 %v3505_v59, 16  ;;  %v1195_v8 = vld [vmem:[#allocation2 + $0x10] sm:$0xf]  ;;  %v1196_v22 = vld [vmem:[#allocation2 + $0x14] sm:$0x1] }
  0x44   : > { %v1969_v4 = vsel %vm11432_vm11, %v10021_v54, %v1968_v63  ;;  %v3573_v15 = vshll.u32 %v3505_v59, 16  ;;  %v3579_v16 = vshll.u32 %v3506_v2, 16  ;;  %v3584_v17 = vshrl.u32 %v3507_v7, 16  ;;  %v1197_v27 = vld [vmem:[#allocation2 + $0x18] sm:$0xf]  ;;  %s272_s29 = sand.u32 1, %s11194_s25  }
  0x45   : > { %v1973_v14 = vsel %vm11432_vm11, %v10022_v32, %v1972_v6  ;;  %3268 = vrot.lane.b32.xlu0 %v10131_v9, %s11207_s20  ;;  %v1280_v18 = vrot.slane %v1279_v10, 4  ;;  %v3572_v20 = vrot.slane %v3570_v12, 4  ;;  %v3587_v21 = vshll.u32 %v3507_v7, 16  ;;  %2128 = vrot.lane.b32.xlu1 %v10050_v56, %s11205_s18  ;;  %v1198_v30 = vld [vmem:[#allocation2 + $0x1c] sm:$0x1]  ;;  %s9981_s8 = sshll.u32 %s272_s29, 2 }
  0x46   : > { %v10051_v19 = vcombine.low %v1969_v4, %v1973_v14  ;;  %v3575_v23 = vrot.slane %v3573_v15, 5  ;;  %v3581_v24 = vrot.slane %v3579_v16, 5  ;;  %v3586_v25 = vrot.slane %v3584_v17, 4  ;;  %v3509_v39 = vld [vmem:[#allocation2 + $0x20] sm:$0xf]  ;;  %s10572_s13 = sshll.u32 %s11273_s28, 6 }
  0x47   : > { %v3593_v26 = vshll.u32 %v3508_v11, 16  ;;  %v1285_v28 = vsel %vm11470_vm12, %v1280_v18, %v1284_v5  ;;  %v3589_v29 = vrot.slane %v3587_v21, 5  ;;  %v1287_v31 = vshrl.u32 %v1195_v8, 16  ;;  %v3510_v49 = vld [vmem:[#allocation2 + $0x24] sm:$0x1]  ;;  %s274_s14 = scalar_lea.vmem [#allocation4], %s9981_s8 }
  0x48   : > { %v1290_v33 = vshll.u32 %v1195_v8, 16  ;;  %v10001_v35 = vcombine.low %v1271_v61, %v1285_v28  ;;  %v3576_v36 = vor.u32 %v3575_v23, %v3572_v20  ;;  %v1296_v38 = vshll.u32 %v1196_v22, 16  ;;  %v3511_v54 = vld [vmem:[#allocation2 + $0x28] sm:$0xf]  ;;  %v3512_v59 = vld [vmem:[#allocation2 + $0x2c] sm:$0x1] }
  0x49   : > { %v3595_v37 = vrot.slane %v3593_v26, 5  ;;  %v3590_v40 = vor.u32 %v3589_v29, %v3586_v25  ;;  %v1289_v41 = vrot.slane %v1287_v31, 4  ;;  %v1301_v43 = vshrl.u32 %v1197_v27, 16  ;;  %2130 = vrot.lane.b32.xlu1 %v10051_v19, %s11205_s18  ;;  %v1199_v3 = vld [vmem:[#allocation2 + $0x20] sm:$0xf]  ;;  %s9918_s15 = sshll.u32 %s274_s14, 4  ;;  %s14373_s15 = int_to_ptr.vmem [resolvable:$true] %s9918_s15 }
  0x4a   : > { %v1292_v42 = vrot.slane %v1290_v33, 5  ;;  %1754 = vrot.lane.b32.xlu0 %v10001_v35, %s11207_s20  ;;  %v3577_v45 = vrot.slane %v3576_v36, 4  ;;  %v1298_v46 = vrot.slane %v1296_v38, 5  ;;  %v1304_v47 = vshll.u32 %v1197_v27, 16  ;;  %v1200_v9 = vld [vmem:[#allocation2 + $0x24] sm:$0x1] }
  0x4b   : > { %v1310_v48 = vshll.u32 %v1198_v30, 16  ;;  %v3591_v50 = vrot.slane %v3590_v40, 4  ;;  %v1303_v52 = vrot.slane %v1301_v43, 4  ;;  %v3598_v55 = vshrl.u32 %v3509_v39, 16  ;;  %v1201_v14 = vld [vmem:[#allocation2 + $0x28] sm:$0xf] }
  0x4c   : > { %v1293_v51 = vor.u32 %v1292_v42, %v1289_v41  ;;  %v3582_v56 = vsel %vm11470_vm12, %v3577_v45, %v3581_v24  ;;  %v1306_v57 = vrot.slane %v1304_v47, 5  ;;  %v3601_v60 = vshll.u32 %v3509_v39, 16  ;;  %v422_v18 = vld [vmem:[#allocation2 + $0x3c] sm:$0x1]  ;;  %v1202_v20 = vld [vmem:[#allocation2 + $0x2c] sm:$0x1] }
  0x4d   : > { %v1312_v58 = vrot.slane %v1310_v48, 5  ;;  %v3596_v61 = vsel %vm11470_vm12, %v3591_v50, %v3595_v37  ;;  %v3600_v63 = vrot.slane %v3598_v55, 4  ;;  %v3607_v2 = vshll.u32 %v3510_v49, 16  ;;  %v3513_v27 = vld [vmem:[#allocation2 + $0x30] sm:$0xf]  ;;  %s9905_s28 = scalar_lea.sflag [#allocation5], %s272_s29 }
  0x4e   : > { %v1294_v62 = vrot.slane %v1293_v51, 4  ;;  %v10161_v5 = vcombine.low %v3582_v56, %v3596_v61  ;;  %v1307_v32 = vor.u32 %v1306_v57, %v1303_v52  ;;  %v3603_v6 = vrot.slane %v3601_v60, 5  ;;  %v3515_v33 = vld [vmem:[#allocation2 + $0x38] sm:$0xf]  ;;  %v3514_v39 = vld [vmem:[#allocation2 + $0x34] sm:$0x1] }
  0x4f   : > { %v3612_v7 = vshrl.u32 %v3511_v54, 16  ;;  %v3609_v4 = vrot.slane %v3607_v2, 5  ;;  %v3615_v11 = vshll.u32 %v3511_v54, 16  ;;  %v3621_v12 = vshll.u32 %v3512_v59, 16  ;;  %v327_v40 = vld [vmem:[#allocation2 + $0x40] sm:$0x1] }
  0x50   : > { %v1299_v10 = vsel %vm11470_vm12, %v1294_v62, %v1298_v46  ;;  %4065 = vrot.lane.b32.xlu0 %v10161_v5, %s11206_s19  ;;  %v1308_v15 = vrot.slane %v1307_v32, 4  ;;  %v3604_v16 = vor.u32 %v3603_v6, %v3600_v63  ;;  %v1315_v8 = vshrl.u32 %v1199_v3, 16  ;;  %v425_v50 = vld [vmem:[#allocation2 + $0x44] sm:$0x1]  ;;  %v507_v56 = vld [vmem:[%s11329_s17 + $0x1c] sm:$0xf] }
  0x51   : > { %v3614_v17 = vrot.slane %v3612_v7, 4  ;;  %v3617_v19 = vrot.slane %v3615_v11, 5  ;;  %v1318_v21 = vshll.u32 %v1199_v3, 16  ;;  %v1324_v22 = vshll.u32 %v1200_v9, 16  ;;  %v1203_v61 = vld [vmem:[#allocation2 + $0x30] sm:$0xf] }
  0x52   : > { %v1313_v23 = vsel %vm11470_vm12, %v1308_v15, %v1312_v58  ;;  %v3605_v24 = vrot.slane %v3604_v16, 4  ;;  %v1317_v25 = vrot.slane %v1315_v8, 4  ;;  %v1329_v26 = vshrl.u32 %v1201_v14, 16  ;;  %v11514_v3 = vld [vmem:[#allocation2 + $0x38] sm:$0xe]  ;;  %s11140_s16 = scalar_lea.vmem %s14373_s15, 64 }
  0x53   : > { %v10002_v28 = vcombine.low %v1299_v10, %v1313_v23  ;;  %v3618_v29 = vor.u32 %v3617_v19, %v3614_v17  ;;  %v3623_v30 = vrot.slane %v3621_v12, 5  ;;  %v1320_v31 = vrot.slane %v1318_v21, 5  ;;  %v1204_v11 = vld [vmem:[#allocation2 + $0x34] sm:$0x1]  ;;  %v1205_v16 = vld [vmem:[#allocation2 + $0x38] sm:$0xf]  ;;  %p11141_p11 = scmp.ne.s32.totalorder %s14373_s15, %s11140_s16 }
  0x54   : > { %v3610_v35 = vsel %vm11470_vm12, %v3605_v24, %v3609_v4  ;;  %v1331_v36 = vrot.slane %v1329_v26, 4  ;;  %v1332_v37 = vshll.u32 %v1201_v14, 16  ;;  %v1338_v38 = vshll.u32 %v1202_v20, 16  ;;  %s11211_s21 = smov [#allocation4]  }
  0x55   : > { %1756 = vrot.lane.b32.xlu1 %v10002_v28, %s11207_s20  ;;  %v3619_v41 = vrot.slane %v3618_v29, 4  ;;  %v1321_v42 = vor.u32 %v1320_v31, %v1317_v25  ;;  %v423_v43 = vsel %vm11318_vm4, 0, %v422_v18  ;;  %v3626_v45 = vshrl.u32 %v3513_v27, 16  ;;  %v3520_v28 = vld [vmem:[#allocation2 + $0x4c] sm:$0x1]  ;;  %p11142_p12 = pnand %p11141_p11, %p11290_p5  ;;  %s11144_s22 = sshll.u32 %s11211_s21, 4  ;;  %s11145_s22 = int_to_ptr.vmem [resolvable:$false] %s11144_s22 }
  0x56   : > { %v587_v46 = vrot.slane %v11386_v1, 4  ;;  %v1326_v47 = vrot.slane %v1324_v22, 5  ;;  %v1334_v48 = vrot.slane %v1332_v37, 5  ;;  %424 = vst [vmem:[#allocation2 + $0x3c] sm:$0x1] %v423_v43  ;;  %v3629_v49 = vshll.u32 %v3513_v27, 16  ;;  %p11147_p0 = scmp.lt.s32.totalorder %s14373_s15, %s11145_s22 }
  0x57   : > { %v3624_v51 = vsel %vm11470_vm12, %v3619_v41, %v3623_v30  ;;  %v1322_v52 = vrot.slane %v1321_v42, 4  ;;  %v3628_v54 = vrot.slane %v3626_v45, 4  ;;  %v3640_v55 = vshrl.u32 %v3515_v33, 16  ;;  %v11525_v22 = vld [vmem:[#allocation2 + $0x30] sm:$0xe]  ;;  %p11143_p13 = pneg %p11142_p12 }
  0x58   : > { %v10162_v57 = vcombine.low %v3610_v35, %v3624_v51  ;;  %v1335_v58 = vor.u32 %v1334_v48, %v1331_v36  ;;  %v1340_v59 = vrot.slane %v1338_v38, 5  ;;  %v3631_v60 = vrot.slane %v3629_v49, 5  ;;  %v3519_v27 = vld [vmem:[#allocation2 + $0x48] sm:$0xf]  ;;  %v330_v35 = vld [vmem:[#allocation2 + $0x58] sm:$0x1] }
  0x59   : > { %v3635_v62 = vshll.u32 %v3514_v39, 16  ;;  %v3642_v63 = vrot.slane %v3640_v55, 4  ;;  %v3643_v1 = vshll.u32 %v3515_v33, 16  ;;  %v328_v2 = vsel %vm11302_vm2, 0, %v327_v40  ;;  %v333_v36 = vld [vmem:[#allocation2 + $0x60] sm:$0x1] }
  0x5a   : > { %4067 = vrot.lane.b32.xlu0 %v10162_v57, %s11206_s19  ;;  %v1327_v5 = vsel %vm11470_vm12, %v1322_v52, %v1326_v47  ;;  %v1336_v32 = vrot.slane %v1335_v58, 4  ;;  %329 = vst [vmem:[#allocation2 + $0x40] sm:$0x1] %v328_v2  ;;  %v426_v6 = vsel %vm11318_vm4, 0, %v425_v50  ;;  %v589_v7 = vshrl.u32 %v507_v56, 16 }
  0x5b   : > { %v3632_v9 = vor.u32 %v3631_v60, %v3628_v54  ;;  %v3645_v10 = vrot.slane %v3643_v1, 5  ;;  %427 = vst [vmem:[#allocation2 + $0x44] sm:$0x1] %v426_v6  ;;  %v592_v4 = vshll.u32 %v507_v56, 16  ;;  %v1343_v12 = vshrl.u32 %v1203_v61, 16 }
  0x5c   : > { %v1341_v14 = vsel %vm11470_vm12, %v1336_v32, %v1340_v59  ;;  %v591_v15 = vrot.slane %v589_v7, 7  ;;  %v1346_v17 = vshll.u32 %v1203_v61, 16  ;;  %v11523_v19 = vrot.slane %v3635_v62, 5  ;;  %v1832_v39 = vld [vmem:[#allocation2 + $0x34] sm:$0x1] }
  0x5d   : > { %v10003_v8 = vcombine.low %v1327_v5, %v1341_v14  ;;  %v893_v18 = vld [vmem:[#allocation2 + $0x3c] sm:$0x1]  ;;  %v3646_v20 = vor.u32 %v3645_v10, %v3642_v63  ;;  %v1345_v21 = vrot.slane %v1343_v12, 4  ;;  %v10103_v25 = vrot.slane %v11514_v3, 9  ;;  %v1833_v40 = vld [vmem:[#allocation2 + $0x38] sm:$0xe] }
  0x5e   : > { %v894_v23 = vsel %vm11302_vm2, %v587_v46, %v893_v18  ;;  %v594_v24 = vor.u32 %v592_v4, %v591_v15  ;;  %v1352_v26 = vshll.u32 %v1204_v11, 16  ;;  %v11531_v29 = vrot.slane %v3632_v9, 4  ;;  %v428_v41 = vld [vmem:[#allocation2 + $0x5c] sm:$0x1]  ;;  %v431_v42 = vld [vmem:[#allocation2 + $0x64] sm:$0x1] }
  0x5f   : > { %1758 = vrot.lane.b32.xlu1 %v10003_v8, %s11207_s20  ;;  %895 = vst [vmem:[#allocation2 + $0x3c] sm:$0x1] %v894_v23  ;;  %v595_v30 = vrot.slane %v591_v15, 4  ;;  %v1348_v31 = vrot.slane %v1346_v17, 5  ;;  %v1357_v33 = vshrl.u32 %v1205_v16, 16  ;;  %v11533_v37 = vrot.slane %v3646_v20, 4 }
  0x60   : > { %v1360_v38 = vshll.u32 %v1205_v16, 16  ;;  %v3668_v47 = vshrl.u32 %v3519_v27, 16  ;;  %v3671_v48 = vshll.u32 %v3519_v27, 16  ;;  %v1354_v51 = vrot.slane %v1352_v26, 5  ;;  %v11545_v63 = vld [vmem:[%s11329_s17 + $0x20] sm:$0xf] }
  0x61   : > { %v896_v43 = vld [vmem:[#allocation2 + $0x40] sm:$0xf]  ;;  %v1349_v45 = vor.u32 %v1348_v31, %v1345_v21  ;;  %v1359_v46 = vrot.slane %v1357_v33, 4  ;;  %v10023_v54 = vrot.slane %v11525_v22, 9  ;;  %v3677_v58 = vshll.u32 %v3520_v28, 16 }
  0x62   : > { %v897_v49 = vsel %vm11360_vm6, %v594_v24, %v896_v43  ;;  %v899_v50 = vld [vmem:[#allocation2 + $0x44] sm:$0x1]  ;;  %v1362_v52 = vrot.slane %v1360_v38, 5  ;;  %v3670_v56 = vrot.slane %v3668_v47, 4  ;;  %v3673_v57 = vrot.slane %v3671_v48, 5 }
  0x63   : > { %898 = vst [vmem:[#allocation2 + $0x40] sm:$0xf] %v897_v49  ;;  %v900_v55 = vsel %vm11302_vm2, %v595_v30, %v899_v50  ;;  %v1350_v59 = vrot.slane %v1349_v45, 4  ;;  %v331_v61 = vsel %vm11302_vm2, 0, %v330_v35  ;;  %v334_v62 = vsel %vm11302_vm2, 0, %v333_v36  ;;  %v11020_v38 = vld [vmem:[%s14414_s1 + $0x40] sm:$0xff]  }
  0x64   : > { %901 = vst [vmem:[#allocation2 + $0x44] sm:$0x1] %v900_v55  ;;  %v1363_v60 = vor.u32 %v1362_v52, %v1359_v46  ;;  %v1976_v1 = vrot.slane %v1832_v39, 5  ;;  %v10024_v2 = vrot.slane %v1833_v40, 9  ;;  %332 = vst [vmem:[#allocation2 + $0x58] sm:$0x1] %v331_v61  ;;  %v3674_v4 = vor.u32 %v3673_v57, %v3670_v56  ;;  %10608 = vmatprep.subr.bf16.mxu0 %v11020_v38 }
  0x65   : > { %335 = vst [vmem:[#allocation2 + $0x60] sm:$0x1] %v334_v62  ;;  %v429_v5 = vsel %vm11318_vm4, 0, %v428_v41  ;;  %v432_v32 = vsel %vm11318_vm4, 0, %v431_v42  ;;  %v509_v6 = vld [vmem:[%s11329_s17 + $0x24] sm:$0xf]  ;;  %v3638_v17 = vsel %vm11470_vm12, %v11531_v29, %v11523_v19  ;;  %v1355_v8 = vsel %vm11470_vm12, %v1350_v59, %v1354_v51 }
  0x66   : > { %v3516_v7 = vld [vmem:[#allocation2 + $0x3c] sm:$0x1]  ;;  %430 = vst [vmem:[#allocation2 + $0x5c] sm:$0x1] %v429_v5  ;;  %433 = vst [vmem:[#allocation2 + $0x64] sm:$0x1] %v432_v32  ;;  %v1977_v19 = vsel %vm11432_vm11, %v10023_v54, %v1976_v1 }
  0x67   : > { %v2973_v9 = vld [vmem:[#allocation2 + $0x3c] sm:$0x1]  ;;  %v3649_v11 = vshll.u32 %v3516_v7, 16  ;;  %v1364_v14 = vrot.slane %v1363_v60, 4  ;;  %v11558_v20 = vrot.slane %v3677_v58, 5  ;;  %v597_v23 = vshrl.u32 %v11545_v63, 16 }
  0x68   : > { %v1206_v10 = vld [vmem:[#allocation2 + $0x3c] sm:$0x1]  ;;  %v3114_v12 = vrot.slane %v2973_v9, 5  ;;  %v605_v24 = vshrl.u32 %v509_v6, 16  ;;  %v11567_v28 = vrot.slane %v3674_v4, 4  ;;  %v600_v29 = vshll.u32 %v11545_v63, 16 }
  0x69   : > { %v1366_v15 = vshll.u32 %v1206_v10, 16  ;;  %v1834_v16 = vld [vmem:[#allocation2 + $0x3c] sm:$0x1]  ;;  %v3651_v21 = vrot.slane %v3649_v11, 5  ;;  %v1207_v36 = vld [vmem:[#allocation2 + $0x50] sm:$0xf] }
  0x6a   : > { %v1980_v18 = vrot.slane %v1834_v16, 5  ;;  %v2974_v26 = vld [vmem:[#allocation2 + $0x40] sm:$0xe]  ;;  %v3115_v27 = vsel %vm11432_vm11, %v10103_v25, %v3114_v12  ;;  %v599_v46 = vrot.slane %v597_v23, 7  ;;  %v607_v47 = vrot.slane %v605_v24, 7 }
  0x6b   : > { %v1368_v22 = vrot.slane %v1366_v15, 5  ;;  %v3652_v30 = vsel %vm11470_vm12, %v11533_v37, %v3651_v21  ;;  %v2975_v31 = vld [vmem:[#allocation2 + $0x44] sm:$0x1]  ;;  %v10104_v33 = vrot.slane %v2974_v26, 9  ;;  %v3517_v25 = vld [vmem:[#allocation2 + $0x40] sm:$0xf]  ;;  %v3680_v24 = vsel %vm11470_vm12, %v11567_v28, %v11558_v20 }
  0x6c   : > { %v1981_v3 = vsel %vm11432_vm11, %v10024_v2, %v1980_v18  ;;  %v10163_v39 = vcombine.low %v3638_v17, %v3652_v30  ;;  %v3118_v40 = vrot.slane %v2975_v31, 5  ;;  %v3518_v42 = vld [vmem:[#allocation2 + $0x44] sm:$0x1]  ;;  %v3654_v43 = vshrl.u32 %v3517_v25, 16  ;;  %v11580_v48 = vld [vmem:[#allocation2 + $0x54] sm:$0x1] }
  0x6d   : > { %v1369_v35 = vsel %vm11470_vm12, %v1364_v14, %v1368_v22  ;;  %v3657_v37 = vshll.u32 %v3517_v25, 16  ;;  %v3663_v45 = vshll.u32 %v3518_v42, 16  ;;  %v10052_v50 = vcombine.low %v1977_v19, %v1981_v3  ;;  %v902_v54 = vld [vmem:[#allocation2 + $0x58] sm:$0xf]  ;;  %v905_v55 = vld [vmem:[#allocation2 + $0x5c] sm:$0x1] }
  0x6e   : > { %v10004_v41 = vcombine.low %v1355_v8, %v1369_v35  ;;  %4069 = vrot.lane.b32.xlu0 %v10163_v39, %s11206_s19  ;;  %v3119_v49 = vsel %vm11432_vm11, %v10104_v33, %v3118_v40  ;;  %v3656_v51 = vrot.slane %v3654_v43, 4  ;;  %v608_v52 = vshll.u32 %v509_v6, 16  ;;  %v336_v56 = vld [vmem:[#allocation2 + $0x68] sm:$0x1]  ;;  %v908_v61 = vld [vmem:[#allocation2 + $0x60] sm:$0xf] }
  0x6f   : > { %v10132_v57 = vcombine.low %v3115_v27, %v3119_v49  ;;  %v3659_v58 = vrot.slane %v3657_v37, 5  ;;  %v3665_v59 = vrot.slane %v3663_v45, 5  ;;  %v602_v60 = vor.u32 %v600_v29, %v599_v46  ;;  %v911_v62 = vld [vmem:[#allocation2 + $0x64] sm:$0x1]  ;;  %v510_v32 = vld [vmem:[%s11329_s17 + $0x28] sm:$0xf] }
  0x70   : > { %1760 = vrot.lane.b32.xlu1 %v10004_v41, %s11207_s20  ;;  %v603_v63 = vrot.slane %v599_v46, 4  ;;  %v610_v1 = vor.u32 %v608_v52, %v607_v47  ;;  %v611_v2 = vrot.slane %v607_v47, 4  ;;  %v1371_v5 = vshrl.u32 %v1207_v36, 16  ;;  %v11021_v7 = vld [vmem:[%s14414_s1] sm:$0xff]   ;;  %v434_v11 = vld [vmem:[#allocation2 + $0x6c] sm:$0x1] }
  0x71   : > { %v3660_v9 = vor.u32 %v3659_v58, %v3656_v51  ;;  %v903_v6 = vsel %vm11360_vm6, %v602_v60, %v902_v54  ;;  %v1374_v10 = vshll.u32 %v1207_v36, 16  ;;  %v1380_v4 = vshll.u32 %v11580_v48, 16  ;;  %v339_v12 = vld [vmem:[#allocation2 + $0x70] sm:$0x1]  ;;  %v11007_v14 = vld [vmem:[#allocation2 + $0x40] ss:$8 sps:$4 sm:$0xff]   ;;  %10609 = vmatpush3.bf16.msra.mxu0 %v11021_v7 }
  0x72   : > { %3270 = vrot.lane.b32.xlu0 %v10132_v57, %s11207_s20  ;;  %v11008_v15 = vld [vmem:[#allocation2 + $0x38] ss:$8 sps:$4 sm:$0xff]   ;;  %904 = vst [vmem:[#allocation2 + $0x58] sm:$0xf] %v903_v6  ;;  %v906_v16 = vsel %vm11302_vm2, %v603_v63, %v905_v55  ;;  %v909_v17 = vsel %vm11360_vm6, %v610_v1, %v908_v61  ;;  %v912_v8 = vsel %vm11302_vm2, %v611_v2, %v911_v62  ;;  %v1373_v18 = vrot.slane %v1371_v5, 4  ;;  %v11023_v22 = vld [vmem:[%s14414_s1 + $0x48] sm:$0xff]  }
  0x73   : > { %v11601_v21 = vld [vmem:[#allocation2 + $0x50] sm:$0xe]  ;;  %v3661_v23 = vrot.slane %v3660_v9, 4  ;;  %907 = vst [vmem:[#allocation2 + $0x5c] sm:$0x1] %v906_v16  ;;  %v1376_v26 = vrot.slane %v1374_v10, 5  ;;  %10610 = vmatprep.subr.bf16.mxu0 %v11023_v22 }
  0x74   : > { %2132 = vrot.lane.b32.xlu1 %v10052_v50, %s11205_s18  ;;  %910 = vst [vmem:[#allocation2 + $0x60] sm:$0xf] %v909_v17  ;;  %913 = vst [vmem:[#allocation2 + $0x64] sm:$0x1] %v912_v8  ;;  %v337_v27 = vsel %vm11302_vm2, 0, %v336_v56  ;;  %v613_v29 = vshrl.u32 %v510_v32, 16 }
  0x75   : > { %v437_v19 = vld [vmem:[#allocation2 + $0x74] sm:$0x1]  ;;  %338 = vst [vmem:[#allocation2 + $0x68] sm:$0x1] %v337_v27  ;;  %v616_v30 = vshll.u32 %v510_v32, 16  ;;  %v3666_v20 = vsel %vm11470_vm12, %v3661_v23, %v3665_v59  ;;  %v1377_v28 = vor.u32 %v1376_v26, %v1373_v18  ;;  %v435_v35 = vsel %vm11318_vm4, 0, %v434_v11 }
  0x76   : > { %v11612_v31 = vld [vmem:[#allocation2 + $0x54] sm:$0x1]  ;;  %v342_v33 = vld [vmem:[#allocation2 + $0x78] sm:$0x1]  ;;  %v340_v3 = vsel %vm11302_vm2, 0, %v339_v12  ;;  %3447 = vrot.lane.b32.xlu0 %v11007_v14, %s11205_s18  ;;  %v10164_v38 = vcombine.low %v3666_v20, %v3680_v24  ;;  %v11628_v39 = vrot.slane %v1380_v4, 5 }
  0x77   : > { %v11621_v25 = vld [vmem:[%s11329_s17 + $0x2c] sm:$0xf]  ;;  %v11624_v36 = vld [vmem:[%s11329_s17 + $0x30] sm:$0xf]  ;;  %v615_v40 = vrot.slane %v613_v29, 7  ;;  %v438_v41 = vsel %vm11318_vm4, 0, %v437_v19 }
  0x78   : > { %2309 = vrot.lane.b32.xlu1 %v11008_v15, %s11206_s19  ;;  %436 = vst [vmem:[#allocation2 + $0x6c] sm:$0x1] %v435_v35  ;;  %341 = vst [vmem:[#allocation2 + $0x70] sm:$0x1] %v340_v3  ;;  %v11632_v42 = vrot.slane %v1377_v28, 4  ;;  %v10025_v43 = vrot.slane %v11601_v21, 9 }
  0x79   : > { %v1984_v37 = vrot.slane %v11612_v31, 5  ;;  %439 = vst [vmem:[#allocation2 + $0x74] sm:$0x1] %v438_v41  ;;  %v343_v45 = vsel %vm11302_vm2, 0, %v342_v33  ;;  %v619_v46 = vrot.slane %v615_v40, 4  ;;  %v621_v47 = vshrl.u32 %v11621_v25, 16 }
  0x7a   : > { %v624_v48 = vshll.u32 %v11621_v25, 16  ;;  %344 = vst [vmem:[#allocation2 + $0x78] sm:$0x1] %v343_v45  ;;  %v629_v49 = vshrl.u32 %v11624_v36, 16  ;;  %v11024_v50 = vld [vmem:[%s14414_s1 + $0x8] sm:$0xff]   ;;  %v618_v54 = vor.u32 %v616_v30, %v615_v40  ;;  %4071 = vrot.lane.b32.xlu0 %v10164_v38, %s11206_s19  ;;  %v11025_v8 = vld [vmem:[%s14414_s1 + $0x50] sm:$0xff]   ;;  %v1383_v30 = vsel %vm11470_vm12, %v11632_v42, %v11628_v39 }
  0x7b   : > { %v2976_v51 = vld [vmem:[#allocation2 + $0x58] sm:$0xe]  ;;  %v2977_v56 = vld [vmem:[#allocation2 + $0x5c] sm:$0x1]  ;;  %v2978_v57 = vld [vmem:[#allocation2 + $0x60] sm:$0xe]  ;;  %10611 = vmatpush3.bf16.msra.mxu0 %v11024_v50  ;;  %v11659_v27 = vsel %vm11432_vm11, %v10025_v43, %v1984_v37 }
  0x7c   : > { %v1209_v52 = vld [vmem:[#allocation2 + $0x58] sm:$0xf]  ;;  %v2979_v58 = vld [vmem:[#allocation2 + $0x64] sm:$0x1]  ;;  %v10105_v59 = vrot.slane %v2976_v51, 9  ;;  %v3122_v60 = vrot.slane %v2977_v56, 5  ;;  %10612 = vmatprep.subr.bf16.mxu0 %v11025_v8 }
  0x7d   : > { %v1837_v55 = vld [vmem:[#allocation2 + $0x58] sm:$0xe]  ;;  %v10106_v61 = vrot.slane %v2978_v57, 9  ;;  %v3126_v62 = vrot.slane %v2979_v58, 5  ;;  %v1210_v63 = vld [vmem:[#allocation2 + $0x5c] sm:$0x1] }
  0x7e   : > { %v1385_v1 = vshrl.u32 %v1209_v52, 16  ;;  %v1388_v2 = vshll.u32 %v1209_v52, 16  ;;  %v1394_v5 = vshll.u32 %v1210_v63, 16  ;;  %v914_v32 = vld [vmem:[#allocation2 + $0x68] sm:$0xf]  ;;  %v10026_v7 = vrot.slane %v1837_v55, 9 }
  0x7f   : > { %v3123_v9 = vsel %vm11432_vm11, %v10105_v59, %v3122_v60  ;;  %v3127_v6 = vsel %vm11432_vm11, %v10106_v61, %v3126_v62  ;;  %v915_v10 = vsel %vm11360_vm6, %v618_v54, %v914_v32  ;;  %v1838_v4 = vld [vmem:[#allocation2 + $0x5c] sm:$0x1]  ;;  %v917_v11 = vld [vmem:[#allocation2 + $0x6c] sm:$0x1]  ;;  %v3521_v17 = vld [vmem:[#allocation2 + $0x60] sm:$0xf] }
  0x80   : > { %v10133_v12 = vcombine.low %v3123_v9, %v3127_v6  ;;  %v1387_v14 = vrot.slane %v1385_v1, 4  ;;  %v1390_v15 = vrot.slane %v1388_v2, 5  ;;  %v1396_v16 = vrot.slane %v1394_v5, 5  ;;  %916 = vst [vmem:[#allocation2 + $0x68] sm:$0xf] %v915_v10  ;;  %v11027_v6 = vld [vmem:[%s14414_s1 + $0x10] sm:$0xff]  }
  0x81   : > { %v1988_v18 = vrot.slane %v1838_v4, 5  ;;  %v918_v21 = vsel %vm11302_vm2, %v619_v46, %v917_v11  ;;  %v3522_v22 = vld [vmem:[#allocation2 + $0x64] sm:$0x1]  ;;  %v3682_v23 = vshrl.u32 %v3521_v17, 16  ;;  %v3685_v24 = vshll.u32 %v3521_v17, 16  ;;  %10613 = vmatpush3.bf16.msra.mxu0 %v11027_v6 }
  0x82   : > { %3272 = vrot.lane.b32.xlu0 %v10133_v12, %s11207_s20  ;;  %v1391_v26 = vor.u32 %v1390_v15, %v1387_v14  ;;  %919 = vst [vmem:[#allocation2 + $0x6c] sm:$0x1] %v918_v21  ;;  %v3691_v19 = vshll.u32 %v3522_v22, 16  ;;  %v623_v29 = vrot.slane %v621_v47, 7  ;;  %v920_v20 = vld [vmem:[#allocation2 + $0x70] sm:$0xf] }
  0x83   : > { %v3684_v31 = vrot.slane %v3682_v23, 4  ;;  %v3687_v33 = vrot.slane %v3685_v24, 5  ;;  %v632_v28 = vshll.u32 %v11624_v36, 16  ;;  %v1989_v3 = vsel %vm11432_vm11, %v10026_v7, %v1988_v18  ;;  %v923_v40 = vld [vmem:[#allocation2 + $0x74] sm:$0x1] }
  0x84   : > { %v1392_v35 = vrot.slane %v1391_v26, 4  ;;  %v11668_v25 = vrot.slane %v3691_v19, 5  ;;  %v626_v38 = vor.u32 %v624_v48, %v623_v29  ;;  %v1211_v41 = vld [vmem:[#allocation2 + $0x60] sm:$0xf]  ;;  %v627_v37 = vrot.slane %v623_v29, 4 }
  0x85   : > { %v3688_v43 = vor.u32 %v3687_v33, %v3684_v31  ;;  %v1212_v45 = vld [vmem:[#allocation2 + $0x64] sm:$0x1]  ;;  %v1399_v46 = vshrl.u32 %v1211_v41, 16  ;;  %v1402_v47 = vshll.u32 %v1211_v41, 16  ;;  %v11676_v51 = vrot.slane %v629_v49, 7 }
  0x86   : > { %v1397_v39 = vsel %vm11470_vm12, %v1392_v35, %v1396_v16  ;;  %v921_v42 = vsel %vm11360_vm6, %v626_v38, %v920_v20  ;;  %v1408_v50 = vshll.u32 %v1212_v45, 16  ;;  %v924_v55 = vsel %vm11302_vm2, %v627_v37, %v923_v40  ;;  %v926_v1 = vld [vmem:[#allocation2 + $0x78] sm:$0xf]  ;;  %v1839_v22 = vld [vmem:[#allocation2 + $0x60] sm:$0xe] }
  0x87   : > { %v10005_v52 = vcombine.low %v1383_v30, %v1397_v39  ;;  %v11009_v48 = vld [vmem:[#allocation2 + $0x60] ss:$8 sps:$4 sm:$0xff]   ;;  %922 = vst [vmem:[#allocation2 + $0x70] sm:$0xf] %v921_v42  ;;  %v3689_v56 = vrot.slane %v3688_v43, 4  ;;  %v1401_v60 = vrot.slane %v1399_v46, 4  ;;  %v10053_v36 = vcombine.low %v11659_v27, %v1989_v3 }
  0x88   : > { %v3523_v54 = vld [vmem:[#allocation2 + $0x68] sm:$0xf]  ;;  %925 = vst [vmem:[#allocation2 + $0x74] sm:$0x1] %v924_v55  ;;  %3449 = vrot.lane.b32.xlu0 %v11009_v48, %s11205_s18  ;;  %v1404_v63 = vrot.slane %v1402_v47, 5  ;;  %v634_v9 = vor.u32 %v632_v28, %v11676_v51  ;;  %v1410_v14 = vrot.slane %v1408_v50, 5 }
  0x89   : > { %v3696_v57 = vshrl.u32 %v3523_v54, 16  ;;  %v3699_v58 = vshll.u32 %v3523_v54, 16  ;;  %v2980_v59 = vld [vmem:[#allocation2 + $0x68] sm:$0xe]  ;;  %1762 = vrot.lane.b32.xlu1 %v10005_v52, %s11207_s20  ;;  %v3524_v49 = vld [vmem:[#allocation2 + $0x6c] sm:$0x1]  ;;  %v3694_v24 = vsel %vm11470_vm12, %v3689_v56, %v11668_v25 }
  0x8a   : > { %v2981_v61 = vld [vmem:[#allocation2 + $0x6c] sm:$0x1]  ;;  %v10107_v62 = vrot.slane %v2980_v59, 9  ;;  %v3705_v32 = vshll.u32 %v3524_v49, 16  ;;  %v1213_v7 = vld [vmem:[#allocation2 + $0x68] sm:$0xf]  ;;  %v1405_v12 = vor.u32 %v1404_v63, %v1401_v60  ;;  %v927_v28 = vsel %vm11360_vm6, %v634_v9, %v926_v1 }
  0x8b   : > { %v3698_v2 = vrot.slane %v3696_v57, 4  ;;  %v3701_v5 = vrot.slane %v3699_v58, 5  ;;  %v11010_v10 = vld [vmem:[#allocation2 + $0x58] ss:$8 sps:$4 sm:$0xff]   ;;  %v3130_v4 = vrot.slane %v2981_v61, 5  ;;  %v1413_v15 = vshrl.u32 %v1213_v7, 16 }
  0x8c   : > { %v1214_v11 = vld [vmem:[#allocation2 + $0x6c] sm:$0x1]  ;;  %v11028_v16 = vld [vmem:[%s14414_s1 + $0x58] sm:$0xff]   ;;  %v3707_v8 = vrot.slane %v3705_v32, 5  ;;  %v1416_v18 = vshll.u32 %v1213_v7, 16  ;;  %v1406_v26 = vrot.slane %v1405_v12, 4 }
  0x8d   : > { %v3702_v17 = vor.u32 %v3701_v5, %v3698_v2  ;;  %v1422_v21 = vshll.u32 %v1214_v11, 16  ;;  %v440_v23 = vld [vmem:[#allocation2 + $0x7c] sm:$0x1]  ;;  %2134 = vrot.lane.b32.xlu1 %v10053_v36, %s11205_s18  ;;  %v1415_v27 = vrot.slane %v1413_v15, 4  ;;  %v1840_v19 = vld [vmem:[#allocation2 + $0x64] sm:$0x1]  ;;  %10614 = vmatprep.subr.bf16.mxu0 %v11028_v16  ;;  %v3131_v3 = vsel %vm11432_vm11, %v10107_v62, %v3130_v4 }
  0x8e   : > { %v1841_v29 = vld [vmem:[#allocation2 + $0x68] sm:$0xe]  ;;  %v2982_v31 = vld [vmem:[#allocation2 + $0x70] sm:$0xe]  ;;  %v1418_v33 = vrot.slane %v1416_v18, 5  ;;  %v10027_v40 = vrot.slane %v1839_v22, 9  ;;  %v1411_v56 = vsel %vm11470_vm12, %v1406_v26, %v1410_v14 }
  0x8f   : > { %v3703_v30 = vrot.slane %v3702_v17, 4  ;;  %v1424_v20 = vrot.slane %v1422_v21, 5  ;;  %v2983_v35 = vld [vmem:[#allocation2 + $0x74] sm:$0x1]  ;;  %v10108_v38 = vrot.slane %v2982_v31, 9  ;;  %v1992_v46 = vrot.slane %v1840_v19, 5 }
  0x90   : > { %928 = vst [vmem:[#allocation2 + $0x78] sm:$0xf] %v927_v28  ;;  %v345_v25 = vld [vmem:[#allocation2 + $0x80] sm:$0x1]  ;;  %v3134_v43 = vrot.slane %v2983_v35, 5  ;;  %v1419_v37 = vor.u32 %v1418_v33, %v1415_v27  ;;  %v10028_v50 = vrot.slane %v1841_v29, 9 }
  0x91   : > { %v3708_v41 = vsel %vm11470_vm12, %v3703_v30, %v3707_v8  ;;  %v1842_v45 = vld [vmem:[#allocation2 + $0x6c] sm:$0x1]  ;;  %v3525_v47 = vld [vmem:[#allocation2 + $0x70] sm:$0xf]  ;;  %v443_v39 = vld [vmem:[#allocation2 + $0x84] sm:$0x1]  ;;  %2311 = vrot.lane.b32.xlu1 %v11010_v10, %s11206_s19  ;;  %v1993_v60 = vsel %vm11432_vm11, %v10027_v40, %v1992_v46 }
  0x92   : > { %v10165_v42 = vcombine.low %v3694_v24, %v3708_v41  ;;  %v1996_v52 = vrot.slane %v1842_v45, 5  ;;  %v441_v48 = vsel %vm11318_vm4, 0, %v440_v23  ;;  %v3526_v54 = vld [vmem:[#allocation2 + $0x74] sm:$0x1]  ;;  %v3135_v55 = vsel %vm11432_vm11, %v10108_v38, %v3134_v43  ;;  %v1215_v6 = vld [vmem:[#allocation2 + $0x70] sm:$0xf] }
  0x93   : > { %v1420_v57 = vrot.slane %v1419_v37, 4  ;;  %442 = vst [vmem:[#allocation2 + $0x7c] sm:$0x1] %v441_v48  ;;  %v3710_v58 = vshrl.u32 %v3525_v47, 16  ;;  %v10134_v59 = vcombine.low %v3131_v3, %v3135_v55  ;;  %v3713_v49 = vshll.u32 %v3525_v47, 16  ;;  %v11029_v8 = vld [vmem:[%s14414_s1 + $0x18] sm:$0xff]  }
  0x94   : > { %4073 = vrot.lane.b32.xlu0 %v10165_v42, %s11206_s19  ;;  %v1997_v36 = vsel %vm11432_vm11, %v10028_v50, %v1996_v52  ;;  %v635_v62 = vrot.slane %v11676_v51, 4  ;;  %v346_v1 = vsel %vm11302_vm2, 0, %v345_v25  ;;  %v513_v2 = vld [vmem:[%s11329_s17 + $0x34] sm:$0xf]  ;;  %v3719_v7 = vshll.u32 %v3526_v54, 16  ;;  %10615 = vmatpush3.bf16.msra.mxu0 %v11029_v8  ;;  %v11031_v40 = vld [vmem:[%s14414_s1 + $0x60] sm:$0xff]  }
  0x95   : > { %v1425_v61 = vsel %vm11470_vm12, %v1420_v57, %v1424_v20  ;;  %v3712_v63 = vrot.slane %v3710_v58, 4  ;;  %v3715_v32 = vrot.slane %v3713_v49, 5  ;;  %347 = vst [vmem:[#allocation2 + $0x80] sm:$0x1] %v346_v1  ;;  %v444_v9 = vsel %vm11318_vm4, 0, %v443_v39  ;;  %10616 = vmatprep.subr.bf16.mxu0 %v11031_v40 }
  0x96   : > { %v10006_v5 = vcombine.low %v1411_v56, %v1425_v61  ;;  %v10054_v4 = vcombine.low %v1993_v60, %v1997_v36  ;;  %445 = vst [vmem:[#allocation2 + $0x84] sm:$0x1] %v444_v9  ;;  %v637_v15 = vshrl.u32 %v513_v2, 16  ;;  %v1216_v17 = vld [vmem:[#allocation2 + $0x74] sm:$0x1]  ;;  %v640_v18 = vshll.u32 %v513_v2, 16 }
  0x97   : > { %v11011_v10 = vld [vmem:[#allocation2 + $0x70] ss:$8 sps:$4 sm:$0xff]   ;;  %v3716_v51 = vor.u32 %v3715_v32, %v3712_v63  ;;  %v1427_v22 = vshrl.u32 %v1215_v6, 16  ;;  %v1430_v23 = vshll.u32 %v1215_v6, 16  ;;  %v348_v24 = vld [vmem:[#allocation2 + $0x88] sm:$0x1] }
  0x98   : > { %v3527_v11 = vld [vmem:[#allocation2 + $0x78] sm:$0xf]  ;;  %3274 = vrot.lane.b32.xlu0 %v10134_v59, %s11207_s20  ;;  %1764 = vrot.lane.b32.xlu1 %v10006_v5, %s11207_s20  ;;  %v11012_v30 = vld [vmem:[#allocation2 + $0x68] ss:$8 sps:$4 sm:$0xff]   ;;  %v639_v31 = vrot.slane %v637_v15, 7  ;;  %v11730_v20 = vrot.slane %v3719_v7, 5 }
  0x99   : > { %v3724_v12 = vshrl.u32 %v3527_v11, 16  ;;  %v3727_v14 = vshll.u32 %v3527_v11, 16  ;;  %v11722_v16 = vld [vmem:[#allocation2 + $0x78] sm:$0xe]  ;;  %v1429_v28 = vrot.slane %v1427_v22, 4  ;;  %v1432_v35 = vrot.slane %v1430_v23, 5 }
  0x9a   : > { %v1217_v21 = vld [vmem:[#allocation2 + $0x78] sm:$0xf]  ;;  %v929_v27 = vld [vmem:[#allocation2 + $0x7c] sm:$0x1]  ;;  %v1843_v3 = vld [vmem:[#allocation2 + $0x70] sm:$0xe]  ;;  %v642_v41 = vor.u32 %v640_v18, %v639_v31 }
  0x9b   : > { %v514_v26 = vld [vmem:[%s11329_s17 + $0x38] sm:$0xf]  ;;  %v3726_v19 = vrot.slane %v3724_v12, 4  ;;  %v3729_v29 = vrot.slane %v3727_v14, 5  ;;  %v930_v33 = vsel %vm11302_vm2, %v635_v62, %v929_v27  ;;  %v1844_v38 = vld [vmem:[#allocation2 + $0x74] sm:$0x1]  ;;  %v1433_v54 = vor.u32 %v1432_v35, %v1429_v28 }
  0x9c   : > { %3451 = vrot.lane.b32.xlu0 %v11011_v10, %s11205_s18  ;;  %2136 = vrot.lane.b32.xlu1 %v10054_v4, %s11205_s18  ;;  %931 = vst [vmem:[#allocation2 + $0x7c] sm:$0x1] %v930_v33  ;;  %v11737_v25 = vrot.slane %v3716_v51, 4  ;;  %v643_v43 = vrot.slane %v639_v31, 4  ;;  %v10109_v37 = vrot.slane %v11722_v16, 9  ;;  %v1436_v39 = vshll.u32 %v1216_v17, 16 }
  0x9d   : > { %v446_v45 = vld [vmem:[#allocation2 + $0x8c] sm:$0x1]  ;;  %v3730_v46 = vor.u32 %v3729_v29, %v3726_v19  ;;  %v932_v47 = vld [vmem:[#allocation2 + $0x80] sm:$0xf]  ;;  %v1441_v42 = vshrl.u32 %v1217_v21, 16  ;;  %v1444_v50 = vshll.u32 %v1217_v21, 16 }
  0x9e   : > { %v933_v52 = vsel %vm11360_vm6, %v642_v41, %v932_v47  ;;  %v935_v48 = vld [vmem:[#allocation2 + $0x84] sm:$0x1]  ;;  %v349_v55 = vsel %vm11302_vm2, 0, %v348_v24  ;;  %v645_v56 = vshrl.u32 %v514_v26, 16  ;;  %v351_v57 = vld [vmem:[#allocation2 + $0x90] sm:$0x1]  ;;  %v3722_v12 = vsel %vm11470_vm12, %v11737_v25, %v11730_v20 }
  0x9f   : > { %934 = vst [vmem:[#allocation2 + $0x80] sm:$0xf] %v933_v52  ;;  %v936_v58 = vsel %vm11302_vm2, %v643_v43, %v935_v48  ;;  %v1443_v59 = vrot.slane %v1441_v42, 4  ;;  %v1446_v60 = vrot.slane %v1444_v50, 5  ;;  %350 = vst [vmem:[#allocation2 + $0x88] sm:$0x1] %v349_v55 }
  0xa0   : > { %v1845_v36 = vld [vmem:[#allocation2 + $0x78] sm:$0xe]  ;;  %2313 = vrot.lane.b32.xlu1 %v11012_v30, %s11206_s19  ;;  %937 = vst [vmem:[#allocation2 + $0x84] sm:$0x1] %v936_v58  ;;  %v647_v49 = vrot.slane %v645_v56, 7  ;;  %v648_v61 = vshll.u32 %v514_v26, 16 }
  0xa1   : > { %v10029_v62 = vrot.slane %v1843_v3, 9  ;;  %v2000_v63 = vrot.slane %v1844_v38, 5  ;;  %v3731_v1 = vrot.slane %v3730_v46, 4  ;;  %v1438_v2 = vrot.slane %v1436_v39, 5  ;;  %v449_v7 = vld [vmem:[#allocation2 + $0x94] sm:$0x1] }
  0xa2   : > { %v1447_v5 = vor.u32 %v1446_v60, %v1443_v59  ;;  %v447_v32 = vsel %vm11318_vm4, 0, %v446_v45  ;;  %v1434_v9 = vrot.slane %v1433_v54, 4  ;;  %v651_v6 = vrot.slane %v647_v49, 4  ;;  %v515_v11 = vld [vmem:[%s11329_s17 + $0x3c] sm:$0xf]  ;;  %v11032_v39 = vld [vmem:[%s14414_s1 + $0x20] sm:$0xff]  }
  0xa3   : > { %v10030_v10 = vrot.slane %v1845_v36, 9  ;;  %448 = vst [vmem:[#allocation2 + $0x8c] sm:$0x1] %v447_v32  ;;  %v352_v4 = vsel %vm11302_vm2, 0, %v351_v57  ;;  %v3528_v51 = vld [vmem:[#allocation2 + $0x7c] sm:$0x1]  ;;  %v650_v16 = vor.u32 %v648_v61, %v647_v49  ;;  %v11758_v17 = vsel %vm11432_vm11, %v10029_v62, %v2000_v63  ;;  %10617 = vmatpush3.bf16.msra.mxu0 %v11032_v39 }
  0xa4   : > { %v2985_v14 = vld [vmem:[#allocation2 + $0x7c] sm:$0x1]  ;;  %353 = vst [vmem:[#allocation2 + $0x90] sm:$0x1] %v352_v4  ;;  %v3733_v8 = vshll.u32 %v3528_v51, 16  ;;  %v1448_v21 = vrot.slane %v1447_v5, 4  ;;  %v1439_v33 = vsel %vm11470_vm12, %v1434_v9, %v1438_v2 }
  0xa5   : > { %v1218_v15 = vld [vmem:[#allocation2 + $0x7c] sm:$0x1]  ;;  %v3138_v18 = vrot.slane %v2985_v14, 5  ;;  %v450_v26 = vsel %vm11318_vm4, 0, %v449_v7  ;;  %v653_v27 = vshrl.u32 %v515_v11, 16  ;;  %v656_v19 = vshll.u32 %v515_v11, 16 }
  0xa6   : > { %v1450_v22 = vshll.u32 %v1218_v15, 16  ;;  %v1846_v23 = vld [vmem:[#allocation2 + $0x7c] sm:$0x1]  ;;  %v3735_v29 = vrot.slane %v3733_v8, 5  ;;  %v2986_v30 = vld [vmem:[#allocation2 + $0x80] sm:$0xe] }
  0xa7   : > { %v2004_v24 = vrot.slane %v1846_v23, 5  ;;  %v3139_v31 = vsel %vm11432_vm11, %v10109_v37, %v3138_v18  ;;  %v938_v28 = vld [vmem:[#allocation2 + $0x88] sm:$0xf]  ;;  %451 = vst [vmem:[#allocation2 + $0x94] sm:$0x1] %v450_v26  ;;  %v10110_v3 = vrot.slane %v2986_v30, 9 }
  0xa8   : > { %v1452_v20 = vrot.slane %v1450_v22, 5  ;;  %v2987_v35 = vld [vmem:[#allocation2 + $0x84] sm:$0x1]  ;;  %v939_v38 = vsel %vm11360_vm6, %v650_v16, %v938_v28  ;;  %v655_v25 = vrot.slane %v653_v27, 7  ;;  %v3736_v41 = vsel %vm11470_vm12, %v3731_v1, %v3735_v29  ;;  %v3529_v46 = vld [vmem:[#allocation2 + $0x80] sm:$0xf] }
  0xa9   : > { %v2005_v40 = vsel %vm11432_vm11, %v10030_v10, %v2004_v24  ;;  %v3142_v43 = vrot.slane %v2987_v35, 5  ;;  %940 = vst [vmem:[#allocation2 + $0x88] sm:$0xf] %v939_v38  ;;  %v3530_v47 = vld [vmem:[#allocation2 + $0x84] sm:$0x1]  ;;  %v10166_v42 = vcombine.low %v3722_v12, %v3736_v41  ;;  %v3738_v48 = vshrl.u32 %v3529_v46, 16 }
  0xaa   : > { %v1453_v37 = vsel %vm11470_vm12, %v1448_v21, %v1452_v20  ;;  %v10055_v45 = vcombine.low %v11758_v17, %v2005_v40  ;;  %v941_v52 = vld [vmem:[#allocation2 + $0x8c] sm:$0x1]  ;;  %v3741_v54 = vshll.u32 %v3529_v46, 16  ;;  %v3747_v57 = vshll.u32 %v3530_v47, 16  ;;  %v1219_v63 = vld [vmem:[#allocation2 + $0x80] sm:$0xf] }
  0xab   : > { %v10007_v50 = vcombine.low %v1439_v33, %v1453_v37  ;;  %v3143_v55 = vsel %vm11432_vm11, %v10110_v3, %v3142_v43  ;;  %v942_v56 = vsel %vm11302_vm2, %v651_v6, %v941_v52  ;;  %v658_v58 = vor.u32 %v656_v19, %v655_v25  ;;  %v944_v59 = vld [vmem:[#allocation2 + $0x90] sm:$0xf]  ;;  %v11034_v60 = vld [vmem:[%s14414_s1 + $0x68] sm:$0xff]   ;;  %4075 = vrot.lane.b32.xlu0 %v10166_v42, %s11206_s19  ;;  %v1220_v5 = vld [vmem:[#allocation2 + $0x84] sm:$0x1] }
  0xac   : > { %v10135_v36 = vcombine.low %v3139_v31, %v3143_v55  ;;  %943 = vst [vmem:[#allocation2 + $0x8c] sm:$0x1] %v942_v56  ;;  %v3740_v49 = vrot.slane %v3738_v48, 4  ;;  %v3743_v61 = vrot.slane %v3741_v54, 5  ;;  %v659_v62 = vrot.slane %v655_v25, 4  ;;  %v11036_v1 = vld [vmem:[%s14414_s1 + $0x28] sm:$0xff]   ;;  %10618 = vmatprep.subr.bf16.mxu0 %v11034_v60 }
  0xad   : > { %1766 = vrot.lane.b32.xlu1 %v10007_v50, %s11207_s20  ;;  %v945_v2 = vsel %vm11360_vm6, %v658_v58, %v944_v59  ;;  %v1455_v32 = vshrl.u32 %v1219_v63, 16  ;;  %v1458_v7 = vshll.u32 %v1219_v63, 16  ;;  %v11792_v9 = vld [vmem:[#allocation2 + $0x98] sm:$0xf]  ;;  %v11037_v6 = vld [vmem:[%s14414_s1 + $0x70] sm:$0xff]   ;;  %v1464_v51 = vshll.u32 %v1220_v5, 16  ;;  %10619 = vmatpush3.bf16.msra.mxu0 %v11036_v1 }
  0xae   : > { %v3744_v10 = vor.u32 %v3743_v61, %v3740_v49  ;;  %v11014_v4 = vld [vmem:[#allocation2 + $0x78] ss:$8 sps:$4 sm:$0xff]   ;;  %946 = vst [vmem:[#allocation2 + $0x90] sm:$0xf] %v945_v2  ;;  %v947_v11 = vld [vmem:[#allocation2 + $0x94] sm:$0x1]  ;;  %10620 = vmatprep.subr.bf16.mxu0 %v11037_v6 }
  0xaf   : > { %v11797_v12 = vrot.slane %v3747_v57, 5  ;;  %v948_v14 = vsel %vm11302_vm2, %v659_v62, %v947_v11  ;;  %v1457_v15 = vrot.slane %v1455_v32, 4  ;;  %v1460_v16 = vrot.slane %v1458_v7, 5  ;;  %v11801_v17 = vld [vmem:[#allocation2 + $0x80] sm:$0xe]  ;;  %v11038_v8 = vld [vmem:[%s14414_s1 + $0x30] sm:$0xff]   ;;  %3276 = vrot.lane.b32.xlu0 %v10135_v36, %s11207_s20 }
  0xb0   : > { %v11013_v18 = vld [vmem:[#allocation2 + $0x80] ss:$8 sps:$4 sm:$0xff]   ;;  %949 = vst [vmem:[#allocation2 + $0x94] sm:$0x1] %v948_v14  ;;  %v3745_v22 = vrot.slane %v3744_v10, 4  ;;  %v11811_v31 = vrot.slane %v1464_v51, 5 }
  0xb1   : > { %2138 = vrot.lane.b32.xlu1 %v10055_v45, %s11205_s18  ;;  %v3531_v21 = vld [vmem:[#allocation2 + $0x88] sm:$0xf]  ;;  %v1461_v27 = vor.u32 %v1460_v16, %v1457_v15  ;;  %v11039_v19 = vld [vmem:[%s14414_s1 + $0x80] sm:$0xff]   ;;  %v10031_v33 = vrot.slane %v11801_v17, 9  ;;  %v3780_v20 = vshrl.u32 %v11792_v9, 16  ;;  %10621 = vmatpush3.bf16.msra.mxu0 %v11038_v8  ;;  %vm1174_vm13 = vcmask 261120  }
  0xb2   : > { %v3752_v23 = vshrl.u32 %v3531_v21, 16  ;;  %v3755_v24 = vshll.u32 %v3531_v21, 16  ;;  %v2988_v26 = vld [vmem:[#allocation2 + $0x88] sm:$0xe]  ;;  %v1848_v40 = vld [vmem:[#allocation2 + $0x84] sm:$0x1]  ;;  %10871 = vmatprep.subr.bf16.mxu1 %v11039_v19  ;;  %v3750_v47 = vsel %vm11470_vm12, %v3745_v22, %v11797_v12 }
  0xb3   : > { %v10111_v29 = vrot.slane %v2988_v26, 9  ;;  %v1221_v30 = vld [vmem:[#allocation2 + $0x88] sm:$0xf]  ;;  %v3532_v28 = vld [vmem:[#allocation2 + $0x8c] sm:$0x1]  ;;  %3453 = vrot.lane.b32.xlu0 %v11013_v18, %s11205_s18  ;;  %v1462_v45 = vrot.slane %v1461_v27, 4  ;;  %10872 = vmatpush3.bf16.msra.mxu1 %v11039_v19 }
  0xb4   : > { %v3754_v35 = vrot.slane %v3752_v23, 4  ;;  %v3757_v3 = vrot.slane %v3755_v24, 5  ;;  %v2989_v38 = vld [vmem:[#allocation2 + $0x8c] sm:$0x1]  ;;  %v1849_v25 = vld [vmem:[#allocation2 + $0x88] sm:$0xe] }
  0xb5   : > { %v3761_v41 = vshll.u32 %v3532_v28, 16  ;;  %2315 = vrot.lane.b32.xlu1 %v11014_v4, %s11206_s19  ;;  %v3146_v43 = vrot.slane %v2989_v38, 5  ;;  %v1222_v37 = vld [vmem:[#allocation2 + $0x8c] sm:$0x1]  ;;  %v1469_v46 = vshrl.u32 %v1221_v30, 16  ;;  %v1472_v50 = vshll.u32 %v1221_v30, 16 }
  0xb6   : > { %v3758_v39 = vor.u32 %v3757_v3, %v3754_v35  ;;  %v2990_v42 = vld [vmem:[#allocation2 + $0x90] sm:$0xe]  ;;  %v1478_v52 = vshll.u32 %v1222_v37, 16  ;;  %v1467_v56 = vsel %vm11470_vm12, %v1462_v45, %v11811_v31  ;;  %v1850_v57 = vld [vmem:[#allocation2 + $0x8c] sm:$0x1]  ;;  %v2008_v62 = vrot.slane %v1848_v40, 5 }
  0xb7   : > { %v3763_v48 = vrot.slane %v3761_v41, 5  ;;  %v3147_v54 = vsel %vm11432_vm11, %v10111_v29, %v3146_v43  ;;  %v10112_v55 = vrot.slane %v2990_v42, 9  ;;  %v2991_v59 = vld [vmem:[#allocation2 + $0x94] sm:$0x1]  ;;  %v1471_v60 = vrot.slane %v1469_v46, 4  ;;  %v11042_v3 = vld [vmem:[%s14414_s1 + $0x78] sm:$0xff]  }
  0xb8   : > { %v3759_v58 = vrot.slane %v3758_v39, 4  ;;  %v1474_v36 = vrot.slane %v1472_v50, 5  ;;  %v1480_v49 = vrot.slane %v1478_v52, 5  ;;  %v3150_v61 = vrot.slane %v2991_v59, 5  ;;  %v3533_v2 = vld [vmem:[#allocation2 + $0x90] sm:$0xf]  ;;  %10622 = vmatprep.subr.bf16.mxu0 %v11042_v3 }
  0xb9   : > { %v10032_v63 = vrot.slane %v1849_v25, 9  ;;  %v2012_v1 = vrot.slane %v1850_v57, 5  ;;  %v3536_v5 = vld [vmem:[#allocation2 + $0x9c] sm:$0x1]  ;;  %v3534_v6 = vld [vmem:[#allocation2 + $0x94] sm:$0x1]  ;;  %v2009_v12 = vsel %vm11432_vm11, %v10031_v33, %v2008_v62 }
  0xba   : > { %v3764_v32 = vsel %vm11470_vm12, %v3759_v58, %v3763_v48  ;;  %v1475_v7 = vor.u32 %v1474_v36, %v1471_v60  ;;  %v3766_v10 = vshrl.u32 %v3533_v2, 16  ;;  %v3769_v4 = vshll.u32 %v3533_v2, 16  ;;  %v354_v15 = vld [vmem:[#allocation2 + $0xa8] sm:$0x1]  ;;  %v357_v16 = vld [vmem:[#allocation2 + $0xb0] sm:$0x1] }
  0xbb   : > { %v10167_v11 = vcombine.low %v3750_v47, %v3764_v32  ;;  %v3151_v51 = vsel %vm11432_vm11, %v10112_v55, %v3150_v61  ;;  %v2013_v14 = vsel %vm11432_vm11, %v10032_v63, %v2012_v1  ;;  %v452_v22 = vld [vmem:[#allocation2 + $0xac] sm:$0x1]  ;;  %v455_v23 = vld [vmem:[#allocation2 + $0xb4] sm:$0x1]  ;;  %v3775_v26 = vshll.u32 %v3534_v6, 16  ;;  %v11043_v48 = vld [vmem:[%s14414_s1 + $0x38] sm:$0xff]  }
  0xbc   : > { %v10136_v17 = vcombine.low %v3147_v54, %v3151_v51  ;;  %v1476_v8 = vrot.slane %v1475_v7, 4  ;;  %v10056_v18 = vcombine.low %v2009_v12, %v2013_v14  ;;  %v3768_v21 = vrot.slane %v3766_v10, 4  ;;  %v516_v29 = vld [vmem:[%s11329_s17 + $0x40] sm:$0xf]  ;;  %v517_v35 = vld [vmem:[%s11329_s17 + $0x44] sm:$0xf]  ;;  %10623 = vmatpush3.bf16.msra.mxu0 %v11043_v48 }
  0xbd   : > { %4077 = vrot.lane.b32.xlu0 %v10167_v11, %s11206_s19  ;;  %v3771_v24 = vrot.slane %v3769_v4, 5  ;;  %v3782_v27 = vrot.slane %v3780_v20, 4  ;;  %v3783_v19 = vshll.u32 %v11792_v9, 16  ;;  %v3789_v31 = vshll.u32 %v3536_v5, 16  ;;  %v1223_v25 = vld [vmem:[#allocation2 + $0xa0] sm:$0xf] }
  0xbe   : > { %v1481_v30 = vsel %vm11470_vm12, %v1476_v8, %v1480_v49  ;;  %v355_v33 = vsel %vm11302_vm2, 0, %v354_v15  ;;  %v358_v28 = vsel %vm11302_vm2, 0, %v357_v16  ;;  %v3777_v40 = vrot.slane %v3775_v26, 5  ;;  %v11015_v41 = vld [vmem:[#allocation2 + $0x90] ss:$8 sps:$4 sm:$0xff]   ;;  %v11044_v61 = vld [vmem:[%s14414_s1 + $0x88] sm:$0xff]  }
  0xbf   : > { %v10008_v38 = vcombine.low %v1467_v56, %v1481_v30  ;;  %v3772_v20 = vor.u32 %v3771_v24, %v3768_v21  ;;  %v3785_v9 = vrot.slane %v3783_v19, 5  ;;  %356 = vst [vmem:[#allocation2 + $0xa8] sm:$0x1] %v355_v33  ;;  %359 = vst [vmem:[#allocation2 + $0xb0] sm:$0x1] %v358_v28  ;;  %v3791_v43 = vrot.slane %v3789_v31, 5  ;;  %10873 = vmatprep.subr.bf16.mxu1 %v11044_v61 }
  0xc0   : > { %v453_v37 = vsel %vm11318_vm4, 0, %v452_v22  ;;  %v456_v45 = vsel %vm11318_vm4, 0, %v455_v23  ;;  %v661_v46 = vshrl.u32 %v516_v29, 16  ;;  %v664_v42 = vshll.u32 %v516_v29, 16  ;;  %v1224_v52 = vld [vmem:[#allocation2 + $0xa4] sm:$0x1]  ;;  %10874 = vmatpush3.bf16.msra.mxu1 %v11044_v61 }
  0xc1   : > { %3278 = vrot.lane.b32.xlu0 %v10136_v17, %s11207_s20  ;;  %1768 = vrot.lane.b32.xlu1 %v10008_v38, %s11207_s20  ;;  %v3773_v47 = vrot.slane %v3772_v20, 4  ;;  %v3786_v39 = vor.u32 %v3785_v9, %v3782_v27  ;;  %454 = vst [vmem:[#allocation2 + $0xac] sm:$0x1] %v453_v37  ;;  %457 = vst [vmem:[#allocation2 + $0xb4] sm:$0x1] %v456_v45  ;;  %v669_v50 = vshrl.u32 %v517_v35, 16 }
  0xc2   : > { %v663_v54 = vrot.slane %v661_v46, 7  ;;  %v672_v55 = vshll.u32 %v517_v35, 16  ;;  %v1483_v56 = vshrl.u32 %v1223_v25, 16  ;;  %v1486_v57 = vshll.u32 %v1223_v25, 16  ;;  %v360_v58 = vld [vmem:[#allocation2 + $0xb8] sm:$0x1] }
  0xc3   : > { %v3778_v59 = vsel %vm11470_vm12, %v3773_v47, %v3777_v40  ;;  %v3787_v60 = vrot.slane %v3786_v39, 4  ;;  %v671_v36 = vrot.slane %v669_v50, 7  ;;  %v518_v49 = vld [vmem:[%s11329_s17 + $0x48] sm:$0xf]  ;;  %v1492_v5 = vshll.u32 %v1224_v52, 16 }
  0xc4   : > { %v11016_v62 = vld [vmem:[#allocation2 + $0x88] ss:$8 sps:$4 sm:$0xff]   ;;  %v666_v63 = vor.u32 %v664_v42, %v663_v54  ;;  %v1485_v1 = vrot.slane %v1483_v56, 4  ;;  %v1488_v2 = vrot.slane %v1486_v57, 5  ;;  %v667_v7 = vrot.slane %v663_v54, 4 }
  0xc5   : > { %3455 = vrot.lane.b32.xlu0 %v11015_v41, %s11205_s18  ;;  %2140 = vrot.lane.b32.xlu1 %v10056_v18, %s11205_s18  ;;  %v3792_v32 = vsel %vm11470_vm12, %v3787_v60, %v3791_v43  ;;  %v674_v6 = vor.u32 %v672_v55, %v671_v36  ;;  %v675_v10 = vrot.slane %v671_v36, 4  ;;  %v458_v4 = vld [vmem:[#allocation2 + $0xbc] sm:$0x1]  ;;  %v363_v11 = vld [vmem:[#allocation2 + $0xc0] sm:$0x1]  ;;  %v361_v15 = vsel %vm11302_vm2, 0, %v360_v58 }
  0xc6   : > { %v10168_v51 = vcombine.low %v3778_v59, %v3792_v32  ;;  %v950_v12 = vld [vmem:[#allocation2 + $0xa8] sm:$0xf]  ;;  %v956_v14 = vld [vmem:[#allocation2 + $0xb0] sm:$0xf]  ;;  %v677_v16 = vshrl.u32 %v518_v49, 16  ;;  %v680_v23 = vshll.u32 %v518_v49, 16  ;;  %v1489_v29 = vor.u32 %v1488_v2, %v1485_v1 }
  0xc7   : > { %v11867_v17 = vld [vmem:[#allocation2 + $0xa0] sm:$0xe]  ;;  %v461_v8 = vld [vmem:[#allocation2 + $0xc4] sm:$0x1]  ;;  %v11870_v18 = vld [vmem:[%s11329_s17 + $0x4c] sm:$0xf]  ;;  %v951_v21 = vsel %vm11360_vm6, %v666_v63, %v950_v12  ;;  %v957_v22 = vsel %vm11360_vm6, %v674_v6, %v956_v14 }
  0xc8   : > { %362 = vst [vmem:[#allocation2 + $0xb8] sm:$0x1] %v361_v15  ;;  %v366_v24 = vld [vmem:[#allocation2 + $0xc8] sm:$0x1]  ;;  %v11877_v26 = vld [vmem:[%s11329_s17 + $0x50] sm:$0xf] }
  0xc9   : > { %952 = vst [vmem:[#allocation2 + $0xa8] sm:$0xf] %v951_v21  ;;  %v953_v27 = vld [vmem:[#allocation2 + $0xac] sm:$0x1]  ;;  %958 = vst [vmem:[#allocation2 + $0xb0] sm:$0xf] %v957_v22  ;;  %4079 = vrot.lane.b32.xlu0 %v10168_v51, %s11206_s19  ;;  %2317 = vrot.lane.b32.xlu1 %v11016_v62, %s11206_s19 }
  0xca   : > { %v959_v19 = vld [vmem:[#allocation2 + $0xb4] sm:$0x1]  ;;  %v11879_v30 = vrot.slane %v677_v16, 7  ;;  %v11881_v31 = vld [vmem:[#allocation2 + $0xa4] sm:$0x1]  ;;  %v954_v33 = vsel %vm11302_vm2, %v667_v7, %v953_v27  ;;  %v459_v35 = vsel %vm11318_vm4, 0, %v458_v4 }
  0xcb   : > { %v960_v28 = vsel %vm11302_vm2, %v675_v10, %v959_v19  ;;  %v464_v3 = vld [vmem:[#allocation2 + $0xcc] sm:$0x1]  ;;  %955 = vst [vmem:[#allocation2 + $0xac] sm:$0x1] %v954_v33  ;;  %v11891_v38 = vrot.slane %v1492_v5, 5  ;;  %v364_v20 = vsel %vm11302_vm2, 0, %v363_v11 }
  0xcc   : > { %961 = vst [vmem:[#allocation2 + $0xb4] sm:$0x1] %v960_v28  ;;  %460 = vst [vmem:[#allocation2 + $0xbc] sm:$0x1] %v459_v35  ;;  %v682_v40 = vor.u32 %v680_v23, %v11879_v30  ;;  %v10033_v9 = vrot.slane %v11867_v17, 9  ;;  %v462_v25 = vsel %vm11318_vm4, 0, %v461_v8 }
  0xcd   : > { %365 = vst [vmem:[#allocation2 + $0xc0] sm:$0x1] %v364_v20  ;;  %v685_v41 = vshrl.u32 %v11870_v18, 16  ;;  %v11900_v43 = vrot.slane %v1489_v29, 4  ;;  %463 = vst [vmem:[#allocation2 + $0xc4] sm:$0x1] %v462_v25 }
  0xce   : > { %v367_v37 = vsel %vm11302_vm2, 0, %v366_v24  ;;  %v693_v45 = vshrl.u32 %v11877_v26, 16  ;;  %v465_v46 = vsel %vm11318_vm4, 0, %v464_v3  ;;  %v369_v47 = vld [vmem:[#allocation2 + $0xd0] sm:$0x1]  ;;  %v683_v39 = vrot.slane %v11879_v30, 4 }
  0xcf   : > { %v2016_v42 = vrot.slane %v11881_v31, 5  ;;  %v688_v50 = vshll.u32 %v11870_v18, 16  ;;  %368 = vst [vmem:[#allocation2 + $0xc8] sm:$0x1] %v367_v37  ;;  %466 = vst [vmem:[#allocation2 + $0xcc] sm:$0x1] %v465_v46  ;;  %v1495_v51 = vsel %vm11470_vm12, %v11900_v43, %v11891_v38 }
  0xd0   : > { %v370_v52 = vsel %vm11302_vm2, 0, %v369_v47  ;;  %v467_v48 = vld [vmem:[#allocation2 + $0xd4] sm:$0x1]  ;;  %v962_v54 = vld [vmem:[#allocation2 + $0xb8] sm:$0xf]  ;;  %v11912_v55 = vrot.slane %v685_v41, 7 }
  0xd1   : > { %v11914_v56 = vrot.slane %v693_v45, 7  ;;  %v696_v57 = vshll.u32 %v11877_v26, 16  ;;  %371 = vst [vmem:[#allocation2 + $0xd0] sm:$0x1] %v370_v52  ;;  %v468_v58 = vsel %vm11318_vm4, 0, %v467_v48  ;;  %v963_v49 = vsel %vm11360_vm6, %v682_v40, %v962_v54 }
  0xd2   : > { %v2992_v59 = vld [vmem:[#allocation2 + $0xa8] sm:$0xe]  ;;  %v2994_v60 = vld [vmem:[#allocation2 + $0xb0] sm:$0xe]  ;;  %469 = vst [vmem:[#allocation2 + $0xd4] sm:$0x1] %v468_v58  ;;  %v690_v28 = vor.u32 %v688_v50, %v11912_v55  ;;  %v2017_v3 = vsel %vm11432_vm11, %v10033_v9, %v2016_v42 }
  0xd3   : > { %v1225_v36 = vld [vmem:[#allocation2 + $0xa8] sm:$0xf]  ;;  %v10113_v61 = vrot.slane %v2992_v59, 9  ;;  %v10114_v62 = vrot.slane %v2994_v60, 9  ;;  %964 = vst [vmem:[#allocation2 + $0xb8] sm:$0xf] %v963_v49  ;;  %v698_v20 = vor.u32 %v696_v57, %v11914_v56 }
  0xd4   : > { %v1497_v63 = vshrl.u32 %v1225_v36, 16  ;;  %v1500_v1 = vshll.u32 %v1225_v36, 16  ;;  %v2993_v2 = vld [vmem:[#allocation2 + $0xac] sm:$0x1]  ;;  %v2995_v5 = vld [vmem:[#allocation2 + $0xb4] sm:$0x1] }
  0xd5   : > { %v1226_v32 = vld [vmem:[#allocation2 + $0xac] sm:$0x1]  ;;  %v3154_v7 = vrot.slane %v2993_v2, 5  ;;  %v3158_v6 = vrot.slane %v2995_v5, 5  ;;  %v1853_v11 = vld [vmem:[#allocation2 + $0xa8] sm:$0xe] }
  0xd6   : > { %v1499_v10 = vrot.slane %v1497_v63, 4  ;;  %v1502_v4 = vrot.slane %v1500_v1, 5  ;;  %v1506_v12 = vshll.u32 %v1226_v32, 16  ;;  %v1854_v14 = vld [vmem:[#allocation2 + $0xac] sm:$0x1]  ;;  %v10034_v15 = vrot.slane %v1853_v11, 9 }
  0xd7   : > { %v965_v16 = vld [vmem:[#allocation2 + $0xbc] sm:$0x1]  ;;  %v3155_v8 = vsel %vm11432_vm11, %v10113_v61, %v3154_v7  ;;  %v3159_v18 = vsel %vm11432_vm11, %v10114_v62, %v3158_v6  ;;  %v2020_v22 = vrot.slane %v1854_v14, 5  ;;  %v3537_v23 = vld [vmem:[#allocation2 + $0xb0] sm:$0xf]  ;;  %v691_v17 = vrot.slane %v11912_v55, 4 }
  0xd8   : > { %v1503_v21 = vor.u32 %v1502_v4, %v1499_v10  ;;  %v3538_v24 = vld [vmem:[#allocation2 + $0xb4] sm:$0x1]  ;;  %v10137_v26 = vcombine.low %v3155_v8, %v3159_v18  ;;  %v1508_v27 = vrot.slane %v1506_v12, 5  ;;  %v966_v19 = vsel %vm11302_vm2, %v683_v39, %v965_v16  ;;  %v968_v37 = vld [vmem:[#allocation2 + $0xc0] sm:$0xf] }
  0xd9   : > { %v3794_v29 = vshrl.u32 %v3537_v23, 16  ;;  %967 = vst [vmem:[#allocation2 + $0xbc] sm:$0x1] %v966_v19  ;;  %v3797_v31 = vshll.u32 %v3537_v23, 16  ;;  %v3803_v33 = vshll.u32 %v3538_v24, 16  ;;  %v2021_v25 = vsel %vm11432_vm11, %v10034_v15, %v2020_v22 }
  0xda   : > { %v1504_v30 = vrot.slane %v1503_v21, 4  ;;  %3280 = vrot.lane.b32.xlu0 %v10137_v26, %s11207_s20  ;;  %v11017_v35 = vld [vmem:[#allocation2 + $0xb0] ss:$8 sps:$4 sm:$0xff]   ;;  %v971_v39 = vld [vmem:[#allocation2 + $0xc4] sm:$0x1]  ;;  %v969_v42 = vsel %vm11360_vm6, %v690_v28, %v968_v37  ;;  %v10057_v54 = vcombine.low %v2017_v3, %v2021_v25  ;;  %vm1802_vm14 = vcmask 523520  }
  0xdb   : > { %v3539_v38 = vld [vmem:[#allocation2 + $0xb8] sm:$0xf]  ;;  %v3796_v41 = vrot.slane %v3794_v29, 4  ;;  %v3799_v43 = vrot.slane %v3797_v31, 5  ;;  %v3805_v9 = vrot.slane %v3803_v33, 5  ;;  %v972_v59 = vsel %vm11302_vm2, %v691_v17, %v971_v39  ;;  %v11961_v17 = vpop.permute.xlu1 %3441 }
  0xdc   : > { %v1509_v40 = vsel %vm11470_vm12, %v1504_v30, %v1508_v27  ;;  %v3808_v46 = vshrl.u32 %v3539_v38, 16  ;;  %v3811_v47 = vshll.u32 %v3539_v38, 16  ;;  %v1227_v52 = vld [vmem:[#allocation2 + $0xb0] sm:$0xf]  ;;  %v1228_v48 = vld [vmem:[#allocation2 + $0xb4] sm:$0x1] }
  0xdd   : > { %v10009_v45 = vcombine.low %v1495_v51, %v1509_v40  ;;  %v3800_v50 = vor.u32 %v3799_v43, %v3796_v41  ;;  %970 = vst [vmem:[#allocation2 + $0xc0] sm:$0xf] %v969_v42  ;;  %v2996_v55 = vld [vmem:[#allocation2 + $0xb8] sm:$0xe]  ;;  %973 = vst [vmem:[#allocation2 + $0xc4] sm:$0x1] %v972_v59 }
  0xde   : > { %3457 = vrot.lane.b32.xlu0 %v11017_v35, %s11205_s18  ;;  %v3810_v57 = vrot.slane %v3808_v46, 4  ;;  %v3813_v58 = vrot.slane %v3811_v47, 5  ;;  %v1229_v60 = vld [vmem:[#allocation2 + $0xb8] sm:$0xf]  ;;  %v1511_v49 = vshrl.u32 %v1227_v52, 16  ;;  %v1514_v61 = vshll.u32 %v1227_v52, 16 }
  0xdf   : > { %1770 = vrot.lane.b32.xlu1 %v10009_v45, %s11207_s20  ;;  %v3801_v36 = vrot.slane %v3800_v50, 4  ;;  %v1520_v62 = vshll.u32 %v1228_v48, 16  ;;  %v974_v63 = vld [vmem:[#allocation2 + $0xc8] sm:$0xf]  ;;  %v10115_v4 = vrot.slane %v2996_v55, 9  ;;  %v1525_v8 = vshrl.u32 %v1229_v60, 16 }
  0xe0   : > { %v3540_v1 = vld [vmem:[#allocation2 + $0xbc] sm:$0x1]  ;;  %v3814_v2 = vor.u32 %v3813_v58, %v3810_v57  ;;  %v11018_v5 = vld [vmem:[#allocation2 + $0xa8] ss:$8 sps:$4 sm:$0xff]   ;;  %v975_v6 = vsel %vm11360_vm6, %v698_v20, %v974_v63  ;;  %v1513_v51 = vrot.slane %v1511_v49, 4  ;;  %v1516_v16 = vrot.slane %v1514_v61, 5 }
  0xe1   : > { %v2997_v32 = vld [vmem:[#allocation2 + $0xbc] sm:$0x1]  ;;  %v3817_v10 = vshll.u32 %v3540_v1, 16  ;;  %976 = vst [vmem:[#allocation2 + $0xc8] sm:$0xf] %v975_v6  ;;  %v3806_v14 = vsel %vm11470_vm12, %v3801_v36, %v3805_v9  ;;  %v1522_v22 = vrot.slane %v1520_v62, 5  ;;  %v11966_v9 = vpop.permute.xlu0 %3443 }
  0xe2   : > { %v1230_v7 = vld [vmem:[#allocation2 + $0xbc] sm:$0x1]  ;;  %v3162_v11 = vrot.slane %v2997_v32, 5  ;;  %v1855_v12 = vld [vmem:[#allocation2 + $0xb0] sm:$0xe]  ;;  %v3815_v15 = vrot.slane %v3814_v2, 4  ;;  %v1517_v19 = vor.u32 %v1516_v16, %v1513_v51 }
  0xe3   : > { %2142 = vrot.lane.b32.xlu1 %v10057_v54, %s11205_s18  ;;  %v1856_v18 = vld [vmem:[#allocation2 + $0xb4] sm:$0x1]  ;;  %v3819_v21 = vrot.slane %v3817_v10, 5  ;;  %v1528_v23 = vshll.u32 %v1229_v60, 16  ;;  %v1534_v24 = vshll.u32 %v1230_v7, 16  ;;  %v1527_v29 = vrot.slane %v1525_v8, 4 }
  0xe4   : > { %v1857_v26 = vld [vmem:[#allocation2 + $0xb8] sm:$0xe]  ;;  %v521_v27 = vld [vmem:[%s11329_s17 + $0x54] sm:$0xf]  ;;  %v699_v30 = vrot.slane %v11914_v56, 4  ;;  %v10035_v33 = vrot.slane %v1855_v12, 9  ;;  %v3163_v3 = vsel %vm11432_vm11, %v10115_v4, %v3162_v11 }
  0xe5   : > { %v1858_v31 = vld [vmem:[#allocation2 + $0xbc] sm:$0x1]  ;;  %v3820_v28 = vsel %vm11470_vm12, %v3815_v15, %v3819_v21  ;;  %v2998_v35 = vld [vmem:[#allocation2 + $0xc0] sm:$0xe]  ;;  %v1530_v38 = vrot.slane %v1528_v23, 5  ;;  %v1536_v20 = vrot.slane %v1534_v24, 5  ;;  %v11982_v21 = vpop.permute.xlu0 %3445 }
  0xe6   : > { %v10169_v40 = vcombine.low %v3806_v14, %v3820_v28  ;;  %v2999_v25 = vld [vmem:[#allocation2 + $0xc4] sm:$0x1]  ;;  %v10116_v41 = vrot.slane %v2998_v35, 9  ;;  %v1518_v43 = vrot.slane %v1517_v19, 4  ;;  %v2024_v37 = vrot.slane %v1856_v18, 5  ;;  %v11979_v14 = vpop.permute.xlu1 %2303 }
  0xe7   : > { %2319 = vrot.lane.b32.xlu1 %v11018_v5, %s11206_s19  ;;  %v3166_v45 = vrot.slane %v2999_v25, 5  ;;  %v1531_v56 = vor.u32 %v1530_v38, %v1527_v29  ;;  %v10036_v46 = vrot.slane %v1857_v26, 9  ;;  %v2028_v47 = vrot.slane %v1858_v31, 5  ;;  %v977_v39 = vld [vmem:[#allocation2 + $0xcc] sm:$0x1] }
  0xe8   : > { %4081 = vrot.lane.b32.xlu0 %v10169_v40, %s11206_s19  ;;  %v1523_v50 = vsel %vm11470_vm12, %v1518_v43, %v1522_v22  ;;  %v978_v42 = vsel %vm11302_vm2, %v699_v30, %v977_v39  ;;  %v3541_v52 = vld [vmem:[#allocation2 + $0xc0] sm:$0xf]  ;;  %v701_v48 = vshrl.u32 %v521_v27, 16  ;;  %v704_v54 = vshll.u32 %v521_v27, 16  ;;  %v3542_v55 = vld [vmem:[#allocation2 + $0xc4] sm:$0x1] }
  0xe9   : > { %v3167_v57 = vsel %vm11432_vm11, %v10116_v41, %v3166_v45  ;;  %v1532_v58 = vrot.slane %v1531_v56, 4  ;;  %v2025_v59 = vsel %vm11432_vm11, %v10035_v33, %v2024_v37  ;;  %979 = vst [vmem:[#allocation2 + $0xcc] sm:$0x1] %v978_v42  ;;  %v3543_v60 = vld [vmem:[#allocation2 + $0xc8] sm:$0xf]  ;;  %v3822_v36 = vshrl.u32 %v3541_v52, 16 }
  0xea   : > { %v10138_v49 = vcombine.low %v3163_v3, %v3167_v57  ;;  %v2029_v61 = vsel %vm11432_vm11, %v10036_v46, %v2028_v47  ;;  %v3825_v62 = vshll.u32 %v3541_v52, 16  ;;  %v3831_v63 = vshll.u32 %v3542_v55, 16  ;;  %v11019_v6 = vld [vmem:[#allocation2 + $0xc0] ss:$8 sps:$4 sm:$0xff]   ;;  %v980_v15 = vld [vmem:[#allocation2 + $0xd0] sm:$0xf]  ;;  %v11992_v42 = vpop.permute.xlu1 %2305 }
  0xeb   : > { %v1537_v1 = vsel %vm11470_vm12, %v1532_v58, %v1536_v20  ;;  %v3824_v2 = vrot.slane %v3822_v36, 4  ;;  %v3836_v5 = vshrl.u32 %v3543_v60, 16  ;;  %v3839_v32 = vshll.u32 %v3543_v60, 16  ;;  %v983_v16 = vld [vmem:[#allocation2 + $0xd4] sm:$0x1] }
  0xec   : > { %3282 = vrot.lane.b32.xlu0 %v10138_v49, %s11207_s20  ;;  %v10010_v7 = vcombine.low %v1523_v50, %v1537_v1  ;;  %v3827_v10 = vrot.slane %v3825_v62, 5  ;;  %v703_v4 = vrot.slane %v701_v48, 7  ;;  %v10058_v11 = vcombine.low %v2025_v59, %v2029_v61  ;;  %v3000_v26 = vld [vmem:[#allocation2 + $0xc8] sm:$0xe]  ;;  %v1231_v27 = vld [vmem:[#allocation2 + $0xc0] sm:$0xf]  ;;  %v11994_v59 = vpop.permute.xlu0 %3264 }
  0xed   : > { %v3838_v51 = vrot.slane %v3836_v5, 4  ;;  %v3841_v12 = vrot.slane %v3839_v32, 5  ;;  %v3833_v18 = vrot.slane %v3831_v63, 5  ;;  %v1232_v19 = vld [vmem:[#allocation2 + $0xc4] sm:$0x1]  ;;  %v1539_v3 = vshrl.u32 %v1231_v27, 16 }
  0xee   : > { %1772 = vrot.lane.b32.xlu1 %v10010_v7, %s11207_s20  ;;  %v3828_v8 = vor.u32 %v3827_v10, %v3824_v2  ;;  %v706_v22 = vor.u32 %v704_v54, %v703_v4  ;;  %v707_v23 = vrot.slane %v703_v4, 4  ;;  %v1233_v29 = vld [vmem:[#allocation2 + $0xc8] sm:$0xf]  ;;  %v1542_v25 = vshll.u32 %v1231_v27, 16  ;;  %v11022_v41 = vld [vmem:[#allocation2 + $0xb8] ss:$8 sps:$4 sm:$0xff]  }
  0xef   : > { %v3842_v24 = vor.u32 %v3841_v12, %v3838_v51  ;;  %v1541_v43 = vrot.slane %v1539_v3, 4  ;;  %v1548_v37 = vshll.u32 %v1232_v19, 16  ;;  %v1553_v45 = vshrl.u32 %v1233_v29, 16  ;;  %v2370_v50 = vld [vmem:[#allocation2 + $0x10] sm:$0xf] }
  0xf0   : > { %3459 = vrot.lane.b32.xlu0 %v11019_v6, %s11205_s18  ;;  %v3544_v30 = vld [vmem:[#allocation2 + $0xcc] sm:$0x1]  ;;  %v3829_v31 = vrot.slane %v3828_v8, 4  ;;  %v981_v33 = vsel %vm11360_vm6, %v706_v22, %v980_v15  ;;  %v984_v28 = vsel %vm11302_vm2, %v707_v23, %v983_v16  ;;  %v1544_v47 = vrot.slane %v1542_v25, 5  ;;  %v2371_v58 = vld [vmem:[#allocation2 + $0x14] sm:$0x1] }
  0xf1   : > { %v3001_v35 = vld [vmem:[#allocation2 + $0xcc] sm:$0x1]  ;;  %v3843_v38 = vrot.slane %v3842_v24, 4  ;;  %v3845_v20 = vshll.u32 %v3544_v30, 16  ;;  %982 = vst [vmem:[#allocation2 + $0xd0] sm:$0xf] %v981_v33  ;;  %v12005_v24 = vpop.permute.xlu1 %2307  ;;  %v12007_v30 = vpop.permute.xlu0 %3266 }
  0xf2   : > { %985 = vst [vmem:[#allocation2 + $0xd4] sm:$0x1] %v984_v28  ;;  %v1234_v40 = vld [vmem:[#allocation2 + $0xcc] sm:$0x1]  ;;  %2144 = vrot.lane.b32.xlu1 %v10058_v11, %s11205_s18  ;;  %v3834_v56 = vsel %vm11470_vm12, %v3829_v31, %v3833_v18  ;;  %v1556_v39 = vshll.u32 %v1233_v29, 16  ;;  %v10117_v52 = vrot.slane %v3000_v26, 9  ;;  %v1545_v60 = vor.u32 %v1544_v47, %v1541_v43 }
  0xf3   : > { %v3847_v46 = vrot.slane %v3845_v20, 5  ;;  %v3170_v48 = vrot.slane %v3001_v35, 5  ;;  %v1555_v54 = vrot.slane %v1553_v45, 4  ;;  %v1562_v57 = vshll.u32 %v1234_v40, 16  ;;  %v2369_v61 = vld [vmem:[#allocation2 + $0xc] sm:$0x1] }
  0xf4   : > { %v1550_v36 = vrot.slane %v1548_v37, 5  ;;  %v1558_v49 = vrot.slane %v1556_v39, 5  ;;  %v2447_v1 = vshrl.u32 %v2370_v50, 16  ;;  %v2368_v2 = vld [vmem:[#allocation2 + $0x8] sm:$0xf]  ;;  %v1546_v5 = vrot.slane %v1545_v60, 4 }
  0xf5   : > { %v3848_v55 = vsel %vm11470_vm12, %v3843_v38, %v3847_v46  ;;  %v1564_v63 = vrot.slane %v1562_v57, 5  ;;  %v2450_v7 = vshll.u32 %v2370_v50, 16  ;;  %v2456_v6 = vshll.u32 %v2371_v58, 16  ;;  %v372_v10 = vld [vmem:[#allocation2 + $0xd8] sm:$0x1] }
  0xf6   : > { %v10170_v62 = vcombine.low %v3834_v56, %v3848_v55  ;;  %2321 = vrot.lane.b32.xlu1 %v11022_v41, %s11206_s19  ;;  %v1559_v32 = vor.u32 %v1558_v49, %v1555_v54  ;;  %v3171_v51 = vsel %vm11432_vm11, %v10117_v52, %v3170_v48  ;;  %v2442_v12 = vshll.u32 %v2369_v61, 16  ;;  %v522_v23 = vld [vmem:[%s11329_s17 + $0x58] sm:$0xf]  ;;  %v1859_v25 = vld [vmem:[#allocation2 + $0xc0] sm:$0xe] }
  0xf7   : > { %v2449_v15 = vrot.slane %v2447_v1, 4  ;;  %v1551_v18 = vsel %vm11470_vm12, %v1546_v5, %v1550_v36  ;;  %v2452_v26 = vrot.slane %v2450_v7, 5  ;;  %v2458_v27 = vrot.slane %v2456_v6, 5  ;;  %v1860_v41 = vld [vmem:[#allocation2 + $0xc4] sm:$0x1]  ;;  %v12020_v36 = vpop.permute.xlu1 %2126  ;;  %v12026_v5 = vpop.permute.xlu0 %3268 }
  0xf8   : > { %4083 = vrot.lane.b32.xlu0 %v10170_v62, %s11206_s19  ;;  %v3002_v4 = vld [vmem:[#allocation2 + $0xd0] sm:$0xe]  ;;  %v1560_v22 = vrot.slane %v1559_v32, 4  ;;  %v2433_v19 = vshrl.u32 %v2368_v2, 16  ;;  %v2436_v29 = vshll.u32 %v2368_v2, 16  ;;  %v373_v28 = vsel %vm11302_vm2, 0, %v372_v10 }
  0xf9   : > { %v3003_v11 = vld [vmem:[#allocation2 + $0xd4] sm:$0x1]  ;;  %v10118_v16 = vrot.slane %v3002_v4, 9  ;;  %v709_v35 = vshrl.u32 %v522_v23, 16  ;;  %v2453_v20 = vor.u32 %v2452_v26, %v2449_v15  ;;  %374 = vst [vmem:[#allocation2 + $0xd8] sm:$0x1] %v373_v28 }
  0xfa   : > { %v3174_v8 = vrot.slane %v3003_v11, 5  ;;  %v1565_v33 = vsel %vm11470_vm12, %v1560_v22, %v1564_v63  ;;  %v2435_v40 = vrot.slane %v2433_v19, 4  ;;  %v2438_v43 = vrot.slane %v2436_v29, 5  ;;  %v1861_v56 = vld [vmem:[#allocation2 + $0xc8] sm:$0xe] }
  0xfb   : > { %v10011_v38 = vcombine.low %v1551_v18, %v1565_v33  ;;  %v12015_v37 = vrot.slane %v709_v35, 7  ;;  %v712_v45 = vshll.u32 %v522_v23, 16  ;;  %v10037_v46 = vrot.slane %v1859_v25, 9  ;;  %v1862_v39 = vld [vmem:[#allocation2 + $0xcc] sm:$0x1]  ;;  %v12040_v25 = vpop.permute.xlu0 %1754 }
  0xfc   : > { %v3175_v31 = vsel %vm11432_vm11, %v10118_v16, %v3174_v8  ;;  %v2454_v47 = vrot.slane %v2453_v20, 4  ;;  %v2032_v50 = vrot.slane %v1860_v41, 5  ;;  %v10038_v52 = vrot.slane %v1861_v56, 9  ;;  %v2372_v55 = vld [vmem:[#allocation2 + $0x18] sm:$0xf] }
  0xfd   : > { %v10139_v3 = vcombine.low %v3171_v51, %v3175_v31  ;;  %1774 = vrot.lane.b32.xlu1 %v10011_v38, %s11207_s20  ;;  %v2444_v48 = vrot.slane %v2442_v12, 5  ;;  %v2439_v54 = vor.u32 %v2438_v43, %v2435_v40  ;;  %v714_v57 = vor.u32 %v712_v45, %v12015_v37  ;;  %v2373_v60 = vld [vmem:[#allocation2 + $0x1c] sm:$0x1]  ;;  %v2374_v62 = vld [vmem:[#allocation2 + $0x20] sm:$0xf] }
  0xfe   : > { %v2036_v58 = vrot.slane %v1862_v39, 5  ;;  %v2459_v49 = vsel %vm11470_vm12, %v2454_v47, %v2458_v27  ;;  %v2033_v61 = vsel %vm11432_vm11, %v10037_v46, %v2032_v50  ;;  %v2375_v63 = vld [vmem:[#allocation2 + $0x24] sm:$0x1]  ;;  %v2461_v1 = vshrl.u32 %v2372_v55, 16  ;;  %v470_v29 = vld [vmem:[#allocation2 + $0xdc] sm:$0x1] }
  0xff   : > { %3284 = vrot.lane.b32.xlu0 %v10139_v3, %s11207_s20  ;;  %v2464_v2 = vshll.u32 %v2372_v55, 16  ;;  %v2440_v32 = vrot.slane %v2439_v54, 4  ;;  %v2470_v6 = vshll.u32 %v2373_v60, 16  ;;  %v2475_v10 = vshrl.u32 %v2374_v62, 16  ;;  %v3545_v31 = vld [vmem:[#allocation2 + $0xd0] sm:$0xf]  ;;  %v12037_v3 = vpop.permute.xlu1 %2128 }
 0x100   : > { %v2037_v7 = vsel %vm11432_vm11, %v10038_v52, %v2036_v58  ;;  %v2463_v11 = vrot.slane %v2461_v1, 4  ;;  %v2478_v12 = vshll.u32 %v2374_v62, 16  ;;  %v986_v16 = vld [vmem:[#allocation2 + $0xd8] sm:$0xf]  ;;  %v2484_v22 = vshll.u32 %v2375_v63, 16  ;;  %v4066_v63 = vpop.permute.xlu0 %4065 }
 0x101   : > { %v10059_v4 = vcombine.low %v2033_v61, %v2037_v7  ;;  %v2466_v51 = vrot.slane %v2464_v2, 5  ;;  %v2445_v15 = vsel %vm11470_vm12, %v2440_v32, %v2444_v48  ;;  %v2472_v8 = vrot.slane %v2470_v6, 5  ;;  %v3546_v56 = vld [vmem:[#allocation2 + $0xd4] sm:$0x1]  ;;  %v11030_v46 = vld [vmem:[#allocation2 + $0xc8] ss:$8 sps:$4 sm:$0xff]  }
 0x102   : > { %v2477_v18 = vrot.slane %v2475_v10, 4  ;;  %v10081_v23 = vcombine.low %v2445_v15, %v2459_v49  ;;  %v987_v26 = vsel %vm11360_vm6, %v714_v57, %v986_v16  ;;  %v2480_v19 = vrot.slane %v2478_v12, 5  ;;  %v2376_v47 = vld [vmem:[#allocation2 + $0x28] sm:$0xf]  ;;  %v2377_v52 = vld [vmem:[#allocation2 + $0x2c] sm:$0x1] }
 0x103   : > { %2146 = vrot.lane.b32.xlu1 %v10059_v4, %s11205_s18  ;;  %v2467_v27 = vor.u32 %v2466_v51, %v2463_v11  ;;  %988 = vst [vmem:[#allocation2 + $0xd8] sm:$0xf] %v987_v26  ;;  %v471_v33 = vsel %vm11318_vm4, 0, %v470_v29  ;;  %v3850_v28 = vshrl.u32 %v3545_v31, 16  ;;  %v3853_v35 = vshll.u32 %v3545_v31, 16  ;;  %v12052_v61 = vpop.permute.xlu1 %2130 }
 0x104   : > { %vm2174_vm15 = vcmask 785920   ;;  %2944 = vst.msk [vmem:[#allocation3 + $0x8] sm:$0xff] %vm1174_vm13, %v10081_v23  ;;  %v2481_v20 = vor.u32 %v2480_v19, %v2477_v18  ;;  %v2486_v40 = vrot.slane %v2484_v22, 5  ;;  %472 = vst [vmem:[#allocation2 + $0xdc] sm:$0x1] %v471_v33  ;;  %v715_v41 = vrot.slane %v12015_v37, 4 }
 0x105   : > { %v2468_v38 = vrot.slane %v2467_v27, 4  ;;  %3312 = vst.msk [vmem:[#allocation3 + $0x8] sm:$0xff] %vm1802_vm14, %v11994_v59  ;;  %v3852_v39 = vrot.slane %v3850_v28, 4  ;;  %v3855_v50 = vrot.slane %v3853_v35, 5  ;;  %v2378_v48 = vld [vmem:[#allocation2 + $0x30] sm:$0xf] }
 0x106   : > { %v2482_v45 = vrot.slane %v2481_v20, 4  ;;  %3489 = vst.msk [vmem:[#allocation3 + $0x8] sm:$0xff] %vm2174_vm15, %v11961_v17  ;;  %v2379_v59 = vld [vmem:[#allocation2 + $0x34] sm:$0x1]  ;;  %v2489_v37 = vshrl.u32 %v2376_v47, 16  ;;  %v2492_v57 = vshll.u32 %v2376_v47, 16 }
 0x107   : > { %v2473_v43 = vsel %vm11470_vm12, %v2468_v38, %v2472_v8  ;;  %2323 = vrot.lane.b32.xlu1 %v11030_v46, %s11206_s19  ;;  %v2498_v55 = vshll.u32 %v2377_v52, 16  ;;  %v2503_v60 = vshrl.u32 %v2378_v48, 16  ;;  %v2506_v49 = vshll.u32 %v2378_v48, 16  ;;  %v375_v12 = vld [vmem:[#allocation2 + $0xe0] sm:$0x1]  ;;  %v12069_v35 = vpop.permute.xlu1 %1756 }
 0x108   : > { %v2487_v54 = vsel %vm11470_vm12, %v2482_v45, %v2486_v40  ;;  %v3859_v2 = vshll.u32 %v3546_v56, 16  ;;  %v2491_v6 = vrot.slane %v2489_v37, 4  ;;  %v3856_v4 = vor.u32 %v3855_v50, %v3852_v39  ;;  %v473_v22 = vld [vmem:[#allocation2 + $0xe4] sm:$0x1]  ;;  %v523_v19 = vld [vmem:[%s11329_s17 + $0x5c] sm:$0xf] }
 0x109   : > { %v10082_v58 = vcombine.low %v2473_v43, %v2487_v54  ;;  %v2494_v11 = vrot.slane %v2492_v57, 5  ;;  %v2505_v51 = vrot.slane %v2503_v60, 4  ;;  %v2508_v8 = vrot.slane %v2506_v49, 5  ;;  %v1235_v40 = vld [vmem:[#allocation2 + $0xd0] sm:$0xf] }
 0x10a   : > { %v11026_v62 = vld [vmem:[#allocation2 + $0xd0] ss:$8 sps:$4 sm:$0xff]   ;;  %v2512_v18 = vshll.u32 %v2379_v59, 16  ;;  %v2500_v26 = vrot.slane %v2498_v55, 5  ;;  %v474_v27 = vsel %vm11318_vm4, 0, %v473_v22  ;;  %v717_v33 = vshrl.u32 %v523_v19, 16 }
 0x10b   : > { %v3547_v17 = vld [vmem:[#allocation2 + $0xd8] sm:$0xf]  ;;  %2945 = vst.msk [vmem:[#allocation3 + $0x20] sm:$0xff] %vm1174_vm13, %v10082_v58  ;;  %v989_v1 = vld [vmem:[#allocation2 + $0xdc] sm:$0x1]  ;;  %3461 = vrot.lane.b32.xlu0 %v11026_v62, %s11205_s18  ;;  %v2495_v23 = vor.u32 %v2494_v11, %v2491_v6  ;;  %v2509_v29 = vor.u32 %v2508_v8, %v2505_v51  ;;  %v720_v20 = vshll.u32 %v523_v19, 16 }
 0x10c   : > { %v3864_v32 = vshrl.u32 %v3547_v17, 16  ;;  %v3867_v7 = vshll.u32 %v3547_v17, 16  ;;  %3313 = vst.msk [vmem:[#allocation3 + $0x20] sm:$0xff] %vm1802_vm14, %v12007_v30  ;;  %v990_v10 = vsel %vm11302_vm2, %v715_v41, %v989_v1  ;;  %v376_v30 = vsel %vm11302_vm2, 0, %v375_v12  ;;  %475 = vst [vmem:[#allocation2 + $0xe4] sm:$0x1] %v474_v27  ;;  %v4068_v41 = vpop.permute.xlu0 %4067 }
 0x10d   : > { %991 = vst [vmem:[#allocation2 + $0xdc] sm:$0x1] %v990_v10  ;;  %3490 = vst.msk [vmem:[#allocation3 + $0x20] sm:$0xff] %vm2174_vm15, %v11966_v9  ;;  %v2514_v31 = vrot.slane %v2512_v18, 5  ;;  %v12067_v28 = vld [vmem:[#allocation2 + $0xd8] sm:$0xe] }
 0x10e   : > { %v3866_v15 = vrot.slane %v3864_v32, 4  ;;  %v3869_v16 = vrot.slane %v3867_v7, 5  ;;  %377 = vst [vmem:[#allocation2 + $0xe0] sm:$0x1] %v376_v30  ;;  %v2496_v9 = vrot.slane %v2495_v23, 4  ;;  %vm2351_vm0 = vcmask 1048320   ;;  %v12079_v32 = vpop.permute.xlu1 %1758 }
 0x10f   : > { %v3861_v43 = vrot.slane %v3859_v2, 5  ;;  %v2510_v45 = vrot.slane %v2509_v29, 4  ;;  %v719_v56 = vrot.slane %v717_v33, 7  ;;  %v1236_v46 = vld [vmem:[#allocation2 + $0xd4] sm:$0x1]  ;;  %v1567_v47 = vshrl.u32 %v1235_v40, 16 }
 0x110   : > { %v3870_v38 = vor.u32 %v3869_v16, %v3866_v15  ;;  %4113 = vst.msk [vmem:[#allocation3 + $0x8] sm:$0xff] %vm2351_vm0, %v4066_v63  ;;  %4114 = vst.msk [vmem:[#allocation3 + $0x20] sm:$0xff] %vm2351_vm0, %v4068_v41  ;;  %v3857_v39 = vrot.slane %v3856_v4, 4  ;;  %v2501_v50 = vsel %vm11470_vm12, %v2496_v9, %v2500_v26  ;;  %v1237_v52 = vld [vmem:[#allocation2 + $0xd8] sm:$0xf]  ;;  %v1570_v48 = vshll.u32 %v1235_v40, 16 }
 0x111   : > { %v2515_v54 = vsel %vm11470_vm12, %v2510_v45, %v2514_v31  ;;  %v722_v59 = vor.u32 %v720_v20, %v719_v56  ;;  %v723_v37 = vrot.slane %v719_v56, 4  ;;  %v1576_v57 = vshll.u32 %v1236_v46, 16  ;;  %v11033_v58 = vld [vmem:[#allocation2] ss:$8 sps:$4 sm:$0xff]   ;;  %v1863_v27 = vld [vmem:[#allocation2 + $0xd0] sm:$0xe] }
 0x112   : > { %v3871_v60 = vrot.slane %v3870_v38, 4  ;;  %v10083_v49 = vcombine.low %v2501_v50, %v2515_v54  ;;  %v10119_v62 = vrot.slane %v12067_v28, 9  ;;  %v1569_v17 = vrot.slane %v1567_v47, 4  ;;  %1175 = vst.msk [vmem:[#allocation3] sm:$0xff] %vm1174_vm13, %v11033_v58  ;;  %v1864_v19 = vld [vmem:[#allocation2 + $0xd4] sm:$0x1]  ;;  %v12101_v41 = vpop.permute.xlu1 %1760 }
 0x113   : > { %v1572_v2 = vrot.slane %v1570_v48, 5  ;;  %v3862_v7 = vsel %vm11470_vm12, %v3857_v39, %v3861_v43  ;;  %v995_v10 = vld [vmem:[#allocation2 + $0xe4] sm:$0x1]  ;;  %v1581_v4 = vshrl.u32 %v1237_v52, 16  ;;  %v1584_v11 = vshll.u32 %v1237_v52, 16  ;;  %1803 = vst.msk [vmem:[#allocation3] sm:$0xff] %vm1802_vm14, %v12040_v25 }
 0x114   : > { %v3548_v55 = vld [vmem:[#allocation2 + $0xdc] sm:$0x1]  ;;  %2946 = vst.msk [vmem:[#allocation3 + $0x38] sm:$0xff] %vm1174_vm13, %v10083_v49  ;;  %v996_v15 = vsel %vm11302_vm2, %v723_v37, %v995_v10  ;;  %v1578_v8 = vrot.slane %v1576_v57, 5  ;;  %v1865_v38 = vld [vmem:[#allocation2 + $0xd8] sm:$0xe] }
 0x115   : > { %v3873_v63 = vshll.u32 %v3548_v55, 16  ;;  %v1238_v1 = vld [vmem:[#allocation2 + $0xdc] sm:$0x1]  ;;  %v992_v6 = vld [vmem:[#allocation2 + $0xe0] sm:$0xf]  ;;  %3314 = vst.msk [vmem:[#allocation3 + $0x38] sm:$0xff] %vm1802_vm14, %v12026_v5  ;;  %v1573_v18 = vor.u32 %v1572_v2, %v1569_v17  ;;  %v4070_v5 = vpop.permute.xlu0 %4069 }
 0x116   : > { %v993_v12 = vsel %vm11360_vm6, %v722_v59, %v992_v6  ;;  %v3005_v16 = vld [vmem:[#allocation2 + $0xdc] sm:$0x1]  ;;  %2175 = vst.msk [vmem:[#allocation3] sm:$0xff] %vm2174_vm15, %v12020_v36  ;;  %997 = vst [vmem:[#allocation2 + $0xe4] sm:$0x1] %v996_v15  ;;  %v1583_v22 = vrot.slane %v1581_v4, 4 }
 0x117   : > { %v3875_v51 = vrot.slane %v3873_v63, 5  ;;  %994 = vst [vmem:[#allocation2 + $0xe0] sm:$0xf] %v993_v12  ;;  %v1586_v25 = vrot.slane %v1584_v11, 5  ;;  %v1590_v23 = vshll.u32 %v1238_v1, 16  ;;  %2352 = vst.msk [vmem:[#allocation3] sm:$0xff] %vm2351_vm0, %v11979_v14  ;;  %v12119_v11 = vpop.permute.xlu1 %2132 }
 0x118   : > { %3491 = vst.msk [vmem:[#allocation3 + $0x38] sm:$0xff] %vm2174_vm15, %v11982_v21  ;;  %v4466_v26 = vld [vmem:[#allocation3 + $0x8] sm:$0xff]  ;;  %v1574_v29 = vrot.slane %v1573_v18, 4  ;;  %v1866_v9 = vld [vmem:[#allocation2 + $0xdc] sm:$0x1]  ;;  %v10039_v14 = vrot.slane %v1863_v27, 9 }
 0x119   : > { %v3876_v30 = vsel %vm11470_vm12, %v3871_v60, %v3875_v51  ;;  %4115 = vst.msk [vmem:[#allocation3 + $0x38] sm:$0xff] %vm2351_vm0, %v4070_v5  ;;  %4744 = vmatprep.mubr.bf16.mxu0 %v4466_v26  ;;  %v1587_v31 = vor.u32 %v1586_v25, %v1583_v22  ;;  %v1592_v33 = vrot.slane %v1590_v23, 5  ;;  %v2040_v20 = vrot.slane %v1864_v19, 5  ;;  %v3551_v46 = vld [vmem:[#allocation2 + $0xe8] sm:$0xf]  ;;  %v12116_v1 = vpop.permute.xlu0 %3270  ;;  %v4469_v23 = vld [vmem:[#allocation3 + $0x20] sm:$0xff] }
 0x11a   : > { %v10171_v36 = vcombine.low %v3862_v7, %v3876_v30  ;;  %v10040_v40 = vrot.slane %v1865_v38, 9  ;;  %v2044_v21 = vrot.slane %v1866_v9, 5  ;;  %v3178_v43 = vrot.slane %v3005_v16, 5  ;;  %v3552_v50 = vld [vmem:[#allocation2 + $0xec] sm:$0x1] }
 0x11b   : > { %v1579_v45 = vsel %vm11470_vm12, %v1574_v29, %v1578_v8  ;;  %v1588_v56 = vrot.slane %v1587_v31, 4  ;;  %v2041_v47 = vsel %vm11432_vm11, %v10039_v14, %v2040_v20  ;;  %v3892_v52 = vshrl.u32 %v3551_v46, 16  ;;  %v11041_v30 = vld [vmem:[#allocation2 + $0x10] ss:$8 sps:$4 sm:$0xff]   ;;  %v476_v14 = vld [vmem:[#allocation2 + $0xfc] sm:$0x1]  ;;  %v12134_v20 = vpop.permute.xlu1 %2309 }
 0x11c   : > { %4085 = vrot.lane.b32.xlu0 %v10171_v36, %s11206_s19  ;;  %v2045_v39 = vsel %vm11432_vm11, %v10040_v40, %v2044_v21  ;;  %v3895_v48 = vshll.u32 %v3551_v46, 16  ;;  %v3901_v59 = vshll.u32 %v3552_v50, 16  ;;  %v3179_v55 = vsel %vm11432_vm11, %v10119_v62, %v3178_v43  ;;  %v378_v19 = vld [vmem:[#allocation2 + $0xf8] sm:$0x1]  ;;  %v381_v36 = vld [vmem:[#allocation2 + $0x100] sm:$0x1] }
 0x11d   : > { %v1593_v54 = vsel %vm11470_vm12, %v1588_v56, %v1592_v33  ;;  %v3007_v57 = vld [vmem:[#allocation2 + $0xe4] sm:$0x1]  ;;  %v10060_v17 = vcombine.low %v2041_v47, %v2045_v39  ;;  %v3894_v10 = vrot.slane %v3892_v52, 4  ;;  %v12125_v29 = vpop.permute.xlu0 %3447  ;;  %1176 = vst.msk [vmem:[#allocation3 + $0x18] sm:$0xff] %vm1174_vm13, %v11041_v30  ;;  %v379_v38 = vsel %vm11302_vm2, 0, %v378_v19 }
 0x11e   : > { %v3006_v37 = vld [vmem:[#allocation2 + $0xe0] sm:$0xe]  ;;  %v10012_v58 = vcombine.low %v1579_v45, %v1593_v54  ;;  %v3182_v49 = vrot.slane %v3007_v57, 5  ;;  %v3550_v2 = vld [vmem:[#allocation2 + $0xe4] sm:$0x1]  ;;  %v3897_v4 = vrot.slane %v3895_v48, 5 }
 0x11f   : > { %v10120_v60 = vrot.slane %v3006_v37, 9  ;;  %v3549_v63 = vld [vmem:[#allocation2 + $0xe0] sm:$0xf]  ;;  %v3887_v51 = vshll.u32 %v3550_v2, 16  ;;  %v3903_v62 = vrot.slane %v3901_v59, 5  ;;  %v382_v9 = vsel %vm11302_vm2, 0, %v381_v36 }
 0x120   : > { %1776 = vrot.lane.b32.xlu1 %v10012_v58, %s11207_s20  ;;  %v3878_v7 = vshrl.u32 %v3549_v63, 16  ;;  %v3881_v6 = vshll.u32 %v3549_v63, 16  ;;  %v11035_v15 = vld [vmem:[#allocation2 + $0xe0] ss:$8 sps:$4 sm:$0xff]   ;;  %v3898_v18 = vor.u32 %v3897_v4, %v3894_v10  ;;  %1804 = vst.msk [vmem:[#allocation3 + $0x18] sm:$0xff] %vm1802_vm14, %v12069_v35  ;;  %v477_v40 = vsel %vm11318_vm4, 0, %v476_v14 }
 0x121   : > { %v3183_v28 = vsel %vm11432_vm11, %v10120_v60, %v3182_v49  ;;  %v11040_v22 = vld [vmem:[#allocation2 + $0xd8] ss:$8 sps:$4 sm:$0xff]   ;;  %v3889_v25 = vrot.slane %v3887_v51, 5  ;;  %380 = vst [vmem:[#allocation2 + $0xf8] sm:$0x1] %v379_v38  ;;  %2176 = vst.msk [vmem:[#allocation3 + $0x18] sm:$0xff] %vm2174_vm15, %v12037_v3  ;;  %v12152_v37 = vpop.permute.xlu0 %4071  ;;  %v12155_v60 = vpop.permute.xlu1 %1762 }
 0x122   : > { %v10140_v12 = vcombine.low %v3179_v55, %v3183_v28  ;;  %v3880_v16 = vrot.slane %v3878_v7, 4  ;;  %v3883_v8 = vrot.slane %v3881_v6, 5  ;;  %v3899_v26 = vrot.slane %v3898_v18, 4  ;;  %v4465_v27 = vld [vmem:[#allocation3] sm:$0xff]  ;;  %383 = vst [vmem:[#allocation2 + $0x100] sm:$0x1] %v382_v9 }
 0x123   : > { %4745 = vmatmul.mubr.bf16.vlgmr.msra.gmra.mrb[0].mxu0 %v4465_v27  ;;  %v479_v21 = vld [vmem:[#allocation2 + $0x104] sm:$0x1]  ;;  %v524_v43 = vld [vmem:[%s11329_s17 + $0x60] sm:$0xf]  ;;  %478 = vst [vmem:[#allocation2 + $0xfc] sm:$0x1] %v477_v40 }
 0x124   : > { %3286 = vrot.lane.b32.xlu0 %v10140_v12, %s11207_s20  ;;  %2148 = vrot.lane.b32.xlu1 %v10060_v17, %s11205_s18  ;;  %v3884_v5 = vor.u32 %v3883_v8, %v3880_v16  ;;  %v3904_v33 = vsel %vm11470_vm12, %v3899_v26, %v3903_v62  ;;  %v480_v35 = vsel %vm11318_vm4, 0, %v479_v21  ;;  %v525_v56 = vld [vmem:[%s11329_s17 + $0x64] sm:$0xf]  ;;  %v725_v46 = vshrl.u32 %v524_v43, 16  ;;  %2353 = vst.msk [vmem:[#allocation3 + $0x18] sm:$0xff] %vm2351_vm0, %v11992_v42  ;;  %v4472_v10 = vld [vmem:[#allocation3 + $0x38] sm:$0xff] }
 0x125   : > { %4752 = vmatprep.mubr.bf16.mxu0 %v4469_v23  ;;  %v728_v47 = vshll.u32 %v524_v43, 16  ;;  %481 = vst [vmem:[#allocation2 + $0x104] sm:$0x1] %v480_v35  ;;  %v733_v50 = vshrl.u32 %v525_v56, 16  ;;  %v736_v52 = vshll.u32 %v525_v56, 16  ;;  %v12170_v27 = vpop.permute.xlu0 %3272  ;;  %v12175_v38 = vpop.permute.xlu1 %2134  ;;  %vm11209_vm1 = vmmov 0  }
 0x126   : > { %v3885_v31 = vrot.slane %v3884_v5, 4  ;;  %v727_v48 = vrot.slane %v725_v46, 7  ;;  %v1239_v59 = vld [vmem:[#allocation2 + $0xf0] sm:$0xf]  ;;  %v11045_v63 = vld [vmem:[#allocation2 + $0x20] ss:$8 sps:$4 sm:$0xff]  }
 0x127   : > { %v735_v54 = vrot.slane %v733_v50, 7  ;;  %v1595_v58 = vshrl.u32 %v1239_v59, 16  ;;  %v1598_v55 = vshll.u32 %v1239_v59, 16  ;;  %v1240_v62 = vld [vmem:[#allocation2 + $0xf4] sm:$0x1]  ;;  %1177 = vst.msk [vmem:[#allocation3 + $0x30] sm:$0xff] %vm1174_vm13, %v11045_v63 }
 0x128   : > { %3463 = vrot.lane.b32.xlu0 %v11035_v15, %s11205_s18  ;;  %v3890_v45 = vsel %vm11470_vm12, %v3885_v31, %v3889_v25  ;;  %2325 = vrot.lane.b32.xlu1 %v11040_v22, %s11206_s19  ;;  %v730_v3 = vor.u32 %v728_v47, %v727_v48  ;;  %v731_v57 = vrot.slane %v727_v48, 4  ;;  %v998_v42 = vld [vmem:[#allocation2 + $0xf8] sm:$0xf]  ;;  %v4129_v12 = vld [vmem:[#allocation2 + $0x10] sm:$0xe]  ;;  %1805 = vst.msk [vmem:[#allocation3 + $0x30] sm:$0xff] %vm1802_vm14, %v12079_v32 }
 0x129   : > { %v10172_v39 = vcombine.low %v3890_v45, %v3904_v33  ;;  %v738_v49 = vor.u32 %v736_v52, %v735_v54  ;;  %v739_v17 = vrot.slane %v735_v54, 4  ;;  %v1004_v2 = vld [vmem:[#allocation2 + $0x100] sm:$0xf]  ;;  %v1597_v7 = vrot.slane %v1595_v58, 4  ;;  %v4130_v8 = vld [vmem:[#allocation2 + $0x14] sm:$0x1] }
 0x12a   : > { %v1600_v6 = vrot.slane %v1598_v55, 5  ;;  %v999_v4 = vsel %vm11360_vm6, %v730_v3, %v998_v42  ;;  %v1001_v28 = vld [vmem:[#allocation2 + $0xfc] sm:$0x1]  ;;  %v4131_v18 = vld [vmem:[#allocation2 + $0x18] sm:$0xe]  ;;  %2177 = vst.msk [vmem:[#allocation3 + $0x30] sm:$0xff] %vm2174_vm15, %v12052_v61 }
 0x12b   : > { %v1005_v51 = vsel %vm11360_vm6, %v738_v49, %v1004_v2  ;;  %1000 = vst [vmem:[#allocation2 + $0xf8] sm:$0xf] %v999_v4  ;;  %v1002_v15 = vsel %vm11302_vm2, %v731_v57, %v1001_v28  ;;  %v4132_v25 = vld [vmem:[#allocation2 + $0x1c] sm:$0x1]  ;;  %v10177_v23 = vrot.slane %v4129_v12, 9  ;;  %v4259_v5 = vrot.slane %v4130_v8, 5  ;;  %v12197_v4 = vpop.permute.xlu1 %2311 }
 0x12c   : > { %4087 = vrot.lane.b32.xlu0 %v10172_v39, %s11206_s19  ;;  %1006 = vst [vmem:[#allocation2 + $0x100] sm:$0xf] %v1005_v51  ;;  %v1007_v16 = vld [vmem:[#allocation2 + $0x104] sm:$0x1]  ;;  %1003 = vst [vmem:[#allocation2 + $0xfc] sm:$0x1] %v1002_v15  ;;  %v1601_v19 = vor.u32 %v1600_v6, %v1597_v7 }
 0x12d   : > { %v1008_v22 = vsel %vm11302_vm2, %v739_v17, %v1007_v16  ;;  %v10178_v26 = vrot.slane %v4131_v18, 9  ;;  %v4468_v30 = vld [vmem:[#allocation3 + $0x18] sm:$0xff]  ;;  %v1604_v32 = vshll.u32 %v1240_v62, 16  ;;  %2354 = vst.msk [vmem:[#allocation3 + $0x30] sm:$0xff] %vm2351_vm0, %v12005_v24  ;;  %v4263_v36 = vrot.slane %v4132_v25, 5  ;;  %v12192_v17 = vpop.permute.xlu0 %3449 }
 0x12e   : > { %1009 = vst [vmem:[#allocation2 + $0x104] sm:$0x1] %v1008_v22  ;;  %v384_v31 = vld [vmem:[#allocation2 + $0x108] sm:$0x1]  ;;  %4753 = vmatmul.mubr.bf16.gmra.mrb[4].mxu0 %v4468_v30  ;;  %v4260_v61 = vsel %vm11432_vm11, %v10177_v23, %v4259_v5  ;;  %v4133_v21 = vld [vmem:[#allocation2 + $0x20] sm:$0xe] }
 0x12f   : > { %v526_v33 = vld [vmem:[%s11329_s17 + $0x68] sm:$0xf]  ;;  %v385_v9 = vsel %vm11302_vm2, 0, %v384_v31  ;;  %4760 = vmatprep.mubr.bf16.mxu0 %v4472_v10  ;;  %v4264_v43 = vsel %vm11432_vm11, %v10178_v26, %v4263_v36  ;;  %v4134_v24 = vld [vmem:[#allocation2 + $0x24] sm:$0x1]  ;;  %v10179_v47 = vrot.slane %v4133_v21, 9 }
 0x130   : > { %v741_v14 = vshrl.u32 %v526_v33, 16  ;;  %v744_v40 = vshll.u32 %v526_v33, 16  ;;  %386 = vst [vmem:[#allocation2 + $0x108] sm:$0x1] %v385_v9  ;;  %v4135_v45 = vld [vmem:[#allocation2 + $0x28] sm:$0xe]  ;;  %v10209_v56 = vcombine.low %v4260_v61, %v4264_v43 }
 0x131   : > { %v4136_v35 = vld [vmem:[#allocation2 + $0x2c] sm:$0x1]  ;;  %v4267_v39 = vrot.slane %v4134_v24, 5  ;;  %v12185_v50 = vrot.slane %v1601_v19, 4  ;;  %v12187_v52 = vrot.slane %v1604_v32, 5  ;;  %v10180_v48 = vrot.slane %v4135_v45, 9 }
 0x132   : > { %v12183_v46 = vrot.slane %v741_v14, 7  ;;  %v4271_v54 = vrot.slane %v4136_v35, 5  ;;  %v1867_v59 = vld [vmem:[#allocation2 + $0xf0] sm:$0xe]  ;;  %v3008_v3 = vld [vmem:[#allocation2 + $0xf8] sm:$0xe]  ;;  %v12206_v35 = vpop.permute.xlu0 %4073 }
 0x133   : > { %v3010_v57 = vld [vmem:[#allocation2 + $0x100] sm:$0xe]  ;;  %v1241_v58 = vld [vmem:[#allocation2 + $0xf8] sm:$0xf]  ;;  %4449 = vst.msk [vmem:[#allocation3 + $0x10] sm:$0xff] %vm1174_vm13, %v10209_v56  ;;  %v4268_v55 = vsel %vm11432_vm11, %v10179_v47, %v4267_v39  ;;  %v10121_v42 = vrot.slane %v3008_v3, 9  ;;  %v1607_v3 = vsel %vm11470_vm12, %v12185_v50, %v12187_v52 }
 0x134   : > { %v1868_v49 = vld [vmem:[#allocation2 + $0xf4] sm:$0x1]  ;;  %v3009_v63 = vld [vmem:[#allocation2 + $0xfc] sm:$0x1]  ;;  %v10122_v2 = vrot.slane %v3010_v57, 9  ;;  %v746_v6 = vor.u32 %v744_v40, %v12183_v46  ;;  %v4272_v10 = vsel %vm11432_vm11, %v10180_v48, %v4271_v54  ;;  %v1609_v62 = vshrl.u32 %v1241_v58, 16 }
 0x135   : > { %v1242_v7 = vld [vmem:[#allocation2 + $0xfc] sm:$0x1]  ;;  %v3011_v28 = vld [vmem:[#allocation2 + $0x104] sm:$0x1]  ;;  %v3186_v51 = vrot.slane %v3009_v63, 5  ;;  %v1612_v12 = vshll.u32 %v1241_v58, 16  ;;  %v10210_v8 = vcombine.low %v4268_v55, %v4272_v10 }
 0x136   : > { %v1618_v15 = vshll.u32 %v1242_v7, 16  ;;  %v3190_v16 = vrot.slane %v3011_v28, 5  ;;  %v1869_v18 = vld [vmem:[#allocation2 + $0xf8] sm:$0xe]  ;;  %v10041_v22 = vrot.slane %v1867_v59, 9  ;;  %v1611_v23 = vrot.slane %v1609_v62, 4  ;;  %v12208_v59 = vpop.permute.xlu1 %1764 }
 0x137   : > { %v3187_v25 = vsel %vm11432_vm11, %v10121_v42, %v3186_v51  ;;  %v1614_v5 = vrot.slane %v1612_v12, 5  ;;  %v1010_v30 = vld [vmem:[#allocation2 + $0x108] sm:$0xf]  ;;  %v4471_v19 = vld [vmem:[#allocation3 + $0x30] sm:$0xff]  ;;  %4450 = vst.msk [vmem:[#allocation3 + $0x28] sm:$0xff] %vm1174_vm13, %v10210_v8  ;;  %v2048_v33 = vrot.slane %v1868_v49, 5 }
 0x138   : > { %v1620_v26 = vrot.slane %v1618_v15, 5  ;;  %v3191_v32 = vsel %vm11432_vm11, %v10122_v2, %v3190_v16  ;;  %v1011_v36 = vsel %vm11360_vm6, %v746_v6, %v1010_v30  ;;  %v1870_v31 = vld [vmem:[#allocation2 + $0xfc] sm:$0x1]  ;;  %v10042_v61 = vrot.slane %v1869_v18, 9  ;;  %v2380_v9 = vld [vmem:[#allocation2 + $0x38] sm:$0xf]  ;;  %4761 = vmatmul.mubr.bf16.gmra.mrb[8].mxu0 %v4471_v19 }
 0x139   : > { %v10141_v14 = vcombine.low %v3187_v25, %v3191_v32  ;;  %v1615_v40 = vor.u32 %v1614_v5, %v1611_v23  ;;  %1012 = vst [vmem:[#allocation2 + $0x108] sm:$0xf] %v1011_v36  ;;  %v2052_v21 = vrot.slane %v1870_v31, 5  ;;  %v2381_v43 = vld [vmem:[#allocation2 + $0x3c] sm:$0x1]  ;;  %v2517_v45 = vshrl.u32 %v2380_v9, 16  ;;  %v12225_v5 = vpop.permute.xlu0 %3274 }
 0x13a   : > { %v2382_v24 = vld [vmem:[#allocation2 + $0x40] sm:$0xf]  ;;  %v4467_v56 = vld [vmem:[#allocation3 + $0x10] sm:$0xff]  ;;  %v2383_v47 = vld [vmem:[#allocation2 + $0x44] sm:$0x1]  ;;  %v2520_v39 = vshll.u32 %v2380_v9, 16  ;;  %v2049_v49 = vsel %vm11432_vm11, %v10041_v22, %v2048_v33  ;;  %v12231_v32 = vpop.permute.xlu1 %2136 }
 0x13b   : > { %v2526_v48 = vshll.u32 %v2381_v43, 16  ;;  %v2531_v54 = vshrl.u32 %v2382_v24, 16  ;;  %3288 = vrot.lane.b32.xlu0 %v10141_v14, %s11207_s20  ;;  %v1616_v57 = vrot.slane %v1615_v40, 4  ;;  %10875 = vmatprep.mubr.msk.bf16.mxu1 %vm1174_vm13, %v4467_v56  ;;  %v2519_v58 = vrot.slane %v2517_v45, 4  ;;  %v11047_v28 = vld [vmem:[#allocation2 + $0x30] ss:$8 sps:$4 sm:$0xff]  }
 0x13c   : > { %v2534_v55 = vshll.u32 %v2382_v24, 16  ;;  %v2522_v63 = vrot.slane %v2520_v39, 5  ;;  %v2053_v7 = vsel %vm11432_vm11, %v10042_v61, %v2052_v21  ;;  %v2540_v10 = vshll.u32 %v2383_v47, 16  ;;  %v482_v50 = vld [vmem:[#allocation2 + $0x10c] sm:$0x1]  ;;  %1178 = vst.msk [vmem:[#allocation3 + $0x48] sm:$0xff] %vm1174_vm13, %v11047_v28 }
 0x13d   : > { %v2533_v42 = vrot.slane %v2531_v54, 4  ;;  %v1621_v2 = vsel %vm11470_vm12, %v1616_v57, %v1620_v26  ;;  %v2528_v62 = vrot.slane %v2526_v48, 5  ;;  %v483_v12 = vsel %vm11318_vm4, 0, %v482_v50  ;;  %v3553_v15 = vld [vmem:[#allocation2 + $0x100] sm:$0xf]  ;;  %1806 = vst.msk [vmem:[#allocation3 + $0x48] sm:$0xff] %vm1802_vm14, %v12101_v41 }
 0x13e   : > { %v2536_v6 = vrot.slane %v2534_v55, 5  ;;  %v10013_v52 = vcombine.low %v1607_v3, %v1621_v2  ;;  %v2523_v51 = vor.u32 %v2522_v63, %v2519_v58  ;;  %v3554_v16 = vld [vmem:[#allocation2 + $0x104] sm:$0x1]  ;;  %v4470_v8 = vld [vmem:[#allocation3 + $0x28] sm:$0xff]  ;;  %v2542_v22 = vrot.slane %v2540_v10, 5  ;;  %2178 = vst.msk [vmem:[#allocation3 + $0x48] sm:$0xff] %vm2174_vm15, %v12119_v11  ;;  %v12251_v55 = vpop.permute.xlu0 %3451  ;;  %v12256_v2 = vpop.permute.xlu1 %2313 }
 0x13f   : > { %484 = vst [vmem:[#allocation2 + $0x10c] sm:$0x1] %v483_v12  ;;  %v3906_v25 = vshrl.u32 %v3553_v15, 16  ;;  %v3909_v23 = vshll.u32 %v3553_v15, 16  ;;  %10876 = vmatmul.mubr.msk.bf16.vlgmr.msra.gmra.mrb[0].mxu1 %vm1174_vm13, %v4470_v8  ;;  %v10061_v30 = vcombine.low %v2049_v49, %v2053_v7  ;;  %v747_v36 = vrot.slane %v12183_v46, 4  ;;  %2355 = vst.msk [vmem:[#allocation3 + $0x48] sm:$0xff] %vm2351_vm0, %v12134_v20 }
 0x140   : > { %v2537_v18 = vor.u32 %v2536_v6, %v2533_v42  ;;  %1778 = vrot.lane.b32.xlu1 %v10013_v52, %s11207_s20  ;;  %v11046_v26 = vld [vmem:[#allocation2 + $0x100] ss:$8 sps:$4 sm:$0xff]   ;;  %v2524_v19 = vrot.slane %v2523_v51, 4  ;;  %v3915_v40 = vshll.u32 %v3554_v16, 16  ;;  %v387_v45 = vld [vmem:[#allocation2 + $0x110] sm:$0x1] }
 0x141   : > { %v3555_v33 = vld [vmem:[#allocation2 + $0x108] sm:$0xf]  ;;  %v3908_v61 = vrot.slane %v3906_v25, 4  ;;  %v3911_v9 = vrot.slane %v3909_v23, 5  ;;  %3465 = vrot.lane.b32.xlu0 %v11046_v26, %s11205_s18  ;;  %v11048_v24 = vld [vmem:[#allocation2 + $0xf8] ss:$8 sps:$4 sm:$0xff]  }
 0x142   : > { %v2538_v31 = vrot.slane %v2537_v18, 4  ;;  %v2529_v14 = vsel %vm11470_vm12, %v2524_v19, %v2528_v62  ;;  %v3920_v21 = vshrl.u32 %v3555_v33, 16  ;;  %v3923_v41 = vshll.u32 %v3555_v33, 16  ;;  %v485_v56 = vld [vmem:[#allocation2 + $0x114] sm:$0x1] }
 0x143   : > { %v3912_v43 = vor.u32 %v3911_v9, %v3908_v61  ;;  %v388_v48 = vsel %vm11302_vm2, 0, %v387_v45  ;;  %v527_v54 = vld [vmem:[%s11329_s17 + $0x6c] sm:$0xf]  ;;  %v486_v20 = vsel %vm11318_vm4, 0, %v485_v56  ;;  %v12249_v58 = vld [vmem:[#allocation2 + $0x108] sm:$0xe] }
 0x144   : > { %v2543_v46 = vsel %vm11470_vm12, %v2538_v31, %v2542_v22  ;;  %2150 = vrot.lane.b32.xlu1 %v10061_v30, %s11205_s18  ;;  %v3922_v47 = vrot.slane %v3920_v21, 4  ;;  %v3925_v39 = vrot.slane %v3923_v41, 5  ;;  %389 = vst [vmem:[#allocation2 + $0x110] sm:$0x1] %v388_v48  ;;  %v749_v3 = vshrl.u32 %v527_v54, 16 }
 0x145   : > { %v10084_v11 = vcombine.low %v2529_v14, %v2543_v46  ;;  %v752_v57 = vshll.u32 %v527_v54, 16  ;;  %v12254_v63 = vrot.slane %v3915_v40, 5  ;;  %487 = vst [vmem:[#allocation2 + $0x114] sm:$0x1] %v486_v20  ;;  %v1243_v42 = vld [vmem:[#allocation2 + $0x100] sm:$0xf]  ;;  %v12275_v14 = vpop.permute.xlu0 %4075 }
 0x146   : > { %v1013_v49 = vld [vmem:[#allocation2 + $0x10c] sm:$0x1]  ;;  %v3926_v6 = vor.u32 %v3925_v39, %v3922_v47  ;;  %v751_v10 = vrot.slane %v749_v3, 7  ;;  %v1244_v28 = vld [vmem:[#allocation2 + $0x104] sm:$0x1]  ;;  %v1623_v52 = vshrl.u32 %v1243_v42, 16 }
 0x147   : > { %2947 = vst.msk [vmem:[#allocation3 + $0x50] sm:$0xff] %vm1174_vm13, %v10084_v11  ;;  %v1014_v7 = vsel %vm11302_vm2, %v747_v36, %v1013_v49  ;;  %v1245_v50 = vld [vmem:[#allocation2 + $0x108] sm:$0xf]  ;;  %v12262_v51 = vrot.slane %v3912_v43, 4  ;;  %v10123_v62 = vrot.slane %v12249_v58, 9  ;;  %v1632_v18 = vshll.u32 %v1244_v28, 16  ;;  %v12277_v43 = vpop.permute.xlu1 %1766 }
 0x148   : > { %3315 = vst.msk [vmem:[#allocation3 + $0x50] sm:$0xff] %vm1802_vm14, %v12116_v1  ;;  %1015 = vst [vmem:[#allocation2 + $0x10c] sm:$0x1] %v1014_v7  ;;  %2327 = vrot.lane.b32.xlu1 %v11048_v24, %s11206_s19  ;;  %v1626_v1 = vshll.u32 %v1243_v42, 16  ;;  %v1637_v12 = vshrl.u32 %v1245_v50, 16  ;;  %v754_v16 = vor.u32 %v752_v57, %v751_v10  ;;  %v1625_v8 = vrot.slane %v1623_v52, 4 }
 0x149   : > { %3492 = vst.msk [vmem:[#allocation3 + $0x50] sm:$0xff] %vm2174_vm15, %v12125_v29  ;;  %v390_v15 = vld [vmem:[#allocation2 + $0x118] sm:$0x1]  ;;  %v1640_v22 = vshll.u32 %v1245_v50, 16  ;;  %v528_v25 = vld [vmem:[%s11329_s17 + $0x70] sm:$0xf]  ;;  %v3918_v7 = vsel %vm11470_vm12, %v12262_v51, %v12254_v63 }
 0x14a   : > { %4116 = vst.msk [vmem:[#allocation3 + $0x50] sm:$0xff] %vm2351_vm0, %v12152_v37  ;;  %v755_v23 = vrot.slane %v751_v10, 4  ;;  %v1628_v26 = vrot.slane %v1626_v1, 5  ;;  %v1639_v30 = vrot.slane %v1637_v12, 4  ;;  %v391_v19 = vsel %vm11302_vm2, 0, %v390_v15  ;;  %v4474_v48 = vld [vmem:[#allocation3 + $0x48] sm:$0xff] }
 0x14b   : > { %v1871_v29 = vld [vmem:[#allocation2 + $0x100] sm:$0xe]  ;;  %v12273_v36 = vrot.slane %v3926_v6, 4  ;;  %v1642_v31 = vrot.slane %v1640_v22, 5  ;;  %392 = vst [vmem:[#allocation2 + $0x118] sm:$0x1] %v391_v19 }
 0x14c   : > { %v757_v33 = vshrl.u32 %v528_v25, 16  ;;  %v760_v61 = vshll.u32 %v528_v25, 16  ;;  %v1872_v9 = vld [vmem:[#allocation2 + $0x104] sm:$0x1]  ;;  %v1016_v40 = vld [vmem:[#allocation2 + $0x110] sm:$0xf]  ;;  %v1629_v21 = vor.u32 %v1628_v26, %v1625_v8  ;;  %v12296_v25 = vpop.permute.xlu0 %3276 }
 0x14d   : > { %v1873_v37 = vld [vmem:[#allocation2 + $0x108] sm:$0xe]  ;;  %v10043_v41 = vrot.slane %v1871_v29, 9  ;;  %v2056_v46 = vrot.slane %v1872_v9, 5  ;;  %v1017_v24 = vsel %vm11360_vm6, %v754_v16, %v1016_v40  ;;  %v1019_v45 = vld [vmem:[#allocation2 + $0x114] sm:$0x1]  ;;  %v1643_v11 = vor.u32 %v1642_v31, %v1639_v30  ;;  %v12298_v31 = vpop.permute.xlu1 %2138 }
 0x14e   : > { %v1634_v56 = vrot.slane %v1632_v18, 5  ;;  %v12281_v47 = vrot.slane %v757_v33, 7  ;;  %v2384_v39 = vld [vmem:[#allocation2 + $0x58] sm:$0xf]  ;;  %1018 = vst [vmem:[#allocation2 + $0x110] sm:$0xf] %v1017_v24  ;;  %v1020_v54 = vsel %vm11302_vm2, %v755_v23, %v1019_v45 }
 0x14f   : > { %v1630_v20 = vrot.slane %v1629_v21, 4  ;;  %v2385_v3 = vld [vmem:[#allocation2 + $0x5c] sm:$0x1]  ;;  %v2386_v57 = vld [vmem:[#allocation2 + $0x60] sm:$0xf]  ;;  %v2545_v49 = vshrl.u32 %v2384_v39, 16  ;;  %v12292_v12 = vsel %vm11432_vm11, %v10043_v41, %v2056_v46 }
 0x150   : > { %v3556_v42 = vld [vmem:[#allocation2 + $0x10c] sm:$0x1]  ;;  %1021 = vst [vmem:[#allocation2 + $0x114] sm:$0x1] %v1020_v54  ;;  %v762_v28 = vor.u32 %v760_v61, %v12281_v47  ;;  %v10044_v15 = vrot.slane %v1873_v37, 9  ;;  %v1644_v18 = vrot.slane %v1643_v11, 4 }
 0x151   : > { %v3013_v6 = vld [vmem:[#allocation2 + $0x10c] sm:$0x1]  ;;  %v3929_v50 = vshll.u32 %v3556_v42, 16  ;;  %v4475_v16 = vld [vmem:[#allocation3 + $0x50] sm:$0xff]  ;;  %v1635_v8 = vsel %vm11470_vm12, %v1630_v20, %v1634_v56  ;;  %v2387_v51 = vld [vmem:[#allocation2 + $0x64] sm:$0x1] }
 0x152   : > { %v1246_v10 = vld [vmem:[#allocation2 + $0x10c] sm:$0x1]  ;;  %v3194_v52 = vrot.slane %v3013_v6, 5  ;;  %4768 = vmatprep.mubr.bf16.mxu0 %v4475_v16  ;;  %v1022_v26 = vld [vmem:[#allocation2 + $0x118] sm:$0xf]  ;;  %v2547_v30 = vrot.slane %v2545_v49, 4 }
 0x153   : > { %v1874_v1 = vld [vmem:[#allocation2 + $0x10c] sm:$0x1]  ;;  %v1646_v22 = vshll.u32 %v1246_v10, 16  ;;  %v3931_v23 = vrot.slane %v3929_v50, 5  ;;  %v2548_v19 = vshll.u32 %v2384_v39, 16  ;;  %v2554_v29 = vshll.u32 %v2385_v3, 16  ;;  %4769 = vmatmul.mubr.bf16.gmra.mrb[12].mxu0 %v4474_v48 }
 0x154   : > { %v2060_v63 = vrot.slane %v1874_v1, 5  ;;  %v3195_v33 = vsel %vm11432_vm11, %v10123_v62, %v3194_v52  ;;  %v1023_v9 = vsel %vm11360_vm6, %v762_v28, %v1022_v26  ;;  %v2559_v40 = vshrl.u32 %v2386_v57, 16  ;;  %v11050_v24 = vld [vmem:[#allocation2 + $0x50] ss:$8 sps:$4 sm:$0xff]   ;;  %v488_v58 = vld [vmem:[#allocation2 + $0x11c] sm:$0x1] }
 0x155   : > { %v1648_v61 = vrot.slane %v1646_v22, 5  ;;  %v3932_v21 = vsel %vm11470_vm12, %v12273_v36, %v3931_v23  ;;  %1024 = vst [vmem:[#allocation2 + $0x118] sm:$0xf] %v1023_v9  ;;  %v2550_v41 = vrot.slane %v2548_v19, 5  ;;  %v2556_v46 = vrot.slane %v2554_v29, 5  ;;  %1179 = vst.msk [vmem:[#allocation3 + $0x60] sm:$0xff] %vm1174_vm13, %v11050_v24 }
 0x156   : > { %v2061_v37 = vsel %vm11432_vm11, %v10044_v15, %v2060_v63  ;;  %v10173_v45 = vcombine.low %v3918_v7, %v3932_v21  ;;  %v3014_v56 = vld [vmem:[#allocation2 + $0x110] sm:$0xe]  ;;  %v2561_v11 = vrot.slane %v2559_v40, 4  ;;  %v2562_v39 = vshll.u32 %v2386_v57, 16  ;;  %1807 = vst.msk [vmem:[#allocation3 + $0x60] sm:$0xff] %vm1802_vm14, %v12155_v60  ;;  %v12319_v57 = vpop.permute.xlu0 %3453  ;;  %v12326_v60 = vpop.permute.xlu1 %2315 }
 0x157   : > { %v1649_v62 = vsel %vm11470_vm12, %v1644_v18, %v1648_v61  ;;  %v3015_v48 = vld [vmem:[#allocation2 + $0x114] sm:$0x1]  ;;  %v10124_v54 = vrot.slane %v3014_v56, 9  ;;  %v2551_v3 = vor.u32 %v2550_v41, %v2547_v30  ;;  %v2568_v36 = vshll.u32 %v2387_v51, 16  ;;  %v3557_v49 = vld [vmem:[#allocation2 + $0x110] sm:$0xf] }
 0x158   : > { %v10014_v20 = vcombine.low %v1635_v8, %v1649_v62  ;;  %4089 = vrot.lane.b32.xlu0 %v10173_v45, %s11206_s19  ;;  %v3198_v42 = vrot.slane %v3015_v48, 5  ;;  %v2564_v6 = vrot.slane %v2562_v39, 5  ;;  %v489_v7 = vsel %vm11318_vm4, 0, %v488_v58  ;;  %v4137_v15 = vld [vmem:[#allocation2 + $0x30] sm:$0xe]  ;;  %2179 = vst.msk [vmem:[#allocation3 + $0x60] sm:$0xff] %vm2174_vm15, %v12175_v38 }
 0x159   : > { %v3934_v10 = vshrl.u32 %v3557_v49, 16  ;;  %v763_v28 = vrot.slane %v12281_v47, 4  ;;  %v10062_v50 = vcombine.low %v12292_v12, %v2061_v37  ;;  %v2552_v52 = vrot.slane %v2551_v3, 4  ;;  %490 = vst [vmem:[#allocation2 + $0x11c] sm:$0x1] %v489_v7  ;;  %2356 = vst.msk [vmem:[#allocation3 + $0x60] sm:$0xff] %vm2351_vm0, %v12197_v4 }
 0x15a   : > { %1780 = vrot.lane.b32.xlu1 %v10014_v20, %s11207_s20  ;;  %v3937_v1 = vshll.u32 %v3557_v49, 16  ;;  %v3199_v16 = vsel %vm11432_vm11, %v10124_v54, %v3198_v42  ;;  %v2565_v8 = vor.u32 %v2564_v6, %v2561_v11  ;;  %v2570_v18 = vrot.slane %v2568_v36, 5  ;;  %v3558_v22 = vld [vmem:[#allocation2 + $0x114] sm:$0x1]  ;;  %v4139_v51 = vld [vmem:[#allocation2 + $0x38] sm:$0xe]  ;;  %v12344_v54 = vpop.permute.xlu1 %1768 }
 0x15b   : > { %v4138_v63 = vld [vmem:[#allocation2 + $0x34] sm:$0x1]  ;;  %v10181_v47 = vrot.slane %v4137_v15, 9  ;;  %v10142_v12 = vcombine.low %v3195_v33, %v3199_v16  ;;  %v3936_v23 = vrot.slane %v3934_v10, 4  ;;  %v4140_v30 = vld [vmem:[#allocation2 + $0x3c] sm:$0x1]  ;;  %v2557_v38 = vsel %vm11470_vm12, %v2552_v52, %v2556_v46  ;;  %v12340_v46 = vpop.permute.xlu0 %4077 }
 0x15c   : > { %v3939_v26 = vrot.slane %v3937_v1, 5  ;;  %v11049_v19 = vld [vmem:[#allocation2 + $0x110] ss:$8 sps:$4 sm:$0xff]   ;;  %v2566_v29 = vrot.slane %v2565_v8, 4  ;;  %v4275_v61 = vrot.slane %v4138_v63, 5  ;;  %v10182_v40 = vrot.slane %v4139_v51, 9 }
 0x15d   : > { %3290 = vrot.lane.b32.xlu0 %v10142_v12, %s11207_s20  ;;  %v3559_v9 = vld [vmem:[#allocation2 + $0x118] sm:$0xf]  ;;  %v4279_v21 = vrot.slane %v4140_v30, 5  ;;  %v11051_v24 = vld [vmem:[#allocation2 + $0x108] ss:$8 sps:$4 sm:$0xff]   ;;  %v3943_v56 = vshll.u32 %v3558_v22, 16 }
 0x15e   : > { %2152 = vrot.lane.b32.xlu1 %v10062_v50, %s11205_s18  ;;  %v2571_v4 = vsel %vm11470_vm12, %v2566_v29, %v2570_v18  ;;  %v3948_v33 = vshrl.u32 %v3559_v9, 16  ;;  %v3951_v37 = vshll.u32 %v3559_v9, 16  ;;  %v4276_v41 = vsel %vm11432_vm11, %v10181_v47, %v4275_v61  ;;  %v4141_v58 = vld [vmem:[#allocation2 + $0x40] sm:$0xe]  ;;  %v4142_v11 = vld [vmem:[#allocation2 + $0x44] sm:$0x1] }
 0x15f   : > { %v10085_v45 = vcombine.low %v2557_v38, %v2571_v4  ;;  %v4280_v62 = vsel %vm11432_vm11, %v10182_v40, %v4279_v21  ;;  %v4143_v39 = vld [vmem:[#allocation2 + $0x48] sm:$0xe]  ;;  %v10183_v48 = vrot.slane %v4141_v58, 9  ;;  %v3940_v3 = vor.u32 %v3939_v26, %v3936_v23  ;;  %v4144_v6 = vld [vmem:[#allocation2 + $0x4c] sm:$0x1]  ;;  %v12373_v38 = vpop.permute.xlu0 %3278  ;;  %v12375_v21 = vpop.permute.xlu1 %2140 }
 0x160   : > { %v1025_v20 = vld [vmem:[#allocation2 + $0x11c] sm:$0x1]  ;;  %v3950_v36 = vrot.slane %v3948_v33, 4  ;;  %v3953_v49 = vrot.slane %v3951_v37, 5  ;;  %v10211_v42 = vcombine.low %v4276_v41, %v4280_v62  ;;  %v4283_v10 = vrot.slane %v4142_v11, 5 }
 0x161   : > { %3467 = vrot.lane.b32.xlu0 %v11049_v19, %s11205_s18  ;;  %2948 = vst.msk [vmem:[#allocation3 + $0x68] sm:$0xff] %vm1174_vm13, %v10085_v45  ;;  %v1026_v7 = vsel %vm11302_vm2, %v763_v28, %v1025_v20  ;;  %v10184_v50 = vrot.slane %v4143_v39, 9  ;;  %v393_v52 = vld [vmem:[#allocation2 + $0x120] sm:$0x1]  ;;  %v491_v1 = vld [vmem:[#allocation2 + $0x124] sm:$0x1] }
 0x162   : > { %2329 = vrot.lane.b32.xlu1 %v11051_v24, %s11206_s19  ;;  %3316 = vst.msk [vmem:[#allocation3 + $0x68] sm:$0xff] %vm1802_vm14, %v12170_v27  ;;  %1027 = vst [vmem:[#allocation2 + $0x11c] sm:$0x1] %v1026_v7  ;;  %v3954_v15 = vor.u32 %v3953_v49, %v3950_v36  ;;  %v4287_v16 = vrot.slane %v4144_v6, 5  ;;  %v394_v8 = vsel %vm11302_vm2, 0, %v393_v52  ;;  %v492_v28 = vsel %vm11318_vm4, 0, %v491_v1 }
 0x163   : > { %4451 = vst.msk [vmem:[#allocation3 + $0x40] sm:$0xff] %vm1174_vm13, %v10211_v42  ;;  %v529_v18 = vld [vmem:[%s11329_s17 + $0x74] sm:$0xf]  ;;  %v12359_v22 = vrot.slane %v3943_v56, 5  ;;  %v4284_v63 = vsel %vm11432_vm11, %v10183_v48, %v4283_v10  ;;  %395 = vst [vmem:[#allocation2 + $0x120] sm:$0x1] %v394_v8 }
 0x164   : > { %3493 = vst.msk [vmem:[#allocation3 + $0x68] sm:$0xff] %vm2174_vm15, %v12192_v17  ;;  %493 = vst [vmem:[#allocation2 + $0x124] sm:$0x1] %v492_v28  ;;  %v765_v27 = vshrl.u32 %v529_v18, 16  ;;  %v768_v51 = vshll.u32 %v529_v18, 16  ;;  %v12365_v12 = vrot.slane %v3940_v3, 4  ;;  %v4288_v26 = vsel %vm11432_vm11, %v10184_v50, %v4287_v16  ;;  %v12389_v28 = vpop.permute.xlu0 %3455 }
 0x165   : > { %v1247_v47 = vld [vmem:[#allocation2 + $0x110] sm:$0xf]  ;;  %v12367_v23 = vrot.slane %v3954_v15, 4  ;;  %v1248_v30 = vld [vmem:[#allocation2 + $0x114] sm:$0x1]  ;;  %4117 = vst.msk [vmem:[#allocation3 + $0x68] sm:$0xff] %vm2351_vm0, %v12206_v35  ;;  %v10212_v17 = vcombine.low %v4284_v63, %v4288_v26 }
 0x166   : > { %v1249_v19 = vld [vmem:[#allocation2 + $0x118] sm:$0xf]  ;;  %v767_v29 = vrot.slane %v765_v27, 7  ;;  %v1651_v61 = vshrl.u32 %v1247_v47, 16  ;;  %v1654_v9 = vshll.u32 %v1247_v47, 16  ;;  %v1660_v4 = vshll.u32 %v1248_v30, 16  ;;  %v12397_v30 = vpop.permute.xlu1 %2317 }
 0x167   : > { %v396_v40 = vld [vmem:[#allocation2 + $0x128] sm:$0x1]  ;;  %v1665_v33 = vshrl.u32 %v1249_v19, 16  ;;  %v1668_v37 = vshll.u32 %v1249_v19, 16  ;;  %v530_v24 = vld [vmem:[%s11329_s17 + $0x78] sm:$0xf]  ;;  %v3946_v19 = vsel %vm11470_vm12, %v12365_v12, %v12359_v22 }
 0x168   : > { %v397_v41 = vsel %vm11302_vm2, 0, %v396_v40  ;;  %4452 = vst.msk [vmem:[#allocation3 + $0x58] sm:$0xff] %vm1174_vm13, %v10212_v17  ;;  %v770_v58 = vor.u32 %v768_v51, %v767_v29  ;;  %v771_v35 = vrot.slane %v767_v29, 4  ;;  %v12381_v45 = vld [vmem:[#allocation2 + $0x118] sm:$0xe]  ;;  %v1653_v56 = vrot.slane %v1651_v61, 4 }
 0x169   : > { %v1656_v62 = vrot.slane %v1654_v9, 5  ;;  %398 = vst [vmem:[#allocation2 + $0x128] sm:$0x1] %v397_v41  ;;  %v12383_v11 = vrot.slane %v1660_v4, 5  ;;  %v1667_v39 = vrot.slane %v1665_v33, 4  ;;  %v1670_v48 = vrot.slane %v1668_v37, 5 }
 0x16a   : > { %v773_v20 = vshrl.u32 %v530_v24, 16  ;;  %v1875_v3 = vld [vmem:[#allocation2 + $0x110] sm:$0xe]  ;;  %v3560_v36 = vld [vmem:[#allocation2 + $0x11c] sm:$0x1]  ;;  %v4473_v49 = vld [vmem:[#allocation3 + $0x40] sm:$0xff] }
 0x16b   : > { %v12385_v42 = vld [vmem:[#allocation2 + $0x11c] sm:$0x1]  ;;  %v1657_v6 = vor.u32 %v1656_v62, %v1653_v56  ;;  %v776_v7 = vshll.u32 %v530_v24, 16  ;;  %v1876_v10 = vld [vmem:[#allocation2 + $0x114] sm:$0x1]  ;;  %v4477_v50 = vld [vmem:[#allocation3 + $0x60] sm:$0xff]  ;;  %10879 = vmatprep.mubr.msk.bf16.mxu1 %vm1174_vm13, %v4473_v49  ;;  %v1671_v8 = vor.u32 %v1670_v48, %v1667_v39 }
 0x16c   : > { %v3957_v52 = vshll.u32 %v3560_v36, 16  ;;  %v1028_v1 = vld [vmem:[#allocation2 + $0x120] sm:$0xf]  ;;  %v1031_v15 = vld [vmem:[#allocation2 + $0x124] sm:$0x1]  ;;  %v10125_v16 = vrot.slane %v12381_v45, 9 }
 0x16d   : > { %v1029_v18 = vsel %vm11360_vm6, %v770_v58, %v1028_v1  ;;  %v1032_v63 = vsel %vm11302_vm2, %v771_v35, %v1031_v15  ;;  %v1250_v27 = vld [vmem:[#allocation2 + $0x11c] sm:$0x1]  ;;  %v1658_v51 = vrot.slane %v1657_v6, 4  ;;  %v12395_v47 = vrot.slane %v773_v20, 7  ;;  %v1877_v26 = vld [vmem:[#allocation2 + $0x118] sm:$0xe] }
 0x16e   : > { %v3959_v17 = vrot.slane %v3957_v52, 5  ;;  %1030 = vst [vmem:[#allocation2 + $0x120] sm:$0xf] %v1029_v18  ;;  %1033 = vst [vmem:[#allocation2 + $0x124] sm:$0x1] %v1032_v63  ;;  %v1672_v29 = vrot.slane %v1671_v8, 4  ;;  %v12423_v18 = vpop.permute.xlu1 %1770 }
 0x16f   : > { %v1674_v61 = vshll.u32 %v1250_v27, 16  ;;  %v1878_v9 = vld [vmem:[#allocation2 + $0x11c] sm:$0x1]  ;;  %v4478_v40 = vld [vmem:[#allocation3 + $0x68] sm:$0xff]  ;;  %v3202_v4 = vrot.slane %v12385_v42, 5  ;;  %v1663_v33 = vsel %vm11470_vm12, %v1658_v51, %v12383_v11  ;;  %v778_v37 = vor.u32 %v776_v7, %v12395_v47  ;;  %v12418_v7 = vpop.permute.xlu0 %4079 }
 0x170   : > { %v10045_v41 = vrot.slane %v1875_v3, 9  ;;  %v2388_v24 = vld [vmem:[#allocation2 + $0x68] sm:$0xf]  ;;  %v2389_v58 = vld [vmem:[#allocation2 + $0x6c] sm:$0x1]  ;;  %4776 = vmatprep.mubr.bf16.mxu0 %v4478_v40  ;;  %v3960_v22 = vsel %vm11470_vm12, %v12367_v23, %v3959_v17  ;;  %v4476_v12 = vld [vmem:[#allocation3 + $0x58] sm:$0xff] }
 0x171   : > { %v1676_v35 = vrot.slane %v1674_v61, 5  ;;  %v1034_v45 = vld [vmem:[#allocation2 + $0x128] sm:$0xf]  ;;  %v2064_v56 = vrot.slane %v1876_v10, 5  ;;  %v10046_v62 = vrot.slane %v1877_v26, 9  ;;  %4777 = vmatmul.mubr.bf16.gmra.mrb[16].mxu0 %v4477_v50  ;;  %v10174_v39 = vcombine.low %v3946_v19, %v3960_v22  ;;  %10880 = vmatmul.mubr.msk.bf16.gmra.mrb[4].mxu1 %vm1174_vm13, %v4476_v12 }
 0x172   : > { %v1035_v11 = vsel %vm11360_vm6, %v778_v37, %v1034_v45  ;;  %v2068_v48 = vrot.slane %v1878_v9, 5  ;;  %v2390_v20 = vld [vmem:[#allocation2 + $0x70] sm:$0xf]  ;;  %v2573_v3 = vshrl.u32 %v2388_v24, 16  ;;  %v2391_v49 = vld [vmem:[#allocation2 + $0x74] sm:$0x1]  ;;  %v3203_v17 = vsel %vm11432_vm11, %v10125_v16, %v3202_v4 }
 0x173   : > { %v1677_v36 = vsel %vm11470_vm12, %v1672_v29, %v1676_v35  ;;  %1036 = vst [vmem:[#allocation2 + $0x128] sm:$0xf] %v1035_v11  ;;  %v2065_v23 = vsel %vm11432_vm11, %v10045_v41, %v2064_v56  ;;  %v2576_v42 = vshll.u32 %v2388_v24, 16  ;;  %v2582_v6 = vshll.u32 %v2389_v58, 16  ;;  %4091 = vrot.lane.b32.xlu0 %v10174_v39, %s11206_s19  ;;  %v11053_v15 = vld [vmem:[#allocation2 + $0x60] ss:$8 sps:$4 sm:$0xff]  }
 0x174   : > { %v10015_v10 = vcombine.low %v1663_v33, %v1677_v36  ;;  %v2069_v50 = vsel %vm11432_vm11, %v10046_v62, %v2068_v48  ;;  %v2575_v52 = vrot.slane %v2573_v3, 4  ;;  %v2587_v1 = vshrl.u32 %v2390_v20, 16  ;;  %v494_v8 = vld [vmem:[#allocation2 + $0x12c] sm:$0x1]  ;;  %1180 = vst.msk [vmem:[#allocation3 + $0x78] sm:$0xff] %vm1174_vm13, %v11053_v15 }
 0x175   : > { %v2578_v63 = vrot.slane %v2576_v42, 5  ;;  %v2584_v27 = vrot.slane %v2582_v6, 5  ;;  %v2590_v51 = vshll.u32 %v2390_v20, 16  ;;  %v3018_v26 = vld [vmem:[#allocation2 + $0x120] sm:$0xe]  ;;  %v10063_v29 = vcombine.low %v2065_v23, %v2069_v50  ;;  %1808 = vst.msk [vmem:[#allocation3 + $0x78] sm:$0xff] %vm1802_vm14, %v12208_v59  ;;  %v12439_v59 = vpop.permute.xlu0 %3280 }
 0x176   : > { %v3019_v19 = vld [vmem:[#allocation2 + $0x124] sm:$0x1]  ;;  %1782 = vrot.lane.b32.xlu1 %v10015_v10, %s11207_s20  ;;  %v10126_v61 = vrot.slane %v3018_v26, 9  ;;  %v2589_v33 = vrot.slane %v2587_v1, 4  ;;  %v3561_v37 = vld [vmem:[#allocation2 + $0x120] sm:$0xf] }
 0x177   : > { %v3206_v9 = vrot.slane %v3019_v19, 5  ;;  %v2579_v40 = vor.u32 %v2578_v63, %v2575_v52  ;;  %v2592_v41 = vrot.slane %v2590_v51, 5  ;;  %v2596_v24 = vshll.u32 %v2391_v49, 16  ;;  %v3562_v22 = vld [vmem:[#allocation2 + $0x124] sm:$0x1]  ;;  %2180 = vst.msk [vmem:[#allocation3 + $0x78] sm:$0xff] %vm2174_vm15, %v12231_v32  ;;  %v12442_v32 = vpop.permute.xlu1 %2142 }
 0x178   : > { %v495_v58 = vsel %vm11318_vm4, 0, %v494_v8  ;;  %v3962_v16 = vshrl.u32 %v3561_v37, 16  ;;  %v3965_v35 = vshll.u32 %v3561_v37, 16  ;;  %v3971_v45 = vshll.u32 %v3562_v22, 16  ;;  %2357 = vst.msk [vmem:[#allocation3 + $0x78] sm:$0xff] %vm2351_vm0, %v12256_v2 }
 0x179   : > { %v3207_v4 = vsel %vm11432_vm11, %v10126_v61, %v3206_v9  ;;  %v2580_v12 = vrot.slane %v2579_v40, 4  ;;  %496 = vst [vmem:[#allocation2 + $0x12c] sm:$0x1] %v495_v58  ;;  %v2593_v39 = vor.u32 %v2592_v41, %v2589_v33  ;;  %v2598_v11 = vrot.slane %v2596_v24, 5  ;;  %v11054_v23 = vld [vmem:[#allocation2 + $0x118] ss:$8 sps:$4 sm:$0xff]   ;;  %v12462_v40 = vpop.permute.xlu0 %3457 }
 0x17a   : > { %v10143_v56 = vcombine.low %v3203_v17, %v3207_v4  ;;  %v11052_v62 = vld [vmem:[#allocation2 + $0x120] ss:$8 sps:$4 sm:$0xff]   ;;  %2154 = vrot.lane.b32.xlu1 %v10063_v29, %s11205_s18  ;;  %v3964_v48 = vrot.slane %v3962_v16, 4  ;;  %v779_v20 = vrot.slane %v12395_v47, 4  ;;  %v3967_v36 = vrot.slane %v3965_v35, 5 }
 0x17b   : > { %v3563_v3 = vld [vmem:[#allocation2 + $0x128] sm:$0xf]  ;;  %v2585_v2 = vsel %vm11470_vm12, %v2580_v12, %v2584_v27  ;;  %v2594_v49 = vrot.slane %v2593_v39, 4  ;;  %v399_v10 = vld [vmem:[#allocation2 + $0x130] sm:$0x1]  ;;  %v12448_v52 = vrot.slane %v3971_v45, 5  ;;  %v12466_v58 = vpop.permute.xlu1 %2319 }
 0x17c   : > { %3292 = vrot.lane.b32.xlu0 %v10143_v56, %s11207_s20  ;;  %v3976_v42 = vshrl.u32 %v3563_v3, 16  ;;  %v3979_v6 = vshll.u32 %v3563_v3, 16  ;;  %v3968_v50 = vor.u32 %v3967_v36, %v3964_v48  ;;  %v400_v1 = vsel %vm11302_vm2, 0, %v399_v10  ;;  %v497_v15 = vld [vmem:[#allocation2 + $0x134] sm:$0x1] }
 0x17d   : > { %v531_v47 = vld [vmem:[%s11329_s17 + $0x7c] sm:$0xf]  ;;  %v2599_v8 = vsel %vm11470_vm12, %v2594_v49, %v2598_v11  ;;  %401 = vst [vmem:[#allocation2 + $0x130] sm:$0x1] %v400_v1  ;;  %v498_v27 = vsel %vm11318_vm4, 0, %v497_v15  ;;  %v12481_v15 = vpop.permute.xlu0 %4081  ;;  %vm9829_vm3 = vcmask 1042434  }
 0x17e   : > { %v3978_v63 = vrot.slane %v3976_v42, 4  ;;  %v3981_v51 = vrot.slane %v3979_v6, 5  ;;  %2331 = vrot.lane.b32.xlu1 %v11054_v23, %s11206_s19  ;;  %v12458_v26 = vld [vmem:[#allocation2 + $0x128] sm:$0xe]  ;;  %v10086_v19 = vcombine.low %v2585_v2, %v2599_v8  ;;  %v12460_v17 = vrot.slane %v3968_v50, 4 }
 0x17f   : > { %499 = vst [vmem:[#allocation2 + $0x134] sm:$0x1] %v498_v27  ;;  %v781_v29 = vshrl.u32 %v531_v47, 16  ;;  %v784_v61 = vshll.u32 %v531_v47, 16  ;;  %v1251_v9 = vld [vmem:[#allocation2 + $0x120] sm:$0xf]  ;;  %v12485_v27 = vpop.permute.xlu1 %1772 }
 0x180   : > { %3469 = vrot.lane.b32.xlu0 %v11052_v62, %s11205_s18  ;;  %v1037_v33 = vld [vmem:[#allocation2 + $0x12c] sm:$0x1]  ;;  %v3982_v37 = vor.u32 %v3981_v51, %v3978_v63  ;;  %v10127_v41 = vrot.slane %v12458_v26, 9  ;;  %v1252_v24 = vld [vmem:[#allocation2 + $0x124] sm:$0x1]  ;;  %v1679_v13 = vshrl.u32 %v1251_v9, 16 }
 0x181   : > { %2949 = vst.msk [vmem:[#allocation3 + $0x80] sm:$0xff] %vm1174_vm13, %v10086_v19  ;;  %v1038_v22 = vsel %vm11302_vm2, %v779_v20, %v1037_v33  ;;  %v783_v16 = vrot.slane %v781_v29, 7  ;;  %v1253_v4 = vld [vmem:[#allocation2 + $0x128] sm:$0xf]  ;;  %v1682_v12 = vshll.u32 %v1251_v9, 16  ;;  %v1688_v56 = vshll.u32 %v1252_v24, 16 }
 0x182   : > { %3317 = vst.msk [vmem:[#allocation3 + $0x80] sm:$0xff] %vm1802_vm14, %v12225_v5  ;;  %1039 = vst [vmem:[#allocation2 + $0x12c] sm:$0x1] %v1038_v22  ;;  %v12473_v35 = vrot.slane %v3982_v37, 4  ;;  %v1681_v45 = vrot.slane %v1679_v13, 4  ;;  %v1693_v62 = vshrl.u32 %v1253_v4, 16 }
 0x183   : > { %v4145_v39 = vld [vmem:[#allocation2 + $0x60] sm:$0xe]  ;;  %3494 = vst.msk [vmem:[#allocation3 + $0x80] sm:$0xff] %vm2174_vm15, %v12251_v55  ;;  %v786_v11 = vor.u32 %v784_v61, %v783_v16  ;;  %v787_v48 = vrot.slane %v783_v16, 4  ;;  %v1684_v3 = vrot.slane %v1682_v12, 5  ;;  %v1696_v20 = vshll.u32 %v1253_v4, 16 }
 0x184   : > { %v4146_v36 = vld [vmem:[#allocation2 + $0x64] sm:$0x1]  ;;  %v12477_v23 = vrot.slane %v1688_v56, 5  ;;  %v1695_v2 = vrot.slane %v1693_v62, 4  ;;  %4118 = vst.msk [vmem:[#allocation3 + $0x80] sm:$0xff] %vm2351_vm0, %v12275_v14  ;;  %v10185_v50 = vrot.slane %v4145_v39, 9 }
 0x185   : > { %v4147_v5 = vld [vmem:[#allocation2 + $0x68] sm:$0xe]  ;;  %v4148_v49 = vld [vmem:[#allocation2 + $0x6c] sm:$0x1]  ;;  %v1040_v42 = vld [vmem:[#allocation2 + $0x130] sm:$0xf]  ;;  %v1685_v6 = vor.u32 %v1684_v3, %v1681_v45 }
 0x186   : > { %v1698_v10 = vrot.slane %v1696_v20, 5  ;;  %v4291_v1 = vrot.slane %v4146_v36, 5  ;;  %v1041_v55 = vsel %vm11360_vm6, %v786_v11, %v1040_v42  ;;  %v1043_v47 = vld [vmem:[#allocation2 + $0x134] sm:$0x1]  ;;  %v10186_v8 = vrot.slane %v4147_v5, 9  ;;  %v4480_v62 = vld [vmem:[#allocation3 + $0x78] sm:$0xff] }
 0x187   : > { %v4295_v63 = vrot.slane %v4148_v49, 5  ;;  %v1879_v51 = vld [vmem:[#allocation2 + $0x120] sm:$0xe]  ;;  %1042 = vst [vmem:[#allocation2 + $0x130] sm:$0xf] %v1041_v55  ;;  %v1044_v14 = vsel %vm11302_vm2, %v787_v48, %v1043_v47  ;;  %v1686_v19 = vrot.slane %v1685_v6, 4  ;;  %v3974_v36 = vsel %vm11470_vm12, %v12460_v17, %v12448_v52  ;;  %v12505_v17 = vpop.permute.xlu1 %2144 }
 0x188   : > { %v1699_v29 = vor.u32 %v1698_v10, %v1695_v2  ;;  %v4292_v61 = vsel %vm11432_vm11, %v10185_v50, %v4291_v1  ;;  %v1880_v9 = vld [vmem:[#allocation2 + $0x124] sm:$0x1]  ;;  %v1881_v33 = vld [vmem:[#allocation2 + $0x128] sm:$0xe]  ;;  %1045 = vst [vmem:[#allocation2 + $0x134] sm:$0x1] %v1044_v14  ;;  %v12500_v10 = vpop.permute.xlu0 %3282 }
 0x189   : > { %v4296_v37 = vsel %vm11432_vm11, %v10186_v8, %v4295_v63  ;;  %v10047_v24 = vrot.slane %v1879_v51, 9  ;;  %v2072_v13 = vrot.slane %v1880_v9, 5  ;;  %v10048_v22 = vrot.slane %v1881_v33, 9  ;;  %v4149_v16 = vld [vmem:[#allocation2 + $0x70] sm:$0xe] }
 0x18a   : > { %v3564_v4 = vld [vmem:[#allocation2 + $0x12c] sm:$0x1]  ;;  %v10213_v56 = vcombine.low %v4292_v61, %v4296_v37  ;;  %v1700_v48 = vrot.slane %v1699_v29, 4  ;;  %v4150_v49 = vld [vmem:[#allocation2 + $0x74] sm:$0x1]  ;;  %v10187_v6 = vrot.slane %v4149_v16, 9  ;;  %v1691_v1 = vsel %vm11470_vm12, %v1686_v19, %v12477_v23 }
 0x18b   : > { %v3021_v12 = vld [vmem:[#allocation2 + $0x12c] sm:$0x1]  ;;  %v3985_v39 = vshll.u32 %v3564_v4, 16  ;;  %v2073_v2 = vsel %vm11432_vm11, %v10047_v24, %v2072_v13  ;;  %v4151_v42 = vld [vmem:[#allocation2 + $0x78] sm:$0xe]  ;;  %v4299_v8 = vrot.slane %v4150_v49, 5 }
 0x18c   : > { %v1254_v45 = vld [vmem:[#allocation2 + $0x12c] sm:$0x1]  ;;  %v3210_v11 = vrot.slane %v3021_v12, 5  ;;  %4453 = vst.msk [vmem:[#allocation3 + $0x70] sm:$0xff] %vm1174_vm13, %v10213_v56  ;;  %v4152_v47 = vld [vmem:[#allocation2 + $0x7c] sm:$0x1] }
 0x18d   : > { %v1702_v3 = vshll.u32 %v1254_v45, 16  ;;  %v1882_v20 = vld [vmem:[#allocation2 + $0x12c] sm:$0x1]  ;;  %v3987_v50 = vrot.slane %v3985_v39, 5  ;;  %v4481_v52 = vld [vmem:[#allocation3 + $0x80] sm:$0xff]  ;;  %v10188_v14 = vrot.slane %v4151_v42, 9  ;;  %v4300_v26 = vsel %vm11432_vm11, %v10187_v6, %v4299_v8  ;;  %v12529_v42 = vpop.permute.xlu1 %2321 }
 0x18e   : > { %v2076_v5 = vrot.slane %v1882_v20, 5  ;;  %v3211_v63 = vsel %vm11432_vm11, %v10127_v41, %v3210_v11  ;;  %v4303_v29 = vrot.slane %v4152_v47, 5  ;;  %v2392_v61 = vld [vmem:[#allocation2 + $0x78] sm:$0xf]  ;;  %4784 = vmatprep.mubr.bf16.mxu0 %v4481_v52  ;;  %v3022_v19 = vld [vmem:[#allocation2 + $0x130] sm:$0xe]  ;;  %v12524_v20 = vpop.permute.xlu0 %3459 }
 0x18f   : > { %v1704_v55 = vrot.slane %v1702_v3, 5  ;;  %v3988_v23 = vsel %vm11470_vm12, %v12473_v35, %v3987_v50  ;;  %v2393_v41 = vld [vmem:[#allocation2 + $0x7c] sm:$0x1]  ;;  %4785 = vmatmul.mubr.bf16.gmra.mrb[20].mxu0 %v4480_v62  ;;  %v3023_v24 = vld [vmem:[#allocation2 + $0x134] sm:$0x1]  ;;  %v10128_v13 = vrot.slane %v3022_v19, 9 }
 0x190   : > { %v2077_v51 = vsel %vm11432_vm11, %v10048_v22, %v2076_v5  ;;  %v10175_v37 = vcombine.low %v3974_v36, %v3988_v23  ;;  %v4304_v16 = vsel %vm11432_vm11, %v10188_v14, %v4303_v29  ;;  %v2394_v4 = vld [vmem:[#allocation2 + $0x80] sm:$0xf]  ;;  %v3214_v12 = vrot.slane %v3023_v24, 5  ;;  %v2395_v45 = vld [vmem:[#allocation2 + $0x84] sm:$0x1] }
 0x191   : > { %v1705_v9 = vsel %vm11470_vm12, %v1700_v48, %v1704_v55  ;;  %v10064_v33 = vcombine.low %v2073_v2, %v2077_v51  ;;  %v10214_v35 = vcombine.low %v4300_v26, %v4304_v16  ;;  %v2601_v56 = vshrl.u32 %v2392_v61, 16  ;;  %v11055_v50 = vld [vmem:[#allocation2 + $0x130] ss:$8 sps:$4 sm:$0xff]   ;;  %v3566_v29 = vld [vmem:[#allocation2 + $0x134] sm:$0x1] }
 0x192   : > { %v10016_v22 = vcombine.low %v1691_v1, %v1705_v9  ;;  %v2604_v39 = vshll.u32 %v2392_v61, 16  ;;  %4093 = vrot.lane.b32.xlu0 %v10175_v37, %s11206_s19  ;;  %v2610_v11 = vshll.u32 %v2393_v41, 16  ;;  %v2615_v48 = vshrl.u32 %v2394_v4, 16  ;;  %v11056_v47 = vld [vmem:[#allocation2 + $0x70] ss:$8 sps:$4 sm:$0xff]  }
 0x193   : > { %v2618_v62 = vshll.u32 %v2394_v4, 16  ;;  %v2624_v3 = vshll.u32 %v2395_v45, 16  ;;  %v3215_v36 = vsel %vm11432_vm11, %v10128_v13, %v3214_v12  ;;  %v4479_v2 = vld [vmem:[#allocation3 + $0x70] sm:$0xff]  ;;  %4454 = vst.msk [vmem:[#allocation3 + $0x88] sm:$0xff] %vm1174_vm13, %v10214_v35  ;;  %v2603_v5 = vrot.slane %v2601_v56, 4  ;;  %1181 = vst.msk [vmem:[#allocation3 + $0x90] sm:$0xff] %vm1174_vm13, %v11056_v47 }
 0x194   : > { %1784 = vrot.lane.b32.xlu1 %v10016_v22, %s11207_s20  ;;  %v2606_v49 = vrot.slane %v2604_v39, 5  ;;  %v10144_v6 = vcombine.low %v3211_v63, %v3215_v36  ;;  %10883 = vmatprep.mubr.msk.bf16.mxu1 %vm1174_vm13, %v4479_v2  ;;  %v2617_v1 = vrot.slane %v2615_v48, 4  ;;  %v2612_v52 = vrot.slane %v2610_v11, 5  ;;  %v3565_v14 = vld [vmem:[#allocation2 + $0x130] sm:$0xf]  ;;  %1809 = vst.msk [vmem:[#allocation3 + $0x90] sm:$0xff] %vm1802_vm14, %v12277_v43  ;;  %v12545_v43 = vpop.permute.xlu1 %1774 }
 0x195   : > { %v2620_v55 = vrot.slane %v2618_v62, 5  ;;  %v2626_v51 = vrot.slane %v2624_v3, 5  ;;  %v3567_v23 = vld [vmem:[#allocation2 + $0x138] sm:$0xf]  ;;  %v3568_v63 = vld [vmem:[#allocation2 + $0x13c] sm:$0x1] }
 0x196   : > { %v2607_v8 = vor.u32 %v2606_v49, %v2603_v5  ;;  %3294 = vrot.lane.b32.xlu0 %v10144_v6, %s11207_s20  ;;  %v3990_v19 = vshrl.u32 %v3565_v14, 16  ;;  %v3993_v9 = vshll.u32 %v3565_v14, 16  ;;  %v3999_v41 = vshll.u32 %v3566_v29, 16  ;;  %2181 = vst.msk [vmem:[#allocation3 + $0x90] sm:$0xff] %vm2174_vm15, %v12298_v31  ;;  %v11057_v39 = vld [vmem:[#allocation2 + $0x128] ss:$8 sps:$4 sm:$0xff]  }
 0x197   : > { %v2621_v61 = vor.u32 %v2620_v55, %v2617_v1  ;;  %v4004_v37 = vshrl.u32 %v3567_v23, 16  ;;  %v4007_v24 = vshll.u32 %v3567_v23, 16  ;;  %v4013_v4 = vshll.u32 %v3568_v63, 16  ;;  %2358 = vst.msk [vmem:[#allocation3 + $0x90] sm:$0xff] %vm2351_vm0, %v12326_v60  ;;  %v2396_v3 = vld [vmem:[#allocation2 + $0x88] sm:$0xf] }
 0x198   : > { %2156 = vrot.lane.b32.xlu1 %v10064_v33, %s11205_s18  ;;  %v2608_v26 = vrot.slane %v2607_v8, 4  ;;  %v3992_v22 = vrot.slane %v3990_v19, 4  ;;  %v3995_v16 = vrot.slane %v3993_v9, 5  ;;  %v12539_v33 = vpop.permute.xlu0 %4083  ;;  %v4001_v35 = vrot.slane %v3999_v41, 5  ;;  %v2397_v36 = vld [vmem:[#allocation2 + $0x8c] sm:$0x1] }
 0x199   : > { %v2622_v13 = vrot.slane %v2621_v61, 4  ;;  %v4006_v45 = vrot.slane %v4004_v37, 4  ;;  %v4009_v56 = vrot.slane %v4007_v24, 5  ;;  %v4015_v62 = vrot.slane %v4013_v4, 5  ;;  %v2398_v49 = vld [vmem:[#allocation2 + $0x90] sm:$0xf] }
 0x19a   : > { %v2613_v12 = vsel %vm11470_vm12, %v2608_v26, %v2612_v52  ;;  %3471 = vrot.lane.b32.xlu0 %v11055_v50, %s11205_s18  ;;  %v4482_v11 = vld [vmem:[#allocation3 + $0x88] sm:$0xff]  ;;  %v3996_v48 = vor.u32 %v3995_v16, %v3992_v22  ;;  %v2399_v60 = vld [vmem:[#allocation2 + $0x94] sm:$0x1]  ;;  %v2629_v6 = vshrl.u32 %v2396_v3, 16  ;;  %v2632_v1 = vshll.u32 %v2396_v3, 16  ;;  %v12563_v22 = vpop.permute.xlu1 %2146 }
 0x19b   : > { %v2627_v31 = vsel %vm11470_vm12, %v2622_v13, %v2626_v51  ;;  %10884 = vmatmul.mubr.msk.bf16.gmra.mrb[8].mxu1 %vm1174_vm13, %v4482_v11  ;;  %v4010_v5 = vor.u32 %v4009_v56, %v4006_v45  ;;  %v2638_v50 = vshll.u32 %v2397_v36, 16  ;;  %v2643_v47 = vshrl.u32 %v2398_v49, 16  ;;  %v11058_v19 = vld [vmem:[#allocation2 + $0x80] ss:$8 sps:$4 sm:$0xff]   ;;  %v4154_v13 = vld [vmem:[#allocation2 + $0x84] sm:$0x1] }
 0x19c   : > { %v10087_v2 = vcombine.low %v2613_v12, %v2627_v31  ;;  %2333 = vrot.lane.b32.xlu1 %v11057_v39, %s11206_s19  ;;  %v3997_v55 = vrot.slane %v3996_v48, 4  ;;  %v2646_v8 = vshll.u32 %v2398_v49, 16  ;;  %v2631_v51 = vrot.slane %v2629_v6, 4  ;;  %v12557_v9 = vpop.permute.xlu0 %3284  ;;  %v4153_v24 = vld [vmem:[#allocation2 + $0x80] sm:$0xe]  ;;  %1182 = vst.msk [vmem:[#allocation3 + $0xa8] sm:$0xff] %vm1174_vm13, %v11058_v19 }
 0x19d   : > { %v4011_v52 = vrot.slane %v4010_v5, 4  ;;  %v2634_v14 = vrot.slane %v2632_v1, 5  ;;  %v2652_v29 = vshll.u32 %v2399_v60, 16  ;;  %v2645_v23 = vrot.slane %v2643_v47, 4  ;;  %v4155_v12 = vld [vmem:[#allocation2 + $0x88] sm:$0xe] }
 0x19e   : > { %2950 = vst.msk [vmem:[#allocation3 + $0x98] sm:$0xff] %vm1174_vm13, %v10087_v2  ;;  %v4002_v61 = vsel %vm11470_vm12, %v3997_v55, %v4001_v35  ;;  %v2648_v63 = vrot.slane %v2646_v8, 5  ;;  %v2640_v37 = vrot.slane %v2638_v50, 5  ;;  %v4156_v35 = vld [vmem:[#allocation2 + $0x8c] sm:$0x1]  ;;  %v10189_v45 = vrot.slane %v4153_v24, 9 }
 0x19f   : > { %3318 = vst.msk [vmem:[#allocation3 + $0x98] sm:$0xff] %vm1802_vm14, %v12296_v25  ;;  %v4016_v26 = vsel %vm11470_vm12, %v4011_v52, %v4015_v62  ;;  %v2635_v41 = vor.u32 %v2634_v14, %v2631_v51  ;;  %v2654_v4 = vrot.slane %v2652_v29, 5  ;;  %1810 = vst.msk [vmem:[#allocation3 + $0xa8] sm:$0xff] %vm1802_vm14, %v12344_v54  ;;  %v10190_v39 = vrot.slane %v4155_v12, 9  ;;  %v4157_v31 = vld [vmem:[#allocation2 + $0x90] sm:$0xe] }
 0x1a0   : > { %3495 = vst.msk [vmem:[#allocation3 + $0x98] sm:$0xff] %vm2174_vm15, %v12319_v57  ;;  %v10176_v25 = vcombine.low %v4002_v61, %v4016_v26  ;;  %v2649_v16 = vor.u32 %v2648_v63, %v2645_v23  ;;  %v4307_v57 = vrot.slane %v4154_v13, 5  ;;  %v4311_v11 = vrot.slane %v4156_v35, 5  ;;  %2182 = vst.msk [vmem:[#allocation3 + $0xa8] sm:$0xff] %vm2174_vm15, %v12375_v21  ;;  %v4159_v62 = vld [vmem:[#allocation2 + $0x98] sm:$0xe]  ;;  %v12583_v8 = vpop.permute.xlu0 %3461  ;;  %v12587_v61 = vpop.permute.xlu1 %2323 }
 0x1a1   : > { %4119 = vst.msk [vmem:[#allocation3 + $0x98] sm:$0xff] %vm2351_vm0, %v12340_v46  ;;  %v2636_v56 = vrot.slane %v2635_v41, 4  ;;  %v4158_v46 = vld [vmem:[#allocation2 + $0x94] sm:$0x1]  ;;  %v10191_v3 = vrot.slane %v4157_v31, 9  ;;  %2359 = vst.msk [vmem:[#allocation3 + $0xa8] sm:$0xff] %vm2351_vm0, %v12397_v30 }
 0x1a2   : > { %4095 = vrot.lane.b32.xlu0 %v10176_v25, %s11206_s19  ;;  %v2650_v48 = vrot.slane %v2649_v16, 4  ;;  %v4308_v2 = vsel %vm11432_vm11, %v10189_v45, %v4307_v57  ;;  %v4312_v54 = vsel %vm11432_vm11, %v10190_v39, %v4311_v11  ;;  %v4160_v5 = vld [vmem:[#allocation2 + $0x9c] sm:$0x1]  ;;  %v4315_v49 = vrot.slane %v4158_v46, 5  ;;  %v2400_v60 = vld [vmem:[#allocation2 + $0xa8] sm:$0xf] }
 0x1a3   : > { %v2641_v36 = vsel %vm11470_vm12, %v2636_v56, %v2640_v37  ;;  %v10215_v6 = vcombine.low %v4308_v2, %v4312_v54  ;;  %v10192_v1 = vrot.slane %v4159_v62, 9  ;;  %v4319_v55 = vrot.slane %v4160_v5, 5  ;;  %v2401_v50 = vld [vmem:[#allocation2 + $0xac] sm:$0x1]  ;;  %v2402_v47 = vld [vmem:[#allocation2 + $0xb0] sm:$0xf] }
 0x1a4   : > { %v2655_v21 = vsel %vm11470_vm12, %v2650_v48, %v2654_v4  ;;  %v4316_v51 = vsel %vm11432_vm11, %v10191_v3, %v4315_v49  ;;  %v2403_v14 = vld [vmem:[#allocation2 + $0xb4] sm:$0x1]  ;;  %v2657_v29 = vshrl.u32 %v2400_v60, 16  ;;  %v2660_v30 = vshll.u32 %v2400_v60, 16  ;;  %v11059_v4 = vld [vmem:[#allocation2 + $0xa0] ss:$8 sps:$4 sm:$0xff]   ;;  %v12607_v60 = vpop.permute.xlu1 %1776 }
 0x1a5   : > { %v10088_v52 = vcombine.low %v2641_v36, %v2655_v21  ;;  %v4483_v23 = vld [vmem:[#allocation3 + $0x90] sm:$0xff]  ;;  %4455 = vst.msk [vmem:[#allocation3 + $0xa0] sm:$0xff] %vm1174_vm13, %v10215_v6  ;;  %v4320_v63 = vsel %vm11432_vm11, %v10192_v1, %v4319_v55  ;;  %v2666_v19 = vshll.u32 %v2401_v50, 16  ;;  %v2671_v26 = vshrl.u32 %v2402_v47, 16  ;;  %v2404_v56 = vld [vmem:[#allocation2 + $0xb8] sm:$0xf]  ;;  %v12603_v36 = vpop.permute.xlu0 %4085 }
 0x1a6   : > { %v2674_v41 = vshll.u32 %v2402_v47, 16  ;;  %v10216_v24 = vcombine.low %v4316_v51, %v4320_v63  ;;  %v2659_v13 = vrot.slane %v2657_v29, 4  ;;  %v2662_v25 = vrot.slane %v2660_v30, 5  ;;  %1183 = vst.msk [vmem:[#allocation3 + $0xc0] sm:$0xff] %vm1174_vm13, %v11059_v4  ;;  %v2405_v11 = vld [vmem:[#allocation2 + $0xbc] sm:$0x1] }
 0x1a7   : > { %2951 = vst.msk [vmem:[#allocation3 + $0xb0] sm:$0xff] %vm1174_vm13, %v10088_v52  ;;  %v2680_v16 = vshll.u32 %v2403_v14, 16  ;;  %v2668_v12 = vrot.slane %v2666_v19, 5  ;;  %v2673_v35 = vrot.slane %v2671_v26, 4  ;;  %v2406_v31 = vld [vmem:[#allocation2 + $0xc0] sm:$0xf] }
 0x1a8   : > { %v4484_v37 = vld [vmem:[#allocation3 + $0x98] sm:$0xff]  ;;  %3319 = vst.msk [vmem:[#allocation3 + $0xb0] sm:$0xff] %vm1802_vm14, %v12373_v38  ;;  %v2676_v45 = vrot.slane %v2674_v41, 5  ;;  %v2663_v57 = vor.u32 %v2662_v25, %v2659_v13  ;;  %v2685_v48 = vshrl.u32 %v2404_v56, 16  ;;  %1811 = vst.msk [vmem:[#allocation3 + $0xc0] sm:$0xff] %vm1802_vm14, %v12423_v18  ;;  %v2688_v62 = vshll.u32 %v2404_v56, 16 }
 0x1a9   : > { %4792 = vmatprep.mubr.bf16.mxu0 %v4484_v37  ;;  %3496 = vst.msk [vmem:[#allocation3 + $0xb0] sm:$0xff] %vm2174_vm15, %v12389_v28  ;;  %v2682_v39 = vrot.slane %v2680_v16, 5  ;;  %v2407_v46 = vld [vmem:[#allocation2 + $0xc4] sm:$0x1]  ;;  %v2694_v28 = vshll.u32 %v2405_v11, 16  ;;  %v2699_v3 = vshrl.u32 %v2406_v31, 16 }
 0x1aa   : > { %4793 = vmatmul.mubr.bf16.gmra.mrb[24].mxu0 %v4483_v23  ;;  %4456 = vst.msk [vmem:[#allocation3 + $0xb8] sm:$0xff] %vm1174_vm13, %v10216_v24  ;;  %v2677_v38 = vor.u32 %v2676_v45, %v2673_v35  ;;  %v2664_v2 = vrot.slane %v2663_v57, 4  ;;  %v2687_v54 = vrot.slane %v2685_v48, 4  ;;  %v2702_v5 = vshll.u32 %v2406_v31, 16  ;;  %v11060_v52 = vld [vmem:[#allocation2 + $0xb0] ss:$8 sps:$4 sm:$0xff]  }
 0x1ab   : > { %4120 = vst.msk [vmem:[#allocation3 + $0xb0] sm:$0xff] %vm2351_vm0, %v12418_v7  ;;  %v2708_v49 = vshll.u32 %v2407_v46, 16  ;;  %v2690_v18 = vrot.slane %v2688_v62, 5  ;;  %v2701_v21 = vrot.slane %v2699_v3, 4  ;;  %v2696_v55 = vrot.slane %v2694_v28, 5  ;;  %v4486_v51 = vld [vmem:[#allocation3 + $0xa8] sm:$0xff] }
 0x1ac   : > { %2183 = vst.msk [vmem:[#allocation3 + $0xc0] sm:$0xff] %vm2174_vm15, %v12442_v32  ;;  %v2678_v7 = vrot.slane %v2677_v38, 4  ;;  %v4485_v6 = vld [vmem:[#allocation3 + $0xa0] sm:$0xff]  ;;  %v2669_v1 = vsel %vm11470_vm12, %v2664_v2, %v2668_v12  ;;  %v2704_v50 = vrot.slane %v2702_v5, 5  ;;  %v4161_v29 = vld [vmem:[#allocation2 + $0xb0] sm:$0xe]  ;;  %v12619_v12 = vpop.permute.xlu0 %3286 }
 0x1ad   : > { %2360 = vst.msk [vmem:[#allocation3 + $0xc0] sm:$0xff] %vm2351_vm0, %v12466_v58  ;;  %v2710_v47 = vrot.slane %v2708_v49, 5  ;;  %10887 = vmatprep.mubr.msk.bf16.mxu1 %vm1174_vm13, %v4485_v6  ;;  %v2691_v14 = vor.u32 %v2690_v18, %v2687_v54  ;;  %v4162_v30 = vld [vmem:[#allocation2 + $0xb4] sm:$0x1]  ;;  %v4163_v58 = vld [vmem:[#allocation2 + $0xb8] sm:$0xe] }
 0x1ae   : > { %v2683_v32 = vsel %vm11470_vm12, %v2678_v7, %v2682_v39  ;;  %v2705_v63 = vor.u32 %v2704_v50, %v2701_v21  ;;  %1184 = vst.msk [vmem:[#allocation3 + $0xd8] sm:$0xff] %vm1174_vm13, %v11060_v52  ;;  %v4164_v19 = vld [vmem:[#allocation2 + $0xbc] sm:$0x1]  ;;  %v10193_v26 = vrot.slane %v4161_v29, 9  ;;  %v4323_v41 = vrot.slane %v4162_v30, 5 }
 0x1af   : > { %v10089_v23 = vcombine.low %v2669_v1, %v2683_v32  ;;  %v4165_v37 = vld [vmem:[#allocation2 + $0xc0] sm:$0xe]  ;;  %v2692_v13 = vrot.slane %v2691_v14, 4  ;;  %1812 = vst.msk [vmem:[#allocation3 + $0xd8] sm:$0xff] %vm1802_vm14, %v12485_v27  ;;  %v10194_v25 = vrot.slane %v4163_v58, 9  ;;  %v4327_v16 = vrot.slane %v4164_v19, 5  ;;  %v12627_v27 = vpop.permute.xlu1 %2148 }
 0x1b0   : > { %v4166_v4 = vld [vmem:[#allocation2 + $0xc4] sm:$0x1]  ;;  %v2706_v45 = vrot.slane %v2705_v63, 4  ;;  %2184 = vst.msk [vmem:[#allocation3 + $0xd8] sm:$0xff] %vm2174_vm15, %v12505_v17  ;;  %v4324_v56 = vsel %vm11432_vm11, %v10193_v26, %v4323_v41  ;;  %v4167_v57 = vld [vmem:[#allocation2 + $0xc8] sm:$0xe]  ;;  %v12649_v52 = vpop.permute.xlu0 %3463 }
 0x1b1   : > { %v4488_v24 = vld [vmem:[#allocation3 + $0xb8] sm:$0xff]  ;;  %2952 = vst.msk [vmem:[#allocation3 + $0xc8] sm:$0xff] %vm1174_vm13, %v10089_v23  ;;  %v4168_v39 = vld [vmem:[#allocation2 + $0xcc] sm:$0x1]  ;;  %v2697_v11 = vsel %vm11470_vm12, %v2692_v13, %v2696_v55  ;;  %v4328_v17 = vsel %vm11432_vm11, %v10194_v25, %v4327_v16  ;;  %v10195_v31 = vrot.slane %v4165_v37, 9  ;;  %v4331_v48 = vrot.slane %v4166_v4, 5 }
 0x1b2   : > { %10888 = vmatmul.mubr.msk.bf16.gmra.mrb[12].mxu1 %vm1174_vm13, %v4488_v24  ;;  %v4487_v35 = vld [vmem:[#allocation3 + $0xb0] sm:$0xff]  ;;  %3320 = vst.msk [vmem:[#allocation3 + $0xc8] sm:$0xff] %vm1802_vm14, %v12439_v59  ;;  %v2408_v38 = vld [vmem:[#allocation2 + $0xc8] sm:$0xf]  ;;  %v2409_v46 = vld [vmem:[#allocation2 + $0xcc] sm:$0x1]  ;;  %v2711_v59 = vsel %vm11470_vm12, %v2706_v45, %v2710_v47  ;;  %v10217_v62 = vcombine.low %v4324_v56, %v4328_v17 }
 0x1b3   : > { %4800 = vmatprep.mubr.bf16.mxu0 %v4487_v35  ;;  %2361 = vst.msk [vmem:[#allocation3 + $0xd8] sm:$0xff] %vm2351_vm0, %v12529_v42  ;;  %v10196_v28 = vrot.slane %v4167_v57, 9  ;;  %v4335_v3 = vrot.slane %v4168_v39, 5  ;;  %v2410_v2 = vld [vmem:[#allocation2 + $0xd0] sm:$0xf]  ;;  %v10090_v42 = vcombine.low %v2697_v11, %v2711_v59  ;;  %v4332_v54 = vsel %vm11432_vm11, %v10195_v31, %v4331_v48  ;;  %v12653_v30 = vpop.permute.xlu1 %2325 }
 0x1b4   : > { %3497 = vst.msk [vmem:[#allocation3 + $0xc8] sm:$0xff] %vm2174_vm15, %v12462_v40  ;;  %4801 = vmatmul.mubr.bf16.gmra.mrb[28].mxu0 %v4486_v51  ;;  %v2411_v5 = vld [vmem:[#allocation2 + $0xd4] sm:$0x1]  ;;  %v2713_v49 = vshrl.u32 %v2408_v38, 16  ;;  %v2716_v7 = vshll.u32 %v2408_v38, 16  ;;  %v2722_v18 = vshll.u32 %v2409_v46, 16  ;;  %v12669_v48 = vpop.permute.xlu0 %4087 }
 0x1b5   : > { %4121 = vst.msk [vmem:[#allocation3 + $0xc8] sm:$0xff] %vm2351_vm0, %v12481_v15  ;;  %v4336_v40 = vsel %vm11432_vm11, %v10196_v28, %v4335_v3  ;;  %v2727_v21 = vshrl.u32 %v2410_v2, 16  ;;  %v2730_v6 = vshll.u32 %v2410_v2, 16  ;;  %v2736_v50 = vshll.u32 %v2411_v5, 16  ;;  %v11061_v47 = vld [vmem:[#allocation2 + $0xc0] ss:$8 sps:$4 sm:$0xff]  }
 0x1b6   : > { %4457 = vst.msk [vmem:[#allocation3 + $0xd0] sm:$0xff] %vm1174_vm13, %v10217_v62  ;;  %2953 = vst.msk [vmem:[#allocation3 + $0xe0] sm:$0xff] %vm1174_vm13, %v10090_v42  ;;  %v10218_v1 = vcombine.low %v4332_v54, %v4336_v40  ;;  %v2715_v55 = vrot.slane %v2713_v49, 4  ;;  %v2718_v15 = vrot.slane %v2716_v7, 5  ;;  %v2724_v32 = vrot.slane %v2722_v18, 5 }
 0x1b7   : > { %3321 = vst.msk [vmem:[#allocation3 + $0xe0] sm:$0xff] %vm1802_vm14, %v12500_v10  ;;  %v2729_v51 = vrot.slane %v2727_v21, 4  ;;  %v2732_v14 = vrot.slane %v2730_v6, 5  ;;  %v2412_v29 = vld [vmem:[#allocation2 + $0xd8] sm:$0xf]  ;;  %v2738_v23 = vrot.slane %v2736_v50, 5  ;;  %v12674_v62 = vpop.permute.xlu1 %1778 }
 0x1b8   : > { %3498 = vst.msk [vmem:[#allocation3 + $0xe0] sm:$0xff] %vm2174_vm15, %v12524_v20  ;;  %v2719_v58 = vor.u32 %v2718_v15, %v2715_v55  ;;  %v2413_v63 = vld [vmem:[#allocation2 + $0xdc] sm:$0x1]  ;;  %v2414_v19 = vld [vmem:[#allocation2 + $0xe0] sm:$0xf]  ;;  %v2741_v26 = vshrl.u32 %v2412_v29, 16 }
 0x1b9   : > { %4458 = vst.msk [vmem:[#allocation3 + $0xe8] sm:$0xff] %vm1174_vm13, %v10218_v1  ;;  %1185 = vst.msk [vmem:[#allocation3 + $0xf0] sm:$0xff] %vm1174_vm13, %v11061_v47  ;;  %v4489_v10 = vld [vmem:[#allocation3 + $0xc0] sm:$0xff]  ;;  %v2733_v41 = vor.u32 %v2732_v14, %v2729_v51  ;;  %v2744_v24 = vshll.u32 %v2412_v29, 16  ;;  %v2750_v20 = vshll.u32 %v2413_v63, 16  ;;  %v2755_v13 = vshrl.u32 %v2414_v19, 16 }
 0x1ba   : > { %4122 = vst.msk [vmem:[#allocation3 + $0xe0] sm:$0xff] %vm2351_vm0, %v12539_v33  ;;  %v2415_v37 = vld [vmem:[#allocation2 + $0xe4] sm:$0x1]  ;;  %v2720_v25 = vrot.slane %v2719_v58, 4  ;;  %v2743_v16 = vrot.slane %v2741_v26, 4  ;;  %v2758_v4 = vshll.u32 %v2414_v19, 16  ;;  %v12697_v26 = vpop.permute.xlu0 %3288 }
 0x1bb   : > { %1813 = vst.msk [vmem:[#allocation3 + $0xf0] sm:$0xff] %vm1802_vm14, %v12545_v43  ;;  %v2764_v35 = vshll.u32 %v2415_v37, 16  ;;  %v2734_v56 = vrot.slane %v2733_v41, 4  ;;  %v2746_v33 = vrot.slane %v2744_v24, 5  ;;  %v2757_v57 = vrot.slane %v2755_v13, 4  ;;  %v4492_v58 = vld [vmem:[#allocation3 + $0xd8] sm:$0xff]  ;;  %v2151_v13 = vpop.permute.xlu1 %2150 }
 0x1bc   : > { %2185 = vst.msk [vmem:[#allocation3 + $0xf0] sm:$0xff] %vm2174_vm15, %v12563_v22  ;;  %v4490_v45 = vld [vmem:[#allocation3 + $0xc8] sm:$0xff]  ;;  %v2725_v39 = vsel %vm11470_vm12, %v2720_v25, %v2724_v32  ;;  %v2752_v11 = vrot.slane %v2750_v20, 5  ;;  %v2760_v17 = vrot.slane %v2758_v4, 5  ;;  %v4169_v46 = vld [vmem:[#allocation2 + $0xd0] sm:$0xe] }
 0x1bd   : > { %2362 = vst.msk [vmem:[#allocation3 + $0xf0] sm:$0xff] %vm2351_vm0, %v12587_v61  ;;  %4808 = vmatprep.mubr.bf16.mxu0 %v4490_v45  ;;  %v4491_v43 = vld [vmem:[#allocation3 + $0xd0] sm:$0xff]  ;;  %v2766_v31 = vrot.slane %v2764_v35, 5  ;;  %v2739_v22 = vsel %vm11470_vm12, %v2734_v56, %v2738_v23  ;;  %v2747_v38 = vor.u32 %v2746_v33, %v2743_v16  ;;  %v4171_v2 = vld [vmem:[#allocation2 + $0xd8] sm:$0xe]  ;;  %v10197_v54 = vrot.slane %v4169_v46, 9 }
 0x1be   : > { %4809 = vmatmul.mubr.bf16.gmra.mrb[32].mxu0 %v4489_v10  ;;  %10891 = vmatprep.mubr.msk.bf16.mxu1 %vm1174_vm13, %v4491_v43  ;;  %v11062_v61 = vld [vmem:[#allocation2 + $0xd0] ss:$8 sps:$4 sm:$0xff]   ;;  %v4170_v59 = vld [vmem:[#allocation2 + $0xd4] sm:$0x1]  ;;  %v10091_v28 = vcombine.low %v2725_v39, %v2739_v22  ;;  %v2761_v3 = vor.u32 %v2760_v17, %v2757_v57  ;;  %v4172_v42 = vld [vmem:[#allocation2 + $0xdc] sm:$0x1] }
 0x1bf   : > { %v4339_v5 = vrot.slane %v4170_v59, 5  ;;  %v2748_v7 = vrot.slane %v2747_v38, 4  ;;  %1186 = vst.msk [vmem:[#allocation3 + $0x108] sm:$0xff] %vm1174_vm13, %v11062_v61  ;;  %v10198_v40 = vrot.slane %v4171_v2, 9  ;;  %v4343_v18 = vrot.slane %v4172_v42, 5 }
 0x1c0   : > { %v4494_v49 = vld [vmem:[#allocation3 + $0xe8] sm:$0xff]  ;;  %v4173_v21 = vld [vmem:[#allocation2 + $0xe0] sm:$0xe]  ;;  %2954 = vst.msk [vmem:[#allocation3 + $0xf8] sm:$0xff] %vm1174_vm13, %v10091_v28  ;;  %v2762_v1 = vrot.slane %v2761_v3, 4  ;;  %vm9831_vm4 = vcmask 1043459  }
 0x1c1   : > { %10892 = vmatmul.mubr.msk.bf16.gmra.mrb[16].mxu1 %vm1174_vm13, %v4494_v49  ;;  %v4493_v6 = vld [vmem:[#allocation3 + $0xe0] sm:$0xff]  ;;  %1814 = vst.msk [vmem:[#allocation3 + $0x108] sm:$0xff] %vm1802_vm14, %v12607_v60  ;;  %v4340_v55 = vsel %vm11432_vm11, %v10197_v54, %v4339_v5  ;;  %v4175_v50 = vld [vmem:[#allocation2 + $0xe8] sm:$0xe]  ;;  %3322 = vst.msk [vmem:[#allocation3 + $0xf8] sm:$0xff] %vm1802_vm14, %v12557_v9  ;;  %v2753_v47 = vsel %vm11470_vm12, %v2748_v7, %v2752_v11  ;;  %v4344_v32 = vsel %vm11432_vm11, %v10198_v40, %v4343_v18  ;;  %vm9899_vm5 = vcmask 130048  }
 0x1c2   : > { %v4174_v15 = vld [vmem:[#allocation2 + $0xe4] sm:$0x1]  ;;  %4816 = vmatprep.mubr.bf16.mxu0 %v4493_v6  ;;  %2186 = vst.msk [vmem:[#allocation3 + $0x108] sm:$0xff] %vm2174_vm15, %v12627_v27  ;;  %v4176_v51 = vld [vmem:[#allocation2 + $0xec] sm:$0x1]  ;;  %v10199_v60 = vrot.slane %v4173_v21, 9  ;;  %v2767_v9 = vsel %vm11470_vm12, %v2762_v1, %v2766_v31  ;;  %v10219_v23 = vcombine.low %v4340_v55, %v4344_v32 }
 0x1c3   : > { %v4347_v14 = vrot.slane %v4174_v15, 5  ;;  %v2416_v29 = vld [vmem:[#allocation2 + $0xf8] sm:$0xf]  ;;  %3499 = vst.msk [vmem:[#allocation3 + $0xf8] sm:$0xff] %vm2174_vm15, %v12583_v8  ;;  %v10200_v63 = vrot.slane %v4175_v50, 9  ;;  %v4351_v27 = vrot.slane %v4176_v51, 5  ;;  %v10092_v10 = vcombine.low %v2753_v47, %v2767_v9 }
 0x1c4   : > { %2363 = vst.msk [vmem:[#allocation3 + $0x108] sm:$0xff] %vm2351_vm0, %v12653_v30  ;;  %v2417_v19 = vld [vmem:[#allocation2 + $0xfc] sm:$0x1]  ;;  %4123 = vst.msk [vmem:[#allocation3 + $0xf8] sm:$0xff] %vm2351_vm0, %v12603_v36  ;;  %v2418_v41 = vld [vmem:[#allocation2 + $0x100] sm:$0xf] }
 0x1c5   : > { %v4348_v8 = vsel %vm11432_vm11, %v10199_v60, %v4347_v14  ;;  %v2419_v37 = vld [vmem:[#allocation2 + $0x104] sm:$0x1]  ;;  %v2769_v24 = vshrl.u32 %v2416_v29, 16  ;;  %v2772_v20 = vshll.u32 %v2416_v29, 16  ;;  %4459 = vst.msk [vmem:[#allocation3 + $0x100] sm:$0xff] %vm1174_vm13, %v10219_v23  ;;  %v4352_v30 = vsel %vm11432_vm11, %v10200_v63, %v4351_v27  ;;  %2955 = vst.msk [vmem:[#allocation3 + $0x110] sm:$0xff] %vm1174_vm13, %v10092_v10 }
 0x1c6   : > { %v2778_v25 = vshll.u32 %v2417_v19, 16  ;;  %v2783_v16 = vshrl.u32 %v2418_v41, 16  ;;  %v2786_v4 = vshll.u32 %v2418_v41, 16  ;;  %4817 = vmatmul.mubr.bf16.gmra.mrb[36].mxu0 %v4492_v58  ;;  %v10220_v36 = vcombine.low %v4348_v8, %v4352_v30  ;;  %3323 = vst.msk [vmem:[#allocation3 + $0x110] sm:$0xff] %vm1802_vm14, %v12619_v12  ;;  %v11063_v43 = vld [vmem:[#allocation2 + $0xf0] ss:$8 sps:$4 sm:$0xff]   ;;  %v3466_v12 = vpop.permute.xlu0 %3465 }
 0x1c7   : > { %v2771_v35 = vrot.slane %v2769_v24, 4  ;;  %v2774_v45 = vrot.slane %v2772_v20, 5  ;;  %v2792_v56 = vshll.u32 %v2419_v37, 16  ;;  %3500 = vst.msk [vmem:[#allocation3 + $0x110] sm:$0xff] %vm2174_vm15, %v12649_v52  ;;  %v2420_v31 = vld [vmem:[#allocation2 + $0x108] sm:$0xf]  ;;  %v2328_v52 = vpop.permute.xlu1 %2327 }
 0x1c8   : > { %v2785_v33 = vrot.slane %v2783_v16, 4  ;;  %v2788_v57 = vrot.slane %v2786_v4, 5  ;;  %4460 = vst.msk [vmem:[#allocation3 + $0x118] sm:$0xff] %vm1174_vm13, %v10220_v36  ;;  %v2780_v11 = vrot.slane %v2778_v25, 5  ;;  %v2421_v22 = vld [vmem:[#allocation2 + $0x10c] sm:$0x1] }
 0x1c9   : > { %v2775_v39 = vor.u32 %v2774_v45, %v2771_v35  ;;  %v2794_v17 = vrot.slane %v2792_v56, 5  ;;  %4124 = vst.msk [vmem:[#allocation3 + $0x110] sm:$0xff] %vm2351_vm0, %v12669_v48  ;;  %v2422_v61 = vld [vmem:[#allocation2 + $0x110] sm:$0xf]  ;;  %v2423_v46 = vld [vmem:[#allocation2 + $0x114] sm:$0x1] }
 0x1ca   : > { %v2789_v38 = vor.u32 %v2788_v57, %v2785_v33  ;;  %1187 = vst.msk [vmem:[#allocation3 + $0x120] sm:$0xff] %vm1174_vm13, %v11063_v43  ;;  %v2797_v59 = vshrl.u32 %v2420_v31, 16  ;;  %v2800_v28 = vshll.u32 %v2420_v31, 16  ;;  %v2806_v2 = vshll.u32 %v2421_v22, 16  ;;  %v4495_v49 = vld [vmem:[#allocation3 + $0xf0] sm:$0xff]  ;;  %v4090_v23 = vpop.permute.xlu0 %4089 }
 0x1cb   : > { %v2776_v3 = vrot.slane %v2775_v39, 4  ;;  %1815 = vst.msk [vmem:[#allocation3 + $0x120] sm:$0xff] %vm1802_vm14, %v12674_v62  ;;  %v2811_v42 = vshrl.u32 %v2422_v61, 16  ;;  %v2814_v54 = vshll.u32 %v2422_v61, 16  ;;  %v4496_v5 = vld [vmem:[#allocation3 + $0xf8] sm:$0xff]  ;;  %v2820_v18 = vshll.u32 %v2423_v46, 16 }
 0x1cc   : > { %v2790_v7 = vrot.slane %v2789_v38, 4  ;;  %2187 = vst.msk [vmem:[#allocation3 + $0x120] sm:$0xff] %vm2174_vm15, %v2151_v13  ;;  %v2799_v48 = vrot.slane %v2797_v59, 4  ;;  %v2802_v40 = vrot.slane %v2800_v28, 5  ;;  %4824 = vmatprep.mubr.bf16.mxu0 %v4496_v5  ;;  %v4497_v21 = vld [vmem:[#allocation3 + $0x100] sm:$0xff]  ;;  %v2808_v50 = vrot.slane %v2806_v2, 5  ;;  %v1781_v37 = vpop.permute.xlu1 %1780 }
 0x1cd   : > { %v2781_v6 = vsel %vm11470_vm12, %v2776_v3, %v2780_v11  ;;  %2364 = vst.msk [vmem:[#allocation3 + $0x120] sm:$0xff] %vm2351_vm0, %v2328_v52  ;;  %v2813_v62 = vrot.slane %v2811_v42, 4  ;;  %v2816_v1 = vrot.slane %v2814_v54, 5  ;;  %10895 = vmatprep.mubr.msk.bf16.mxu1 %vm1174_vm13, %v4497_v21  ;;  %v2822_v47 = vrot.slane %v2820_v18, 5  ;;  %v11064_v32 = vld [vmem:[#allocation2 + $0x100] ss:$8 sps:$4 sm:$0xff]  }
 0x1ce   : > { %v2795_v55 = vsel %vm11470_vm12, %v2790_v7, %v2794_v17  ;;  %v2803_v15 = vor.u32 %v2802_v40, %v2799_v48  ;;  %4825 = vmatmul.mubr.bf16.gmra.mrb[40].mxu0 %v4495_v49  ;;  %v4177_v14 = vld [vmem:[#allocation2 + $0x100] sm:$0xe]  ;;  %v4178_v29 = vld [vmem:[#allocation2 + $0x104] sm:$0x1]  ;;  %v4179_v58 = vld [vmem:[#allocation2 + $0x108] sm:$0xe] }
 0x1cf   : > { %v10093_v51 = vcombine.low %v2781_v6, %v2795_v55  ;;  %v2817_v60 = vor.u32 %v2816_v1, %v2813_v62  ;;  %v4500_v9 = vld [vmem:[#allocation3 + $0x118] sm:$0xff]  ;;  %1188 = vst.msk [vmem:[#allocation3 + $0x138] sm:$0xff] %vm1174_vm13, %v11064_v32  ;;  %v4180_v27 = vld [vmem:[#allocation2 + $0x10c] sm:$0x1]  ;;  %v10201_v19 = vrot.slane %v4177_v14, 9  ;;  %v4355_v10 = vrot.slane %v4178_v29, 5  ;;  %v3291_v38 = vpop.permute.xlu0 %3290 }
 0x1d0   : > { %v2804_v63 = vrot.slane %v2803_v15, 4  ;;  %10896 = vmatmul.mubr.msk.bf16.gmra.mrb[20].mxu1 %vm1174_vm13, %v4500_v9  ;;  %v4499_v8 = vld [vmem:[#allocation3 + $0x110] sm:$0xff]  ;;  %v10202_v24 = vrot.slane %v4179_v58, 9  ;;  %v4359_v20 = vrot.slane %v4180_v27, 5  ;;  %1816 = vst.msk [vmem:[#allocation3 + $0x138] sm:$0xff] %vm1802_vm14, %v1781_v37  ;;  %v4498_v43 = vld [vmem:[#allocation3 + $0x108] sm:$0xff] }
 0x1d1   : > { %2956 = vst.msk [vmem:[#allocation3 + $0x128] sm:$0xff] %vm1174_vm13, %v10093_v51  ;;  %v2818_v41 = vrot.slane %v2817_v60, 4  ;;  %v4181_v13 = vld [vmem:[#allocation2 + $0x110] sm:$0xe]  ;;  %4832 = vmatprep.mubr.bf16.mxu0 %v4499_v8  ;;  %v4356_v25 = vsel %vm11432_vm11, %v10201_v19, %v4355_v10  ;;  %v4182_v16 = vld [vmem:[#allocation2 + $0x114] sm:$0x1] }
 0x1d2   : > { %3324 = vst.msk [vmem:[#allocation3 + $0x128] sm:$0xff] %vm1802_vm14, %v12697_v26  ;;  %v2809_v30 = vsel %vm11470_vm12, %v2804_v63, %v2808_v50  ;;  %v4183_v4 = vld [vmem:[#allocation2 + $0x118] sm:$0xe]  ;;  %v4184_v36 = vld [vmem:[#allocation2 + $0x11c] sm:$0x1]  ;;  %v4360_v26 = vsel %vm11432_vm11, %v10202_v24, %v4359_v20  ;;  %v10203_v45 = vrot.slane %v4181_v13, 9 }
 0x1d3   : > { %3501 = vst.msk [vmem:[#allocation3 + $0x128] sm:$0xff] %vm2174_vm15, %v3466_v12  ;;  %v2823_v35 = vsel %vm11470_vm12, %v2818_v41, %v2822_v47  ;;  %v4363_v56 = vrot.slane %v4182_v16, 5  ;;  %v2424_v33 = vld [vmem:[#allocation2 + $0x118] sm:$0xf]  ;;  %v2425_v57 = vld [vmem:[#allocation2 + $0x11c] sm:$0x1]  ;;  %v10221_v11 = vcombine.low %v4356_v25, %v4360_v26  ;;  %v2153_v12 = vpop.permute.xlu1 %2152  ;;  %v3468_v62 = vpop.permute.xlu0 %3467 }
 0x1d4   : > { %4125 = vst.msk [vmem:[#allocation3 + $0x128] sm:$0xff] %vm2351_vm0, %v4090_v23  ;;  %v10094_v39 = vcombine.low %v2809_v30, %v2823_v35  ;;  %v10204_v17 = vrot.slane %v4183_v4, 9  ;;  %v4367_v31 = vrot.slane %v4184_v36, 5  ;;  %v2426_v22 = vld [vmem:[#allocation2 + $0x120] sm:$0xf]  ;;  %v2825_v59 = vshrl.u32 %v2424_v33, 16 }
 0x1d5   : > { %v4364_v61 = vsel %vm11432_vm11, %v10203_v45, %v4363_v56  ;;  %v2427_v46 = vld [vmem:[#allocation2 + $0x124] sm:$0x1]  ;;  %v2828_v28 = vshll.u32 %v2424_v33, 16  ;;  %v2834_v3 = vshll.u32 %v2425_v57, 16  ;;  %2188 = vst.msk [vmem:[#allocation3 + $0x138] sm:$0xff] %vm2174_vm15, %v2153_v12  ;;  %v2839_v2 = vshrl.u32 %v2426_v22, 16 }
 0x1d6   : > { %2957 = vst.msk [vmem:[#allocation3 + $0x140] sm:$0xff] %vm1174_vm13, %v10094_v39  ;;  %4461 = vst.msk [vmem:[#allocation3 + $0x130] sm:$0xff] %vm1174_vm13, %v10221_v11  ;;  %v4368_v52 = vsel %vm11432_vm11, %v10204_v17, %v4367_v31  ;;  %v2842_v42 = vshll.u32 %v2426_v22, 16  ;;  %v2848_v54 = vshll.u32 %v2427_v46, 16  ;;  %4833 = vmatmul.mubr.bf16.gmra.mrb[44].mxu0 %v4498_v43  ;;  %v2827_v49 = vrot.slane %v2825_v59, 4  ;;  %v4501_v9 = vld [vmem:[#allocation3 + $0x120] sm:$0xff] }
 0x1d7   : > { %3325 = vst.msk [vmem:[#allocation3 + $0x140] sm:$0xff] %vm1802_vm14, %v3291_v38  ;;  %v10222_v5 = vcombine.low %v4364_v61, %v4368_v52  ;;  %v2830_v7 = vrot.slane %v2828_v28, 5  ;;  %v2836_v48 = vrot.slane %v2834_v3, 5  ;;  %v2841_v40 = vrot.slane %v2839_v2, 4  ;;  %v11065_v6 = vld [vmem:[#allocation2 + $0x110] ss:$8 sps:$4 sm:$0xff]   ;;  %v2330_v1 = vpop.permute.xlu1 %2329 }
 0x1d8   : > { %v2844_v18 = vrot.slane %v2842_v42, 5  ;;  %v2850_v21 = vrot.slane %v2848_v54, 5  ;;  %v2428_v15 = vld [vmem:[#allocation2 + $0x128] sm:$0xf]  ;;  %v2429_v50 = vld [vmem:[#allocation2 + $0x12c] sm:$0x1] }
 0x1d9   : > { %4462 = vst.msk [vmem:[#allocation3 + $0x148] sm:$0xff] %vm1174_vm13, %v10222_v5  ;;  %v2831_v55 = vor.u32 %v2830_v7, %v2827_v49  ;;  %v2430_v47 = vld [vmem:[#allocation2 + $0x130] sm:$0xf]  ;;  %1189 = vst.msk [vmem:[#allocation3 + $0x150] sm:$0xff] %vm1174_vm13, %v11065_v6  ;;  %v2431_v51 = vld [vmem:[#allocation2 + $0x134] sm:$0x1] }
 0x1da   : > { %3502 = vst.msk [vmem:[#allocation3 + $0x140] sm:$0xff] %vm2174_vm15, %v3468_v62  ;;  %v2845_v32 = vor.u32 %v2844_v18, %v2841_v40  ;;  %v2853_v60 = vshrl.u32 %v2428_v15, 16  ;;  %v2856_v14 = vshll.u32 %v2428_v15, 16  ;;  %v2862_v29 = vshll.u32 %v2429_v50, 16  ;;  %v11066_v36 = vld [vmem:[#allocation2 + $0x120] ss:$8 sps:$4 sm:$0xff]  }
 0x1db   : > { %2365 = vst.msk [vmem:[#allocation3 + $0x138] sm:$0xff] %vm2351_vm0, %v2330_v1  ;;  %v4502_v58 = vld [vmem:[#allocation3 + $0x128] sm:$0xff]  ;;  %v2832_v23 = vrot.slane %v2831_v55, 4  ;;  %v2867_v63 = vshrl.u32 %v2430_v47, 16  ;;  %v2870_v27 = vshll.u32 %v2430_v47, 16  ;;  %v2876_v19 = vshll.u32 %v2431_v51, 16 }
 0x1dc   : > { %4840 = vmatprep.mubr.bf16.mxu0 %v4502_v58  ;;  %v2846_v10 = vrot.slane %v2845_v32, 4  ;;  %v2855_v8 = vrot.slane %v2853_v60, 4  ;;  %v2858_v41 = vrot.slane %v2856_v14, 5  ;;  %v2864_v37 = vrot.slane %v2862_v29, 5  ;;  %v4185_v35 = vld [vmem:[#allocation2 + $0x120] sm:$0xe] }
 0x1dd   : > { %v4503_v24 = vld [vmem:[#allocation3 + $0x130] sm:$0xff]  ;;  %v2837_v20 = vsel %vm11470_vm12, %v2832_v23, %v2836_v48  ;;  %v2869_v13 = vrot.slane %v2867_v63, 4  ;;  %v2872_v30 = vrot.slane %v2870_v27, 5  ;;  %v2878_v25 = vrot.slane %v2876_v19, 5  ;;  %v4186_v26 = vld [vmem:[#allocation2 + $0x124] sm:$0x1] }
 0x1de   : > { %10899 = vmatprep.mubr.msk.bf16.mxu1 %vm1174_vm13, %v4503_v24  ;;  %v2851_v16 = vsel %vm11470_vm12, %v2846_v10, %v2850_v21  ;;  %v2859_v4 = vor.u32 %v2858_v41, %v2855_v8  ;;  %4841 = vmatmul.mubr.bf16.gmra.mrb[48].mxu0 %v4501_v9  ;;  %v4187_v33 = vld [vmem:[#allocation2 + $0x128] sm:$0xe]  ;;  %v4188_v57 = vld [vmem:[#allocation2 + $0x12c] sm:$0x1]  ;;  %v10205_v43 = vrot.slane %v4185_v35, 9  ;;  %v4371_v39 = vrot.slane %v4186_v26, 5 }
 0x1df   : > { %v10095_v45 = vcombine.low %v2837_v20, %v2851_v16  ;;  %v2873_v56 = vor.u32 %v2872_v30, %v2869_v13  ;;  %1190 = vst.msk [vmem:[#allocation3 + $0x168] sm:$0xff] %vm1174_vm13, %v11066_v36  ;;  %v10206_v31 = vrot.slane %v4187_v33, 9  ;;  %v4375_v22 = vrot.slane %v4188_v57, 5  ;;  %v4189_v38 = vld [vmem:[#allocation2 + $0x130] sm:$0xe]  ;;  %v11071_v23 = vld [vmem:[%s14416_s3 + $0x80] sm:$0xff]  }
 0x1e0   : > { %v4506_v11 = vld [vmem:[#allocation3 + $0x148] sm:$0xff]  ;;  %v2860_v17 = vrot.slane %v2859_v4, 4  ;;  %v4372_v61 = vsel %vm11432_vm11, %v10205_v43, %v4371_v39  ;;  %v4190_v46 = vld [vmem:[#allocation2 + $0x134] sm:$0x1]  ;;  %v4191_v59 = vld [vmem:[#allocation2 + $0x138] sm:$0xe]  ;;  %10907 = vmatprep.subr.bf16.mxu0 %v11071_v23 }
 0x1e1   : > { %10900 = vmatmul.mubr.msk.bf16.gmra.mrb[24].mxu1 %vm1174_vm13, %v4506_v11  ;;  %2958 = vst.msk [vmem:[#allocation3 + $0x158] sm:$0xff] %vm1174_vm13, %v10095_v45  ;;  %v2874_v12 = vrot.slane %v2873_v56, 4  ;;  %v4376_v3 = vsel %vm11432_vm11, %v10206_v31, %v4375_v22  ;;  %v4192_v52 = vld [vmem:[#allocation2 + $0x13c] sm:$0x1]  ;;  %v10207_v2 = vrot.slane %v4189_v38, 9  ;;  %v4379_v42 = vrot.slane %v4190_v46, 5  ;;  %10908 = vmatpush3.bf16.msra.mxu0 %v11071_v23 }
 0x1e2   : > { %v2865_v28 = vsel %vm11470_vm12, %v2860_v17, %v2864_v37  ;;  %v10223_v5 = vcombine.low %v4372_v61, %v4376_v3  ;;  %v10208_v49 = vrot.slane %v4191_v59, 9  ;;  %v4383_v7 = vrot.slane %v4192_v52, 5  ;;  %v4504_v50 = vld [vmem:[#allocation3 + $0x138] sm:$0xff]  ;;  %v11072_v19 = vld [vmem:[%s14416_s3 + $0x88] sm:$0xff]   ;;  %v12800_v43 = vld [vmem:[%s14415_s2] ss:$0 sm:$0xff] }
 0x1e3   : > { %v2879_v54 = vsel %vm11470_vm12, %v2874_v12, %v2878_v25  ;;  %v4380_v40 = vsel %vm11432_vm11, %v10207_v2, %v4379_v42  ;;  %10909 = vmatprep.subr.bf16.mxu0 %v11072_v19  ;;  %v5850_v52 = vld [vmem:[#allocation2] sm:$0xf] }
 0x1e4   : > { %v10096_v48 = vcombine.low %v2865_v28, %v2879_v54  ;;  %4463 = vst.msk [vmem:[#allocation3 + $0x160] sm:$0xff] %vm1174_vm13, %v10223_v5  ;;  %v4384_v18 = vsel %vm11432_vm11, %v10208_v49, %v4383_v7 }
 0x1e5   : > { %v10224_v21 = vcombine.low %v4380_v40, %v4384_v18  ;;  %v4092_v6 = vpop.permute.xlu0 %4091  ;;  %10910 = vmatpush3.bf16.msra.mxu0 %v11072_v19 }
 0x1e6   : > { %2959 = vst.msk [vmem:[#allocation3 + $0x170] sm:$0xff] %vm1174_vm13, %v10096_v48 }
 0x1e7   : > { %4464 = vst.msk [vmem:[#allocation3 + $0x178] sm:$0xff] %vm1174_vm13, %v10224_v21  ;;  %v5915_v21 = vshrl.u32 %v5850_v52, 16 }
 0x1e8   : > { %4126 = vst.msk [vmem:[#allocation3 + $0x140] sm:$0xff] %vm2351_vm0, %v4092_v6  ;;  %v1783_v62 = vpop.permute.xlu1 %1782 }
 0x1e9   : > { %1817 = vst.msk [vmem:[#allocation3 + $0x150] sm:$0xff] %vm1802_vm14, %v1783_v62  ;;  %v5917_v23 = vrot.slane %v5915_v21, 4 }
 0x1eb   : > { %v4509_v1 = vld [vmem:[#allocation3 + $0x160] sm:$0xff] }
 0x1ec   : > { %10903 = vmatprep.mubr.msk.bf16.mxu1 %vm1174_vm13, %v4509_v1  ;;  %v2155_v55 = vpop.permute.xlu1 %2154  ;;  %v5918_v1 = vshll.u32 %v5850_v52, 16 }
 0x1ed   : > { %2189 = vst.msk [vmem:[#allocation3 + $0x150] sm:$0xff] %vm2174_vm15, %v2155_v55 }
 0x1ee   : > { %v4512_v15 = vld [vmem:[#allocation3 + $0x178] sm:$0xff]  ;;  %v3293_v47 = vpop.permute.xlu0 %3292 }
 0x1ef   : > { %10904 = vmatmul.mubr.msk.bf16.gmra.mrb[28].mxu1 %vm1174_vm13, %v4512_v15  ;;  %v4505_v32 = vld [vmem:[#allocation3 + $0x140] sm:$0xff]  ;;  %3326 = vst.msk [vmem:[#allocation3 + $0x158] sm:$0xff] %vm1802_vm14, %v3293_v47 }
 0x1f0   : > { %4848 = vmatprep.mubr.bf16.mxu0 %v4505_v32  ;;  %v2332_v51 = vpop.permute.xlu1 %2331  ;;  %v5526_v32 = vld [vmem:[#allocation2 + $0x18] sm:$0xf] }
 0x1f1   : > { %4849 = vmatmul.mubr.bf16.gmra.mrb[52].mxu0 %v4504_v50  ;;  %2366 = vst.msk [vmem:[#allocation3 + $0x150] sm:$0xff] %vm2351_vm0, %v2332_v51  ;;  %v5514_v51 = vld [vmem:[#allocation2 + $0x8] sm:$0xf] }
 0x1f2   : > { %v3470_v60 = vpop.permute.xlu0 %3469 }
 0x1f3   : > { %3503 = vst.msk [vmem:[#allocation3 + $0x158] sm:$0xff] %vm2174_vm15, %v3470_v60  ;;  %v5517_v60 = vld [vmem:[#allocation2 + $0xc] sm:$0x1] }
 0x1f6   : > { %v10624_v14 = vpop.f32.mrb[0].mxu0 }
 0x1f7   : > { %v10625_v29 = vpop.f32.mrb[1].mxu0 }
 0x1f8   : > { %v10626_v58 = vadd.f32 %v10625_v29, %v10624_v14  ;;  %v10627_v9 = vpop.f32.mrb[2].mxu0  ;;  %v4507_v16 = vld [vmem:[#allocation3 + $0x150] sm:$0xff] }
 0x1f9   : > { %v10628_v63 = vpop.f32.mrb[3].mxu0 }
 0x1fa   : > { %v10629_v27 = vadd.f32 %v10628_v63, %v10627_v9  ;;  %v4747_v22 = vadd.f32 %v10626_v58, %v12800_v43  ;;  %v5529_v58 = vld [vmem:[#allocation2 + $0x1c] sm:$0x1] }
 0x1fc   : > { %v4750_v61 = vadd.f32 %v10629_v27, %v12800_v43 }
 0x201   : > { %v10630_v41 = vpop.f32.mrb[4].mxu0 }
 0x202   : > { %v10631_v37 = vpop.f32.mrb[5].mxu0 }
 0x203   : > { %v10632_v13 = vadd.f32 %v10631_v37, %v10630_v41  ;;  %v10633_v30 = vpop.f32.mrb[6].mxu0  ;;  %v5520_v41 = vld [vmem:[#allocation2 + $0x10] sm:$0xf] }
 0x204   : > { %v4094_v10 = vpop.permute.xlu0 %4093  ;;  %v10634_v25 = vpop.f32.mrb[7].mxu0 }
 0x205   : > { %4127 = vst.msk [vmem:[#allocation3 + $0x158] sm:$0xff] %vm2351_vm0, %v4094_v10  ;;  %v10635_v4 = vadd.f32 %v10634_v25, %v10633_v30  ;;  %v4755_v31 = vadd.f32 %v10632_v13, %v12800_v43  ;;  %v5532_v10 = vld [vmem:[#allocation2 + $0x20] sm:$0xf]  ;;  %v5535_v30 = vld [vmem:[#allocation2 + $0x24] sm:$0x1] }
 0x206   : > { %v1785_v8 = vpop.permute.xlu1 %1784 }
 0x207   : > { %1818 = vst.msk [vmem:[#allocation3 + $0x168] sm:$0xff] %vm1802_vm14, %v1785_v8  ;;  %v4758_v38 = vadd.f32 %v10635_v4, %v12800_v43  ;;  %v5920_v8 = vrot.slane %v5918_v1, 5 }
 0x208   : > { %v3295_v24 = vpop.permute.xlu0 %3294 }
 0x209   : > { %3327 = vst.msk [vmem:[#allocation3 + $0x170] sm:$0xff] %vm1802_vm14, %v3295_v24 }
 0x20a   : > { %v2157_v20 = vpop.permute.xlu1 %2156 }
 0x20b   : > { %2190 = vst.msk [vmem:[#allocation3 + $0x168] sm:$0xff] %vm2174_vm15, %v2157_v20  ;;  %v10636_v45 = vpop.f32.mrb[8].mxu0 }
 0x20c   : > { %v3472_v36 = vpop.permute.xlu0 %3471  ;;  %v4508_v35 = vld [vmem:[#allocation3 + $0x158] sm:$0xff]  ;;  %v10637_v56 = vpop.f32.mrb[9].mxu0 }
 0x20d   : > { %3504 = vst.msk [vmem:[#allocation3 + $0x170] sm:$0xff] %vm2174_vm15, %v3472_v36  ;;  %4856 = vmatprep.mubr.bf16.mxu0 %v4508_v35  ;;  %v12795_v33 = vadd.f32 %v10637_v56, %v10636_v45  ;;  %v10639_v57 = vpop.f32.mrb[10].mxu0  ;;  %v5851_v35 = vld [vmem:[#allocation2 + $0x4] sm:$0x1] }
 0x20e   : > { %v2334_v26 = vpop.permute.xlu1 %2333  ;;  %4857 = vmatmul.mubr.bf16.gmra.mrb[56].mxu0 %v4507_v16  ;;  %v10640_v39 = vpop.f32.mrb[11].mxu0 }
 0x20f   : > { %2367 = vst.msk [vmem:[#allocation3 + $0x168] sm:$0xff] %vm2351_vm0, %v2334_v26  ;;  %v12802_v17 = vadd.f32 %v10640_v39, %v10639_v57  ;;  %v5523_v26 = vld [vmem:[#allocation2 + $0x14] sm:$0x1] }
 0x212   : > { %v10877_v12 = vpop.f32.mrb[0].mxu1 }
 0x213   : > { %v4907_v46 = vpop.f32.mrb[1].mxu1  ;;  %v4916_v59 = vadd.f32 %v10877_v12, %v4755_v31 }
 0x214   : > { %v4096_v11 = vpop.permute.xlu0 %4095  ;;  %v4908_v28 = vadd.f32 %v4907_v46, %v4747_v22  ;;  %v10878_v3 = vpop.f32.mrb[2].mxu1 }
 0x215   : > { %4128 = vst.msk [vmem:[#allocation3 + $0x170] sm:$0xff] %vm2351_vm0, %v4096_v11  ;;  %v4910_v42 = vpop.f32.mrb[3].mxu1  ;;  %v5036_v54 = vmax.f32 %v4916_v59, 0.0  ;;  %v4919_v5 = vadd.f32 %v10878_v3, %v4758_v38  ;;  %v8168_v11 = vld [vmem:[#allocation2 + $0x48] sm:$0xf]  ;;  %v5921_v59 = vor.u32 %v5920_v8, %v5917_v23 }
 0x216   : > { %v4510_v2 = vld [vmem:[#allocation3 + $0x168] sm:$0xff]  ;;  %v5034_v7 = vmax.f32 %v4908_v28, 0.0  ;;  %v4911_v48 = vadd.f32 %v4910_v42, %v4750_v61  ;;  %v5924_v28 = vshll.u32 %v5851_v35, 16  ;;  %v6475_v42 = vld [vmem:[#allocation2 + $0x4] sm:$0x1] }
 0x217   : > { %v10578_v40 = vpack.c.bf16 %v5036_v54, %v5036_v54  ;;  %v5037_v18 = vmax.f32 %v4919_v5, 0.0  ;;  %v8317_v54 = vshrl.u32 %v8168_v11, 16  ;;  %v8320_v5 = vshll.u32 %v8168_v11, 16 }
 0x218   : > { %v10576_v6 = vpack.c.bf16 %v5034_v7, %v5034_v7  ;;  %v5035_v62 = vmax.f32 %v4911_v48, 0.0  ;;  %v8169_v48 = vld [vmem:[#allocation2 + $0x4c] sm:$0x1]  ;;  %v6604_v21 = vrot.slane %v6475_v42, 5 }
 0x219   : > { %v5211_v55 = vshrl.u32 %v10578_v40, 16  ;;  %v10579_v15 = vpack.c.bf16 %v5037_v18, %v5037_v18  ;;  %v5214_v29 = vshll.u32 %v10578_v40, 16 }
 0x21a   : > { %v5195_v50 = vshrl.u32 %v10576_v6, 16  ;;  %v10577_v47 = vpack.c.bf16 %v5035_v62, %v5035_v62  ;;  %v5198_v27 = vshll.u32 %v10576_v6, 16  ;;  %v12827_v6 = vrot.slane %v5921_v59, 4 }
 0x21b   : > { %v5213_v14 = vrot.slane %v5211_v55, 7  ;;  %v5219_v9 = vshrl.u32 %v10579_v15, 16  ;;  %v5222_v13 = vshll.u32 %v10579_v15, 16  ;;  %v12829_v62 = vrot.slane %v5924_v28, 5 }
 0x21c   : > { %v4511_v49 = vld [vmem:[#allocation3 + $0x170] sm:$0xff]  ;;  %v5197_v63 = vrot.slane %v5195_v50, 7  ;;  %v5203_v19 = vshrl.u32 %v10577_v47, 16  ;;  %v5206_v36 = vshll.u32 %v10577_v47, 16  ;;  %v8319_v50 = vrot.slane %v8317_v54, 4 }
 0x21d   : > { %4864 = vmatprep.mubr.bf16.mxu0 %v4511_v49  ;;  %v5216_v37 = vor.u32 %v5214_v29, %v5213_v14  ;;  %v5217_v24 = vrot.slane %v5213_v14, 4  ;;  %v5221_v20 = vrot.slane %v5219_v9, 7  ;;  %v12825_v49 = vld [vmem:[#allocation2 + $0x48] sm:$0xe]  ;;  %v8322_v47 = vrot.slane %v8320_v5, 5 }
 0x21e   : > { %4865 = vmatmul.mubr.bf16.gmra.mrb[60].mxu0 %v4510_v2  ;;  %v5200_v25 = vor.u32 %v5198_v27, %v5197_v63  ;;  %v5201_v16 = vrot.slane %v5197_v63, 4  ;;  %v5205_v4 = vrot.slane %v5203_v19, 7  ;;  %v6474_v2 = vld [vmem:[#allocation2] sm:$0xe]  ;;  %v10491_v15 = vrot.slane %v12825_v49, 9 }
 0x21f   : > { %v5527_v45 = vsel %vm11360_vm6, %v5216_v37, %v5526_v32  ;;  %v5530_v56 = vsel %vm11302_vm2, %v5217_v24, %v5529_v58  ;;  %v5224_v57 = vor.u32 %v5222_v13, %v5221_v20  ;;  %v5225_v39 = vrot.slane %v5221_v20, 4 }
 0x220   : > { %v5515_v31 = vsel %vm11360_vm6, %v5200_v25, %v5514_v51  ;;  %v5518_v22 = vsel %vm11302_vm2, %v5201_v16, %v5517_v60  ;;  %v5208_v38 = vor.u32 %v5206_v36, %v5205_v4  ;;  %v5209_v12 = vrot.slane %v5205_v4, 4  ;;  %5531 = vst [vmem:[#allocation2 + $0x1c] sm:$0x1] %v5530_v56  ;;  %5528 = vst [vmem:[#allocation2 + $0x18] sm:$0xf] %v5527_v45 }
 0x221   : > { %5519 = vst [vmem:[#allocation2 + $0xc] sm:$0x1] %v5518_v22  ;;  %5516 = vst [vmem:[#allocation2 + $0x8] sm:$0xf] %v5515_v31  ;;  %v5533_v61 = vsel %vm11360_vm6, %v5224_v57, %v5532_v10  ;;  %v5536_v46 = vsel %vm11302_vm2, %v5225_v39, %v5535_v30  ;;  %v10324_v18 = vrot.slane %v6474_v2, 9  ;;  %v8326_v51 = vshll.u32 %v8169_v48, 16 }
 0x222   : > { %v5521_v3 = vsel %vm11360_vm6, %v5208_v38, %v5520_v41  ;;  %v5524_v52 = vsel %vm11302_vm2, %v5209_v12, %v5523_v26  ;;  %5537 = vst [vmem:[#allocation2 + $0x24] sm:$0x1] %v5536_v46  ;;  %5534 = vst [vmem:[#allocation2 + $0x20] sm:$0xf] %v5533_v61  ;;  %v5866_v60 = vld [vmem:[#allocation2 + $0x50] sm:$0xf]  ;;  %v8323_v57 = vor.u32 %v8322_v47, %v8319_v50 }
 0x223   : > { %5525 = vst [vmem:[#allocation2 + $0x14] sm:$0x1] %v5524_v52  ;;  %5522 = vst [vmem:[#allocation2 + $0x10] sm:$0xf] %v5521_v3  ;;  %v6605_v8 = vsel %vm11432_vm11, %v10324_v18, %v6604_v21  ;;  %v6027_v13 = vshrl.u32 %v5866_v60, 16  ;;  %v6030_v4 = vshll.u32 %v5866_v60, 16 }
 0x224   : > { %v12839_v16 = vld [vmem:[#allocation2 + $0x4c] sm:$0x1]  ;;  %v12845_v39 = vld [vmem:[#allocation2 + $0x54] sm:$0x1]  ;;  %v12854_v48 = vrot.slane %v8326_v51, 5  ;;  %v5927_v51 = vsel %vm11470_vm12, %v12827_v6, %v12829_v62 }
 0x225   : > { %v8936_v5 = vrot.slane %v12839_v16, 5  ;;  %v6036_v50 = vshll.u32 %v12845_v39, 16 }
 0x226   : > { %v10642_v7 = vpop.f32.mrb[12].mxu0 }
 0x227   : > { %v10643_v40 = vpop.f32.mrb[13].mxu0  ;;  %v7614_v25 = vld [vmem:[#allocation2 + $0x18] sm:$0xe]  ;;  %v7615_v56 = vld [vmem:[#allocation2 + $0x1c] sm:$0x1] }
 0x228   : > { %v12831_v1 = vadd.f32 %v10643_v40, %v10642_v7  ;;  %v10645_v55 = vpop.f32.mrb[14].mxu0  ;;  %v7610_v29 = vld [vmem:[#allocation2 + $0x8] sm:$0xe]  ;;  %v7611_v58 = vld [vmem:[#allocation2 + $0xc] sm:$0x1]  ;;  %v10406_v28 = vrot.slane %v7614_v25, 9 }
 0x229   : > { %v10646_v32 = vpop.f32.mrb[15].mxu0  ;;  %v10404_v9 = vrot.slane %v7610_v29, 9  ;;  %v7740_v23 = vrot.slane %v7611_v58, 5  ;;  %v6476_v63 = vld [vmem:[#allocation2 + $0x8] sm:$0xe]  ;;  %v7748_v42 = vrot.slane %v7615_v56, 5 }
 0x22a   : > { %v12834_v14 = vadd.f32 %v10646_v32, %v10645_v55  ;;  %v6477_v27 = vld [vmem:[#allocation2 + $0xc] sm:$0x1]  ;;  %v11067_v19 = vld [vmem:[#allocation2 + $0x8] ss:$8 sps:$4 sm:$0xff]   ;;  %v7613_v41 = vld [vmem:[#allocation2 + $0x14] sm:$0x1] }
 0x22b   : > { %v7612_v10 = vld [vmem:[#allocation2 + $0x10] sm:$0xe]  ;;  %v10325_v24 = vrot.slane %v6476_v63, 9  ;;  %v6608_v20 = vrot.slane %v6477_v27, 5  ;;  %6954 = vrot.lane.b32.xlu1 %v11067_v19, %s11206_s19  ;;  %v7744_v30 = vrot.slane %v7613_v41, 5  ;;  %v7741_v36 = vsel %vm11432_vm11, %v10404_v9, %v7740_v23 }
 0x22c   : > { %v10405_v37 = vrot.slane %v7612_v10, 9  ;;  %v5852_v26 = vld [vmem:[#allocation2 + $0x8] sm:$0xf]  ;;  %v5853_v45 = vld [vmem:[#allocation2 + $0xc] sm:$0x1]  ;;  %v12852_v7 = vrot.slane %v8323_v57, 4  ;;  %v7749_v63 = vsel %vm11432_vm11, %v10406_v28, %v7748_v42 }
 0x22d   : > { %v6609_v35 = vsel %vm11432_vm11, %v10325_v24, %v6608_v20  ;;  %v5929_v22 = vshrl.u32 %v5852_v26, 16  ;;  %v5932_v38 = vshll.u32 %v5852_v26, 16  ;;  %v7616_v12 = vld [vmem:[#allocation2 + $0x20] sm:$0xe]  ;;  %v7617_v61 = vld [vmem:[#allocation2 + $0x24] sm:$0x1] }
 0x22e   : > { %v7745_v11 = vsel %vm11432_vm11, %v10405_v37, %v7744_v30  ;;  %v10356_v31 = vcombine.low %v6605_v8, %v6609_v35  ;;  %v5938_v59 = vshll.u32 %v5853_v45, 16  ;;  %v10407_v3 = vrot.slane %v7616_v12, 9  ;;  %v11068_v47 = vld [vmem:[#allocation2 + $0x10] ss:$8 sps:$4 sm:$0xff]   ;;  %v6481_v60 = vld [vmem:[#allocation2 + $0x1c] sm:$0x1] }
 0x22f   : > { %v10436_v46 = vcombine.low %v7741_v36, %v7745_v11  ;;  %v5931_v52 = vrot.slane %v5929_v22, 4  ;;  %v5934_v2 = vrot.slane %v5932_v38, 5  ;;  %v7752_v54 = vrot.slane %v7617_v61, 5  ;;  %v6480_v32 = vld [vmem:[#allocation2 + $0x18] sm:$0xe] }
 0x230   : > { %6778 = vrot.lane.b32.xlu1 %v10356_v31, %s11205_s18  ;;  %v6029_v40 = vrot.slane %v6027_v13, 4  ;;  %v6032_v55 = vrot.slane %v6030_v4, 5  ;;  %v12859_v29 = vld [vmem:[#allocation2 + $0x50] sm:$0xe]  ;;  %v12861_v58 = vld [vmem:[#allocation2 + $0x54] sm:$0x1]  ;;  %v4763_v61 = vadd.f32 %v12795_v33, %v12800_v43 }
 0x231   : > { %7914 = vrot.lane.b32.xlu0 %v10436_v46, %s11207_s20  ;;  %v5935_v18 = vor.u32 %v5934_v2, %v5931_v52  ;;  %v7753_v21 = vsel %vm11432_vm11, %v10407_v3, %v7752_v54  ;;  %v5940_v23 = vrot.slane %v5938_v59, 5  ;;  %v8778_v27 = vld [vmem:[#allocation2 + $0x10] sm:$0xe]  ;;  %v8779_v19 = vld [vmem:[#allocation2 + $0x14] sm:$0x1]  ;;  %v10327_v4 = vrot.slane %v6480_v32, 9 }
 0x232   : > { %v10437_v10 = vcombine.low %v7749_v63, %v7753_v21  ;;  %v8780_v8 = vld [vmem:[#allocation2 + $0x18] sm:$0xe]  ;;  %v8781_v41 = vld [vmem:[#allocation2 + $0x1c] sm:$0x1]  ;;  %v10484_v37 = vrot.slane %v8778_v27, 9  ;;  %v8908_v24 = vrot.slane %v8779_v19, 5  ;;  %v6033_v35 = vor.u32 %v6032_v55, %v6029_v40 }
 0x233   : > { %v5936_v9 = vrot.slane %v5935_v18, 4  ;;  %v6478_v13 = vld [vmem:[#allocation2 + $0x10] sm:$0xe]  ;;  %v6479_v30 = vld [vmem:[#allocation2 + $0x14] sm:$0x1]  ;;  %v10485_v6 = vrot.slane %v8780_v8, 9  ;;  %v4766_v46 = vadd.f32 %v12802_v17, %v12800_v43  ;;  %v4771_v2 = vadd.f32 %v12831_v1, %v12800_v43 }
 0x234   : > { %v8912_v62 = vrot.slane %v8781_v41, 5  ;;  %v6616_v36 = vrot.slane %v6481_v60, 5  ;;  %v8909_v26 = vsel %vm11432_vm11, %v10484_v37, %v8908_v24  ;;  %v5854_v56 = vld [vmem:[#allocation2 + $0x10] sm:$0xf]  ;;  %v10332_v57 = vrot.slane %v12859_v29, 9 }
 0x235   : > { %8090 = vrot.lane.b32.xlu0 %v11068_v47, %s11205_s18  ;;  %v5941_v20 = vsel %vm11470_vm12, %v5936_v9, %v5940_v23  ;;  %v6636_v39 = vrot.slane %v12861_v58, 5  ;;  %v11069_v11 = vld [vmem:[#allocation2 + $0x18] ss:$8 sps:$4 sm:$0xff]   ;;  %v10326_v31 = vrot.slane %v6478_v13, 9  ;;  %v6612_v22 = vrot.slane %v6479_v30, 5 }
 0x236   : > { %v10308_v25 = vcombine.low %v5927_v51, %v5941_v20  ;;  %v8913_v45 = vsel %vm11432_vm11, %v10485_v6, %v8912_v62  ;;  %v8154_v12 = vld [vmem:[#allocation2 + $0x10] sm:$0xf]  ;;  %v8155_v59 = vld [vmem:[#allocation2 + $0x14] sm:$0x1]  ;;  %v5856_v28 = vld [vmem:[#allocation2 + $0x18] sm:$0xf]  ;;  %v6617_v42 = vsel %vm11432_vm11, %v10327_v4, %v6616_v36 }
 0x237   : > { %v10516_v38 = vcombine.low %v8909_v26, %v8913_v45  ;;  %v5943_v3 = vshrl.u32 %v5854_v56, 16  ;;  %v12884_v52 = vrot.slane %v6036_v50, 5  ;;  %v5855_v54 = vld [vmem:[#allocation2 + $0x14] sm:$0x1]  ;;  %v5857_v40 = vld [vmem:[#allocation2 + $0x1c] sm:$0x1]  ;;  %v4774_v50 = vadd.f32 %v12834_v14, %v12800_v43 }
 0x238   : > { %6410 = vrot.lane.b32.xlu1 %v10308_v25, %s11207_s20  ;;  %v5946_v18 = vshll.u32 %v5854_v56, 16  ;;  %v12891_v33 = vrot.slane %v6033_v35, 4  ;;  %v8156_v21 = vld [vmem:[#allocation2 + $0x18] sm:$0xf]  ;;  %v8219_v17 = vshrl.u32 %v8154_v12, 16  ;;  %v5957_v47 = vshrl.u32 %v5856_v28, 16 }
 0x239   : > { %7916 = vrot.lane.b32.xlu0 %v10437_v10, %s11207_s20  ;;  %9098 = vst.msk [vmem:[#allocation3 + $0x10] sm:$0xff] %vm1174_vm13, %v10516_v38  ;;  %v5945_v55 = vrot.slane %v5943_v3, 4  ;;  %v5960_v32 = vshll.u32 %v5856_v28, 16  ;;  %v6613_v1 = vsel %vm11432_vm11, %v10326_v31, %v6612_v22  ;;  %v8157_v60 = vld [vmem:[#allocation2 + $0x1c] sm:$0x1]  ;;  %v8222_v51 = vshll.u32 %v8154_v12, 16 }
 0x23a   : > { %v5948_v9 = vrot.slane %v5946_v18, 5  ;;  %v5952_v23 = vshll.u32 %v5855_v54, 16  ;;  %v5959_v63 = vrot.slane %v5957_v47, 4  ;;  %v5966_v19 = vshll.u32 %v5857_v40, 16  ;;  %v8158_v40 = vld [vmem:[#allocation2 + $0x20] sm:$0xf] }
 0x23b   : > { %v5962_v27 = vrot.slane %v5960_v32, 5  ;;  %v10357_v8 = vcombine.low %v6613_v1, %v6617_v42  ;;  %v8228_v41 = vshll.u32 %v8155_v59, 16  ;;  %v8233_v37 = vshrl.u32 %v8156_v21, 16 }
 0x23c   : > { %6956 = vrot.lane.b32.xlu1 %v11069_v11, %s11206_s19  ;;  %v5949_v24 = vor.u32 %v5948_v9, %v5945_v55  ;;  %v12898_v14 = vrot.slane %v8219_v17, 4  ;;  %v8236_v30 = vshll.u32 %v8156_v21, 16  ;;  %v8242_v6 = vshll.u32 %v8157_v60, 16 }
 0x23d   : > { %v5963_v62 = vor.u32 %v5962_v27, %v5959_v63  ;;  %v12903_v26 = vrot.slane %v8222_v51, 5  ;;  %v5954_v38 = vrot.slane %v5952_v23, 5  ;;  %v5968_v59 = vrot.slane %v5966_v19, 5 }
 0x23e   : > { %v5950_v45 = vrot.slane %v5949_v24, 4  ;;  %v12914_v32 = vrot.slane %v8233_v37, 4  ;;  %v12916_v51 = vrot.slane %v8236_v30, 5  ;;  %v8247_v9 = vshrl.u32 %v8158_v40, 16 }
 0x23f   : > { %v5964_v12 = vrot.slane %v5963_v62, 4  ;;  %v12918_v27 = vrot.slane %v8242_v6, 5  ;;  %v8225_v37 = vor.u32 %v12903_v26, %v12898_v14  ;;  %v5553_v62 = vld [vmem:[#allocation2 + $0x3c] sm:$0x1]  ;;  %v13000_v16 = vsel %vm11432_vm11, %v10332_v57, %v6636_v39 }
 0x240   : > { %6780 = vrot.lane.b32.xlu1 %v10357_v8, %s11205_s18  ;;  %v9116_v22 = vld [vmem:[#allocation3 + $0x10] sm:$0xff]  ;;  %v8239_v14 = vor.u32 %v12916_v51, %v12914_v32  ;;  %v12933_v51 = vld [vmem:[#allocation2 + $0x20] sm:$0xe]  ;;  %v6039_v49 = vsel %vm11470_vm12, %v12891_v33, %v12884_v52 }
 0x241   : > { %10911 = vmatprep.mubr.msk.bf16.mxu0 %vm1174_vm13, %v9116_v22  ;;  %v5969_v17 = vsel %vm11470_vm12, %v5964_v12, %v5968_v59 }
 0x244   : > { %v10648_v10 = vpop.f32.mrb[16].mxu0  ;;  %v10881_v20 = vpop.f32.mrb[4].mxu1 }
 0x245   : > { %v10649_v13 = vpop.f32.mrb[17].mxu0  ;;  %v4923_v25 = vpop.f32.mrb[5].mxu1  ;;  %v4932_v4 = vadd.f32 %v10881_v20, %v4771_v2  ;;  %v12908_v2 = vrot.slane %v8228_v41, 5  ;;  %v5550_v41 = vld [vmem:[#allocation2 + $0x38] sm:$0xf] }
 0x246   : > { %v12900_v36 = vadd.f32 %v10649_v13, %v10648_v10  ;;  %v10651_v35 = vpop.f32.mrb[18].mxu0  ;;  %v4924_v56 = vadd.f32 %v4923_v25, %v4763_v61  ;;  %v10882_v11 = vpop.f32.mrb[6].mxu1  ;;  %v5955_v61 = vsel %vm11470_vm12, %v5950_v45, %v5954_v38  ;;  %v5538_v20 = vld [vmem:[#allocation2 + $0x28] sm:$0xf]  ;;  %v5541_v13 = vld [vmem:[#allocation2 + $0x2c] sm:$0x1] }
 0x247   : > { %v10652_v31 = vpop.f32.mrb[19].mxu0  ;;  %v4926_v28 = vpop.f32.mrb[7].mxu1  ;;  %v5040_v3 = vmax.f32 %v4932_v4, 0.0  ;;  %v4935_v42 = vadd.f32 %v10882_v11, %v4774_v50  ;;  %v10309_v50 = vcombine.low %v5955_v61, %v5969_v17  ;;  %v8249_v4 = vrot.slane %v8247_v9, 4  ;;  %v5559_v11 = vld [vmem:[#allocation2 + $0x44] sm:$0x1] }
 0x248   : > { %v12905_v54 = vadd.f32 %v10652_v31, %v10651_v35  ;;  %v5038_v18 = vmax.f32 %v4924_v56, 0.0  ;;  %v4927_v21 = vadd.f32 %v4926_v28, %v4766_v46  ;;  %v8250_v46 = vshll.u32 %v8158_v40, 16  ;;  %v5556_v56 = vld [vmem:[#allocation2 + $0x40] sm:$0xf]  ;;  %v8159_v31 = vld [vmem:[#allocation2 + $0x24] sm:$0x1] }
 0x249   : > { %v10582_v55 = vpack.c.bf16 %v5040_v3, %v5040_v3  ;;  %v5041_v47 = vmax.f32 %v4935_v42, 0.0  ;;  %6412 = vrot.lane.b32.xlu1 %v10309_v50, %s11207_s20  ;;  %v5544_v38 = vld [vmem:[#allocation2 + $0x30] sm:$0xf]  ;;  %v5859_v9 = vld [vmem:[#allocation2 + $0x24] sm:$0x1] }
 0x24a   : > { %v10580_v1 = vpack.c.bf16 %v5038_v18, %v5038_v18  ;;  %v5039_v60 = vmax.f32 %v4927_v21, 0.0  ;;  %v8252_v22 = vrot.slane %v8250_v46, 5  ;;  %v5858_v18 = vld [vmem:[#allocation2 + $0x20] sm:$0xf]  ;;  %v5547_v21 = vld [vmem:[#allocation2 + $0x34] sm:$0x1] }
 0x24b   : > { %v5243_v23 = vshrl.u32 %v10582_v55, 16  ;;  %v10583_v63 = vpack.c.bf16 %v5041_v47, %v5041_v47  ;;  %v5246_v8 = vshll.u32 %v10582_v55, 16  ;;  %v12939_v46 = vld [vmem:[#allocation2 + $0x24] sm:$0x1] }
 0x24c   : > { %v5227_v19 = vshrl.u32 %v10580_v1, 16  ;;  %v10581_v10 = vpack.c.bf16 %v5039_v60, %v5039_v60  ;;  %v5230_v24 = vshll.u32 %v10580_v1, 16 }
 0x24d   : > { %v5245_v30 = vrot.slane %v5243_v23, 7  ;;  %v5251_v25 = vshrl.u32 %v10583_v63, 16  ;;  %v5254_v45 = vshll.u32 %v10583_v63, 16 }
 0x24e   : > { %v5229_v35 = vrot.slane %v5227_v19, 7  ;;  %v5235_v6 = vshrl.u32 %v10581_v10, 16  ;;  %v5238_v40 = vshll.u32 %v10581_v10, 16  ;;  %v12941_v19 = vld [vmem:[#allocation2 + $0x20] sm:$0xe]  ;;  %v8256_v10 = vshll.u32 %v8159_v31, 16 }
 0x24f   : > { %v5248_v12 = vor.u32 %v5246_v8, %v5245_v30  ;;  %v5249_v59 = vrot.slane %v5245_v30, 4  ;;  %v5253_v28 = vrot.slane %v5251_v25, 7  ;;  %v5971_v8 = vshrl.u32 %v5858_v18, 16 }
 0x250   : > { %v5232_v26 = vor.u32 %v5230_v24, %v5229_v35  ;;  %v5233_v3 = vrot.slane %v5229_v35, 4  ;;  %v5237_v42 = vrot.slane %v5235_v6, 7  ;;  %v5974_v30 = vshll.u32 %v5858_v18, 16 }
 0x251   : > { %v5551_v61 = vsel %vm11360_vm6, %v5248_v12, %v5550_v41  ;;  %v5554_v17 = vsel %vm11302_vm2, %v5249_v59, %v5553_v62  ;;  %v5256_v55 = vor.u32 %v5254_v45, %v5253_v28  ;;  %v5257_v47 = vrot.slane %v5253_v28, 4  ;;  %v7019_v62 = vld [vmem:[#allocation2 + $0xc] sm:$0x1]  ;;  %v12954_v12 = vld [vmem:[#allocation2 + $0x10] sm:$0xf] }
 0x252   : > { %v5539_v50 = vsel %vm11360_vm6, %v5232_v26, %v5538_v20  ;;  %v5542_v32 = vsel %vm11302_vm2, %v5233_v3, %v5541_v13  ;;  %v5240_v1 = vor.u32 %v5238_v40, %v5237_v42  ;;  %v5241_v60 = vrot.slane %v5237_v42, 4  ;;  %5555 = vst [vmem:[#allocation2 + $0x3c] sm:$0x1] %v5554_v17  ;;  %5552 = vst [vmem:[#allocation2 + $0x38] sm:$0xf] %v5551_v61 }
 0x253   : > { %5543 = vst [vmem:[#allocation2 + $0x2c] sm:$0x1] %v5542_v32  ;;  %5540 = vst [vmem:[#allocation2 + $0x28] sm:$0xf] %v5539_v50  ;;  %v5557_v23 = vsel %vm11360_vm6, %v5256_v55, %v5556_v56  ;;  %v5560_v63 = vsel %vm11302_vm2, %v5257_v47, %v5559_v11  ;;  %v12947_v20 = vld [vmem:[#allocation2 + $0x24] sm:$0x1]  ;;  %v8253_v13 = vor.u32 %v8252_v22, %v8249_v4 }
 0x254   : > { %v5545_v41 = vsel %vm11360_vm6, %v5240_v1, %v5544_v38  ;;  %v5548_v24 = vsel %vm11302_vm2, %v5241_v60, %v5547_v21  ;;  %5558 = vst [vmem:[#allocation2 + $0x40] sm:$0xf] %v5557_v23  ;;  %5561 = vst [vmem:[#allocation2 + $0x44] sm:$0x1] %v5560_v63  ;;  %v8226_v25 = vrot.slane %v8225_v37, 4  ;;  %v10486_v35 = vrot.slane %v12933_v51, 9 }
 0x255   : > { %5549 = vst [vmem:[#allocation2 + $0x34] sm:$0x1] %v5548_v24  ;;  %5546 = vst [vmem:[#allocation2 + $0x30] sm:$0xf] %v5545_v41  ;;  %v5973_v6 = vrot.slane %v5971_v8, 4  ;;  %v5980_v45 = vshll.u32 %v5859_v9, 16 }
 0x256   : > { %v12950_v56 = vld [vmem:[#allocation2 + $0x98] sm:$0xe]  ;;  %v8240_v11 = vrot.slane %v8239_v14, 4  ;;  %v5976_v31 = vrot.slane %v5974_v30, 5  ;;  %v12952_v38 = vld [vmem:[#allocation2 + $0x9c] sm:$0x1]  ;;  %v8231_v63 = vsel %vm11470_vm12, %v8226_v25, %v12908_v2 }
 0x257   : > { %v8916_v59 = vrot.slane %v12939_v46, 5  ;;  %v10328_v4 = vrot.slane %v12941_v19, 9  ;;  %v6620_v22 = vrot.slane %v12947_v20, 5  ;;  %v7092_v28 = vshll.u32 %v7019_v62, 16 }
 0x258   : > { %v12959_v37 = vrot.slane %v8253_v13, 4  ;;  %v12961_v26 = vrot.slane %v8256_v10, 5  ;;  %v5977_v3 = vor.u32 %v5976_v31, %v5973_v6  ;;  %v10499_v42 = vrot.slane %v12950_v56, 9 }
 0x259   : > { %v12964_v14 = vrot.slane %v5980_v45, 5  ;;  %v8968_v40 = vrot.slane %v12952_v38, 5  ;;  %v7097_v18 = vshrl.u32 %v12954_v12, 16  ;;  %v7100_v21 = vshll.u32 %v12954_v12, 16  ;;  %v12969_v55 = vld [vmem:[#allocation2 + $0x38] sm:$0xe] }
 0x25a   : > { %v11070_v61 = vld [vmem:[#allocation2 + $0x20] ss:$8 sps:$4 sm:$0xff]   ;;  %v8245_v47 = vsel %vm11470_vm12, %v8240_v11, %v12918_v27  ;;  %v7619_v50 = vld [vmem:[#allocation2 + $0x2c] sm:$0x1]  ;;  %v12974_v1 = vrot.slane %v7092_v28, 5  ;;  %v12977_v23 = vrot.slane %v5977_v3, 4  ;;  %v12988_v27 = vsel %vm11432_vm11, %v10491_v15, %v8936_v5 }
 0x25b   : > { %v7618_v17 = vld [vmem:[#allocation2 + $0x28] sm:$0xe]  ;;  %8092 = vrot.lane.b32.xlu0 %v11070_v61, %s11205_s18  ;;  %v7756_v9 = vrot.slane %v7619_v50, 5  ;;  %v10468_v8 = vcombine.low %v8231_v63, %v8245_v47  ;;  %v8785_v24 = vld [vmem:[#allocation2 + $0x2c] sm:$0x1]  ;;  %v8329_v20 = vsel %vm11470_vm12, %v12852_v7, %v12854_v48  ;;  %v10489_v58 = vrot.slane %v12969_v55, 9 }
 0x25c   : > { %v10408_v32 = vrot.slane %v7618_v17, 9  ;;  %v7620_v60 = vld [vmem:[#allocation2 + $0x30] sm:$0xe]  ;;  %v7621_v51 = vld [vmem:[#allocation2 + $0x34] sm:$0x1]  ;;  %v8920_v2 = vrot.slane %v8785_v24, 5  ;;  %v8917_v39 = vsel %vm11432_vm11, %v10486_v35, %v8916_v59  ;;  %v6621_v62 = vsel %vm11432_vm11, %v10328_v4, %v6620_v22 }
 0x25d   : > { %v10409_v46 = vrot.slane %v7620_v60, 9  ;;  %v7760_v19 = vrot.slane %v7621_v51, 5  ;;  %v11073_v10 = vld [vmem:[#allocation2 + $0x28] ss:$8 sps:$4 sm:$0xff]   ;;  %v6485_v30 = vld [vmem:[#allocation2 + $0x2c] sm:$0x1]  ;;  %v8259_v24 = vsel %vm11470_vm12, %v12959_v37, %v12961_v26 }
 0x25e   : > { %v8784_v41 = vld [vmem:[#allocation2 + $0x28] sm:$0xe]  ;;  %6958 = vrot.lane.b32.xlu1 %v11073_v10, %s11206_s19  ;;  %v7757_v57 = vsel %vm11432_vm11, %v10408_v32, %v7756_v9  ;;  %v6624_v31 = vrot.slane %v6485_v30, 5  ;;  %v8161_v28 = vld [vmem:[#allocation2 + $0x2c] sm:$0x1] }
 0x25f   : > { %v7761_v15 = vsel %vm11432_vm11, %v10409_v46, %v7760_v19  ;;  %v10487_v5 = vrot.slane %v8784_v41, 9  ;;  %v6484_v13 = vld [vmem:[#allocation2 + $0x28] sm:$0xe]  ;;  %8714 = vrot.lane.b32.xlu0 %v10468_v8, %s11206_s19  ;;  %v8789_v17 = vld [vmem:[#allocation2 + $0x3c] sm:$0x1]  ;;  %v8270_v35 = vshll.u32 %v8161_v28, 16  ;;  %v13023_v19 = vadd.f32 %v12900_v36, %v12800_v43 }
 0x260   : > { %v10329_v25 = vrot.slane %v6484_v13, 9  ;;  %v8160_v6 = vld [vmem:[#allocation2 + $0x28] sm:$0xf]  ;;  %v10438_v50 = vcombine.low %v7757_v57, %v7761_v15  ;;  %v5861_v60 = vld [vmem:[#allocation2 + $0x2c] sm:$0x1] }
 0x261   : > { %v8921_v11 = vsel %vm11432_vm11, %v10487_v5, %v8920_v2  ;;  %v8261_v3 = vshrl.u32 %v8160_v6, 16  ;;  %v8264_v61 = vshll.u32 %v8160_v6, 16  ;;  %v5860_v59 = vld [vmem:[#allocation2 + $0x28] sm:$0xf]  ;;  %v8786_v46 = vld [vmem:[#allocation2 + $0x30] sm:$0xe] }
 0x262   : > { %v10654_v29 = vpop.f32.mrb[20].mxu0  ;;  %v10517_v32 = vcombine.low %v8917_v39, %v8921_v11  ;;  %v6625_v4 = vsel %vm11432_vm11, %v10329_v25, %v6624_v31  ;;  %v5985_v63 = vshrl.u32 %v5860_v59, 16  ;;  %v11074_v8 = vld [vmem:[#allocation2 + $0x30] ss:$8 sps:$4 sm:$0xff]   ;;  %v8787_v15 = vld [vmem:[#allocation2 + $0x34] sm:$0x1] }
 0x263   : > { %v10655_v45 = vpop.f32.mrb[21].mxu0  ;;  %v8263_v22 = vrot.slane %v8261_v3, 4  ;;  %v8266_v9 = vrot.slane %v8264_v61, 5  ;;  %7918 = vrot.lane.b32.xlu0 %v10438_v50, %s11207_s20  ;;  %v10358_v41 = vcombine.low %v6621_v62, %v6625_v4  ;;  %v8790_v5 = vld [vmem:[#allocation2 + $0x40] sm:$0xe]  ;;  %v5994_v57 = vshll.u32 %v5861_v60, 16 }
 0x264   : > { %v10656_v55 = vadd.f32 %v10655_v45, %v10654_v29  ;;  %v10657_v47 = vpop.f32.mrb[22].mxu0  ;;  %9099 = vst.msk [vmem:[#allocation3 + $0x28] sm:$0xff] %vm1174_vm13, %v10517_v32  ;;  %v5987_v13 = vrot.slane %v5985_v63, 4  ;;  %v5988_v29 = vshll.u32 %v5860_v59, 16  ;;  %v8791_v36 = vld [vmem:[#allocation2 + $0x44] sm:$0x1] }
 0x265   : > { %v10658_v51 = vpop.f32.mrb[23].mxu0  ;;  %v8267_v2 = vor.u32 %v8266_v9, %v8263_v22  ;;  %6782 = vrot.lane.b32.xlu1 %v10358_v41, %s11205_s18  ;;  %v10488_v30 = vrot.slane %v8786_v46, 9  ;;  %v8924_v25 = vrot.slane %v8787_v15, 5  ;;  %v8928_v6 = vrot.slane %v8789_v17, 5  ;;  %v7622_v50 = vld [vmem:[#allocation2 + $0x38] sm:$0xe] }
 0x266   : > { %v10659_v10 = vadd.f32 %v10658_v51, %v10657_v47  ;;  %v4787_v39 = vadd.f32 %v10656_v55, %v12800_v43  ;;  %v8272_v45 = vrot.slane %v8270_v35, 5  ;;  %v5990_v11 = vrot.slane %v5988_v29, 5  ;;  %v7623_v32 = vld [vmem:[#allocation2 + $0x3c] sm:$0x1]  ;;  %v7624_v60 = vld [vmem:[#allocation2 + $0x40] sm:$0xe] }
 0x267   : > { %v8268_v62 = vrot.slane %v8267_v2, 4  ;;  %v10490_v31 = vrot.slane %v8790_v5, 9  ;;  %8094 = vrot.lane.b32.xlu0 %v11074_v8, %s11205_s18  ;;  %v8925_v26 = vsel %vm11432_vm11, %v10488_v30, %v8924_v25  ;;  %v8929_v28 = vsel %vm11432_vm11, %v10489_v58, %v8928_v6  ;;  %v7625_v51 = vld [vmem:[#allocation2 + $0x44] sm:$0x1]  ;;  %v6486_v8 = vld [vmem:[#allocation2 + $0x30] sm:$0xe] }
 0x268   : > { %v4790_v37 = vadd.f32 %v10659_v10, %v12800_v43  ;;  %v8932_v3 = vrot.slane %v8791_v36, 5  ;;  %v5991_v55 = vor.u32 %v5990_v11, %v5987_v13  ;;  %v5996_v17 = vrot.slane %v5994_v57, 5  ;;  %v6487_v5 = vld [vmem:[#allocation2 + $0x34] sm:$0x1]  ;;  %v6488_v2 = vld [vmem:[#allocation2 + $0x38] sm:$0xe] }
 0x269   : > { %v8273_v61 = vsel %vm11470_vm12, %v8268_v62, %v8272_v45  ;;  %v10518_v47 = vcombine.low %v8925_v26, %v8929_v28  ;;  %v10410_v4 = vrot.slane %v7622_v50, 9  ;;  %v7764_v22 = vrot.slane %v7623_v32, 5  ;;  %v11075_v36 = vld [vmem:[#allocation2 + $0x40] ss:$8 sps:$4 sm:$0xff]  }
 0x26a   : > { %v10469_v35 = vcombine.low %v8259_v24, %v8273_v61  ;;  %v8933_v59 = vsel %vm11432_vm11, %v10490_v31, %v8932_v3  ;;  %v5992_v63 = vrot.slane %v5991_v55, 4  ;;  %v10411_v46 = vrot.slane %v7624_v60, 9  ;;  %v11076_v50 = vld [vmem:[#allocation2 + $0x38] ss:$8 sps:$4 sm:$0xff]  }
 0x26b   : > { %v9119_v9 = vld [vmem:[#allocation3 + $0x28] sm:$0xff]  ;;  %9100 = vst.msk [vmem:[#allocation3 + $0x40] sm:$0xff] %vm1174_vm13, %v10518_v47  ;;  %v10519_v58 = vcombine.low %v8933_v59, %v12988_v27  ;;  %v7768_v10 = vrot.slane %v7625_v51, 5  ;;  %v4782_v24 = vadd.f32 %v12905_v54, %v12800_v43  ;;  %v5983_v15 = vsel %vm11470_vm12, %v12977_v23, %v12964_v14  ;;  %v6489_v14 = vld [vmem:[#allocation2 + $0x3c] sm:$0x1] }
 0x26c   : > { %10912 = vmatmul.mubr.msk.bf16.vlgmr.msra.gmra.mrb[64].mxu0 %vm1174_vm13, %v9119_v9  ;;  %8716 = vrot.lane.b32.xlu0 %v10469_v35, %s11206_s19  ;;  %v13059_v27 = vsel %vm11432_vm11, %v10499_v42, %v8968_v40  ;;  %v13063_v43 = vrot.slane %v7097_v18, 4  ;;  %v5997_v29 = vsel %vm11470_vm12, %v5992_v63, %v5996_v17  ;;  %v10330_v56 = vrot.slane %v6486_v8, 9  ;;  %v8162_v23 = vld [vmem:[#allocation2 + $0x30] sm:$0xf]  ;;  %v13083_v59 = vld [vmem:[#allocation2 + $0x34] sm:$0x1] }
 0x26d   : > { %9101 = vst.msk [vmem:[#allocation3 + $0x58] sm:$0xff] %vm1174_vm13, %v10519_v58  ;;  %v7769_v38 = vsel %vm11432_vm11, %v10411_v46, %v7768_v10  ;;  %v10310_v57 = vcombine.low %v5983_v15, %v5997_v29  ;;  %v6628_v18 = vrot.slane %v6487_v5, 5  ;;  %v10331_v30 = vrot.slane %v6488_v2, 9  ;;  %v8164_v58 = vld [vmem:[#allocation2 + $0x38] sm:$0xf] }
 0x26e   : > { %v10885_v41 = vpop.f32.mrb[8].mxu1  ;;  %v7765_v62 = vsel %vm11432_vm11, %v10410_v4, %v7764_v22  ;;  %v6632_v45 = vrot.slane %v6489_v14, 5  ;;  %v8275_v26 = vshrl.u32 %v8162_v23, 16  ;;  %v13077_v55 = vrot.slane %v7100_v21, 5  ;;  %v5562_v10 = vld [vmem:[#allocation2 + $0x58] sm:$0xf] }
 0x26f   : > { %v4939_v54 = vpop.f32.mrb[9].mxu1  ;;  %v4948_v13 = vadd.f32 %v10885_v41, %v4787_v39  ;;  %6414 = vrot.lane.b32.xlu1 %v10310_v57, %s11207_s20  ;;  %v10439_v61 = vcombine.low %v7765_v62, %v7769_v38  ;;  %v6629_v32 = vsel %vm11432_vm11, %v10330_v56, %v6628_v18  ;;  %v5565_v8 = vld [vmem:[#allocation2 + $0x5c] sm:$0x1]  ;;  %v8284_v2 = vshll.u32 %v13083_v59, 16  ;;  %v5577_v38 = vld [vmem:[#allocation2 + $0x6c] sm:$0x1] }
 0x270   : > { %v4940_v42 = vadd.f32 %v4939_v54, %v13023_v19  ;;  %v10886_v40 = vpop.f32.mrb[10].mxu1  ;;  %8096 = vrot.lane.b32.xlu0 %v11075_v36, %s11205_s18  ;;  %v8278_v19 = vshll.u32 %v8162_v23, 16  ;;  %v6633_v35 = vsel %vm11432_vm11, %v10331_v30, %v6632_v45  ;;  %v13086_v12 = vrot.slane %v8275_v26, 4  ;;  %v5568_v56 = vld [vmem:[#allocation2 + $0x60] sm:$0xf] }
 0x271   : > { %v4942_v25 = vpop.f32.mrb[11].mxu1  ;;  %v5044_v39 = vmax.f32 %v4948_v13, 0.0  ;;  %v4951_v6 = vadd.f32 %v10886_v40, %v4790_v37  ;;  %v10359_v14 = vcombine.low %v6629_v32, %v6633_v35  ;;  %v8289_v57 = vshrl.u32 %v8164_v58, 16  ;;  %v5571_v62 = vld [vmem:[#allocation2 + $0x64] sm:$0x1] }
 0x272   : > { %v5042_v11 = vmax.f32 %v4940_v42, 0.0  ;;  %v4943_v31 = vadd.f32 %v4942_v25, %v4782_v24  ;;  %v9122_v47 = vld [vmem:[#allocation3 + $0x40] sm:$0xff]  ;;  %v13090_v46 = vrot.slane %v8278_v19, 5  ;;  %v5574_v24 = vld [vmem:[#allocation2 + $0x68] sm:$0xf] }
 0x273   : > { %v10586_v28 = vpack.c.bf16 %v5044_v39, %v5044_v39  ;;  %v5045_v3 = vmax.f32 %v4951_v6, 0.0  ;;  %10915 = vmatprep.mubr.msk.bf16.mxu0 %vm1174_vm13, %v9122_v47  ;;  %6960 = vrot.lane.b32.xlu1 %v11076_v50, %s11206_s19  ;;  %v5580_v25 = vld [vmem:[#allocation2 + $0x70] sm:$0xf]  ;;  %v5583_v39 = vld [vmem:[#allocation2 + $0x74] sm:$0x1] }
 0x274   : > { %v10584_v37 = vpack.c.bf16 %v5042_v11, %v5042_v11  ;;  %v5043_v17 = vmax.f32 %v4943_v31, 0.0  ;;  %v9125_v63 = vld [vmem:[#allocation3 + $0x58] sm:$0xff]  ;;  %7920 = vrot.lane.b32.xlu0 %v10439_v61, %s11207_s20  ;;  %v8281_v6 = vor.u32 %v13090_v46, %v13086_v12  ;;  %v5862_v47 = vld [vmem:[#allocation2 + $0x30] sm:$0xf]  ;;  %v5863_v50 = vld [vmem:[#allocation2 + $0x34] sm:$0x1] }
 0x275   : > { %v5275_v60 = vshrl.u32 %v10586_v28, 16  ;;  %v5278_v51 = vshll.u32 %v10586_v28, 16  ;;  %v10587_v4 = vpack.c.bf16 %v5045_v3, %v5045_v3  ;;  %10916 = vmatmul.mubr.msk.bf16.gmra.mrb[68].mxu0 %vm1174_vm13, %v9125_v63  ;;  %v8165_v19 = vld [vmem:[#allocation2 + $0x3c] sm:$0x1] }
 0x276   : > { %v5259_v21 = vshrl.u32 %v10584_v37, 16  ;;  %v5262_v22 = vshll.u32 %v10584_v37, 16  ;;  %v10585_v9 = vpack.c.bf16 %v5043_v17, %v5043_v17  ;;  %v8298_v63 = vshll.u32 %v8165_v19, 16  ;;  %v5865_v46 = vld [vmem:[#allocation2 + $0x3c] sm:$0x1] }
 0x277   : > { %v5277_v41 = vrot.slane %v5275_v60, 7  ;;  %v5283_v15 = vshrl.u32 %v10587_v4, 16  ;;  %v5286_v5 = vshll.u32 %v10587_v4, 16  ;;  %6784 = vrot.lane.b32.xlu1 %v10359_v14, %s11205_s18  ;;  %v8291_v60 = vrot.slane %v8289_v57, 4  ;;  %v5864_v4 = vld [vmem:[#allocation2 + $0x38] sm:$0xf] }
 0x278   : > { %v5261_v54 = vrot.slane %v5259_v21, 7  ;;  %v5267_v13 = vshrl.u32 %v10585_v9, 16  ;;  %v5270_v29 = vshll.u32 %v10585_v9, 16  ;;  %v13119_v14 = vld [vmem:[%s14415_s2] ss:$0 sm:$0xff]  ;;  %v8300_v57 = vrot.slane %v8298_v63, 5 }
 0x279   : > { %v5280_v23 = vor.u32 %v5278_v51, %v5277_v41  ;;  %v5281_v42 = vrot.slane %v5277_v41, 4  ;;  %v5285_v40 = vrot.slane %v5283_v15, 7  ;;  %v8292_v51 = vshll.u32 %v8164_v58, 16 }
 0x27a   : > { %v5264_v36 = vor.u32 %v5262_v22, %v5261_v54  ;;  %v5265_v18 = vrot.slane %v5261_v54, 4  ;;  %v5269_v30 = vrot.slane %v5267_v13, 7  ;;  %v6002_v58 = vshll.u32 %v5862_v47, 16 }
 0x27b   : > { %v5575_v45 = vsel %vm11360_vm6, %v5280_v23, %v5574_v24  ;;  %v5578_v11 = vsel %vm11302_vm2, %v5281_v42, %v5577_v38  ;;  %v5288_v31 = vor.u32 %v5286_v5, %v5285_v40  ;;  %v5289_v26 = vrot.slane %v5285_v40, 4  ;;  %v11088_v38 = vld [vmem:[%s14416_s3 + $0x40] sm:$0xff]  }
 0x27c   : > { %v5563_v28 = vsel %vm11360_vm6, %v5264_v36, %v5562_v10  ;;  %v5566_v3 = vsel %vm11302_vm2, %v5265_v18, %v5565_v8  ;;  %v5272_v61 = vor.u32 %v5270_v29, %v5269_v30  ;;  %v5273_v37 = vrot.slane %v5269_v30, 4  ;;  %5576 = vst [vmem:[#allocation2 + $0x68] sm:$0xf] %v5575_v45  ;;  %5579 = vst [vmem:[#allocation2 + $0x6c] sm:$0x1] %v5578_v11 }
 0x27d   : > { %v10660_v17 = vpop.f32.mrb[24].mxu0  ;;  %5564 = vst [vmem:[#allocation2 + $0x58] sm:$0xf] %v5563_v28  ;;  %5567 = vst [vmem:[#allocation2 + $0x5c] sm:$0x1] %v5566_v3  ;;  %v5581_v32 = vsel %vm11360_vm6, %v5288_v31, %v5580_v25  ;;  %v5584_v35 = vsel %vm11302_vm2, %v5289_v26, %v5583_v39  ;;  %v8286_v8 = vrot.slane %v8284_v2, 5  ;;  %10738 = vmatprep.subr.bf16.mxu1 %v11088_v38 }
 0x27e   : > { %v10661_v59 = vpop.f32.mrb[25].mxu0  ;;  %v5569_v12 = vsel %vm11360_vm6, %v5272_v61, %v5568_v56  ;;  %v5572_v21 = vsel %vm11302_vm2, %v5273_v37, %v5571_v62  ;;  %5585 = vst [vmem:[#allocation2 + $0x74] sm:$0x1] %v5584_v35  ;;  %5582 = vst [vmem:[#allocation2 + $0x70] sm:$0xf] %v5581_v32  ;;  %v8294_v41 = vrot.slane %v8292_v51, 5 }
 0x27f   : > { %v10662_v22 = vadd.f32 %v10661_v59, %v10660_v17  ;;  %v10663_v9 = vpop.f32.mrb[26].mxu0  ;;  %5573 = vst [vmem:[#allocation2 + $0x64] sm:$0x1] %v5572_v21  ;;  %5570 = vst [vmem:[#allocation2 + $0x60] sm:$0xf] %v5569_v12  ;;  %v5999_v24 = vshrl.u32 %v5862_v47, 16 }
 0x280   : > { %v10664_v10 = vpop.f32.mrb[27].mxu0  ;;  %v8282_v5 = vrot.slane %v8281_v6, 4  ;;  %v6008_v54 = vshll.u32 %v5863_v50, 16  ;;  %v6013_v13 = vshrl.u32 %v5864_v4, 16  ;;  %v8166_v29 = vld [vmem:[#allocation2 + $0x40] sm:$0xf]  ;;  %v8295_v2 = vor.u32 %v8294_v41, %v8291_v60 }
 0x281   : > { %v10665_v15 = vadd.f32 %v10664_v10, %v10663_v9  ;;  %v4795_v56 = vadd.f32 %v13119_v14, %v10662_v22  ;;  %v6001_v23 = vrot.slane %v5999_v24, 4  ;;  %v6004_v42 = vrot.slane %v6002_v58, 5  ;;  %v8167_v40 = vld [vmem:[#allocation2 + $0x44] sm:$0x1] }
 0x282   : > { %v6015_v36 = vrot.slane %v6013_v13, 4  ;;  %v6016_v18 = vshll.u32 %v5864_v4, 16  ;;  %v6022_v30 = vshll.u32 %v5865_v46, 16  ;;  %v8296_v25 = vrot.slane %v8295_v2, 4  ;;  %v11090_v4 = vld [vmem:[%s14416_s3] sm:$0xff]  }
 0x283   : > { %v6005_v39 = vor.u32 %v6004_v42, %v6001_v23  ;;  %v8303_v6 = vshrl.u32 %v8166_v29, 16  ;;  %v8306_v62 = vshll.u32 %v8166_v29, 16  ;;  %v4798_v11 = vadd.f32 %v13119_v14, %v10665_v15  ;;  %10739 = vmatpush3.bf16.msra.mxu1 %v11090_v4  ;;  %v5592_v4 = vld [vmem:[#allocation2 + $0x80] sm:$0xf] }
 0x284   : > { %v8287_v31 = vsel %vm11470_vm12, %v8282_v5, %v8286_v8  ;;  %v6018_v26 = vrot.slane %v6016_v18, 5  ;;  %v8312_v19 = vshll.u32 %v8167_v40, 16  ;;  %v8301_v3 = vsel %vm11470_vm12, %v8296_v25, %v8300_v57  ;;  %v7626_v47 = vld [vmem:[#allocation2 + $0x58] sm:$0xe]  ;;  %v7627_v46 = vld [vmem:[#allocation2 + $0x5c] sm:$0x1] }
 0x285   : > { %v10889_v45 = vpop.f32.mrb[12].mxu1  ;;  %v6006_v61 = vrot.slane %v6005_v39, 4  ;;  %v8305_v37 = vrot.slane %v8303_v6, 4  ;;  %v8308_v17 = vrot.slane %v8306_v62, 5  ;;  %v10470_v59 = vcombine.low %v8287_v31, %v8301_v3  ;;  %v6492_v6 = vld [vmem:[#allocation2 + $0x58] sm:$0xe] }
 0x286   : > { %v4955_v28 = vpop.f32.mrb[13].mxu1  ;;  %v6010_v60 = vrot.slane %v6008_v54, 5  ;;  %v6019_v51 = vor.u32 %v6018_v26, %v6015_v36  ;;  %v6024_v22 = vrot.slane %v6022_v30, 5  ;;  %v8314_v63 = vrot.slane %v8312_v19, 5  ;;  %v7628_v5 = vld [vmem:[#allocation2 + $0x60] sm:$0xe] }
 0x287   : > { %v4956_v50 = vadd.f32 %v4955_v28, %v4795_v56  ;;  %v10890_v32 = vpop.f32.mrb[14].mxu1  ;;  %v10666_v35 = vpop.f32.mrb[28].mxu0  ;;  %v8309_v9 = vor.u32 %v8308_v17, %v8305_v37  ;;  %v7103_v10 = vor.u32 %v13077_v55, %v13063_v43  ;;  %8718 = vrot.lane.b32.xlu0 %v10470_v59, %s11206_s19  ;;  %v10412_v38 = vrot.slane %v7626_v47, 9  ;;  %v7629_v57 = vld [vmem:[#allocation2 + $0x64] sm:$0x1]  ;;  %v11091_v36 = vld [vmem:[%s14416_s3 + $0x48] sm:$0xff]  }
 0x288   : > { %v4958_v12 = vpop.f32.mrb[15].mxu1  ;;  %v10667_v21 = vpop.f32.mrb[29].mxu0  ;;  %v6020_v15 = vrot.slane %v6019_v51, 4  ;;  %v6011_v13 = vsel %vm11470_vm12, %v6006_v61, %v6010_v60  ;;  %v7772_v56 = vrot.slane %v7627_v46, 5  ;;  %v10413_v39 = vrot.slane %v7628_v5, 9  ;;  %v11092_v62 = vld [vmem:[%s14416_s3 + $0x8] sm:$0xff]   ;;  %10740 = vmatprep.subr.bf16.mxu1 %v11091_v36 }
 0x289   : > { %v5046_v8 = vmax.f32 %v4956_v50, 0.0  ;;  %v4959_v41 = vadd.f32 %v4958_v12, %v4798_v11  ;;  %v10668_v24 = vadd.f32 %v10667_v21, %v10666_v35  ;;  %v10669_v58 = vpop.f32.mrb[30].mxu0  ;;  %v8310_v29 = vrot.slane %v8309_v9, 4  ;;  %v6493_v28 = vld [vmem:[#allocation2 + $0x5c] sm:$0x1]  ;;  %10741 = vmatpush3.bf16.msra.mxu1 %v11092_v62 }
 0x28a   : > { %v10670_v54 = vpop.f32.mrb[31].mxu0  ;;  %v6025_v18 = vsel %vm11470_vm12, %v6020_v15, %v6024_v22  ;;  %v7773_v25 = vsel %vm11432_vm11, %v10412_v38, %v7772_v56  ;;  %v5586_v3 = vld [vmem:[#allocation2 + $0x78] sm:$0xf]  ;;  %v5589_v61 = vld [vmem:[#allocation2 + $0x7c] sm:$0x1]  ;;  %v7776_v50 = vrot.slane %v7629_v57, 5 }
 0x28b   : > { %v10588_v2 = vpack.c.bf16 %v5046_v8, %v5046_v8  ;;  %v5047_v23 = vmax.f32 %v4959_v41, 0.0  ;;  %v4803_v42 = vadd.f32 %v13119_v14, %v10668_v24  ;;  %v10671_v40 = vadd.f32 %v10670_v54, %v10669_v58  ;;  %v5595_v12 = vld [vmem:[#allocation2 + $0x84] sm:$0x1]  ;;  %v11077_v22 = vld [vmem:[#allocation2 + $0x58] ss:$8 sps:$4 sm:$0xff]  }
 0x28c   : > { %v8315_v30 = vsel %vm11470_vm12, %v8310_v29, %v8314_v63  ;;  %v10311_v17 = vcombine.low %v6011_v13, %v6025_v18  ;;  %v7777_v9 = vsel %vm11432_vm11, %v10413_v39, %v7776_v50  ;;  %v10333_v7 = vrot.slane %v6492_v6, 9  ;;  %v8795_v24 = vld [vmem:[#allocation2 + $0x64] sm:$0x1]  ;;  %v8796_v58 = vld [vmem:[#allocation2 + $0x68] sm:$0xe] }
 0x28d   : > { %v5291_v11 = vshrl.u32 %v10588_v2, 16  ;;  %v5294_v31 = vshll.u32 %v10588_v2, 16  ;;  %v10589_v26 = vpack.c.bf16 %v5047_v23, %v5047_v23  ;;  %v4964_v19 = vadd.f32 %v10889_v45, %v4803_v42  ;;  %v8794_v45 = vld [vmem:[#allocation2 + $0x60] sm:$0xe]  ;;  %v8797_v13 = vld [vmem:[#allocation2 + $0x6c] sm:$0x1] }
 0x28e   : > { %v4806_v37 = vadd.f32 %v13119_v14, %v10671_v40  ;;  %v10471_v47 = vcombine.low %v8315_v30, %v8329_v20  ;;  %6416 = vrot.lane.b32.xlu1 %v10311_v17, %s11207_s20  ;;  %v6640_v48 = vrot.slane %v6493_v28, 5  ;;  %v10440_v5 = vcombine.low %v7773_v25, %v7777_v9  ;;  %v13164_v40 = vld [vmem:[#allocation2 + $0x58] sm:$0xf]  ;;  %v11078_v6 = vld [vmem:[#allocation2 + $0x60] ss:$8 sps:$4 sm:$0xff]  }
 0x28f   : > { %v5293_v35 = vrot.slane %v5291_v11, 7  ;;  %v5299_v59 = vshrl.u32 %v10589_v26, 16  ;;  %v5302_v60 = vshll.u32 %v10589_v26, 16  ;;  %v5048_v51 = vmax.f32 %v4964_v19, 0.0  ;;  %v5601_v26 = vld [vmem:[#allocation2 + $0x8c] sm:$0x1] }
 0x290   : > { %v4967_v21 = vadd.f32 %v10890_v32, %v4806_v37  ;;  %8720 = vrot.lane.b32.xlu0 %v10471_v47, %s11206_s19  ;;  %v6641_v54 = vsel %vm11432_vm11, %v10333_v7, %v6640_v48  ;;  %v10492_v29 = vrot.slane %v8794_v45, 9  ;;  %v8940_v28 = vrot.slane %v8795_v24, 5 }
 0x291   : > { %v5296_v20 = vor.u32 %v5294_v31, %v5293_v35  ;;  %v5297_v63 = vrot.slane %v5293_v35, 4  ;;  %v5301_v46 = vrot.slane %v5299_v59, 7  ;;  %v10590_v8 = vpack.c.bf16 %v5048_v51, %v5048_v51  ;;  %v10672_v41 = vpop.f32.mrb[32].mxu0  ;;  %v5598_v31 = vld [vmem:[#allocation2 + $0x88] sm:$0xf]  ;;  %v11093_v59 = vld [vmem:[%s14416_s3 + $0x50] sm:$0xff]  }
 0x292   : > { %v5049_v15 = vmax.f32 %v4967_v21, 0.0  ;;  %v10673_v32 = vpop.f32.mrb[33].mxu0  ;;  %6962 = vrot.lane.b32.xlu1 %v11077_v22, %s11206_s19  ;;  %v10360_v19 = vcombine.low %v13000_v16, %v6641_v54  ;;  %v10493_v50 = vrot.slane %v8796_v58, 9  ;;  %v5607_v51 = vld [vmem:[#allocation2 + $0x94] sm:$0x1]  ;;  %v8941_v16 = vsel %vm11432_vm11, %v10492_v29, %v8940_v28  ;;  %10742 = vmatprep.subr.bf16.mxu1 %v11093_v59 }
 0x293   : > { %v5587_v38 = vsel %vm11360_vm6, %v5296_v20, %v5586_v3  ;;  %v5590_v56 = vsel %vm11302_vm2, %v5297_v63, %v5589_v61  ;;  %v5304_v2 = vor.u32 %v5302_v60, %v5301_v46  ;;  %v5305_v23 = vrot.slane %v5301_v46, 4  ;;  %v10675_v42 = vpop.f32.mrb[34].mxu0  ;;  %v5869_v61 = vld [vmem:[#allocation2 + $0x5c] sm:$0x1]  ;;  %v5604_v60 = vld [vmem:[#allocation2 + $0x90] sm:$0xf] }
 0x294   : > { %5591 = vst [vmem:[#allocation2 + $0x7c] sm:$0x1] %v5590_v56  ;;  %5588 = vst [vmem:[#allocation2 + $0x78] sm:$0xf] %v5587_v38  ;;  %v5307_v57 = vshrl.u32 %v10590_v8, 16  ;;  %v5310_v36 = vshll.u32 %v10590_v8, 16  ;;  %v10591_v18 = vpack.c.bf16 %v5049_v15, %v5049_v15  ;;  %7922 = vrot.lane.b32.xlu0 %v10440_v5, %s11207_s20  ;;  %v10674_v30 = vadd.f32 %v10673_v32, %v10672_v41 }
 0x295   : > { %v10676_v25 = vpop.f32.mrb[35].mxu0  ;;  %v13168_v39 = vpop.f32.mrb[16].mxu1  ;;  %v5593_v62 = vsel %vm11360_vm6, %v5304_v2, %v5592_v4  ;;  %v5596_v11 = vsel %vm11302_vm2, %v5305_v23, %v5595_v12  ;;  %v8944_v45 = vrot.slane %v8797_v13, 5  ;;  %v6041_v48 = vshrl.u32 %v13164_v40, 16  ;;  %v7630_v20 = vld [vmem:[#allocation2 + $0x68] sm:$0xe] }
 0x296   : > { %v4971_v3 = vpop.f32.mrb[17].mxu1  ;;  %5597 = vst [vmem:[#allocation2 + $0x84] sm:$0x1] %v5596_v11  ;;  %5594 = vst [vmem:[#allocation2 + $0x80] sm:$0xf] %v5593_v62  ;;  %v5309_v37 = vrot.slane %v5307_v57, 7  ;;  %v10677_v4 = vadd.f32 %v10676_v25, %v10675_v42  ;;  %v4811_v12 = vadd.f32 %v13119_v14, %v10674_v30  ;;  %6786 = vrot.lane.b32.xlu1 %v10360_v19, %s11205_s18 }
 0x297   : > { %v5315_v17 = vshrl.u32 %v10591_v18, 16  ;;  %v5318_v47 = vshll.u32 %v10591_v18, 16  ;;  %v13175_v35 = vpop.f32.mrb[18].mxu1  ;;  %v11094_v63 = vld [vmem:[%s14416_s3 + $0x10] sm:$0xff]   ;;  %v8945_v46 = vsel %vm11432_vm11, %v10493_v50, %v8944_v45  ;;  %v6044_v41 = vshll.u32 %v13164_v40, 16  ;;  %v11097_v5 = vld [vmem:[%s14416_s3 + $0x58] sm:$0xff]  }
 0x298   : > { %v4974_v21 = vpop.f32.mrb[19].mxu1  ;;  %v5312_v22 = vor.u32 %v5310_v36, %v5309_v37  ;;  %v5313_v9 = vrot.slane %v5309_v37, 4  ;;  %8098 = vrot.lane.b32.xlu0 %v11078_v6, %s11205_s18  ;;  %v4972_v8 = vadd.f32 %v4971_v3, %v4811_v12  ;;  %v6050_v24 = vshll.u32 %v5869_v61, 16  ;;  %v7631_v58 = vld [vmem:[#allocation2 + $0x6c] sm:$0x1]  ;;  %10743 = vmatpush3.bf16.msra.mxu1 %v11094_v63 }
 0x299   : > { %v5317_v7 = vrot.slane %v5315_v17, 7  ;;  %v10678_v15 = vpop.f32.mrb[36].mxu0  ;;  %v7632_v38 = vld [vmem:[#allocation2 + $0x70] sm:$0xe]  ;;  %v7633_v56 = vld [vmem:[#allocation2 + $0x74] sm:$0x1]  ;;  %v10520_v23 = vcombine.low %v8941_v16, %v8945_v46  ;;  %10744 = vmatprep.subr.bf16.mxu1 %v11097_v5  ;;  %v4814_v6 = vadd.f32 %v13119_v14, %v10677_v4 }
 0x29a   : > { %v5599_v32 = vsel %vm11360_vm6, %v5312_v22, %v5598_v31  ;;  %v5602_v54 = vsel %vm11302_vm2, %v5313_v9, %v5601_v26  ;;  %v10679_v2 = vpop.f32.mrb[37].mxu0  ;;  %v5050_v42 = vmax.f32 %v4972_v8, 0.0  ;;  %v6043_v40 = vrot.slane %v6041_v48, 4  ;;  %v6494_v17 = vld [vmem:[#allocation2 + $0x60] sm:$0xe] }
 0x29b   : > { %v5320_v13 = vor.u32 %v5318_v47, %v5317_v7  ;;  %v5321_v29 = vrot.slane %v5317_v7, 4  ;;  %5603 = vst [vmem:[#allocation2 + $0x8c] sm:$0x1] %v5602_v54  ;;  %5600 = vst [vmem:[#allocation2 + $0x88] sm:$0xf] %v5599_v32  ;;  %v6046_v57 = vrot.slane %v6044_v41, 5  ;;  %v4975_v28 = vadd.f32 %v4974_v21, %v4814_v6 }
 0x29c   : > { %v10681_v36 = vpop.f32.mrb[38].mxu0  ;;  %v6052_v25 = vrot.slane %v6050_v24, 5  ;;  %9102 = vst.msk [vmem:[#allocation3 + $0x70] sm:$0xff] %vm1174_vm13, %v10520_v23  ;;  %v10592_v11 = vpack.c.bf16 %v5050_v42, %v5050_v42  ;;  %v10414_v26 = vrot.slane %v7630_v20, 9  ;;  %v7780_v19 = vrot.slane %v7631_v58, 5 }
 0x29d   : > { %v5605_v18 = vsel %vm11360_vm6, %v5320_v13, %v5604_v60  ;;  %v5608_v30 = vsel %vm11302_vm2, %v5321_v29, %v5607_v51  ;;  %v10682_v62 = vpop.f32.mrb[39].mxu0  ;;  %v6047_v31 = vor.u32 %v6046_v57, %v6043_v40  ;;  %v10415_v3 = vrot.slane %v7632_v38, 9  ;;  %v11099_v51 = vld [vmem:[%s14416_s3 + $0x18] sm:$0xff]   ;;  %v5610_v16 = vld [vmem:[#allocation2 + $0xa8] sm:$0xf] }
 0x29e   : > { %5606 = vst [vmem:[#allocation2 + $0x90] sm:$0xf] %v5605_v18  ;;  %5609 = vst [vmem:[#allocation2 + $0x94] sm:$0x1] %v5608_v30  ;;  %v7784_v61 = vrot.slane %v7633_v56, 5  ;;  %v10680_v37 = vadd.f32 %v10679_v2, %v10678_v15  ;;  %v5323_v47 = vshrl.u32 %v10592_v11, 16  ;;  %v7781_v60 = vsel %vm11432_vm11, %v10414_v26, %v7780_v19  ;;  %10745 = vmatpush3.bf16.msra.mxu1 %v11099_v51 }
 0x29f   : > { %v5326_v50 = vshll.u32 %v10592_v11, 16  ;;  %v6048_v59 = vrot.slane %v6047_v31, 4  ;;  %v5051_v45 = vmax.f32 %v4975_v28, 0.0  ;;  %v10683_v21 = vadd.f32 %v10682_v62, %v10681_v36  ;;  %v6495_v22 = vld [vmem:[#allocation2 + $0x64] sm:$0x1] }
 0x2a0   : > { %v7785_v4 = vsel %vm11432_vm11, %v10415_v3, %v7784_v61  ;;  %v4819_v12 = vadd.f32 %v13119_v14, %v10680_v37  ;;  %v6496_v9 = vld [vmem:[#allocation2 + $0x68] sm:$0xe]  ;;  %v5325_v7 = vrot.slane %v5323_v47, 7  ;;  %v5613_v48 = vld [vmem:[#allocation2 + $0xac] sm:$0x1]  ;;  %v10334_v8 = vrot.slane %v6494_v17, 9 }
 0x2a1   : > { %v6053_v20 = vsel %vm11470_vm12, %v6048_v59, %v6052_v25  ;;  %v10441_v63 = vcombine.low %v7781_v60, %v7785_v4  ;;  %v6497_v46 = vld [vmem:[#allocation2 + $0x6c] sm:$0x1]  ;;  %v10593_v24 = vpack.c.bf16 %v5051_v45, %v5051_v45  ;;  %v4822_v15 = vadd.f32 %v13119_v14, %v10683_v21  ;;  %v8798_v5 = vld [vmem:[#allocation2 + $0x70] sm:$0xe]  ;;  %v8799_v32 = vld [vmem:[#allocation2 + $0x74] sm:$0x1] }
 0x2a2   : > { %v10312_v41 = vcombine.low %v6039_v49, %v6053_v20  ;;  %v4980_v58 = vadd.f32 %v13168_v39, %v4819_v12  ;;  %v8800_v54 = vld [vmem:[#allocation2 + $0x78] sm:$0xe]  ;;  %v5328_v13 = vor.u32 %v5326_v50, %v5325_v7  ;;  %v5329_v29 = vrot.slane %v5325_v7, 4  ;;  %v8801_v2 = vld [vmem:[#allocation2 + $0x7c] sm:$0x1]  ;;  %v13223_v23 = vpop.f32.mrb[40].mxu0 }
 0x2a3   : > { %7924 = vrot.lane.b32.xlu0 %v10441_v63, %s11207_s20  ;;  %v6644_v38 = vrot.slane %v6495_v22, 5  ;;  %v10335_v56 = vrot.slane %v6496_v9, 9  ;;  %v9128_v42 = vld [vmem:[#allocation3 + $0x70] sm:$0xff]  ;;  %v5331_v52 = vshrl.u32 %v10593_v24, 16  ;;  %v5334_v33 = vshll.u32 %v10593_v24, 16  ;;  %v13234_v11 = vpop.f32.mrb[41].mxu0 }
 0x2a4   : > { %6418 = vrot.lane.b32.xlu1 %v10312_v41, %s11207_s20  ;;  %v11079_v49 = vld [vmem:[#allocation2 + $0x68] ss:$8 sps:$4 sm:$0xff]   ;;  %v5052_v39 = vmax.f32 %v4980_v58, 0.0  ;;  %v4983_v40 = vadd.f32 %v13175_v35, %v4822_v15  ;;  %10919 = vmatprep.mubr.msk.bf16.mxu0 %vm1174_vm13, %v9128_v42  ;;  %v5611_v57 = vsel %vm11360_vm6, %v5328_v13, %v5610_v16  ;;  %v5614_v36 = vsel %vm11302_vm2, %v5329_v29, %v5613_v48  ;;  %v5619_v30 = vld [vmem:[#allocation2 + $0xb4] sm:$0x1]  ;;  %v13236_v28 = vpop.f32.mrb[42].mxu0 }
 0x2a5   : > { %v5616_v18 = vld [vmem:[#allocation2 + $0xb0] sm:$0xf]  ;;  %v6645_v6 = vsel %vm11432_vm11, %v10334_v8, %v6644_v38  ;;  %v6648_v62 = vrot.slane %v6497_v46, 5  ;;  %5612 = vst [vmem:[#allocation2 + $0xa8] sm:$0xf] %v5611_v57  ;;  %v5333_v35 = vrot.slane %v5331_v52, 7 }
 0x2a6   : > { %v11080_v25 = vld [vmem:[#allocation2 + $0x70] ss:$8 sps:$4 sm:$0xff]   ;;  %5615 = vst [vmem:[#allocation2 + $0xac] sm:$0x1] %v5614_v36  ;;  %v10594_v31 = vpack.c.bf16 %v5052_v39, %v5052_v39  ;;  %v5053_v26 = vmax.f32 %v4983_v40, 0.0  ;;  %v10494_v19 = vrot.slane %v8798_v5, 9 }
 0x2a7   : > { %8100 = vrot.lane.b32.xlu0 %v11080_v25, %s11205_s18  ;;  %v6649_v3 = vsel %vm11432_vm11, %v10335_v56, %v6648_v62  ;;  %v8948_v61 = vrot.slane %v8799_v32, 5  ;;  %v10495_v37 = vrot.slane %v8800_v54, 9  ;;  %v8952_v17 = vrot.slane %v8801_v2, 5  ;;  %v13241_v47 = vpop.f32.mrb[20].mxu1  ;;  %v8170_v16 = vld [vmem:[#allocation2 + $0x60] sm:$0xf] }
 0x2a8   : > { %v5336_v50 = vor.u32 %v5334_v33, %v5333_v35  ;;  %v5337_v59 = vrot.slane %v5333_v35, 4  ;;  %6964 = vrot.lane.b32.xlu1 %v11079_v49, %s11206_s19  ;;  %v5339_v60 = vshrl.u32 %v10594_v31, 16  ;;  %v5342_v51 = vshll.u32 %v10594_v31, 16  ;;  %v13244_v45 = vpop.f32.mrb[43].mxu0  ;;  %v8171_v9 = vld [vmem:[#allocation2 + $0x64] sm:$0x1] }
 0x2a9   : > { %v10595_v4 = vpack.c.bf16 %v5053_v26, %v5053_v26  ;;  %v10361_v12 = vcombine.low %v6645_v6, %v6649_v3  ;;  %v8949_v21 = vsel %vm11432_vm11, %v10494_v19, %v8948_v61  ;;  %v8953_v22 = vsel %vm11432_vm11, %v10495_v37, %v8952_v17  ;;  %v8172_v7 = vld [vmem:[#allocation2 + $0x68] sm:$0xf]  ;;  %v5622_v46 = vld [vmem:[#allocation2 + $0xb8] sm:$0xf]  ;;  %v5625_v8 = vld [vmem:[#allocation2 + $0xbc] sm:$0x1] }
 0x2aa   : > { %v5617_v48 = vsel %vm11360_vm6, %v5336_v50, %v5616_v18  ;;  %v5620_v20 = vsel %vm11302_vm2, %v5337_v59, %v5619_v30  ;;  %v5341_v63 = vrot.slane %v5339_v60, 7  ;;  %v10521_v41 = vcombine.low %v8949_v21, %v8953_v22  ;;  %v13254_v24 = vpop.f32.mrb[21].mxu1  ;;  %v8173_v5 = vld [vmem:[#allocation2 + $0x6c] sm:$0x1]  ;;  %v5870_v2 = vld [vmem:[#allocation2 + $0x60] sm:$0xf] }
 0x2ab   : > { %5621 = vst [vmem:[#allocation2 + $0xb4] sm:$0x1] %v5620_v20  ;;  %5618 = vst [vmem:[#allocation2 + $0xb0] sm:$0xf] %v5617_v48  ;;  %v5347_v58 = vshrl.u32 %v10595_v4, 16  ;;  %v5350_v15 = vshll.u32 %v10595_v4, 16 }
 0x2ac   : > { %v8331_v32 = vshrl.u32 %v8170_v16, 16  ;;  %v8334_v54 = vshll.u32 %v8170_v16, 16  ;;  %v5344_v13 = vor.u32 %v5342_v51, %v5341_v63  ;;  %v5345_v29 = vrot.slane %v5341_v63, 4  ;;  %6788 = vrot.lane.b32.xlu1 %v10361_v12, %s11205_s18  ;;  %9103 = vst.msk [vmem:[#allocation3 + $0x88] sm:$0xff] %vm1174_vm13, %v10521_v41  ;;  %v13258_v42 = vpop.f32.mrb[22].mxu1 }
 0x2ad   : > { %v8340_v38 = vshll.u32 %v8171_v9, 16  ;;  %v8345_v56 = vshrl.u32 %v8172_v7, 16  ;;  %v5349_v52 = vrot.slane %v5347_v58, 7  ;;  %v8348_v39 = vshll.u32 %v8172_v7, 16  ;;  %v5871_v40 = vld [vmem:[#allocation2 + $0x64] sm:$0x1] }
 0x2ae   : > { %v8333_v33 = vrot.slane %v8331_v32, 4  ;;  %v8336_v49 = vrot.slane %v8334_v54, 5  ;;  %v5623_v57 = vsel %vm11360_vm6, %v5344_v13, %v5622_v46  ;;  %v5626_v36 = vsel %vm11302_vm2, %v5345_v29, %v5625_v8  ;;  %v5628_v18 = vld [vmem:[#allocation2 + $0xc0] sm:$0xf]  ;;  %v5631_v30 = vld [vmem:[#allocation2 + $0xc4] sm:$0x1] }
 0x2af   : > { %v8342_v25 = vrot.slane %v8340_v38, 5  ;;  %v8347_v6 = vrot.slane %v8345_v56, 4  ;;  %5624 = vst [vmem:[#allocation2 + $0xb8] sm:$0xf] %v5623_v57  ;;  %5627 = vst [vmem:[#allocation2 + $0xbc] sm:$0x1] %v5626_v36  ;;  %v5352_v62 = vor.u32 %v5350_v15, %v5349_v52 }
 0x2b0   : > { %v5353_v35 = vrot.slane %v5349_v52, 4  ;;  %v8337_v31 = vor.u32 %v8336_v49, %v8333_v33  ;;  %v8350_v26 = vrot.slane %v8348_v39, 5  ;;  %v5872_v19 = vld [vmem:[#allocation2 + $0x68] sm:$0xf]  ;;  %v5873_v3 = vld [vmem:[#allocation2 + $0x6c] sm:$0x1] }
 0x2b1   : > { %v8354_v61 = vshll.u32 %v8173_v5, 16  ;;  %v6055_v37 = vshrl.u32 %v5870_v2, 16  ;;  %v6058_v17 = vshll.u32 %v5870_v2, 16  ;;  %v6064_v50 = vshll.u32 %v5871_v40, 16  ;;  %v7634_v59 = vld [vmem:[#allocation2 + $0x78] sm:$0xe] }
 0x2b2   : > { %v5629_v60 = vsel %vm11360_vm6, %v5352_v62, %v5628_v18  ;;  %v5632_v51 = vsel %vm11302_vm2, %v5353_v35, %v5631_v30  ;;  %v8338_v16 = vrot.slane %v8337_v31, 4  ;;  %v8351_v4 = vor.u32 %v8350_v26, %v8347_v6  ;;  %v7635_v12 = vld [vmem:[#allocation2 + $0x7c] sm:$0x1]  ;;  %v7636_v21 = vld [vmem:[#allocation2 + $0x80] sm:$0xe]  ;;  %v13268_v22 = vpop.f32.mrb[23].mxu1 }
 0x2b3   : > { %5633 = vst [vmem:[#allocation2 + $0xc4] sm:$0x1] %v5632_v51  ;;  %5630 = vst [vmem:[#allocation2 + $0xc0] sm:$0xf] %v5629_v60  ;;  %v8356_v9 = vrot.slane %v8354_v61, 5  ;;  %v6057_v7 = vrot.slane %v6055_v37, 4  ;;  %v10686_v26 = vadd.f32 %v13234_v11, %v13223_v23 }
 0x2b4   : > { %v6060_v48 = vrot.slane %v6058_v17, 5  ;;  %v6066_v20 = vrot.slane %v6064_v50, 5  ;;  %v7637_v63 = vld [vmem:[#allocation2 + $0x84] sm:$0x1]  ;;  %v6498_v46 = vld [vmem:[#allocation2 + $0x70] sm:$0xe]  ;;  %v8343_v41 = vsel %vm11470_vm12, %v8338_v16, %v8342_v25 }
 0x2b5   : > { %v9131_v8 = vld [vmem:[#allocation3 + $0x88] sm:$0xff]  ;;  %v8352_v58 = vrot.slane %v8351_v4, 4  ;;  %v6069_v15 = vshrl.u32 %v5872_v19, 16  ;;  %v6072_v5 = vshll.u32 %v5872_v19, 16  ;;  %v6499_v32 = vld [vmem:[#allocation2 + $0x74] sm:$0x1] }
 0x2b6   : > { %v6500_v54 = vld [vmem:[#allocation2 + $0x78] sm:$0xe]  ;;  %v6501_v13 = vld [vmem:[#allocation2 + $0x7c] sm:$0x1]  ;;  %10920 = vmatmul.mubr.msk.bf16.gmra.mrb[72].mxu0 %vm1174_vm13, %v9131_v8  ;;  %v6061_v29 = vor.u32 %v6060_v48, %v6057_v7  ;;  %v6078_v38 = vshll.u32 %v5873_v3, 16  ;;  %v10416_v56 = vrot.slane %v7634_v59, 9 }
 0x2b7   : > { %v7788_v2 = vrot.slane %v7635_v12, 5  ;;  %v8802_v52 = vld [vmem:[#allocation2 + $0x80] sm:$0xe]  ;;  %v13273_v33 = vpop.f32.mrb[44].mxu0  ;;  %v8357_v49 = vsel %vm11470_vm12, %v8352_v58, %v8356_v9  ;;  %v6071_v39 = vrot.slane %v6069_v15, 4  ;;  %v6074_v40 = vrot.slane %v6072_v5, 5 }
 0x2b8   : > { %v10417_v57 = vrot.slane %v7636_v21, 9  ;;  %v13277_v36 = vpop.f32.mrb[45].mxu0  ;;  %v10472_v18 = vcombine.low %v8343_v41, %v8357_v49  ;;  %v6062_v30 = vrot.slane %v6061_v29, 4  ;;  %v6080_v25 = vrot.slane %v6078_v38, 5  ;;  %v8803_v62 = vld [vmem:[#allocation2 + $0x84] sm:$0x1] }
 0x2b9   : > { %v7789_v6 = vsel %vm11432_vm11, %v10416_v56, %v7788_v2  ;;  %v6075_v35 = vor.u32 %v6074_v40, %v6071_v39  ;;  %v7792_v31 = vrot.slane %v7637_v63, 5  ;;  %v10336_v19 = vrot.slane %v6498_v46, 9  ;;  %v8804_v3 = vld [vmem:[#allocation2 + $0x88] sm:$0xe]  ;;  %v8805_v59 = vld [vmem:[#allocation2 + $0x8c] sm:$0x1] }
 0x2ba   : > { %8722 = vrot.lane.b32.xlu0 %v10472_v18, %s11206_s19  ;;  %v6067_v61 = vsel %vm11470_vm12, %v6062_v30, %v6066_v20  ;;  %v6652_v37 = vrot.slane %v6499_v32, 5  ;;  %v10337_v17 = vrot.slane %v6500_v54, 9  ;;  %v6656_v50 = vrot.slane %v6501_v13, 5  ;;  %v13286_v60 = vpop.f32.mrb[46].mxu0  ;;  %v8806_v23 = vld [vmem:[#allocation2 + $0x90] sm:$0xe] }
 0x2bb   : > { %v6076_v51 = vrot.slane %v6075_v35, 4  ;;  %v7793_v16 = vsel %vm11432_vm11, %v10417_v57, %v7792_v31  ;;  %v10496_v4 = vrot.slane %v8802_v52, 9  ;;  %v8956_v12 = vrot.slane %v8803_v62, 5  ;;  %v13290_v11 = vpop.f32.mrb[47].mxu0  ;;  %v8807_v20 = vld [vmem:[#allocation2 + $0x94] sm:$0x1] }
 0x2bc   : > { %v10442_v21 = vcombine.low %v7789_v6, %v7793_v16  ;;  %v13294_v9 = vsel %vm11432_vm11, %v10336_v19, %v6652_v37  ;;  %v13298_v7 = vsel %vm11432_vm11, %v10337_v17, %v6656_v50  ;;  %v10497_v48 = vrot.slane %v8804_v3, 9  ;;  %v8174_v63 = vld [vmem:[#allocation2 + $0x70] sm:$0xf]  ;;  %v13300_v46 = vpop.f32.mrb[48].mxu0  ;;  %v8175_v5 = vld [vmem:[#allocation2 + $0x74] sm:$0x1] }
 0x2bd   : > { %v6081_v8 = vsel %vm11470_vm12, %v6076_v51, %v6080_v25  ;;  %v10362_v41 = vcombine.low %v13294_v9, %v13298_v7  ;;  %v8957_v58 = vsel %vm11432_vm11, %v10496_v4, %v8956_v12  ;;  %v8960_v15 = vrot.slane %v8805_v59, 5  ;;  %v8176_v32 = vld [vmem:[#allocation2 + $0x78] sm:$0xf]  ;;  %v13308_v54 = vpop.f32.mrb[49].mxu0  ;;  %v11082_v29 = vld [vmem:[#allocation2 + $0x80] ss:$8 sps:$4 sm:$0xff]  }
 0x2be   : > { %v10313_v13 = vcombine.low %v6067_v61, %v6081_v8  ;;  %7926 = vrot.lane.b32.xlu0 %v10442_v21, %s11207_s20  ;;  %v13313_v38 = vadd.f32 %v13244_v45, %v13236_v28  ;;  %v4827_v56 = vadd.f32 %v13119_v14, %v10686_v26  ;;  %v10498_v2 = vrot.slane %v8806_v23, 9  ;;  %v13316_v52 = vpop.f32.mrb[50].mxu0  ;;  %v8177_v40 = vld [vmem:[#allocation2 + $0x7c] sm:$0x1]  ;;  %v5874_v62 = vld [vmem:[#allocation2 + $0x70] sm:$0xf] }
 0x2bf   : > { %v8961_v49 = vsel %vm11432_vm11, %v10497_v48, %v8960_v15  ;;  %v8964_v39 = vrot.slane %v8807_v20, 5  ;;  %v8359_v57 = vshrl.u32 %v8174_v63, 16  ;;  %v8362_v18 = vshll.u32 %v8174_v63, 16  ;;  %v13320_v30 = vpop.f32.mrb[51].mxu0  ;;  %v5875_v35 = vld [vmem:[#allocation2 + $0x74] sm:$0x1] }
 0x2c0   : > { %6420 = vrot.lane.b32.xlu1 %v10313_v13, %s11207_s20  ;;  %v10522_v25 = vcombine.low %v8957_v58, %v8961_v49  ;;  %v4988_v28 = vadd.f32 %v13254_v24, %v4827_v56  ;;  %v8368_v45 = vshll.u32 %v8175_v5, 16  ;;  %v8373_v6 = vshrl.u32 %v8176_v32, 16  ;;  %v5876_v61 = vld [vmem:[#allocation2 + $0x78] sm:$0xf]  ;;  %v13326_v37 = vpop.f32.mrb[24].mxu1 }
 0x2c1   : > { %v8965_v31 = vsel %vm11432_vm11, %v10498_v2, %v8964_v39  ;;  %v8361_v26 = vrot.slane %v8359_v57, 4  ;;  %v8364_v19 = vrot.slane %v8362_v18, 5  ;;  %v8376_v3 = vshll.u32 %v8176_v32, 16  ;;  %v11081_v17 = vld [vmem:[#allocation2 + $0x78] ss:$8 sps:$4 sm:$0xff]   ;;  %v13331_v16 = vpop.f32.mrb[25].mxu1 }
 0x2c2   : > { %8102 = vrot.lane.b32.xlu0 %v11082_v29, %s11205_s18  ;;  %9104 = vst.msk [vmem:[#allocation3 + $0xa0] sm:$0xff] %vm1174_vm13, %v10522_v25  ;;  %v5054_v50 = vmax.f32 %v4988_v28, 0.0  ;;  %v10523_v24 = vcombine.low %v8965_v31, %v13059_v27  ;;  %v8370_v59 = vrot.slane %v8368_v45, 5  ;;  %v8375_v51 = vrot.slane %v8373_v6, 4  ;;  %v13333_v48 = vpop.f32.mrb[26].mxu1 }
 0x2c3   : > { %v8365_v4 = vor.u32 %v8364_v19, %v8361_v26  ;;  %v8378_v12 = vrot.slane %v8376_v3, 5  ;;  %v8382_v23 = vshll.u32 %v8177_v40, 16  ;;  %v6083_v21 = vshrl.u32 %v5874_v62, 16  ;;  %v13337_v15 = vpop.f32.mrb[27].mxu1  ;;  %v5877_v13 = vld [vmem:[#allocation2 + $0x7c] sm:$0x1] }
 0x2c4   : > { %6966 = vrot.lane.b32.xlu1 %v11081_v17, %s11206_s19  ;;  %v10596_v20 = vpack.c.bf16 %v5054_v50, %v5054_v50  ;;  %9105 = vst.msk [vmem:[#allocation3 + $0xb8] sm:$0xff] %vm1174_vm13, %v10523_v24  ;;  %v6086_v63 = vshll.u32 %v5874_v62, 16  ;;  %v6092_v8 = vshll.u32 %v5875_v35, 16  ;;  %v6097_v58 = vshrl.u32 %v5876_v61, 16  ;;  %v13339_v56 = vpop.f32.mrb[28].mxu1  ;;  %v13343_v35 = vpop.f32.mrb[52].mxu0 }
 0x2c5   : > { %v8366_v27 = vrot.slane %v8365_v4, 4  ;;  %v8379_v5 = vor.u32 %v8378_v12, %v8375_v51  ;;  %v8384_v32 = vrot.slane %v8382_v23, 5  ;;  %v6085_v29 = vrot.slane %v6083_v21, 4  ;;  %v7638_v57 = vld [vmem:[#allocation2 + $0x88] sm:$0xe]  ;;  %v13355_v4 = vpop.f32.mrb[53].mxu0 }
 0x2c6   : > { %v5355_v2 = vshrl.u32 %v10596_v20, 16  ;;  %v5358_v49 = vshll.u32 %v10596_v20, 16  ;;  %v6088_v39 = vrot.slane %v6086_v63, 5  ;;  %v6094_v40 = vrot.slane %v6092_v8, 5  ;;  %v5634_v18 = vld [vmem:[#allocation2 + $0xc8] sm:$0xf] }
 0x2c7   : > { %v5637_v25 = vld [vmem:[#allocation2 + $0xcc] sm:$0x1]  ;;  %v8371_v28 = vsel %vm11470_vm12, %v8366_v27, %v8370_v59  ;;  %v8380_v45 = vrot.slane %v8379_v5, 4  ;;  %v6099_v6 = vrot.slane %v6097_v58, 4  ;;  %v6100_v62 = vshll.u32 %v5876_v61, 16 }
 0x2c8   : > { %6790 = vrot.lane.b32.xlu1 %v10362_v41, %s11205_s18  ;;  %v5357_v31 = vrot.slane %v5355_v2, 7  ;;  %v6089_v26 = vor.u32 %v6088_v39, %v6085_v29  ;;  %v6106_v19 = vshll.u32 %v5877_v13, 16  ;;  %v4830_v3 = vadd.f32 %v13119_v14, %v13313_v38  ;;  %v7639_v59 = vld [vmem:[#allocation2 + $0x8c] sm:$0x1]  ;;  %v7640_v23 = vld [vmem:[#allocation2 + $0x90] sm:$0xe] }
 0x2c9   : > { %v9134_v17 = vld [vmem:[#allocation3 + $0xa0] sm:$0xff]  ;;  %v8385_v50 = vsel %vm11470_vm12, %v8380_v45, %v8384_v32  ;;  %v6102_v24 = vrot.slane %v6100_v62, 5  ;;  %v10692_v61 = vadd.f32 %v13277_v36, %v13273_v33  ;;  %v10418_v51 = vrot.slane %v7638_v57, 9  ;;  %v7641_v58 = vld [vmem:[#allocation2 + $0x94] sm:$0x1] }
 0x2ca   : > { %10923 = vmatprep.mubr.msk.bf16.mxu0 %vm1174_vm13, %v9134_v17  ;;  %v5360_v9 = vor.u32 %v5358_v49, %v5357_v31  ;;  %v5361_v7 = vrot.slane %v5357_v31, 4  ;;  %v10473_v41 = vcombine.low %v8371_v28, %v8385_v50  ;;  %v6090_v12 = vrot.slane %v6089_v26, 4  ;;  %v6502_v33 = vld [vmem:[#allocation2 + $0x80] sm:$0xe]  ;;  %v6503_v13 = vld [vmem:[#allocation2 + $0x84] sm:$0x1] }
 0x2cb   : > { %v9137_v38 = vld [vmem:[#allocation3 + $0xb8] sm:$0xff]  ;;  %v6103_v21 = vor.u32 %v6102_v24, %v6099_v6  ;;  %v6108_v20 = vrot.slane %v6106_v19, 5  ;;  %v4991_v63 = vadd.f32 %v13268_v22, %v4830_v3  ;;  %v4835_v8 = vadd.f32 %v13119_v14, %v10692_v61  ;;  %v13368_v22 = vpop.f32.mrb[54].mxu0  ;;  %v6504_v39 = vld [vmem:[#allocation2 + $0x88] sm:$0xe]  ;;  %v13388_v24 = vpop.f32.mrb[29].mxu1 }
 0x2cc   : > { %v5635_v36 = vsel %vm11360_vm6, %v5360_v9, %v5634_v18  ;;  %v5638_v27 = vsel %vm11302_vm2, %v5361_v7, %v5637_v25  ;;  %10924 = vmatmul.mubr.msk.bf16.gmra.mrb[76].mxu0 %vm1174_vm13, %v9137_v38  ;;  %8724 = vrot.lane.b32.xlu0 %v10473_v41, %s11206_s19  ;;  %v6095_v5 = vsel %vm11470_vm12, %v6090_v12, %v6094_v40  ;;  %v7796_v32 = vrot.slane %v7639_v59, 5  ;;  %v13371_v57 = vpop.f32.mrb[55].mxu0  ;;  %v11083_v18 = vld [vmem:[#allocation2 + $0x90] ss:$8 sps:$4 sm:$0xff]   ;;  %v6505_v45 = vld [vmem:[#allocation2 + $0x8c] sm:$0x1] }
 0x2cd   : > { %5639 = vst [vmem:[#allocation2 + $0xcc] sm:$0x1] %v5638_v27  ;;  %5636 = vst [vmem:[#allocation2 + $0xc8] sm:$0xf] %v5635_v36  ;;  %v6104_v14 = vrot.slane %v6103_v21, 4  ;;  %v5055_v29 = vmax.f32 %v4991_v63, 0.0  ;;  %v4996_v2 = vadd.f32 %v13241_v47, %v4835_v8  ;;  %v10695_v40 = vadd.f32 %v13290_v11, %v13286_v60 }
 0x2ce   : > { %v10419_v49 = vrot.slane %v7640_v23, 9  ;;  %v7797_v25 = vsel %vm11432_vm11, %v10418_v51, %v7796_v32  ;;  %v7800_v28 = vrot.slane %v7641_v58, 5  ;;  %v10338_v6 = vrot.slane %v6502_v33, 9  ;;  %v8178_v19 = vld [vmem:[#allocation2 + $0x80] sm:$0xf] }
 0x2cf   : > { %v6109_v62 = vsel %vm11470_vm12, %v6104_v14, %v6108_v20  ;;  %v10597_v31 = vpack.c.bf16 %v5055_v29, %v5055_v29  ;;  %v5056_v26 = vmax.f32 %v4996_v2, 0.0  ;;  %v6660_v47 = vrot.slane %v6503_v13, 5  ;;  %v13385_v50 = vld [vmem:[%s14415_s2] ss:$0 sm:$0xff]  ;;  %v8179_v7 = vld [vmem:[#allocation2 + $0x84] sm:$0x1] }
 0x2d0   : > { %v10314_v3 = vcombine.low %v6095_v5, %v6109_v62  ;;  %8104 = vrot.lane.b32.xlu0 %v11083_v18, %s11205_s18  ;;  %v7801_v17 = vsel %vm11432_vm11, %v10419_v49, %v7800_v28  ;;  %v4838_v60 = vadd.f32 %v13385_v50, %v10695_v40  ;;  %v10339_v11 = vrot.slane %v6504_v39, 9  ;;  %v5640_v41 = vld [vmem:[#allocation2 + $0xd0] sm:$0xf]  ;;  %v5643_v12 = vld [vmem:[#allocation2 + $0xd4] sm:$0x1]  ;;  %v11100_v49 = vld [vmem:[%s14416_s3 + $0x60] sm:$0xff]  }
 0x2d1   : > { %v5363_v61 = vshrl.u32 %v10597_v31, 16  ;;  %v5366_v59 = vshll.u32 %v10597_v31, 16  ;;  %v10598_v51 = vpack.c.bf16 %v5056_v26, %v5056_v26  ;;  %v10443_v9 = vcombine.low %v7797_v25, %v7801_v17  ;;  %v11084_v23 = vld [vmem:[#allocation2 + $0x88] ss:$8 sps:$4 sm:$0xff]   ;;  %v5646_v5 = vld [vmem:[#allocation2 + $0xd8] sm:$0xf]  ;;  %10746 = vmatprep.subr.bf16.mxu1 %v11100_v49 }
 0x2d2   : > { %6422 = vrot.lane.b32.xlu1 %v10314_v3, %s11207_s20  ;;  %v4999_v38 = vadd.f32 %v13258_v42, %v4838_v60  ;;  %v6661_v21 = vsel %vm11432_vm11, %v10338_v6, %v6660_v47  ;;  %v6664_v20 = vrot.slane %v6505_v45, 5  ;;  %v8387_v63 = vshrl.u32 %v8178_v19, 16  ;;  %v8180_v36 = vld [vmem:[#allocation2 + $0x88] sm:$0xf]  ;;  %v5649_v32 = vld [vmem:[#allocation2 + $0xdc] sm:$0x1] }
 0x2d3   : > { %v5365_v8 = vrot.slane %v5363_v61, 7  ;;  %v5371_v58 = vshrl.u32 %v10598_v51, 16  ;;  %v5374_v33 = vshll.u32 %v10598_v51, 16  ;;  %v8390_v27 = vshll.u32 %v8178_v19, 16  ;;  %v8181_v29 = vld [vmem:[#allocation2 + $0x8c] sm:$0x1] }
 0x2d4   : > { %7928 = vrot.lane.b32.xlu0 %v10443_v9, %s11207_s20  ;;  %v5057_v13 = vmax.f32 %v4999_v38, 0.0  ;;  %v6665_v14 = vsel %vm11432_vm11, %v10339_v11, %v6664_v20  ;;  %v8389_v42 = vrot.slane %v8387_v63, 4  ;;  %v8396_v2 = vshll.u32 %v8179_v7, 16  ;;  %v5878_v40 = vld [vmem:[#allocation2 + $0x80] sm:$0xf]  ;;  %v13410_v11 = vpop.permute.xlu1 %6954  ;;  %v13412_v61 = vpop.f32.mrb[30].mxu1 }
 0x2d5   : > { %v5368_v39 = vor.u32 %v5366_v59, %v5365_v8  ;;  %v5369_v18 = vrot.slane %v5365_v8, 4  ;;  %v5373_v25 = vrot.slane %v5371_v58, 7  ;;  %v10363_v28 = vcombine.low %v6661_v21, %v6665_v14  ;;  %v5879_v26 = vld [vmem:[#allocation2 + $0x84] sm:$0x1]  ;;  %v13414_v38 = vpop.f32.mrb[31].mxu1 }
 0x2d6   : > { %6968 = vrot.lane.b32.xlu1 %v11084_v23, %s11206_s19  ;;  %v10599_v45 = vpack.c.bf16 %v5057_v13, %v5057_v13  ;;  %v8392_v6 = vrot.slane %v8390_v27, 5  ;;  %v13401_v62 = vrot.slane %v8396_v2, 5  ;;  %v8401_v31 = vshrl.u32 %v8180_v36, 16  ;;  %v11101_v47 = vld [vmem:[%s14416_s3 + $0x20] sm:$0xff]   ;;  %v5880_v23 = vld [vmem:[#allocation2 + $0x88] sm:$0xf] }
 0x2d7   : > { %v5641_v19 = vsel %vm11360_vm6, %v5368_v39, %v5640_v41  ;;  %v5644_v3 = vsel %vm11302_vm2, %v5369_v18, %v5643_v12  ;;  %v5376_v17 = vor.u32 %v5374_v33, %v5373_v25  ;;  %v5377_v60 = vrot.slane %v5373_v25, 4  ;;  %10747 = vmatpush3.bf16.msra.mxu1 %v11101_v47  ;;  %v5652_v21 = vld [vmem:[#allocation2 + $0xe0] sm:$0xf]  ;;  %v5655_v58 = vld [vmem:[#allocation2 + $0xe4] sm:$0x1] }
 0x2d8   : > { %5645 = vst [vmem:[#allocation2 + $0xd4] sm:$0x1] %v5644_v3  ;;  %5642 = vst [vmem:[#allocation2 + $0xd0] sm:$0xf] %v5641_v19  ;;  %v5379_v59 = vshrl.u32 %v10599_v45, 16  ;;  %v5382_v51 = vshll.u32 %v10599_v45, 16  ;;  %v8393_v9 = vor.u32 %v8392_v6, %v8389_v42  ;;  %v13426_v47 = vpop.permute.xlu1 %6778 }
 0x2d9   : > { %v8403_v7 = vrot.slane %v8401_v31, 4  ;;  %v5647_v41 = vsel %vm11360_vm6, %v5376_v17, %v5646_v5  ;;  %v5650_v12 = vsel %vm11302_vm2, %v5377_v60, %v5649_v32  ;;  %v8404_v20 = vshll.u32 %v8180_v36, 16  ;;  %v5881_v2 = vld [vmem:[#allocation2 + $0x8c] sm:$0x1]  ;;  %v8184_v25 = vld [vmem:[#allocation2 + $0x98] sm:$0xf] }
 0x2da   : > { %v8410_v63 = vshll.u32 %v8181_v29, 16  ;;  %5651 = vst [vmem:[#allocation2 + $0xdc] sm:$0x1] %v5650_v12  ;;  %5648 = vst [vmem:[#allocation2 + $0xd8] sm:$0xf] %v5647_v41  ;;  %v5381_v8 = vrot.slane %v5379_v59, 7  ;;  %6792 = vrot.lane.b32.xlu1 %v10363_v28, %s11205_s18 }
 0x2db   : > { %v8394_v33 = vrot.slane %v8393_v9, 4  ;;  %v6111_v27 = vshrl.u32 %v5878_v40, 16  ;;  %v6114_v13 = vshll.u32 %v5878_v40, 16  ;;  %v8406_v14 = vrot.slane %v8404_v20, 5  ;;  %v8182_v29 = vld [vmem:[#allocation2 + $0x90] sm:$0xf] }
 0x2dc   : > { %v8412_v42 = vrot.slane %v8410_v63, 5  ;;  %v6120_v49 = vshll.u32 %v5879_v26, 16  ;;  %v6125_v5 = vshrl.u32 %v5880_v23, 16  ;;  %v5384_v39 = vor.u32 %v5382_v51, %v5381_v8  ;;  %v8183_v40 = vld [vmem:[#allocation2 + $0x94] sm:$0x1]  ;;  %v11102_v26 = vld [vmem:[%s14416_s3 + $0x68] sm:$0xff]  }
 0x2dd   : > { %v5385_v18 = vrot.slane %v5381_v8, 4  ;;  %v8399_v36 = vsel %vm11470_vm12, %v8394_v33, %v13401_v62  ;;  %v6113_v32 = vrot.slane %v6111_v27, 4  ;;  %v8407_v45 = vor.u32 %v8406_v14, %v8403_v7  ;;  %v8185_v60 = vld [vmem:[#allocation2 + $0x9c] sm:$0x1]  ;;  %v7642_v41 = vld [vmem:[#allocation2 + $0xa8] sm:$0xe]  ;;  %10748 = vmatprep.subr.bf16.mxu1 %v11102_v26 }
 0x2de   : > { %v6116_v6 = vrot.slane %v6114_v13, 5  ;;  %v13424_v28 = vrot.slane %v6120_v49, 5  ;;  %v6127_v31 = vrot.slane %v6125_v5, 4  ;;  %v5653_v19 = vsel %vm11360_vm6, %v5384_v39, %v5652_v21  ;;  %v11104_v12 = vld [vmem:[%s14416_s3 + $0x28] sm:$0xff]   ;;  %v7644_v14 = vld [vmem:[#allocation2 + $0xb0] sm:$0xe] }
 0x2df   : > { %v5656_v62 = vsel %vm11302_vm2, %v5385_v18, %v5655_v58  ;;  %v6128_v3 = vshll.u32 %v5880_v23, 16  ;;  %v6134_v17 = vshll.u32 %v5881_v2, 16  ;;  %5654 = vst [vmem:[#allocation2 + $0xe0] sm:$0xf] %v5653_v19  ;;  %v8408_v59 = vrot.slane %v8407_v45, 4  ;;  %10749 = vmatpush3.bf16.msra.mxu1 %v11104_v12  ;;  %v11107_v2 = vld [vmem:[%s14416_s3 + $0x70] sm:$0xff]  }
 0x2e0   : > { %5657 = vst [vmem:[#allocation2 + $0xe4] sm:$0x1] %v5656_v62  ;;  %v6117_v51 = vor.u32 %v6116_v6, %v6113_v32  ;;  %v8415_v9 = vshrl.u32 %v8182_v29, 16  ;;  %v8418_v7 = vshll.u32 %v8182_v29, 16  ;;  %v8424_v63 = vshll.u32 %v8183_v40, 16  ;;  %v13448_v62 = vpop.permute.xlu1 %6410  ;;  %10750 = vmatprep.subr.bf16.mxu1 %v11107_v2 }
 0x2e1   : > { %v6130_v20 = vrot.slane %v6128_v3, 5  ;;  %v6136_v21 = vrot.slane %v6134_v17, 5  ;;  %v8429_v8 = vshrl.u32 %v8184_v25, 16  ;;  %v7643_v58 = vld [vmem:[#allocation2 + $0xac] sm:$0x1]  ;;  %v8413_v23 = vsel %vm11470_vm12, %v8408_v59, %v8412_v42 }
 0x2e2   : > { %v6118_v33 = vrot.slane %v6117_v51, 4  ;;  %v8417_v27 = vrot.slane %v8415_v9, 4  ;;  %v8420_v13 = vrot.slane %v8418_v7, 5  ;;  %v10474_v49 = vcombine.low %v8399_v36, %v8413_v23  ;;  %v7645_v32 = vld [vmem:[#allocation2 + $0xb4] sm:$0x1] }
 0x2e3   : > { %v6131_v5 = vor.u32 %v6130_v20, %v6127_v31  ;;  %v13443_v39 = vrot.slane %v8424_v63, 5  ;;  %v8431_v18 = vrot.slane %v8429_v8, 4  ;;  %v6506_v29 = vld [vmem:[#allocation2 + $0xa0] sm:$0xe]  ;;  %v8432_v6 = vshll.u32 %v8184_v25, 16 }
 0x2e4   : > { %v6123_v42 = vsel %vm11470_vm12, %v6118_v33, %v13424_v28  ;;  %v8421_v45 = vor.u32 %v8420_v13, %v8417_v27  ;;  %v8438_v40 = vshll.u32 %v8185_v60, 16  ;;  %v6507_v26 = vld [vmem:[#allocation2 + $0xa4] sm:$0x1]  ;;  %v6508_v19 = vld [vmem:[#allocation2 + $0xa8] sm:$0xe]  ;;  %8726 = vrot.lane.b32.xlu0 %v10474_v49, %s11206_s19  ;;  %v10420_v31 = vrot.slane %v7642_v41, 9 }
 0x2e5   : > { %v6132_v36 = vrot.slane %v6131_v5, 4  ;;  %v7804_v3 = vrot.slane %v7643_v58, 5  ;;  %v10421_v17 = vrot.slane %v7644_v14, 9  ;;  %v6509_v59 = vld [vmem:[#allocation2 + $0xac] sm:$0x1]  ;;  %v8434_v9 = vrot.slane %v8432_v6, 5 }
 0x2e6   : > { %v8422_v51 = vrot.slane %v8421_v45, 4  ;;  %v8440_v7 = vrot.slane %v8438_v40, 5  ;;  %v7808_v12 = vrot.slane %v7645_v32, 5  ;;  %v8810_v28 = vld [vmem:[#allocation2 + $0xb0] sm:$0xe]  ;;  %v10698_v20 = vadd.f32 %v13308_v54, %v13300_v46  ;;  %v13459_v58 = vpop.f32.mrb[56].mxu0  ;;  %v13470_v32 = vpop.permute.xlu0 %7914 }
 0x2e7   : > { %v6137_v25 = vsel %vm11470_vm12, %v6132_v36, %v6136_v21  ;;  %v13455_v60 = vsel %vm11432_vm11, %v10420_v31, %v7804_v3  ;;  %v10340_v63 = vrot.slane %v6506_v29, 9  ;;  %v8811_v41 = vld [vmem:[#allocation2 + $0xb4] sm:$0x1]  ;;  %v8812_v8 = vld [vmem:[#allocation2 + $0xb8] sm:$0xe]  ;;  %v8435_v27 = vor.u32 %v8434_v9, %v8431_v18  ;;  %v13472_v29 = vpop.f32.mrb[57].mxu0  ;;  %v13475_v40 = vpop.permute.xlu1 %6956 }
 0x2e8   : > { %v10315_v23 = vcombine.low %v6123_v42, %v6137_v25  ;;  %v8427_v33 = vsel %vm11470_vm12, %v8422_v51, %v13443_v39  ;;  %v13466_v21 = vsel %vm11432_vm11, %v10421_v17, %v7808_v12  ;;  %v8813_v13 = vld [vmem:[#allocation2 + $0xbc] sm:$0x1]  ;;  %v5882_v14 = vld [vmem:[#allocation2 + $0xa0] sm:$0xf]  ;;  %v6668_v54 = vrot.slane %v6507_v26, 5  ;;  %v13483_v17 = vpop.f32.mrb[58].mxu0 }
 0x2e9   : > { %v10444_v46 = vcombine.low %v13455_v60, %v13466_v21  ;;  %v10341_v2 = vrot.slane %v6508_v19, 9  ;;  %v6672_v49 = vrot.slane %v6509_v59, 5  ;;  %v5883_v5 = vld [vmem:[#allocation2 + $0xa4] sm:$0x1]  ;;  %v8436_v39 = vrot.slane %v8435_v27, 4  ;;  %v11109_v60 = vld [vmem:[%s14416_s3 + $0x78] sm:$0xff]  }
 0x2ea   : > { %6424 = vrot.lane.b32.xlu1 %v10315_v23, %s11207_s20  ;;  %v10500_v18 = vrot.slane %v8810_v28, 9  ;;  %v8972_v42 = vrot.slane %v8811_v41, 5  ;;  %v10501_v45 = vrot.slane %v8812_v8, 9  ;;  %v5884_v6 = vld [vmem:[#allocation2 + $0xa8] sm:$0xf]  ;;  %v6669_v36 = vsel %vm11432_vm11, %v10340_v63, %v6668_v54 }
 0x2eb   : > { %v6673_v26 = vsel %vm11432_vm11, %v10341_v2, %v6672_v49  ;;  %v8976_v19 = vrot.slane %v8813_v13, 5  ;;  %v10701_v31 = vadd.f32 %v13320_v30, %v13316_v52  ;;  %v11096_v3 = vld [vmem:[#allocation2] ss:$8 sps:$4 sm:$0xff]   ;;  %v8441_v59 = vsel %vm11470_vm12, %v8436_v39, %v8440_v7  ;;  %v5885_v25 = vld [vmem:[#allocation2 + $0xac] sm:$0x1]  ;;  %v13498_v39 = vpop.permute.xlu0 %8090 }
 0x2ec   : > { %v11085_v51 = vld [vmem:[#allocation2 + $0xa8] ss:$8 sps:$4 sm:$0xff]   ;;  %v10364_v9 = vcombine.low %v6669_v36, %v6673_v26  ;;  %v8973_v12 = vsel %vm11432_vm11, %v10500_v18, %v8972_v42  ;;  %v4843_v28 = vadd.f32 %v13385_v50, %v10698_v20  ;;  %v10475_v63 = vcombine.low %v8427_v33, %v8441_v59  ;;  %5834 = vst.msk [vmem:[#allocation3] sm:$0xff] %vm1174_vm13, %v11096_v3  ;;  %v7646_v13 = vld [vmem:[#allocation2 + $0xb8] sm:$0xe] }
 0x2ed   : > { %v8977_v41 = vsel %vm11432_vm11, %v10501_v45, %v8976_v19  ;;  %v6139_v8 = vshrl.u32 %v5882_v14, 16  ;;  %v6142_v52 = vshll.u32 %v5882_v14, 16  ;;  %v6148_v23 = vshll.u32 %v5883_v5, 16  ;;  %v7647_v54 = vld [vmem:[#allocation2 + $0xbc] sm:$0x1]  ;;  %6458 = vst.msk [vmem:[#allocation3] sm:$0xff] %vm1802_vm14, %v13448_v62 }
 0x2ee   : > { %6970 = vrot.lane.b32.xlu1 %v11085_v51, %s11206_s19  ;;  %v10524_v30 = vcombine.low %v8973_v12, %v8977_v41  ;;  %v5004_v7 = vadd.f32 %v13331_v16, %v4843_v28  ;;  %v6153_v27 = vshrl.u32 %v5884_v6, 16  ;;  %8728 = vrot.lane.b32.xlu0 %v10475_v63, %s11206_s19  ;;  %v6156_v2 = vshll.u32 %v5884_v6, 16  ;;  %v7648_v49 = vld [vmem:[#allocation2 + $0xc0] sm:$0xe]  ;;  %6826 = vst.msk [vmem:[#allocation3] sm:$0xff] %vm2174_vm15, %v13426_v47  ;;  %v13506_v45 = vpop.f32.mrb[59].mxu0  ;;  %v13508_v6 = vpop.permute.xlu1 %6780 }
 0x2ef   : > { %v6141_v20 = vrot.slane %v6139_v8, 4  ;;  %v6144_v33 = vrot.slane %v6142_v52, 5  ;;  %v6162_v14 = vshll.u32 %v5885_v25, 16  ;;  %v6150_v5 = vrot.slane %v6148_v23, 5  ;;  %v7649_v62 = vld [vmem:[#allocation2 + $0xc4] sm:$0x1]  ;;  %v13531_v23 = vpop.permute.xlu0 %7916 }
 0x2f0   : > { %9106 = vst.msk [vmem:[#allocation3 + $0xd0] sm:$0xff] %vm1174_vm13, %v10524_v30  ;;  %v5058_v16 = vmax.f32 %v5004_v7, 0.0  ;;  %v6155_v18 = vrot.slane %v6153_v27, 4  ;;  %v4846_v42 = vadd.f32 %v13385_v50, %v10701_v31  ;;  %v6158_v26 = vrot.slane %v6156_v2, 5  ;;  %v11108_v47 = vld [vmem:[%s14416_s3 + $0x30] sm:$0xff]  }
 0x2f1   : > { %7002 = vst.msk [vmem:[#allocation3] sm:$0xff] %vm2351_vm0, %v13410_v11  ;;  %v6145_v36 = vor.u32 %v6144_v33, %v6141_v20  ;;  %v6164_v19 = vrot.slane %v6162_v14, 5  ;;  %v10422_v3 = vrot.slane %v7646_v13, 9  ;;  %v7812_v51 = vrot.slane %v7647_v54, 5  ;;  %v6510_v41 = vld [vmem:[#allocation2 + $0xb0] sm:$0xe]  ;;  %10751 = vmatpush3.bf16.msra.mxu1 %v11108_v47 }
 0x2f2   : > { %6794 = vrot.lane.b32.xlu1 %v10364_v9, %s11205_s18  ;;  %v10600_v59 = vpack.c.bf16 %v5058_v16, %v5058_v16  ;;  %v5007_v31 = vadd.f32 %v13337_v15, %v4846_v42  ;;  %v10423_v12 = vrot.slane %v7648_v49, 9  ;;  %7930 = vrot.lane.b32.xlu0 %v10444_v46, %s11207_s20  ;;  %v6159_v28 = vor.u32 %v6158_v26, %v6155_v18  ;;  %v6511_v30 = vld [vmem:[#allocation2 + $0xb4] sm:$0x1]  ;;  %v11086_v21 = vld [vmem:[#allocation2 + $0xb0] ss:$8 sps:$4 sm:$0xff]   ;;  %v13533_v27 = vpop.f32.mrb[60].mxu0  ;;  %v13539_v16 = vpop.permute.xlu1 %6412 }
 0x2f3   : > { %v6146_v11 = vrot.slane %v6145_v36, 4  ;;  %v7816_v25 = vrot.slane %v7649_v62, 5  ;;  %v10704_v63 = vadd.f32 %v13355_v4, %v13343_v35  ;;  %v7813_v15 = vsel %vm11432_vm11, %v10422_v3, %v7812_v51  ;;  %v5658_v54 = vld [vmem:[#allocation2 + $0xf8] sm:$0xf]  ;;  %v5661_v20 = vld [vmem:[#allocation2 + $0xfc] sm:$0x1]  ;;  %10752 = vmatprep.subr.bf16.mxu1 %v11109_v60 }
 0x2f4   : > { %v5387_v8 = vshrl.u32 %v10600_v59, 16  ;;  %v5390_v9 = vshll.u32 %v10600_v59, 16  ;;  %v5059_v52 = vmax.f32 %v5007_v31, 0.0  ;;  %v6160_v7 = vrot.slane %v6159_v28, 4  ;;  %v13537_v49 = vpop.f32.mrb[61].mxu0 }
 0x2f5   : > { %v6151_v46 = vsel %vm11470_vm12, %v6146_v11, %v6150_v5  ;;  %v7817_v35 = vsel %vm11432_vm11, %v10423_v12, %v7816_v25  ;;  %v4851_v4 = vadd.f32 %v13385_v50, %v10704_v63  ;;  %v10707_v14 = vadd.f32 %v13371_v57, %v13368_v22  ;;  %v6512_v62 = vld [vmem:[#allocation2 + $0xb8] sm:$0xe]  ;;  %v13545_v3 = vpop.f32.mrb[62].mxu0  ;;  %v6513_v31 = vld [vmem:[#allocation2 + $0xbc] sm:$0x1] }
 0x2f6   : > { %v5389_v13 = vrot.slane %v5387_v8, 7  ;;  %v10601_v33 = vpack.c.bf16 %v5059_v52, %v5059_v52  ;;  %v10445_v2 = vcombine.low %v7813_v15, %v7817_v35  ;;  %8106 = vrot.lane.b32.xlu0 %v11086_v21, %s11205_s18  ;;  %v6165_v18 = vsel %vm11470_vm12, %v6160_v7, %v6164_v19  ;;  %v8814_v51 = vld [vmem:[#allocation2 + $0xc0] sm:$0xe]  ;;  %v8815_v25 = vld [vmem:[#allocation2 + $0xc4] sm:$0x1] }
 0x2f7   : > { %v9140_v5 = vld [vmem:[#allocation3 + $0xd0] sm:$0xff]  ;;  %v5012_v42 = vadd.f32 %v13326_v37, %v4851_v4  ;;  %v10342_v36 = vrot.slane %v6510_v41, 9  ;;  %v6676_v26 = vrot.slane %v6511_v30, 5  ;;  %v10316_v47 = vcombine.low %v6151_v46, %v6165_v18  ;;  %v5664_v11 = vld [vmem:[#allocation2 + $0x100] sm:$0xf] }
 0x2f8   : > { %10927 = vmatprep.mubr.msk.bf16.mxu0 %vm1174_vm13, %v9140_v5  ;;  %v5392_v22 = vor.u32 %v5390_v9, %v5389_v13  ;;  %v5393_v57 = vrot.slane %v5389_v13, 4  ;;  %v5395_v59 = vshrl.u32 %v10601_v33, 16  ;;  %v5398_v12 = vshll.u32 %v10601_v33, 16  ;;  %v13551_v63 = vld [vmem:[#allocation2 + $0xc8] sm:$0xe] }
 0x2f9   : > { %v5060_v28 = vmax.f32 %v5012_v42, 0.0  ;;  %v4854_v19 = vadd.f32 %v13385_v50, %v10707_v14  ;;  %v6677_v37 = vsel %vm11432_vm11, %v10342_v36, %v6676_v26  ;;  %6426 = vrot.lane.b32.xlu1 %v10316_v47, %s11207_s20  ;;  %v5667_v52 = vld [vmem:[#allocation2 + $0x104] sm:$0x1]  ;;  %v11087_v15 = vld [vmem:[#allocation2 + $0xb8] ss:$8 sps:$4 sm:$0xff]   ;;  %v10343_v30 = vrot.slane %v6512_v62, 9  ;;  %v13565_v62 = vpop.permute.xlu1 %6958 }
 0x2fa   : > { %v5659_v41 = vsel %vm11360_vm6, %v5392_v22, %v5658_v54  ;;  %v5662_v8 = vsel %vm11302_vm2, %v5393_v57, %v5661_v20  ;;  %v5397_v9 = vrot.slane %v5395_v59, 7  ;;  %7932 = vrot.lane.b32.xlu0 %v10445_v2, %s11207_s20  ;;  %v11089_v21 = vld [vmem:[#allocation2 + $0xc0] ss:$8 sps:$4 sm:$0xff]   ;;  %v6680_v7 = vrot.slane %v6513_v31, 5  ;;  %v8817_v35 = vld [vmem:[#allocation2 + $0xcc] sm:$0x1]  ;;  %v13560_v54 = vpop.permute.xlu0 %8092 }
 0x2fb   : > { %5660 = vst [vmem:[#allocation2 + $0xf8] sm:$0xf] %v5659_v41  ;;  %5663 = vst [vmem:[#allocation2 + $0xfc] sm:$0x1] %v5662_v8  ;;  %v10602_v60 = vpack.c.bf16 %v5060_v28, %v5060_v28  ;;  %v5015_v46 = vadd.f32 %v13333_v48, %v4854_v19  ;;  %v10502_v4 = vrot.slane %v8814_v51, 9  ;;  %v8980_v14 = vrot.slane %v8815_v25, 5 }
 0x2fc   : > { %v8186_v13 = vld [vmem:[#allocation2 + $0xb0] sm:$0xf]  ;;  %v5400_v20 = vor.u32 %v5398_v12, %v5397_v9  ;;  %v5401_v33 = vrot.slane %v5397_v9, 4  ;;  %v10503_v5 = vrot.slane %v13551_v63, 9  ;;  %v8187_v18 = vld [vmem:[#allocation2 + $0xb4] sm:$0x1]  ;;  %v6681_v48 = vsel %vm11432_vm11, %v10343_v30, %v6680_v7 }
 0x2fd   : > { %v13563_v42 = vpop.f32.mrb[63].mxu0  ;;  %v5403_v2 = vshrl.u32 %v10602_v60, 16  ;;  %v5406_v36 = vshll.u32 %v10602_v60, 16  ;;  %v5061_v26 = vmax.f32 %v5015_v46, 0.0  ;;  %v8188_v22 = vld [vmem:[#allocation2 + $0xb8] sm:$0xf]  ;;  %6972 = vrot.lane.b32.xlu1 %v11087_v15, %s11206_s19  ;;  %v10365_v51 = vcombine.low %v6677_v37, %v6681_v48 }
 0x2fe   : > { %v11110_v57 = vld [vmem:[%s14416_s3 + $0x38] sm:$0xff]   ;;  %v5665_v47 = vsel %vm11360_vm6, %v5400_v20, %v5664_v11  ;;  %v5668_v59 = vsel %vm11302_vm2, %v5401_v33, %v5667_v52  ;;  %v5670_v31 = vld [vmem:[#allocation2 + $0x108] sm:$0xf]  ;;  %v8981_v12 = vsel %vm11432_vm11, %v10502_v4, %v8980_v14  ;;  %8108 = vrot.lane.b32.xlu0 %v11089_v21, %s11205_s18  ;;  %v8984_v25 = vrot.slane %v8817_v35, 5  ;;  %v5673_v11 = vld [vmem:[#allocation2 + $0x10c] sm:$0x1]  ;;  %v13586_v7 = vpop.permute.xlu0 %8714 }
 0x2ff   : > { %5669 = vst [vmem:[#allocation2 + $0x104] sm:$0x1] %v5668_v59  ;;  %5666 = vst [vmem:[#allocation2 + $0x100] sm:$0xf] %v5665_v47  ;;  %v5405_v28 = vrot.slane %v5403_v2, 7  ;;  %v10603_v19 = vpack.c.bf16 %v5061_v26, %v5061_v26  ;;  %v8443_v63 = vshrl.u32 %v8186_v13, 16  ;;  %10753 = vmatpush3.bf16.msra.mxu1 %v11110_v57 }
 0x300   : > { %v8446_v41 = vshll.u32 %v8186_v13, 16  ;;  %v8452_v8 = vshll.u32 %v8187_v18, 16  ;;  %v8457_v9 = vshrl.u32 %v8188_v22, 16  ;;  %v8460_v52 = vshll.u32 %v8188_v22, 16  ;;  %v13583_v37 = vld [vmem:[%s14416_s3 + $0x80] sm:$0xff]   ;;  %v13591_v18 = vpop.permute.xlu1 %6782 }
 0x301   : > { %10951 = vmatprep.subr.bf16.mxu1 %v13583_v37  ;;  %v5408_v15 = vor.u32 %v5406_v36, %v5405_v28  ;;  %v5409_v30 = vrot.slane %v5405_v28, 4  ;;  %v5411_v60 = vshrl.u32 %v10603_v19, 16  ;;  %v5414_v21 = vshll.u32 %v10603_v19, 16  ;;  %v8189_v46 = vld [vmem:[#allocation2 + $0xbc] sm:$0x1]  ;;  %6796 = vrot.lane.b32.xlu1 %v10365_v51, %s11205_s18 }
 0x302   : > { %v5676_v35 = vld [vmem:[#allocation2 + $0x110] sm:$0xf]  ;;  %v8985_v4 = vsel %vm11432_vm11, %v10503_v5, %v8984_v25  ;;  %v8445_v13 = vrot.slane %v8443_v63, 4  ;;  %v8448_v20 = vrot.slane %v8446_v41, 5  ;;  %v8454_v33 = vrot.slane %v8452_v8, 5 }
 0x303   : > { %v5886_v14 = vld [vmem:[#allocation2 + $0xb0] sm:$0xf]  ;;  %v5671_v2 = vsel %vm11360_vm6, %v5408_v15, %v5670_v31  ;;  %v5674_v36 = vsel %vm11302_vm2, %v5409_v30, %v5673_v11  ;;  %v5413_v26 = vrot.slane %v5411_v60, 7  ;;  %v10525_v48 = vcombine.low %v8981_v12, %v8985_v4  ;;  %v5887_v22 = vld [vmem:[#allocation2 + $0xb4] sm:$0x1] }
 0x304   : > { %v11106_v57 = vld [vmem:[#allocation2 + $0x10] ss:$8 sps:$4 sm:$0xff]   ;;  %5672 = vst [vmem:[#allocation2 + $0x108] sm:$0xf] %v5671_v2  ;;  %5675 = vst [vmem:[#allocation2 + $0x10c] sm:$0x1] %v5674_v36  ;;  %v8449_v5 = vor.u32 %v8448_v20, %v8445_v13  ;;  %v13607_v20 = vpop.permute.xlu0 %7918 }
 0x305   : > { %v5679_v47 = vld [vmem:[#allocation2 + $0x114] sm:$0x1]  ;;  %v8459_v59 = vrot.slane %v8457_v9, 4  ;;  %v8462_v51 = vrot.slane %v8460_v52, 5  ;;  %v8466_v28 = vshll.u32 %v8189_v46, 16  ;;  %v5416_v19 = vor.u32 %v5414_v21, %v5413_v26  ;;  %9107 = vst.msk [vmem:[#allocation3 + $0xe8] sm:$0xff] %vm1174_vm13, %v10525_v48  ;;  %v13613_v48 = vpop.permute.xlu1 %6414 }
 0x306   : > { %v5417_v25 = vrot.slane %v5413_v26, 4  ;;  %v5888_v63 = vld [vmem:[#allocation2 + $0xb8] sm:$0xf]  ;;  %v6167_v31 = vshrl.u32 %v5886_v14, 16  ;;  %v6170_v41 = vshll.u32 %v5886_v14, 16  ;;  %5835 = vst.msk [vmem:[#allocation3 + $0x18] sm:$0xff] %vm1174_vm13, %v11106_v57 }
 0x307   : > { %v7021_v8 = vld [vmem:[#allocation2 + $0x14] sm:$0x1]  ;;  %v8450_v12 = vrot.slane %v8449_v5, 4  ;;  %v8463_v11 = vor.u32 %v8462_v51, %v8459_v59  ;;  %v8468_v15 = vrot.slane %v8466_v28, 5  ;;  %v5889_v30 = vld [vmem:[#allocation2 + $0xbc] sm:$0x1]  ;;  %v5677_v9 = vsel %vm11360_vm6, %v5416_v19, %v5676_v35 }
 0x308   : > { %v6176_v60 = vshll.u32 %v5887_v22, 16  ;;  %6459 = vst.msk [vmem:[#allocation3 + $0x18] sm:$0xff] %vm1802_vm14, %v13539_v16  ;;  %v5680_v52 = vsel %vm11302_vm2, %v5417_v25, %v5679_v47  ;;  %v6169_v21 = vrot.slane %v6167_v31, 4  ;;  %v6172_v46 = vrot.slane %v6170_v41, 5  ;;  %v7018_v4 = vld [vmem:[#allocation2 + $0x8] sm:$0xf] }
 0x309   : > { %v7650_v13 = vld [vmem:[#allocation2 + $0xc8] sm:$0xe]  ;;  %6827 = vst.msk [vmem:[#allocation3 + $0x18] sm:$0xff] %vm2174_vm15, %v13508_v6  ;;  %5681 = vst [vmem:[#allocation2 + $0x114] sm:$0x1] %v5680_v52  ;;  %v8455_v16 = vsel %vm11470_vm12, %v8450_v12, %v8454_v33  ;;  %v8464_v14 = vrot.slane %v8463_v11, 4 }
 0x30a   : > { %5678 = vst [vmem:[#allocation2 + $0x110] sm:$0xf] %v5677_v9  ;;  %v6178_v2 = vrot.slane %v6176_v60, 5  ;;  %v6181_v35 = vshrl.u32 %v5888_v63, 16  ;;  %v7651_v36 = vld [vmem:[#allocation2 + $0xcc] sm:$0x1]  ;;  %v6173_v22 = vor.u32 %v6172_v46, %v6169_v21  ;;  %v13626_v21 = vpop.permute.xlu0 %8094 }
 0x30b   : > { %v7652_v26 = vld [vmem:[#allocation2 + $0xd0] sm:$0xe]  ;;  %7003 = vst.msk [vmem:[#allocation3 + $0x18] sm:$0xff] %vm2351_vm0, %v13475_v40  ;;  %v6184_v57 = vshll.u32 %v5888_v63, 16  ;;  %v6190_v6 = vshll.u32 %v5889_v30, 16  ;;  %v13618_v47 = vrot.slane %v7103_v10, 4  ;;  %v8469_v33 = vsel %vm11470_vm12, %v8464_v14, %v8468_v15 }
 0x30c   : > { %v7653_v5 = vld [vmem:[#allocation2 + $0xd4] sm:$0x1]  ;;  %v6183_v59 = vrot.slane %v6181_v35, 4  ;;  %v7106_v51 = vshll.u32 %v7021_v8, 16  ;;  %v7083_v28 = vshrl.u32 %v7018_v4, 16  ;;  %v10476_v25 = vcombine.low %v8455_v16, %v8469_v33  ;;  %v9143_v63 = vld [vmem:[#allocation3 + $0xe8] sm:$0xff] }
 0x30d   : > { %v6514_v19 = vld [vmem:[#allocation2 + $0xc0] sm:$0xe]  ;;  %v6174_v40 = vrot.slane %v6173_v22, 4  ;;  %v6186_v31 = vrot.slane %v6184_v57, 5  ;;  %v6192_v41 = vrot.slane %v6190_v6, 5  ;;  %v7086_v60 = vshll.u32 %v7018_v4, 16  ;;  %10928 = vmatmul.mubr.msk.bf16.gmra.mrb[80].mxu0 %vm1174_vm13, %v9143_v63  ;;  %v13633_v22 = vpop.permute.xlu1 %6960 }
 0x30e   : > { %v6515_v12 = vld [vmem:[#allocation2 + $0xc4] sm:$0x1]  ;;  %v7108_v11 = vrot.slane %v7106_v51, 5  ;;  %v7085_v30 = vrot.slane %v7083_v28, 4  ;;  %v10424_v43 = vrot.slane %v7650_v13, 9  ;;  %8730 = vrot.lane.b32.xlu0 %v10476_v25, %s11206_s19  ;;  %v7820_v8 = vrot.slane %v7651_v36, 5 }
 0x30f   : > { %v6179_v55 = vsel %vm11470_vm12, %v6174_v40, %v6178_v2  ;;  %v6187_v10 = vor.u32 %v6186_v31, %v6183_v59  ;;  %v10425_v15 = vrot.slane %v7652_v26, 9  ;;  %v6516_v9 = vld [vmem:[#allocation2 + $0xc8] sm:$0xe]  ;;  %v6517_v52 = vld [vmem:[#allocation2 + $0xcc] sm:$0x1]  ;;  %v7088_v4 = vrot.slane %v7086_v60, 5 }
 0x310   : > { %v7109_v46 = vsel %vm11470_vm12, %v13618_v47, %v7108_v11  ;;  %v7824_v13 = vrot.slane %v7653_v5, 5  ;;  %v10710_v16 = vadd.f32 %v13472_v29, %v13459_v58  ;;  %v8818_v14 = vld [vmem:[#allocation2 + $0xd0] sm:$0xe]  ;;  %v8819_v35 = vld [vmem:[#allocation2 + $0xd4] sm:$0x1]  ;;  %v7821_v36 = vsel %vm11432_vm11, %v10424_v43, %v7820_v8 }
 0x311   : > { %v6188_v2 = vrot.slane %v6187_v10, 4  ;;  %v10344_v26 = vrot.slane %v6514_v19, 9  ;;  %v6684_v57 = vrot.slane %v6515_v12, 5  ;;  %v8820_v6 = vld [vmem:[#allocation2 + $0xd8] sm:$0xe]  ;;  %v7089_v33 = vor.u32 %v7088_v4, %v7085_v30 }
 0x312   : > { %v7825_v47 = vsel %vm11432_vm11, %v10425_v15, %v7824_v13  ;;  %v10345_v59 = vrot.slane %v6516_v9, 9  ;;  %v6688_v5 = vrot.slane %v6517_v52, 5  ;;  %v8821_v51 = vld [vmem:[#allocation2 + $0xdc] sm:$0x1]  ;;  %v7022_v28 = vld [vmem:[#allocation2 + $0x18] sm:$0xf]  ;;  %v13652_v52 = vpop.permute.xlu0 %8716 }
 0x313   : > { %v6193_v58 = vsel %vm11470_vm12, %v6188_v2, %v6192_v41  ;;  %v10446_v29 = vcombine.low %v7821_v36, %v7825_v47  ;;  %v13643_v25 = vsel %vm11432_vm11, %v10344_v26, %v6684_v57  ;;  %v10504_v40 = vrot.slane %v8818_v14, 9  ;;  %v7023_v19 = vld [vmem:[#allocation2 + $0x1c] sm:$0x1]  ;;  %v7024_v30 = vld [vmem:[#allocation2 + $0x20] sm:$0xf]  ;;  %v13660_v26 = vpop.permute.xlu1 %6784 }
 0x314   : > { %v10317_v31 = vcombine.low %v6179_v55, %v6193_v58  ;;  %v7090_v12 = vrot.slane %v7089_v33, 4  ;;  %v13647_v63 = vsel %vm11432_vm11, %v10345_v59, %v6688_v5  ;;  %v8988_v11 = vrot.slane %v8819_v35, 5  ;;  %v7025_v60 = vld [vmem:[#allocation2 + $0x24] sm:$0x1]  ;;  %v11098_v43 = vld [vmem:[#allocation2 + $0xd0] ss:$8 sps:$4 sm:$0xff]  }
 0x315   : > { %7934 = vrot.lane.b32.xlu0 %v10446_v29, %s11207_s20  ;;  %v10366_v41 = vcombine.low %v13643_v25, %v13647_v63  ;;  %v10505_v10 = vrot.slane %v8820_v6, 9  ;;  %v8992_v8 = vrot.slane %v8821_v51, 5  ;;  %v7111_v15 = vshrl.u32 %v7022_v28, 16  ;;  %v8822_v9 = vld [vmem:[#allocation2 + $0xe0] sm:$0xe] }
 0x316   : > { %6428 = vrot.lane.b32.xlu1 %v10317_v31, %s11207_s20  ;;  %v7095_v55 = vsel %vm11470_vm12, %v7090_v12, %v12974_v1  ;;  %v11095_v4 = vld [vmem:[#allocation2 + $0xc8] ss:$8 sps:$4 sm:$0xff]   ;;  %v8989_v13 = vsel %vm11432_vm11, %v10504_v40, %v8988_v11  ;;  %v7114_v14 = vshll.u32 %v7022_v28, 16  ;;  %v7120_v35 = vshll.u32 %v7023_v19, 16  ;;  %v8823_v2 = vld [vmem:[#allocation2 + $0xe4] sm:$0x1] }
 0x317   : > { %v8824_v36 = vld [vmem:[#allocation2 + $0xe8] sm:$0xe]  ;;  %v10388_v57 = vcombine.low %v7095_v55, %v7109_v46  ;;  %v8993_v6 = vsel %vm11432_vm11, %v10505_v10, %v8992_v8  ;;  %v7113_v33 = vrot.slane %v7111_v15, 4  ;;  %v7125_v47 = vshrl.u32 %v7024_v30, 16  ;;  %v8825_v59 = vld [vmem:[#allocation2 + $0xec] sm:$0x1] }
 0x318   : > { %v8190_v5 = vld [vmem:[#allocation2 + $0xc0] sm:$0xf]  ;;  %v10526_v51 = vcombine.low %v8989_v13, %v8993_v6  ;;  %v7116_v1 = vrot.slane %v7114_v14, 5  ;;  %v7122_v58 = vrot.slane %v7120_v35, 5  ;;  %v7128_v29 = vshll.u32 %v7024_v30, 16 }
 0x319   : > { %7594 = vst.msk [vmem:[#allocation3 + $0x8] sm:$0xff] %vm1174_vm13, %v10388_v57  ;;  %8110 = vrot.lane.b32.xlu0 %v11098_v43, %s11205_s18  ;;  %v7127_v28 = vrot.slane %v7125_v47, 4  ;;  %v7134_v25 = vshll.u32 %v7025_v60, 16  ;;  %v13668_v46 = vadd.f32 %v13506_v45, %v13483_v17  ;;  %v4859_v40 = vadd.f32 %v13385_v50, %v10710_v16  ;;  %v8191_v19 = vld [vmem:[#allocation2 + $0xc4] sm:$0x1]  ;;  %v13678_v60 = vpop.permute.xlu0 %8096 }
 0x31a   : > { %7962 = vst.msk [vmem:[#allocation3 + $0x8] sm:$0xff] %vm1802_vm14, %v13470_v32  ;;  %6974 = vrot.lane.b32.xlu1 %v11095_v4, %s11206_s19  ;;  %v7117_v31 = vor.u32 %v7116_v1, %v7113_v33  ;;  %v7130_v12 = vrot.slane %v7128_v29, 5  ;;  %v10506_v63 = vrot.slane %v8822_v9, 9  ;;  %v8996_v11 = vrot.slane %v8823_v2, 5  ;;  %v11112_v30 = vld [vmem:[#allocation2 + $0x20] ss:$8 sps:$4 sm:$0xff]  }
 0x31b   : > { %9108 = vst.msk [vmem:[#allocation3 + $0x100] sm:$0xff] %vm1174_vm13, %v10526_v51  ;;  %v7136_v17 = vrot.slane %v7134_v25, 5  ;;  %v5020_v45 = vadd.f32 %v13388_v24, %v4859_v40  ;;  %v10507_v50 = vrot.slane %v8824_v36, 9  ;;  %v9000_v16 = vrot.slane %v8825_v59, 5  ;;  %v8192_v8 = vld [vmem:[#allocation2 + $0xc8] sm:$0xf] }
 0x31c   : > { %8138 = vst.msk [vmem:[#allocation3 + $0x8] sm:$0xff] %vm2174_vm15, %v13498_v39  ;;  %v7118_v32 = vrot.slane %v7117_v31, 4  ;;  %v7131_v43 = vor.u32 %v7130_v12, %v7127_v28  ;;  %v8997_v10 = vsel %vm11432_vm11, %v10506_v63, %v8996_v11  ;;  %v8193_v15 = vld [vmem:[#allocation2 + $0xcc] sm:$0x1]  ;;  %v8471_v9 = vshrl.u32 %v8190_v5, 16  ;;  %v13685_v39 = vpop.permute.xlu1 %6416 }
 0x31d   : > { %8762 = vst.msk [vmem:[#allocation3 + $0x8] sm:$0xff] %vm2351_vm0, %v13586_v7  ;;  %v5062_v24 = vmax.f32 %v5020_v45, 0.0  ;;  %v9001_v55 = vsel %vm11432_vm11, %v10507_v50, %v9000_v16  ;;  %v8474_v4 = vshll.u32 %v8190_v5, 16  ;;  %v8480_v13 = vshll.u32 %v8191_v19, 16  ;;  %v5890_v14 = vld [vmem:[#allocation2 + $0xc0] sm:$0xf]  ;;  %v13703_v19 = vpop.permute.xlu0 %7920 }
 0x31e   : > { %5836 = vst.msk [vmem:[#allocation3 + $0x30] sm:$0xff] %vm1174_vm13, %v11112_v30  ;;  %6798 = vrot.lane.b32.xlu1 %v10366_v41, %s11205_s18  ;;  %v7123_v35 = vsel %vm11470_vm12, %v7118_v32, %v7122_v58  ;;  %v7132_v7 = vrot.slane %v7131_v43, 4  ;;  %v10527_v2 = vcombine.low %v8997_v10, %v9001_v55  ;;  %v8473_v36 = vrot.slane %v8471_v9, 4  ;;  %v5891_v59 = vld [vmem:[#allocation2 + $0xc4] sm:$0x1] }
 0x31f   : > { %6460 = vst.msk [vmem:[#allocation3 + $0x30] sm:$0xff] %vm1802_vm14, %v13613_v48  ;;  %v10604_v57 = vpack.c.bf16 %v5062_v24, %v5062_v24  ;;  %v8476_v6 = vrot.slane %v8474_v4, 5  ;;  %v13696_v33 = vrot.slane %v8480_v13, 5  ;;  %v8485_v47 = vshrl.u32 %v8192_v8, 16  ;;  %v5892_v51 = vld [vmem:[#allocation2 + $0xc8] sm:$0xf] }
 0x320   : > { %6828 = vst.msk [vmem:[#allocation3 + $0x30] sm:$0xff] %vm2174_vm15, %v13591_v18  ;;  %v7137_v48 = vsel %vm11470_vm12, %v7132_v7, %v7136_v17  ;;  %v8488_v41 = vshll.u32 %v8192_v8, 16  ;;  %v8494_v5 = vshll.u32 %v8193_v15, 16  ;;  %v6195_v1 = vshrl.u32 %v5890_v14, 16  ;;  %v5893_v40 = vld [vmem:[#allocation2 + $0xcc] sm:$0x1]  ;;  %v13706_v17 = vpop.permute.xlu1 %6962 }
 0x321   : > { %7004 = vst.msk [vmem:[#allocation3 + $0x30] sm:$0xff] %vm2351_vm0, %v13565_v62  ;;  %v10389_v18 = vcombine.low %v7123_v35, %v7137_v48  ;;  %v5419_v29 = vshrl.u32 %v10604_v57, 16  ;;  %v5422_v28 = vshll.u32 %v10604_v57, 16  ;;  %v8477_v25 = vor.u32 %v8476_v6, %v8473_v36  ;;  %v5682_v62 = vld [vmem:[#allocation2 + $0x118] sm:$0xf]  ;;  %v9114_v55 = vld [vmem:[#allocation3] sm:$0xff] }
 0x322   : > { %9109 = vst.msk [vmem:[#allocation3 + $0x118] sm:$0xff] %vm1174_vm13, %v10527_v2  ;;  %v9146_v58 = vld [vmem:[#allocation3 + $0x100] sm:$0xff]  ;;  %v5685_v31 = vld [vmem:[#allocation2 + $0x11c] sm:$0x1]  ;;  %v8487_v12 = vrot.slane %v8485_v47, 4  ;;  %v8490_v63 = vrot.slane %v8488_v41, 5  ;;  %v13723_v41 = vpop.permute.xlu0 %8718 }
 0x323   : > { %10931 = vmatprep.mubr.msk.bf16.mxu0 %vm1174_vm13, %v9146_v58  ;;  %v8496_v11 = vrot.slane %v8494_v5, 5  ;;  %v6197_v30 = vrot.slane %v6195_v1, 4  ;;  %7595 = vst.msk [vmem:[#allocation3 + $0x20] sm:$0xff] %vm1174_vm13, %v10389_v18  ;;  %v5421_v45 = vrot.slane %v5419_v29, 7  ;;  %v8478_v50 = vrot.slane %v8477_v25, 4  ;;  %v11138_v5 = vld [vmem:[%s14416_s3 + $0x88] sm:$0xff]  }
 0x324   : > { %v6198_v16 = vshll.u32 %v5890_v14, 16  ;;  %v6204_v32 = vshll.u32 %v5891_v59, 16  ;;  %v9115_v43 = vld [vmem:[#allocation3 + $0x8] sm:$0xff]  ;;  %7963 = vst.msk [vmem:[#allocation3 + $0x20] sm:$0xff] %vm1802_vm14, %v13531_v23  ;;  %v8491_v10 = vor.u32 %v8490_v63, %v8487_v12  ;;  %v6209_v8 = vshrl.u32 %v5892_v51, 16  ;;  %v13737_v29 = vpop.permute.xlu1 %6786 }
 0x325   : > { %v6212_v15 = vshll.u32 %v5892_v51, 16  ;;  %v6218_v9 = vshll.u32 %v5893_v40, 16  ;;  %v7654_v24 = vld [vmem:[#allocation2 + $0xd8] sm:$0xe]  ;;  %9393 = vmatprep.mubr.bf16.mxu1 %v9115_v43  ;;  %v5424_v4 = vor.u32 %v5422_v28, %v5421_v45  ;;  %v5425_v13 = vrot.slane %v5421_v45, 4  ;;  %8139 = vst.msk [vmem:[#allocation3 + $0x20] sm:$0xff] %vm2174_vm15, %v13560_v54 }
 0x326   : > { %v8483_v35 = vsel %vm11470_vm12, %v8478_v50, %v13696_v33  ;;  %v6200_v7 = vrot.slane %v6198_v16, 5  ;;  %v7655_v14 = vld [vmem:[#allocation2 + $0xdc] sm:$0x1]  ;;  %9394 = vmatmul.mubr.bf16.vlgmr.msra.gmra.mrb[32].mxu1 %v9114_v55  ;;  %v8492_v23 = vrot.slane %v8491_v10, 4  ;;  %v6206_v2 = vrot.slane %v6204_v32, 5  ;;  %8763 = vst.msk [vmem:[#allocation3 + $0x20] sm:$0xff] %vm2351_vm0, %v13652_v52 }
 0x327   : > { %v6211_v36 = vrot.slane %v6209_v8, 4  ;;  %v6214_v57 = vrot.slane %v6212_v15, 5  ;;  %10953 = vmatpush3.bf16.msra.mxu1 %v13583_v37  ;;  %v5683_v6 = vsel %vm11360_vm6, %v5424_v4, %v5682_v62  ;;  %v5686_v33 = vsel %vm11302_vm2, %v5425_v13, %v5685_v31  ;;  %v7656_v48 = vld [vmem:[#allocation2 + $0xe0] sm:$0xe]  ;;  %v11139_v51 = vld [vmem:[%s14415_s2] ss:$0 sm:$0xff] }
 0x328   : > { %v6201_v59 = vor.u32 %v6200_v7, %v6197_v30  ;;  %v6220_v54 = vrot.slane %v6218_v9, 5  ;;  %10952 = vmatprep.subr.bf16.mxu1 %v11138_v5  ;;  %5687 = vst [vmem:[#allocation2 + $0x11c] sm:$0x1] %v5686_v33  ;;  %5684 = vst [vmem:[#allocation2 + $0x118] sm:$0xf] %v5683_v6  ;;  %v8497_v37 = vsel %vm11470_vm12, %v8492_v23, %v8496_v11  ;;  %v10426_v40 = vrot.slane %v7654_v24, 9 }
 0x329   : > { %v9149_v47 = vld [vmem:[#allocation3 + $0x118] sm:$0xff]  ;;  %v6215_v52 = vor.u32 %v6214_v57, %v6211_v36  ;;  %v4862_v1 = vadd.f32 %v11139_v51, %v13668_v46  ;;  %v10716_v58 = vadd.f32 %v13537_v49, %v13533_v27  ;;  %v7657_v18 = vld [vmem:[#allocation2 + $0xe4] sm:$0x1]  ;;  %v10477_v28 = vcombine.low %v8483_v35, %v8497_v37  ;;  %v6518_v31 = vld [vmem:[#allocation2 + $0xd0] sm:$0xe]  ;;  %v13754_v57 = vpop.permute.xlu1 %6418 }
 0x32a   : > { %10932 = vmatmul.mubr.msk.bf16.gmra.mrb[84].mxu0 %vm1174_vm13, %v9149_v47  ;;  %v6202_v25 = vrot.slane %v6201_v59, 4  ;;  %v7828_v62 = vrot.slane %v7655_v14, 5  ;;  %v10427_v30 = vrot.slane %v7656_v48, 9  ;;  %v6519_v45 = vld [vmem:[#allocation2 + $0xd4] sm:$0x1]  ;;  %v7832_v50 = vrot.slane %v7657_v18, 5  ;;  %v13752_v14 = vpop.permute.xlu0 %8720 }
 0x32b   : > { %v6216_v12 = vrot.slane %v6215_v52, 4  ;;  %v5023_v63 = vadd.f32 %v13414_v38, %v4862_v1  ;;  %v4867_v11 = vadd.f32 %v11139_v51, %v10716_v58  ;;  %10954 = vmatpush3.bf16.msra.mxu1 %v11138_v5  ;;  %8732 = vrot.lane.b32.xlu0 %v10477_v28, %s11206_s19  ;;  %v11103_v49 = vld [vmem:[#allocation2 + $0xe0] ss:$8 sps:$4 sm:$0xff]   ;;  %v10719_v16 = vadd.f32 %v13563_v42, %v13545_v3  ;;  %v6520_v32 = vld [vmem:[#allocation2 + $0xd8] sm:$0xe] }
 0x32c   : > { %v6207_v27 = vsel %vm11470_vm12, %v6202_v25, %v6206_v2  ;;  %v7829_v46 = vsel %vm11432_vm11, %v10426_v40, %v7828_v62  ;;  %v6521_v8 = vld [vmem:[#allocation2 + $0xdc] sm:$0x1]  ;;  %v10346_v15 = vrot.slane %v6518_v31, 9  ;;  %v7026_v9 = vld [vmem:[#allocation2 + $0x28] sm:$0xf]  ;;  %v7833_v55 = vsel %vm11432_vm11, %v10427_v30, %v7832_v50 }
 0x32d   : > { %v6221_v38 = vsel %vm11470_vm12, %v6216_v12, %v6220_v54  ;;  %v5063_v43 = vmax.f32 %v5023_v63, 0.0  ;;  %v5028_v10 = vadd.f32 %v13339_v56, %v4867_v11  ;;  %v4870_v4 = vadd.f32 %v11139_v51, %v10719_v16  ;;  %v7027_v35 = vld [vmem:[#allocation2 + $0x2c] sm:$0x1]  ;;  %v9118_v7 = vld [vmem:[#allocation3 + $0x20] sm:$0xff]  ;;  %v7028_v36 = vld [vmem:[#allocation2 + $0x30] sm:$0xf] }
 0x32e   : > { %v10318_v24 = vcombine.low %v6207_v27, %v6221_v38  ;;  %v6692_v13 = vrot.slane %v6519_v45, 5  ;;  %v10447_v23 = vcombine.low %v7829_v46, %v7833_v55  ;;  %v10347_v2 = vrot.slane %v6520_v32, 9  ;;  %9401 = vmatprep.mubr.bf16.mxu1 %v9118_v7  ;;  %v9117_v56 = vld [vmem:[#allocation3 + $0x18] sm:$0xff]  ;;  %v5688_v1 = vld [vmem:[#allocation2 + $0x120] sm:$0xf]  ;;  %v13770_v46 = vpop.permute.xlu0 %7922 }
 0x32f   : > { %v10605_v3 = vpack.c.bf16 %v5063_v43, %v5063_v43  ;;  %v5064_v42 = vmax.f32 %v5028_v10, 0.0  ;;  %8112 = vrot.lane.b32.xlu0 %v11103_v49, %s11205_s18  ;;  %v11105_v6 = vld [vmem:[#allocation2 + $0xd8] ss:$8 sps:$4 sm:$0xff]   ;;  %v5031_v33 = vadd.f32 %v13412_v61, %v4870_v4  ;;  %v6696_v59 = vrot.slane %v6521_v8, 5  ;;  %9402 = vmatmul.mubr.bf16.gmra.mrb[36].mxu1 %v9117_v56  ;;  %v5691_v58 = vld [vmem:[#allocation2 + $0x124] sm:$0x1]  ;;  %v13774_v10 = vpop.permute.xlu1 %6964 }
 0x330   : > { %6430 = vrot.lane.b32.xlu1 %v10318_v24, %s11207_s20  ;;  %v6693_v47 = vsel %vm11432_vm11, %v10346_v15, %v6692_v13  ;;  %v7139_v54 = vshrl.u32 %v7026_v9, 16  ;;  %v7142_v52 = vshll.u32 %v7026_v9, 16  ;;  %v11115_v51 = vld [vmem:[#allocation2 + $0x30] ss:$8 sps:$4 sm:$0xff]   ;;  %v7148_v40 = vshll.u32 %v7027_v35, 16 }
 0x331   : > { %v5427_v48 = vshrl.u32 %v10605_v3, 16  ;;  %v5430_v5 = vshll.u32 %v10605_v3, 16  ;;  %v10606_v37 = vpack.c.bf16 %v5064_v42, %v5064_v42  ;;  %v5065_v18 = vmax.f32 %v5031_v33, 0.0  ;;  %5837 = vst.msk [vmem:[#allocation3 + $0x48] sm:$0xff] %vm1174_vm13, %v11115_v51  ;;  %v5694_v63 = vld [vmem:[#allocation2 + $0x128] sm:$0xf] }
 0x332   : > { %v6697_v28 = vsel %vm11432_vm11, %v10347_v2, %v6696_v59  ;;  %v7141_v25 = vrot.slane %v7139_v54, 4  ;;  %v5697_v11 = vld [vmem:[#allocation2 + $0x12c] sm:$0x1]  ;;  %v7144_v45 = vrot.slane %v7142_v52, 5  ;;  %v13766_v27 = vrot.slane %v7148_v40, 5  ;;  %6461 = vst.msk [vmem:[#allocation3 + $0x48] sm:$0xff] %vm1802_vm14, %v13685_v39  ;;  %v13790_v52 = vpop.permute.xlu0 %8098 }
 0x333   : > { %v5429_v61 = vrot.slane %v5427_v48, 7  ;;  %v5435_v62 = vshrl.u32 %v10606_v37, 16  ;;  %v5438_v31 = vshll.u32 %v10606_v37, 16  ;;  %v10367_v12 = vcombine.low %v6693_v47, %v6697_v28  ;;  %7936 = vrot.lane.b32.xlu0 %v10447_v23, %s11207_s20  ;;  %v7029_v38 = vld [vmem:[#allocation2 + $0x34] sm:$0x1]  ;;  %6829 = vst.msk [vmem:[#allocation3 + $0x48] sm:$0xff] %vm2174_vm15, %v13660_v26 }
 0x334   : > { %6976 = vrot.lane.b32.xlu1 %v11105_v6, %s11206_s19  ;;  %v10607_v30 = vpack.c.bf16 %v5065_v18, %v5065_v18  ;;  %v7153_v49 = vshrl.u32 %v7028_v36, 16  ;;  %v7156_v43 = vshll.u32 %v7028_v36, 16  ;;  %v7145_v9 = vor.u32 %v7144_v45, %v7141_v25  ;;  %v8194_v55 = vld [vmem:[#allocation2 + $0xd0] sm:$0xf]  ;;  %7005 = vst.msk [vmem:[#allocation3 + $0x48] sm:$0xff] %vm2351_vm0, %v13633_v22  ;;  %v13792_v25 = vpop.permute.xlu1 %6788 }
 0x335   : > { %v5432_v50 = vor.u32 %v5430_v5, %v5429_v61  ;;  %v5433_v16 = vrot.slane %v5429_v61, 4  ;;  %v5437_v32 = vrot.slane %v5435_v62, 7  ;;  %v5700_v7 = vld [vmem:[#allocation2 + $0x130] sm:$0xf]  ;;  %v7162_v23 = vshll.u32 %v7029_v38, 16 }
 0x336   : > { %v5443_v8 = vshrl.u32 %v10607_v30, 16  ;;  %v5446_v15 = vshll.u32 %v10607_v30, 16  ;;  %v7155_v24 = vrot.slane %v7153_v49, 4  ;;  %v7146_v3 = vrot.slane %v7145_v9, 4  ;;  %v8195_v2 = vld [vmem:[#allocation2 + $0xd4] sm:$0x1] }
 0x337   : > { %v5689_v39 = vsel %vm11360_vm6, %v5432_v50, %v5688_v1  ;;  %v5692_v4 = vsel %vm11302_vm2, %v5433_v16, %v5691_v58  ;;  %v5440_v13 = vor.u32 %v5438_v31, %v5437_v32  ;;  %v5441_v35 = vrot.slane %v5437_v32, 4  ;;  %v5703_v56 = vld [vmem:[#allocation2 + $0x134] sm:$0x1]  ;;  %v8196_v6 = vld [vmem:[#allocation2 + $0xd8] sm:$0xf] }
 0x338   : > { %5693 = vst [vmem:[#allocation2 + $0x124] sm:$0x1] %v5692_v4  ;;  %5690 = vst [vmem:[#allocation2 + $0x120] sm:$0xf] %v5689_v39  ;;  %v5445_v26 = vrot.slane %v5443_v8, 7  ;;  %6800 = vrot.lane.b32.xlu1 %v10367_v12, %s11205_s18  ;;  %v7158_v42 = vrot.slane %v7156_v43, 5  ;;  %v7151_v48 = vsel %vm11470_vm12, %v7146_v3, %v13766_v27  ;;  %v13800_v4 = vpop.permute.xlu0 %7924 }
 0x339   : > { %v5695_v22 = vsel %vm11360_vm6, %v5440_v13, %v5694_v63  ;;  %v5698_v36 = vsel %vm11302_vm2, %v5441_v35, %v5697_v11  ;;  %v8499_v33 = vshrl.u32 %v8194_v55, 16  ;;  %v8502_v47 = vshll.u32 %v8194_v55, 16  ;;  %v8197_v37 = vld [vmem:[#allocation2 + $0xdc] sm:$0x1]  ;;  %v5894_v28 = vld [vmem:[#allocation2 + $0xd0] sm:$0xf] }
 0x33a   : > { %5699 = vst [vmem:[#allocation2 + $0x12c] sm:$0x1] %v5698_v36  ;;  %5696 = vst [vmem:[#allocation2 + $0x128] sm:$0xf] %v5695_v22  ;;  %v5448_v59 = vor.u32 %v5446_v15, %v5445_v26  ;;  %v5449_v54 = vrot.slane %v5445_v26, 4  ;;  %v7159_v5 = vor.u32 %v7158_v42, %v7155_v24  ;;  %v7164_v51 = vrot.slane %v7162_v23, 5  ;;  %v13805_v23 = vpop.permute.xlu1 %6420 }
 0x33b   : > { %v8501_v1 = vrot.slane %v8499_v33, 4  ;;  %v8504_v58 = vrot.slane %v8502_v47, 5  ;;  %v8508_v18 = vshll.u32 %v8195_v2, 16  ;;  %v8513_v31 = vshrl.u32 %v8196_v6, 16  ;;  %v5895_v12 = vld [vmem:[#allocation2 + $0xd4] sm:$0x1] }
 0x33c   : > { %v5701_v40 = vsel %vm11360_vm6, %v5448_v59, %v5700_v7  ;;  %v5704_v61 = vsel %vm11302_vm2, %v5449_v54, %v5703_v56  ;;  %v7160_v62 = vrot.slane %v7159_v5, 4  ;;  %v8516_v30 = vshll.u32 %v8196_v6, 16  ;;  %v5896_v27 = vld [vmem:[#allocation2 + $0xd8] sm:$0xf]  ;;  %v5897_v16 = vld [vmem:[#allocation2 + $0xdc] sm:$0x1] }
 0x33d   : > { %5702 = vst [vmem:[#allocation2 + $0x130] sm:$0xf] %v5701_v40  ;;  %5705 = vst [vmem:[#allocation2 + $0x134] sm:$0x1] %v5704_v61  ;;  %v8505_v63 = vor.u32 %v8504_v58, %v8501_v1  ;;  %v8510_v11 = vrot.slane %v8508_v18, 5  ;;  %v8522_v45 = vshll.u32 %v8197_v37, 16 }
 0x33e   : > { %v7165_v49 = vsel %vm11470_vm12, %v7160_v62, %v7164_v51  ;;  %v8515_v50 = vrot.slane %v8513_v31, 4  ;;  %v6223_v34 = vshrl.u32 %v5894_v28, 16  ;;  %v6226_v32 = vshll.u32 %v5894_v28, 16  ;;  %v8198_v15 = vld [vmem:[#allocation2 + $0xe0] sm:$0xf] }
 0x33f   : > { %v10390_v38 = vcombine.low %v7151_v48, %v7165_v49  ;;  %v8506_v0 = vrot.slane %v8505_v63, 4  ;;  %v8518_v43 = vrot.slane %v8516_v30, 5  ;;  %v8524_v8 = vrot.slane %v8522_v45, 5  ;;  %v8199_v3 = vld [vmem:[#allocation2 + $0xe4] sm:$0x1]  ;;  %v13817_v45 = vpop.permute.xlu0 %8100 }
 0x340   : > { %v6225_v9 = vrot.slane %v6223_v34, 4  ;;  %v6228_v24 = vrot.slane %v6226_v32, 5  ;;  %v6232_v55 = vshll.u32 %v5895_v12, 16  ;;  %v6237_v39 = vshrl.u32 %v5896_v27, 16  ;;  %v8200_v42 = vld [vmem:[#allocation2 + $0xe8] sm:$0xf] }
 0x341   : > { %7596 = vst.msk [vmem:[#allocation3 + $0x38] sm:$0xff] %vm1174_vm13, %v10390_v38  ;;  %v8511_v13 = vsel %vm11470_vm12, %v8506_v0, %v8510_v11  ;;  %v8519_v35 = vor.u32 %v8518_v43, %v8515_v50  ;;  %v6240_v7 = vshll.u32 %v5896_v27, 16  ;;  %v6246_v26 = vshll.u32 %v5897_v16, 16  ;;  %v8201_v56 = vld [vmem:[#allocation2 + $0xec] sm:$0x1]  ;;  %v13819_v0 = vpop.permute.xlu1 %6966 }
 0x342   : > { %7964 = vst.msk [vmem:[#allocation3 + $0x38] sm:$0xff] %vm1802_vm14, %v13607_v20  ;;  %v6229_v2 = vor.u32 %v6228_v24, %v6225_v9  ;;  %v6234_v22 = vrot.slane %v6232_v55, 5  ;;  %v6239_v36 = vrot.slane %v6237_v39, 4  ;;  %v8527_v6 = vshrl.u32 %v8198_v15, 16  ;;  %v7658_v48 = vld [vmem:[#allocation2 + $0xf8] sm:$0xe] }
 0x343   : > { %v8520_v33 = vrot.slane %v8519_v35, 4  ;;  %v6242_v47 = vrot.slane %v6240_v7, 5  ;;  %v6248_v59 = vrot.slane %v6246_v26, 5  ;;  %8140 = vst.msk [vmem:[#allocation3 + $0x38] sm:$0xff] %vm2174_vm15, %v13626_v21  ;;  %v8530_v54 = vshll.u32 %v8198_v15, 16 }
 0x344   : > { %v7659_v5 = vld [vmem:[#allocation2 + $0xfc] sm:$0x1]  ;;  %v6230_v37 = vrot.slane %v6229_v2, 4  ;;  %v8529_v51 = vrot.slane %v8527_v6, 4  ;;  %v8536_v1 = vshll.u32 %v8199_v3, 16  ;;  %v8541_v58 = vshrl.u32 %v8200_v42, 16 }
 0x345   : > { %v7660_v18 = vld [vmem:[#allocation2 + $0x100] sm:$0xe]  ;;  %8764 = vst.msk [vmem:[#allocation3 + $0x38] sm:$0xff] %vm2351_vm0, %v13723_v41  ;;  %v8525_v20 = vsel %vm11470_vm12, %v8520_v33, %v8524_v8  ;;  %v6243_v28 = vor.u32 %v6242_v47, %v6239_v36  ;;  %v8532_v40 = vrot.slane %v8530_v54, 5  ;;  %v8544_v61 = vshll.u32 %v8200_v42, 16 }
 0x346   : > { %v7661_v62 = vld [vmem:[#allocation2 + $0x104] sm:$0x1]  ;;  %v6522_v31 = vld [vmem:[#allocation2 + $0xf0] sm:$0xe]  ;;  %v10478_v21 = vcombine.low %v8511_v13, %v8525_v20  ;;  %v6235_v12 = vsel %vm11470_vm12, %v6230_v37, %v6234_v22  ;;  %v8538_v63 = vrot.slane %v8536_v1, 5  ;;  %v8543_v11 = vrot.slane %v8541_v58, 4  ;;  %v13844_v20 = vpop.permute.xlu0 %8722 }
 0x347   : > { %v6523_v30 = vld [vmem:[#allocation2 + $0xf4] sm:$0x1]  ;;  %v6244_v27 = vrot.slane %v6243_v28, 4  ;;  %v8533_v49 = vor.u32 %v8532_v40, %v8529_v51  ;;  %v8546_v41 = vrot.slane %v8544_v61, 5  ;;  %v8550_v50 = vshll.u32 %v8201_v56, 16  ;;  %v13832_v56 = vpop.f32.mrb[64].mxu0 }
 0x348   : > { %v6524_v16 = vld [vmem:[#allocation2 + $0xf8] sm:$0xe]  ;;  %v6525_v34 = vld [vmem:[#allocation2 + $0xfc] sm:$0x1]  ;;  %v8826_v32 = vld [vmem:[#allocation2 + $0x100] sm:$0xe]  ;;  %8734 = vrot.lane.b32.xlu0 %v10478_v21, %s11206_s19 }
 0x349   : > { %v8827_v38 = vld [vmem:[#allocation2 + $0x104] sm:$0x1]  ;;  %v10428_v43 = vrot.slane %v7658_v48, 9  ;;  %v7836_v8 = vrot.slane %v7659_v5, 5  ;;  %v10429_v15 = vrot.slane %v7660_v18, 9  ;;  %v7840_v9 = vrot.slane %v7661_v62, 5 }
 0x34a   : > { %v8828_v24 = vld [vmem:[#allocation2 + $0x108] sm:$0xe]  ;;  %v8829_v55 = vld [vmem:[#allocation2 + $0x10c] sm:$0x1]  ;;  %v6249_v39 = vsel %vm11470_vm12, %v6244_v27, %v6248_v59  ;;  %v8534_v13 = vrot.slane %v8533_v49, 4  ;;  %v8547_v35 = vor.u32 %v8546_v41, %v8543_v11  ;;  %v8552_v7 = vrot.slane %v8550_v50, 5 }
 0x34b   : > { %v5898_v26 = vld [vmem:[#allocation2 + $0xf0] sm:$0xf]  ;;  %v10319_v42 = vcombine.low %v6235_v12, %v6249_v39  ;;  %v13826_v2 = vsel %vm11432_vm11, %v10428_v43, %v7836_v8  ;;  %v13830_v22 = vsel %vm11432_vm11, %v10429_v15, %v7840_v9  ;;  %v10348_v36 = vrot.slane %v6522_v31, 9  ;;  %v5899_v54 = vld [vmem:[#allocation2 + $0xf4] sm:$0x1]  ;;  %v13839_v5 = vpop.f32.mrb[65].mxu0  ;;  %v13852_v12 = vpop.permute.xlu1 %6790 }
 0x34c   : > { %v11118_v3 = vld [vmem:[#allocation2 + $0x50] ss:$8 sps:$4 sm:$0xff]   ;;  %v8539_v6 = vsel %vm11470_vm12, %v8534_v13, %v8538_v63  ;;  %v8548_v33 = vrot.slane %v8547_v35, 4  ;;  %v10448_v47 = vcombine.low %v13826_v2, %v13830_v22  ;;  %v6700_v59 = vrot.slane %v6523_v30, 5  ;;  %v5901_v30 = vld [vmem:[#allocation2 + $0xfc] sm:$0x1] }
 0x34d   : > { %v9121_v48 = vld [vmem:[#allocation3 + $0x38] sm:$0xff]  ;;  %5838 = vst.msk [vmem:[#allocation3 + $0x60] sm:$0xff] %vm1174_vm13, %v11118_v3  ;;  %6432 = vrot.lane.b32.xlu1 %v10319_v42, %s11207_s20  ;;  %v10349_v37 = vrot.slane %v6524_v16, 9  ;;  %v6704_v51 = vrot.slane %v6525_v34, 5  ;;  %v10508_v1 = vrot.slane %v8826_v32, 9  ;;  %v9004_v58 = vrot.slane %v8827_v38, 5 }
 0x34e   : > { %9409 = vmatprep.mubr.bf16.mxu1 %v9121_v48  ;;  %v9120_v18 = vld [vmem:[#allocation3 + $0x30] sm:$0xff]  ;;  %6462 = vst.msk [vmem:[#allocation3 + $0x60] sm:$0xff] %vm1802_vm14, %v13754_v57  ;;  %v8553_v28 = vsel %vm11470_vm12, %v8548_v33, %v8552_v7  ;;  %v11111_v40 = vld [vmem:[#allocation2 + $0xf8] ss:$8 sps:$4 sm:$0xff]   ;;  %v6701_v61 = vsel %vm11432_vm11, %v10348_v36, %v6700_v59  ;;  %v10509_v62 = vrot.slane %v8828_v24, 9  ;;  %v9008_v31 = vrot.slane %v8829_v55, 5  ;;  %v13869_v59 = vpop.permute.xlu0 %7926 }
 0x34f   : > { %v5900_v21 = vld [vmem:[#allocation2 + $0xf8] sm:$0xf]  ;;  %9410 = vmatmul.mubr.bf16.gmra.mrb[40].mxu1 %v9120_v18  ;;  %6830 = vst.msk [vmem:[#allocation3 + $0x60] sm:$0xff] %vm2174_vm15, %v13737_v29  ;;  %v10479_v63 = vcombine.low %v8539_v6, %v8553_v28  ;;  %v6705_v57 = vsel %vm11432_vm11, %v10349_v37, %v6704_v51  ;;  %v9005_v11 = vsel %vm11432_vm11, %v10508_v1, %v9004_v58  ;;  %v6251_v27 = vshrl.u32 %v5898_v26, 16  ;;  %v13860_v41 = vpop.f32.mrb[66].mxu0  ;;  %v13871_v58 = vpop.permute.xlu1 %6422 }
 0x350   : > { %v7030_v49 = vld [vmem:[#allocation2 + $0x38] sm:$0xf]  ;;  %7006 = vst.msk [vmem:[#allocation3 + $0x60] sm:$0xff] %vm2351_vm0, %v13706_v17  ;;  %v10368_v50 = vcombine.low %v6701_v61, %v6705_v57  ;;  %v9009_v29 = vsel %vm11432_vm11, %v10509_v62, %v9008_v31  ;;  %v6254_v16 = vshll.u32 %v5898_v26, 16  ;;  %v6260_v34 = vshll.u32 %v5899_v54, 16  ;;  %v13866_v55 = vpop.f32.mrb[67].mxu0 }
 0x351   : > { %v7031_v32 = vld [vmem:[#allocation2 + $0x3c] sm:$0x1]  ;;  %v7032_v38 = vld [vmem:[#allocation2 + $0x40] sm:$0xf]  ;;  %8736 = vrot.lane.b32.xlu0 %v10479_v63, %s11206_s19  ;;  %6978 = vrot.lane.b32.xlu1 %v11111_v40, %s11206_s19  ;;  %v10528_v43 = vcombine.low %v9005_v11, %v9009_v29  ;;  %v6253_v8 = vrot.slane %v6251_v27, 4  ;;  %v6265_v15 = vshrl.u32 %v5900_v21, 16 }
 0x352   : > { %v6268_v9 = vshll.u32 %v5900_v21, 16  ;;  %v7033_v24 = vld [vmem:[#allocation2 + $0x44] sm:$0x1]  ;;  %v7662_v17 = vld [vmem:[#allocation2 + $0x108] sm:$0xe]  ;;  %v6256_v39 = vrot.slane %v6254_v16, 5 }
 0x353   : > { %v6262_v13 = vrot.slane %v6260_v34, 5  ;;  %v6274_v35 = vshll.u32 %v5901_v30, 16  ;;  %v7167_v7 = vshrl.u32 %v7030_v49, 16  ;;  %v7663_v26 = vld [vmem:[#allocation2 + $0x10c] sm:$0x1]  ;;  %9110 = vst.msk [vmem:[#allocation3 + $0x130] sm:$0xff] %vm1174_vm13, %v10528_v43 }
 0x354   : > { %v6267_v3 = vrot.slane %v6265_v15, 4  ;;  %v6270_v42 = vrot.slane %v6268_v9, 5  ;;  %v7170_v36 = vshll.u32 %v7030_v49, 16  ;;  %v7176_v6 = vshll.u32 %v7031_v32, 16  ;;  %v7664_v33 = vld [vmem:[#allocation2 + $0x110] sm:$0xe] }
 0x355   : > { %v6257_v54 = vor.u32 %v6256_v39, %v6253_v8  ;;  %v6276_v48 = vrot.slane %v6274_v35, 5  ;;  %v7169_v37 = vrot.slane %v7167_v7, 4  ;;  %v7181_v51 = vshrl.u32 %v7032_v38, 16  ;;  %v7665_v1 = vld [vmem:[#allocation2 + $0x114] sm:$0x1]  ;;  %v13873_v18 = vpop.f32.mrb[68].mxu0  ;;  %7938 = vrot.lane.b32.xlu0 %v10448_v47, %s11207_s20  ;;  %6802 = vrot.lane.b32.xlu1 %v10368_v50, %s11205_s18 }
 0x356   : > { %v11113_v28 = vld [vmem:[#allocation2 + $0x100] ss:$8 sps:$4 sm:$0xff]   ;;  %v6271_v40 = vor.u32 %v6270_v42, %v6267_v3  ;;  %v7172_v61 = vrot.slane %v7170_v36, 5  ;;  %v7178_v62 = vrot.slane %v7176_v6, 5  ;;  %v7184_v31 = vshll.u32 %v7032_v38, 16  ;;  %v13880_v57 = vpop.f32.mrb[69].mxu0  ;;  %v13891_v3 = vpop.permute.xlu0 %8102 }
 0x357   : > { %v6526_v21 = vld [vmem:[#allocation2 + $0x100] sm:$0xe]  ;;  %v6527_v63 = vld [vmem:[#allocation2 + $0x104] sm:$0x1]  ;;  %v6258_v11 = vrot.slane %v6257_v54, 4  ;;  %v7183_v30 = vrot.slane %v7181_v51, 4 }
 0x358   : > { %v7190_v27 = vshll.u32 %v7033_v24, 16  ;;  %v10430_v49 = vrot.slane %v7662_v17, 9  ;;  %v6528_v29 = vld [vmem:[#allocation2 + $0x108] sm:$0xe]  ;;  %v6272_v16 = vrot.slane %v6271_v40, 4  ;;  %v7173_v34 = vor.u32 %v7172_v61, %v7169_v37  ;;  %v13884_v9 = vpop.f32.mrb[70].mxu0 }
 0x359   : > { %v7186_v2 = vrot.slane %v7184_v31, 5  ;;  %v7844_v22 = vrot.slane %v7663_v26, 5  ;;  %v6529_v47 = vld [vmem:[#allocation2 + $0x10c] sm:$0x1]  ;;  %v8830_v50 = vld [vmem:[#allocation2 + $0x110] sm:$0xe]  ;;  %v6263_v32 = vsel %vm11470_vm12, %v6258_v11, %v6262_v13  ;;  %8114 = vrot.lane.b32.xlu0 %v11113_v28, %s11205_s18 }
 0x35a   : > { %v7192_v43 = vrot.slane %v7190_v27, 5  ;;  %v10431_v38 = vrot.slane %v7664_v33, 9  ;;  %v7848_v8 = vrot.slane %v7665_v1, 5  ;;  %v8831_v15 = vld [vmem:[#allocation2 + $0x114] sm:$0x1]  ;;  %v6277_v24 = vsel %vm11470_vm12, %v6272_v16, %v6276_v48  ;;  %v13893_v13 = vpop.f32.mrb[71].mxu0  ;;  %v13897_v48 = vpop.permute.xlu1 %6968 }
 0x35b   : > { %v7174_v17 = vrot.slane %v7173_v34, 4  ;;  %v7187_v39 = vor.u32 %v7186_v2, %v7183_v30  ;;  %v7845_v35 = vsel %vm11432_vm11, %v10430_v49, %v7844_v22  ;;  %v8832_v7 = vld [vmem:[#allocation2 + $0x118] sm:$0xe]  ;;  %v8833_v26 = vld [vmem:[#allocation2 + $0x11c] sm:$0x1]  ;;  %v9152_v42 = vld [vmem:[#allocation3 + $0x130] sm:$0xff]  ;;  %v10320_v36 = vcombine.low %v6263_v32, %v6277_v24 }
 0x35c   : > { %v7849_v6 = vsel %vm11432_vm11, %v10431_v38, %v7848_v8  ;;  %v10350_v33 = vrot.slane %v6526_v21, 9  ;;  %v6708_v54 = vrot.slane %v6527_v63, 5  ;;  %v8202_v37 = vld [vmem:[#allocation2 + $0x100] sm:$0xf]  ;;  %10935 = vmatprep.mubr.msk.bf16.mxu0 %vm1174_vm13, %v9152_v42  ;;  %v10351_v40 = vrot.slane %v6528_v29, 9 }
 0x35d   : > { %v7179_v51 = vsel %vm11470_vm12, %v7174_v17, %v7178_v62  ;;  %v7188_v1 = vrot.slane %v7187_v39, 4  ;;  %v10449_v28 = vcombine.low %v7845_v35, %v7849_v6  ;;  %v8203_v61 = vld [vmem:[#allocation2 + $0x104] sm:$0x1]  ;;  %v8204_v31 = vld [vmem:[#allocation2 + $0x108] sm:$0xf]  ;;  %6434 = vrot.lane.b32.xlu1 %v10320_v36, %s11207_s20  ;;  %v6712_v63 = vrot.slane %v6529_v47, 5  ;;  %v13914_v35 = vpop.permute.xlu0 %8724 }
 0x35e   : > { %v11114_v11 = vld [vmem:[#allocation2 + $0x108] ss:$8 sps:$4 sm:$0xff]   ;;  %v6709_v21 = vsel %vm11432_vm11, %v10350_v33, %v6708_v54  ;;  %v10510_v30 = vrot.slane %v8830_v50, 9  ;;  %v9012_v27 = vrot.slane %v8831_v15, 5  ;;  %v8205_v49 = vld [vmem:[#allocation2 + $0x10c] sm:$0x1]  ;;  %v13918_v33 = vpop.permute.xlu1 %6792 }
 0x35f   : > { %v7193_v16 = vsel %vm11470_vm12, %v7188_v1, %v7192_v43  ;;  %7940 = vrot.lane.b32.xlu0 %v10449_v28, %s11207_s20  ;;  %v11116_v62 = vld [vmem:[#allocation2 + $0x110] ss:$8 sps:$4 sm:$0xff]   ;;  %v10511_v34 = vrot.slane %v8832_v7, 9  ;;  %v9016_v29 = vrot.slane %v8833_v26, 5  ;;  %v8555_v2 = vshrl.u32 %v8202_v37, 16 }
 0x360   : > { %v5902_v22 = vld [vmem:[#allocation2 + $0x100] sm:$0xf]  ;;  %v10391_v32 = vcombine.low %v7179_v51, %v7193_v16  ;;  %v6713_v38 = vsel %vm11432_vm11, %v10351_v40, %v6712_v63  ;;  %v9013_v47 = vsel %vm11432_vm11, %v10510_v30, %v9012_v27  ;;  %v8558_v50 = vshll.u32 %v8202_v37, 16  ;;  %v5903_v8 = vld [vmem:[#allocation2 + $0x104] sm:$0x1] }
 0x361   : > { %v5904_v15 = vld [vmem:[#allocation2 + $0x108] sm:$0xf]  ;;  %v10369_v24 = vcombine.low %v6709_v21, %v6713_v38  ;;  %v9017_v43 = vsel %vm11432_vm11, %v10511_v34, %v9016_v29  ;;  %v8557_v17 = vrot.slane %v8555_v2, 4  ;;  %v8564_v39 = vshll.u32 %v8203_v61, 16  ;;  %6980 = vrot.lane.b32.xlu1 %v11114_v11, %s11206_s19  ;;  %v5905_v51 = vld [vmem:[#allocation2 + $0x10c] sm:$0x1] }
 0x362   : > { %7597 = vst.msk [vmem:[#allocation3 + $0x50] sm:$0xff] %vm1174_vm13, %v10391_v32  ;;  %v10529_v7 = vcombine.low %v9013_v47, %v9017_v43  ;;  %v8560_v26 = vrot.slane %v8558_v50, 5  ;;  %v8569_v42 = vshrl.u32 %v8204_v31, 16  ;;  %v8572_v36 = vshll.u32 %v8204_v31, 16  ;;  %v11120_v6 = vld [vmem:[#allocation2 + $0x60] ss:$8 sps:$4 sm:$0xff]   ;;  %v13936_v47 = vpop.permute.xlu0 %8104 }
 0x363   : > { %7965 = vst.msk [vmem:[#allocation3 + $0x50] sm:$0xff] %vm1802_vm14, %v13703_v19  ;;  %8116 = vrot.lane.b32.xlu0 %v11116_v62, %s11205_s18  ;;  %v8566_v54 = vrot.slane %v8564_v39, 5  ;;  %v8578_v37 = vshll.u32 %v8205_v49, 16  ;;  %v6279_v1 = vshrl.u32 %v5902_v22, 16  ;;  %v6282_v28 = vshll.u32 %v5902_v22, 16 }
 0x364   : > { %8141 = vst.msk [vmem:[#allocation3 + $0x50] sm:$0xff] %vm2174_vm15, %v13678_v60  ;;  %v8561_v40 = vor.u32 %v8560_v26, %v8557_v17  ;;  %v8571_v61 = vrot.slane %v8569_v42, 4  ;;  %v8574_v31 = vrot.slane %v8572_v36, 5  ;;  %v6288_v11 = vshll.u32 %v5903_v8, 16  ;;  %v7034_v21 = vld [vmem:[#allocation2 + $0x58] sm:$0xf]  ;;  %v13940_v17 = vpop.permute.xlu1 %6424 }
 0x365   : > { %9111 = vst.msk [vmem:[#allocation3 + $0x148] sm:$0xff] %vm1174_vm13, %v10529_v7  ;;  %5839 = vst.msk [vmem:[#allocation3 + $0x78] sm:$0xff] %vm1174_vm13, %v11120_v6  ;;  %v8580_v19 = vrot.slane %v8578_v37, 5  ;;  %v6281_v63 = vrot.slane %v6279_v1, 4  ;;  %v6284_v30 = vrot.slane %v6282_v28, 5  ;;  %v6293_v27 = vshrl.u32 %v5904_v15, 16  ;;  %6804 = vrot.lane.b32.xlu1 %v10369_v24, %s11205_s18 }
 0x366   : > { %8765 = vst.msk [vmem:[#allocation3 + $0x50] sm:$0xff] %vm2351_vm0, %v13752_v14  ;;  %v7035_v49 = vld [vmem:[#allocation2 + $0x5c] sm:$0x1]  ;;  %v8562_v60 = vrot.slane %v8561_v40, 4  ;;  %v8575_v16 = vor.u32 %v8574_v31, %v8571_v61  ;;  %v6290_v62 = vrot.slane %v6288_v11, 5  ;;  %v6296_v34 = vshll.u32 %v5904_v15, 16 }
 0x367   : > { %6463 = vst.msk [vmem:[#allocation3 + $0x78] sm:$0xff] %vm1802_vm14, %v13805_v23  ;;  %v7036_v29 = vld [vmem:[#allocation2 + $0x60] sm:$0xf]  ;;  %v6285_v2 = vor.u32 %v6284_v30, %v6281_v63  ;;  %v6295_v14 = vrot.slane %v6293_v27, 4  ;;  %v6302_v22 = vshll.u32 %v5905_v51, 16  ;;  %v7195_v38 = vshrl.u32 %v7034_v21, 16 }
 0x368   : > { %6831 = vst.msk [vmem:[#allocation3 + $0x78] sm:$0xff] %vm2174_vm15, %v13792_v25  ;;  %v7037_v32 = vld [vmem:[#allocation2 + $0x64] sm:$0x1]  ;;  %v8567_v23 = vsel %vm11470_vm12, %v8562_v60, %v8566_v54  ;;  %v8576_v50 = vrot.slane %v8575_v16, 4  ;;  %v6298_v8 = vrot.slane %v6296_v34, 5  ;;  %v7198_v15 = vshll.u32 %v7034_v21, 16 }
 0x369   : > { %7007 = vst.msk [vmem:[#allocation3 + $0x78] sm:$0xff] %vm2351_vm0, %v13774_v10  ;;  %v7666_v24 = vld [vmem:[#allocation2 + $0x118] sm:$0xe]  ;;  %v7667_v43 = vld [vmem:[#allocation2 + $0x11c] sm:$0x1]  ;;  %v6286_v25 = vrot.slane %v6285_v2, 4 }
 0x36a   : > { %v6304_v39 = vrot.slane %v6302_v22, 5  ;;  %v7197_v7 = vrot.slane %v7195_v38, 4  ;;  %v7204_v26 = vshll.u32 %v7035_v49, 16  ;;  %v7668_v42 = vld [vmem:[#allocation2 + $0x120] sm:$0xe]  ;;  %v8581_v10 = vsel %vm11470_vm12, %v8576_v50, %v8580_v19  ;;  %v9123_v63 = vld [vmem:[#allocation3 + $0x48] sm:$0xff]  ;;  %v13948_v38 = vpop.permute.xlu0 %7928 }
 0x36b   : > { %v6299_v36 = vor.u32 %v6298_v8, %v6295_v14  ;;  %v7200_v6 = vrot.slane %v7198_v15, 5  ;;  %v7209_v37 = vshrl.u32 %v7036_v29, 16  ;;  %v7669_v51 = vld [vmem:[#allocation2 + $0x124] sm:$0x1]  ;;  %v6530_v54 = vld [vmem:[#allocation2 + $0x110] sm:$0xe]  ;;  %v10480_v28 = vcombine.low %v8567_v23, %v8581_v10 }
 0x36c   : > { %v9155_v1 = vld [vmem:[#allocation3 + $0x148] sm:$0xff]  ;;  %v6291_v40 = vsel %vm11470_vm12, %v6286_v25, %v6290_v62  ;;  %v7206_v61 = vrot.slane %v7204_v26, 5  ;;  %v7212_v31 = vshll.u32 %v7036_v29, 16  ;;  %v6531_v11 = vld [vmem:[#allocation2 + $0x114] sm:$0x1]  ;;  %v7218_v49 = vshll.u32 %v7037_v32, 16  ;;  %v13952_v32 = vpop.permute.xlu1 %6970 }
 0x36d   : > { %v6532_v21 = vld [vmem:[#allocation2 + $0x118] sm:$0xe]  ;;  %10936 = vmatmul.mubr.msk.bf16.gmra.mrb[88].mxu0 %vm1174_vm13, %v9155_v1  ;;  %v6300_v30 = vrot.slane %v6299_v36, 4  ;;  %v7201_v27 = vor.u32 %v7200_v6, %v7197_v7  ;;  %v7211_v19 = vrot.slane %v7209_v37, 4  ;;  %v9124_v60 = vld [vmem:[#allocation3 + $0x50] sm:$0xff]  ;;  %8738 = vrot.lane.b32.xlu0 %v10480_v28, %s11206_s19  ;;  %v10432_v14 = vrot.slane %v7666_v24, 9 }
 0x36e   : > { %v6533_v16 = vld [vmem:[#allocation2 + $0x11c] sm:$0x1]  ;;  %v7038_v34 = vld [vmem:[#allocation2 + $0x68] sm:$0xf]  ;;  %v7214_v2 = vrot.slane %v7212_v31, 5  ;;  %v7852_v22 = vrot.slane %v7667_v43, 5  ;;  %9417 = vmatprep.mubr.bf16.mxu1 %v9124_v60 }
 0x36f   : > { %v10433_v62 = vrot.slane %v7668_v42, 9  ;;  %v7039_v29 = vld [vmem:[#allocation2 + $0x6c] sm:$0x1]  ;;  %v6305_v23 = vsel %vm11470_vm12, %v6300_v30, %v6304_v39  ;;  %v7202_v50 = vrot.slane %v7201_v27, 4  ;;  %v7220_v8 = vrot.slane %v7218_v49, 5  ;;  %9418 = vmatmul.mubr.bf16.gmra.mrb[44].mxu1 %v9123_v63 }
 0x370   : > { %v7856_v15 = vrot.slane %v7669_v51, 5  ;;  %v10321_v25 = vcombine.low %v6291_v40, %v6305_v23  ;;  %v7215_v7 = vor.u32 %v7214_v2, %v7211_v19  ;;  %v7853_v24 = vsel %vm11432_vm11, %v10432_v14, %v7852_v22  ;;  %v7040_v26 = vld [vmem:[#allocation2 + $0x70] sm:$0xf]  ;;  %v11117_v51 = vld [vmem:[#allocation2 + $0x118] ss:$8 sps:$4 sm:$0xff]   ;;  %v13968_v2 = vpop.permute.xlu0 %8726  ;;  %v13970_v23 = vpop.permute.xlu1 %6794 }
 0x371   : > { %v10352_v43 = vrot.slane %v6530_v54, 9  ;;  %v7207_v42 = vsel %vm11470_vm12, %v7202_v50, %v7206_v61  ;;  %v6716_v39 = vrot.slane %v6531_v11, 5  ;;  %v10353_v36 = vrot.slane %v6532_v21, 9  ;;  %v7041_v28 = vld [vmem:[#allocation2 + $0x74] sm:$0x1] }
 0x372   : > { %v7857_v10 = vsel %vm11432_vm11, %v10433_v62, %v7856_v15  ;;  %6436 = vrot.lane.b32.xlu1 %v10321_v25, %s11207_s20  ;;  %v7216_v6 = vrot.slane %v7215_v7, 4  ;;  %v6720_v1 = vrot.slane %v6533_v16, 5  ;;  %v7223_v40 = vshrl.u32 %v7038_v34, 16  ;;  %v8206_v61 = vld [vmem:[#allocation2 + $0x110] sm:$0xf] }
 0x373   : > { %v10450_v37 = vcombine.low %v7853_v24, %v7857_v10  ;;  %v6717_v54 = vsel %vm11432_vm11, %v10352_v43, %v6716_v39  ;;  %v7226_v31 = vshll.u32 %v7038_v34, 16  ;;  %v7232_v63 = vshll.u32 %v7039_v29, 16  ;;  %v11119_v11 = vld [vmem:[#allocation2 + $0x120] ss:$8 sps:$4 sm:$0xff]   ;;  %v8207_v60 = vld [vmem:[#allocation2 + $0x114] sm:$0x1] }
 0x374   : > { %v7237_v30 = vshrl.u32 %v7040_v26, 16  ;;  %v7221_v27 = vsel %vm11470_vm12, %v7216_v6, %v7220_v8  ;;  %v6721_v21 = vsel %vm11432_vm11, %v10353_v36, %v6720_v1  ;;  %v7225_v19 = vrot.slane %v7223_v40, 4  ;;  %v8208_v16 = vld [vmem:[#allocation2 + $0x118] sm:$0xf]  ;;  %v8209_v29 = vld [vmem:[#allocation2 + $0x11c] sm:$0x1] }
 0x375   : > { %7942 = vrot.lane.b32.xlu0 %v10450_v37, %s11207_s20  ;;  %v7240_v49 = vshll.u32 %v7040_v26, 16  ;;  %v10392_v14 = vcombine.low %v7207_v42, %v7221_v27  ;;  %v10370_v34 = vcombine.low %v6717_v54, %v6721_v21  ;;  %v7228_v22 = vrot.slane %v7226_v31, 5  ;;  %v11123_v7 = vld [vmem:[#allocation2 + $0x70] ss:$8 sps:$4 sm:$0xff]   ;;  %v7671_v21 = vld [vmem:[#allocation2 + $0x12c] sm:$0x1] }
 0x376   : > { %v7234_v62 = vrot.slane %v7232_v63, 5  ;;  %6982 = vrot.lane.b32.xlu1 %v11117_v51, %s11206_s19  ;;  %v7239_v50 = vrot.slane %v7237_v30, 4  ;;  %v7246_v15 = vshll.u32 %v7041_v28, 16  ;;  %v8583_v25 = vshrl.u32 %v8206_v61, 16  ;;  %v5906_v42 = vld [vmem:[#allocation2 + $0x110] sm:$0xf] }
 0x377   : > { %v7242_v8 = vrot.slane %v7240_v49, 5  ;;  %7598 = vst.msk [vmem:[#allocation3 + $0x68] sm:$0xff] %vm1174_vm13, %v10392_v14  ;;  %v7229_v24 = vor.u32 %v7228_v22, %v7225_v19  ;;  %v8586_v43 = vshll.u32 %v8206_v61, 16  ;;  %v8592_v26 = vshll.u32 %v8207_v60, 16  ;;  %v5907_v51 = vld [vmem:[#allocation2 + $0x114] sm:$0x1] }
 0x378   : > { %v8597_v10 = vshrl.u32 %v8208_v16, 16  ;;  %7966 = vst.msk [vmem:[#allocation3 + $0x68] sm:$0xff] %vm1802_vm14, %v13770_v46  ;;  %v7248_v36 = vrot.slane %v7246_v15, 5  ;;  %v8585_v6 = vrot.slane %v8583_v25, 4  ;;  %v8600_v37 = vshll.u32 %v8208_v16, 16  ;;  %v6427_v16 = vpop.permute.xlu1 %6426 }
 0x379   : > { %8118 = vrot.lane.b32.xlu0 %v11119_v11, %s11205_s18  ;;  %v7243_v39 = vor.u32 %v7242_v8, %v7239_v50  ;;  %5840 = vst.msk [vmem:[#allocation3 + $0x90] sm:$0xff] %vm1174_vm13, %v11123_v7  ;;  %v7230_v1 = vrot.slane %v7229_v24, 4  ;;  %v8588_v28 = vrot.slane %v8586_v43, 5  ;;  %v8594_v40 = vrot.slane %v8592_v26, 5  ;;  %v5908_v31 = vld [vmem:[#allocation2 + $0x118] sm:$0xf] }
 0x37a   : > { %8142 = vst.msk [vmem:[#allocation3 + $0x68] sm:$0xff] %vm2174_vm15, %v13790_v52  ;;  %v8599_v54 = vrot.slane %v8597_v10, 4  ;;  %v5909_v63 = vld [vmem:[#allocation2 + $0x11c] sm:$0x1]  ;;  %6806 = vrot.lane.b32.xlu1 %v10370_v34, %s11205_s18  ;;  %v8602_v30 = vrot.slane %v8600_v37, 5  ;;  %v8606_v61 = vshll.u32 %v8209_v29, 16  ;;  %v13987_v52 = vpop.permute.xlu0 %8728 }
 0x37b   : > { %6464 = vst.msk [vmem:[#allocation3 + $0x90] sm:$0xff] %vm1802_vm14, %v13871_v58  ;;  %v7244_v46 = vrot.slane %v7243_v39, 4  ;;  %v6307_v27 = vshrl.u32 %v5906_v42, 16  ;;  %v7670_v11 = vld [vmem:[#allocation2 + $0x128] sm:$0xe]  ;;  %v7235_v19 = vsel %vm11470_vm12, %v7230_v1, %v7234_v62  ;;  %v8589_v58 = vor.u32 %v8588_v28, %v8585_v6 }
 0x37c   : > { %8766 = vst.msk [vmem:[#allocation3 + $0x68] sm:$0xff] %vm2351_vm0, %v13844_v20  ;;  %v6310_v49 = vshll.u32 %v5906_v42, 16  ;;  %v6316_v60 = vshll.u32 %v5907_v51, 16  ;;  %v8603_v34 = vor.u32 %v8602_v30, %v8599_v54  ;;  %v8608_v20 = vrot.slane %v8606_v61, 5  ;;  %v7672_v29 = vld [vmem:[#allocation2 + $0x130] sm:$0xe] }
 0x37d   : > { %6832 = vst.msk [vmem:[#allocation3 + $0x90] sm:$0xff] %vm2174_vm15, %v13852_v12  ;;  %v7249_v14 = vsel %vm11470_vm12, %v7244_v46, %v7248_v36  ;;  %v6309_v22 = vrot.slane %v6307_v27, 4  ;;  %v11124_v12 = vld [vmem:[#allocation2 + $0x80] ss:$8 sps:$4 sm:$0xff]   ;;  %v8590_v8 = vrot.slane %v8589_v58, 4  ;;  %v6321_v26 = vshrl.u32 %v5908_v31, 16 }
 0x37e   : > { %7008 = vst.msk [vmem:[#allocation3 + $0x90] sm:$0xff] %vm2351_vm0, %v13819_v0  ;;  %v10393_v50 = vcombine.low %v7235_v19, %v7249_v14  ;;  %v6312_v15 = vrot.slane %v6310_v49, 5  ;;  %v13995_v25 = vrot.slane %v6316_v60, 5  ;;  %v7673_v62 = vld [vmem:[#allocation2 + $0x134] sm:$0x1]  ;;  %v8604_v43 = vrot.slane %v8603_v34, 4  ;;  %v14017_v19 = vpop.permute.xlu1 %6972 }
 0x37f   : > { %v6534_v7 = vld [vmem:[#allocation2 + $0x120] sm:$0xe]  ;;  %v6535_v24 = vld [vmem:[#allocation2 + $0x124] sm:$0x1]  ;;  %v6324_v0 = vshll.u32 %v5908_v31, 16  ;;  %v6330_v10 = vshll.u32 %v5909_v63, 16  ;;  %v8595_v36 = vsel %vm11470_vm12, %v8590_v8, %v8594_v40  ;;  %v14009_v40 = vpop.permute.xlu0 %7930 }
 0x380   : > { %v6536_v42 = vld [vmem:[#allocation2 + $0x128] sm:$0xe]  ;;  %v6537_v39 = vld [vmem:[#allocation2 + $0x12c] sm:$0x1]  ;;  %5841 = vst.msk [vmem:[#allocation3 + $0xa8] sm:$0xff] %vm1174_vm13, %v11124_v12  ;;  %7599 = vst.msk [vmem:[#allocation3 + $0x80] sm:$0xff] %vm1174_vm13, %v10393_v50  ;;  %v6313_v6 = vor.u32 %v6312_v15, %v6309_v22  ;;  %v8609_v28 = vsel %vm11470_vm12, %v8604_v43, %v8608_v20 }
 0x381   : > { %v10434_v37 = vrot.slane %v7670_v11, 9  ;;  %v7860_v51 = vrot.slane %v7671_v21, 5  ;;  %v8210_v1 = vld [vmem:[#allocation2 + $0x120] sm:$0xf]  ;;  %6465 = vst.msk [vmem:[#allocation3 + $0xa8] sm:$0xff] %vm1802_vm14, %v13940_v17  ;;  %7967 = vst.msk [vmem:[#allocation3 + $0x80] sm:$0xff] %vm1802_vm14, %v13800_v4  ;;  %v10481_v61 = vcombine.low %v8595_v36, %v8609_v28 }
 0x382   : > { %v6323_v54 = vrot.slane %v6321_v26, 4  ;;  %v6326_v31 = vrot.slane %v6324_v0, 5  ;;  %v6332_v63 = vrot.slane %v6330_v10, 5  ;;  %v8211_v46 = vld [vmem:[#allocation2 + $0x124] sm:$0x1]  ;;  %6833 = vst.msk [vmem:[#allocation3 + $0xa8] sm:$0xff] %vm2174_vm15, %v13918_v33  ;;  %v6797_v28 = vpop.permute.xlu1 %6796 }
 0x383   : > { %v11125_v30 = vld [vmem:[#allocation2 + $0xa0] ss:$8 sps:$4 sm:$0xff]   ;;  %v6314_v27 = vrot.slane %v6313_v6, 4  ;;  %8143 = vst.msk [vmem:[#allocation3 + $0x80] sm:$0xff] %vm2174_vm15, %v13817_v45  ;;  %v7861_v4 = vsel %vm11432_vm11, %v10434_v37, %v7860_v51  ;;  %v10435_v17 = vrot.slane %v7672_v29, 9  ;;  %v7864_v58 = vrot.slane %v7673_v62, 5  ;;  %8740 = vrot.lane.b32.xlu0 %v10481_v61, %s11206_s19  ;;  %v14039_v36 = vpop.permute.xlu0 %8106 }
 0x384   : > { %v8212_v11 = vld [vmem:[#allocation2 + $0x128] sm:$0xf]  ;;  %7009 = vst.msk [vmem:[#allocation3 + $0xa8] sm:$0xff] %vm2351_vm0, %v13897_v48  ;;  %v6327_v33 = vor.u32 %v6326_v31, %v6323_v54  ;;  %v10354_v49 = vrot.slane %v6534_v7, 9  ;;  %v6724_v60 = vrot.slane %v6535_v24, 5  ;;  %v9126_v34 = vld [vmem:[#allocation3 + $0x60] sm:$0xff] }
 0x385   : > { %v9127_v21 = vld [vmem:[#allocation3 + $0x68] sm:$0xff]  ;;  %8767 = vst.msk [vmem:[#allocation3 + $0x80] sm:$0xff] %vm2351_vm0, %v13914_v35  ;;  %v6319_v45 = vsel %vm11470_vm12, %v6314_v27, %v13995_v25  ;;  %v10355_v48 = vrot.slane %v6536_v42, 9  ;;  %v6728_v20 = vrot.slane %v6537_v39, 5  ;;  %v8611_v22 = vshrl.u32 %v8210_v1, 16 }
 0x386   : > { %v8213_v14 = vld [vmem:[#allocation2 + $0x12c] sm:$0x1]  ;;  %9425 = vmatprep.mubr.bf16.mxu1 %v9127_v21  ;;  %5842 = vst.msk [vmem:[#allocation3 + $0xc0] sm:$0xff] %vm1174_vm13, %v11125_v30  ;;  %v5910_v29 = vld [vmem:[#allocation2 + $0x120] sm:$0xf]  ;;  %v6328_v12 = vrot.slane %v6327_v33, 4  ;;  %v7865_v50 = vsel %vm11432_vm11, %v10435_v17, %v7864_v58  ;;  %v6725_v35 = vsel %vm11432_vm11, %v10354_v49, %v6724_v60 }
 0x387   : > { %9426 = vmatmul.mubr.bf16.gmra.mrb[48].mxu1 %v9126_v34  ;;  %6466 = vst.msk [vmem:[#allocation3 + $0xc0] sm:$0xff] %vm1802_vm14, %v6427_v16  ;;  %v8614_v8 = vshll.u32 %v8210_v1, 16  ;;  %v5911_v15 = vld [vmem:[#allocation2 + $0x124] sm:$0x1]  ;;  %v10451_v25 = vcombine.low %v7861_v4, %v7865_v50  ;;  %v6729_v62 = vsel %vm11432_vm11, %v10355_v48, %v6728_v20  ;;  %v8613_v7 = vrot.slane %v8611_v22, 4  ;;  %v9129_v33 = vld [vmem:[#allocation3 + $0x78] sm:$0xff] }
 0x388   : > { %6834 = vst.msk [vmem:[#allocation3 + $0xc0] sm:$0xff] %vm2174_vm15, %v13970_v23  ;;  %v8620_v24 = vshll.u32 %v8211_v46, 16  ;;  %v11126_v16 = vld [vmem:[#allocation2 + $0xb0] ss:$8 sps:$4 sm:$0xff]   ;;  %v6333_v43 = vsel %vm11470_vm12, %v6328_v12, %v6332_v63  ;;  %v10371_v26 = vcombine.low %v6725_v35, %v6729_v62  ;;  %v8625_v10 = vshrl.u32 %v8212_v11, 16  ;;  %v14046_v35 = vpop.permute.xlu0 %7932 }
 0x389   : > { %7010 = vst.msk [vmem:[#allocation3 + $0xc0] sm:$0xff] %vm2351_vm0, %v13952_v32  ;;  %v8616_v0 = vrot.slane %v8614_v8, 5  ;;  %v5912_v42 = vld [vmem:[#allocation2 + $0x128] sm:$0xf]  ;;  %v5913_v39 = vld [vmem:[#allocation2 + $0x12c] sm:$0x1]  ;;  %v10322_v23 = vcombine.low %v6319_v45, %v6333_v43  ;;  %7944 = vrot.lane.b32.xlu0 %v10451_v25, %s11207_s20 }
 0x38a   : > { %v8622_v6 = vrot.slane %v8620_v24, 5  ;;  %v8628_v37 = vshll.u32 %v8212_v11, 16  ;;  %v8634_v51 = vshll.u32 %v8213_v14, 16  ;;  %v7042_v1 = vld [vmem:[#allocation2 + $0x78] sm:$0xf]  ;;  %5843 = vst.msk [vmem:[#allocation3 + $0xd8] sm:$0xff] %vm1174_vm13, %v11126_v16  ;;  %v6429_v16 = vpop.permute.xlu1 %6428 }
 0x38b   : > { %v8617_v32 = vor.u32 %v8616_v0, %v8613_v7  ;;  %v8627_v54 = vrot.slane %v8625_v10, 4  ;;  %v6335_v31 = vshrl.u32 %v5910_v29, 16  ;;  %v6338_v63 = vshll.u32 %v5910_v29, 16  ;;  %v7043_v46 = vld [vmem:[#allocation2 + $0x7c] sm:$0x1]  ;;  %6438 = vrot.lane.b32.xlu1 %v10322_v23, %s11207_s20  ;;  %6467 = vst.msk [vmem:[#allocation3 + $0xd8] sm:$0xff] %vm1802_vm14, %v6429_v16 }
 0x38c   : > { %v8630_v30 = vrot.slane %v8628_v37, 5  ;;  %v8636_v61 = vrot.slane %v8634_v51, 5  ;;  %v6344_v27 = vshll.u32 %v5911_v15, 16  ;;  %v6349_v4 = vshrl.u32 %v5912_v42, 16  ;;  %v7044_v17 = vld [vmem:[#allocation2 + $0x80] sm:$0xf] }
 0x38d   : > { %v9130_v21 = vld [vmem:[#allocation3 + $0x80] sm:$0xff]  ;;  %v8618_v11 = vrot.slane %v8617_v32, 4  ;;  %v6337_v58 = vrot.slane %v6335_v31, 4  ;;  %v6340_v49 = vrot.slane %v6338_v63, 5  ;;  %v6352_v60 = vshll.u32 %v5912_v42, 16  ;;  %6835 = vst.msk [vmem:[#allocation3 + $0xd8] sm:$0xff] %vm2174_vm15, %v6797_v28 }
 0x38e   : > { %9433 = vmatprep.mubr.bf16.mxu1 %v9130_v21  ;;  %v8631_v14 = vor.u32 %v8630_v30, %v8627_v54  ;;  %v6346_v34 = vrot.slane %v6344_v27, 5  ;;  %v6351_v45 = vrot.slane %v6349_v4, 4  ;;  %v6358_v48 = vshll.u32 %v5913_v39, 16  ;;  %v7045_v12 = vld [vmem:[#allocation2 + $0x84] sm:$0x1]  ;;  %7011 = vst.msk [vmem:[#allocation3 + $0xd8] sm:$0xff] %vm2351_vm0, %v14017_v19 }
 0x38f   : > { %9434 = vmatmul.mubr.bf16.gmra.mrb[52].mxu1 %v9129_v33  ;;  %v8623_v20 = vsel %vm11470_vm12, %v8618_v11, %v8622_v6  ;;  %v6341_v22 = vor.u32 %v6340_v49, %v6337_v58  ;;  %v6354_v29 = vrot.slane %v6352_v60, 5  ;;  %v7251_v50 = vshrl.u32 %v7042_v1, 16  ;;  %v11127_v8 = vld [vmem:[#allocation2 + $0xc0] ss:$8 sps:$4 sm:$0xff]   ;;  %6808 = vrot.lane.b32.xlu1 %v10371_v26, %s11205_s18  ;;  %v8214_v24 = vld [vmem:[#allocation2 + $0x130] sm:$0xf]  ;;  %v14063_v58 = vpop.permute.xlu0 %8108 }
 0x390   : > { %v8632_v15 = vrot.slane %v8631_v14, 4  ;;  %v6360_v25 = vrot.slane %v6358_v48, 5  ;;  %v7254_v62 = vshll.u32 %v7042_v1, 16  ;;  %v7260_v7 = vshll.u32 %v7043_v46, 16  ;;  %v8215_v39 = vld [vmem:[#allocation2 + $0x134] sm:$0x1] }
 0x391   : > { %v6342_v43 = vrot.slane %v6341_v22, 4  ;;  %v6355_v0 = vor.u32 %v6354_v29, %v6351_v45  ;;  %v7253_v10 = vrot.slane %v7251_v50, 4  ;;  %v7265_v42 = vshrl.u32 %v7044_v17, 16  ;;  %5844 = vst.msk [vmem:[#allocation3 + $0xf0] sm:$0xff] %vm1174_vm13, %v11127_v8  ;;  %v8216_v51 = vld [vmem:[#allocation2 + $0x138] sm:$0xf] }
 0x392   : > { %v8637_v23 = vsel %vm11470_vm12, %v8632_v15, %v8636_v61  ;;  %v7256_v6 = vrot.slane %v7254_v62, 5  ;;  %v7262_v26 = vrot.slane %v7260_v7, 5  ;;  %v7268_v37 = vshll.u32 %v7044_v17, 16  ;;  %v8217_v63 = vld [vmem:[#allocation2 + $0x13c] sm:$0x1]  ;;  %v14058_v4 = vpop.f32.mrb[72].mxu0 }
 0x393   : > { %v10482_v1 = vcombine.low %v8623_v20, %v8637_v23  ;;  %v6347_v32 = vsel %vm11470_vm12, %v6342_v43, %v6346_v34  ;;  %v6356_v54 = vrot.slane %v6355_v0, 4  ;;  %v7267_v31 = vrot.slane %v7265_v42, 4  ;;  %v11121_v17 = vld [vmem:[#allocation2 + $0x130] ss:$8 sps:$4 sm:$0xff]   ;;  %v14065_v60 = vpop.f32.mrb[73].mxu0 }
 0x394   : > { %v7257_v46 = vor.u32 %v7256_v6, %v7253_v10  ;;  %v7270_v30 = vrot.slane %v7268_v37, 5  ;;  %v7274_v27 = vshll.u32 %v7045_v12, 16  ;;  %v8639_v61 = vshrl.u32 %v8214_v24, 16  ;;  %v11128_v49 = vld [vmem:[#allocation2 + $0xd0] ss:$8 sps:$4 sm:$0xff]   ;;  %v14071_v43 = vpop.f32.mrb[74].mxu0 }
 0x395   : > { %8742 = vrot.lane.b32.xlu0 %v10482_v1, %s11206_s19  ;;  %v6361_v28 = vsel %vm11470_vm12, %v6356_v54, %v6360_v25  ;;  %v8642_v21 = vshll.u32 %v8214_v24, 16  ;;  %v8648_v33 = vshll.u32 %v8215_v39, 16  ;;  %v8653_v11 = vshrl.u32 %v8216_v51, 16  ;;  %v7046_v48 = vld [vmem:[#allocation2 + $0x88] sm:$0xf]  ;;  %5845 = vst.msk [vmem:[#allocation3 + $0x108] sm:$0xff] %vm1174_vm13, %v11128_v49 }
 0x396   : > { %v10323_v19 = vcombine.low %v6347_v32, %v6361_v28  ;;  %v7258_v14 = vrot.slane %v7257_v46, 4  ;;  %v7271_v34 = vor.u32 %v7270_v30, %v7267_v31  ;;  %v7276_v45 = vrot.slane %v7274_v27, 5  ;;  %v7047_v20 = vld [vmem:[#allocation2 + $0x8c] sm:$0x1]  ;;  %v7048_v50 = vld [vmem:[#allocation2 + $0x90] sm:$0xf]  ;;  %v14078_v30 = vpop.permute.xlu0 %8730 }
 0x397   : > { %v8641_v22 = vrot.slane %v8639_v61, 4  ;;  %v8644_v29 = vrot.slane %v8642_v21, 5  ;;  %v8655_v12 = vrot.slane %v8653_v11, 4  ;;  %v11122_v25 = vld [vmem:[#allocation2 + $0x128] ss:$8 sps:$4 sm:$0xff]   ;;  %v8656_v62 = vshll.u32 %v8216_v51, 16 }
 0x398   : > { %6440 = vrot.lane.b32.xlu1 %v10323_v19, %s11207_s20  ;;  %v7263_v8 = vsel %vm11470_vm12, %v7258_v14, %v7262_v26  ;;  %v7272_v15 = vrot.slane %v7271_v34, 4  ;;  %v8662_v7 = vshll.u32 %v8217_v63, 16  ;;  %v7049_v24 = vld [vmem:[#allocation2 + $0x94] sm:$0x1]  ;;  %v7050_v16 = vld [vmem:[#allocation2 + $0xa8] sm:$0xf]  ;;  %s14371_s20 = scalar_lea.hbm %s14420_s7, %s10572_s13 }
 0x399   : > { %8120 = vrot.lane.b32.xlu0 %v11121_v17, %s11205_s18  ;;  %v8645_v0 = vor.u32 %v8644_v29, %v8641_v22  ;;  %v8650_v10 = vrot.slane %v8648_v33, 5  ;;  %v7279_v42 = vshrl.u32 %v7046_v48, 16  ;;  %v7282_v39 = vshll.u32 %v7046_v48, 16  ;;  %v14074_v23 = vpop.f32.mrb[75].mxu0  ;;  %v11129_v51 = vld [vmem:[#allocation2 + $0xf0] ss:$8 sps:$4 sm:$0xff]  }
 0x39a   : > { %v7277_v6 = vsel %vm11470_vm12, %v7272_v15, %v7276_v45  ;;  %v8658_v26 = vrot.slane %v8656_v62, 5  ;;  %v7288_v37 = vshll.u32 %v7047_v20, 16  ;;  %v7293_v1 = vshrl.u32 %v7048_v50, 16  ;;  %v7051_v46 = vld [vmem:[#allocation2 + $0xac] sm:$0x1]  ;;  %5846 = vst.msk [vmem:[#allocation3 + $0x120] sm:$0xff] %vm1174_vm13, %v11129_v51  ;;  %v14085_v45 = vpop.permute.xlu1 %6974 }
 0x39b   : > { %v10394_v32 = vcombine.low %v7263_v8, %v7277_v6  ;;  %v8646_v54 = vrot.slane %v8645_v0, 4  ;;  %v7281_v31 = vrot.slane %v7279_v42, 4  ;;  %v7284_v63 = vrot.slane %v7282_v39, 5  ;;  %v7052_v21 = vld [vmem:[#allocation2 + $0xb0] sm:$0xf] }
 0x39c   : > { %6984 = vrot.lane.b32.xlu1 %v11122_v25, %s11206_s19  ;;  %v8659_v27 = vor.u32 %v8658_v26, %v8655_v12  ;;  %v8664_v61 = vrot.slane %v8662_v7, 5  ;;  %v7295_v28 = vrot.slane %v7293_v1, 4  ;;  %v7296_v17 = vshll.u32 %v7048_v50, 16  ;;  %v7053_v19 = vld [vmem:[#allocation2 + $0xb4] sm:$0x1]  ;;  %v14095_v26 = vpop.permute.xlu0 %7934 }
 0x39d   : > { %7600 = vst.msk [vmem:[#allocation3 + $0x98] sm:$0xff] %vm1174_vm13, %v10394_v32  ;;  %v8651_v33 = vsel %vm11470_vm12, %v8646_v54, %v8650_v10  ;;  %v7285_v11 = vor.u32 %v7284_v63, %v7281_v31  ;;  %v7302_v49 = vshll.u32 %v7049_v24, 16  ;;  %v7307_v14 = vshrl.u32 %v7050_v16, 16  ;;  %v7054_v34 = vld [vmem:[#allocation2 + $0xb8] sm:$0xf] }
 0x39e   : > { %7968 = vst.msk [vmem:[#allocation3 + $0x98] sm:$0xff] %vm1802_vm14, %v13869_v59  ;;  %v8660_v48 = vrot.slane %v8659_v27, 4  ;;  %v7298_v20 = vrot.slane %v7296_v17, 5  ;;  %v7310_v22 = vshll.u32 %v7050_v16, 16  ;;  %v7316_v29 = vshll.u32 %v7051_v46, 16 }
 0x39f   : > { %8144 = vst.msk [vmem:[#allocation3 + $0x98] sm:$0xff] %vm2174_vm15, %v13891_v3  ;;  %v7286_v12 = vrot.slane %v7285_v11, 4  ;;  %v7290_v50 = vrot.slane %v7288_v37, 5  ;;  %v7309_v8 = vrot.slane %v7307_v14, 4  ;;  %v7321_v15 = vshrl.u32 %v7052_v21, 16 }
 0x3a0   : > { %v7055_v25 = vld [vmem:[#allocation2 + $0xbc] sm:$0x1]  ;;  %v8665_v62 = vsel %vm11470_vm12, %v8660_v48, %v8664_v61  ;;  %v7299_v7 = vor.u32 %v7298_v20, %v7295_v28  ;;  %v7304_v24 = vrot.slane %v7302_v49, 5  ;;  %8768 = vst.msk [vmem:[#allocation3 + $0x98] sm:$0xff] %vm2351_vm0, %v13968_v2  ;;  %v7312_v59 = vrot.slane %v7310_v22, 5  ;;  %v6799_v61 = vpop.permute.xlu1 %6798 }
 0x3a1   : > { %v7056_v0 = vld [vmem:[#allocation2 + $0xc0] sm:$0xf]  ;;  %v10483_v10 = vcombine.low %v8651_v33, %v8665_v62  ;;  %v7318_v42 = vrot.slane %v7316_v29, 5  ;;  %v7323_v39 = vrot.slane %v7321_v15, 4  ;;  %v7324_v3 = vshll.u32 %v7052_v21, 16  ;;  %v9132_v29 = vld [vmem:[#allocation3 + $0x90] sm:$0xff] }
 0x3a2   : > { %v11130_v16 = vld [vmem:[#allocation2 + $0x100] ss:$8 sps:$4 sm:$0xff]   ;;  %v7057_v6 = vld [vmem:[#allocation2 + $0xc4] sm:$0x1]  ;;  %v7300_v37 = vrot.slane %v7299_v7, 4  ;;  %v7313_v1 = vor.u32 %v7312_v59, %v7309_v8  ;;  %v7330_v51 = vshll.u32 %v7053_v19, 16  ;;  %v7291_v2 = vsel %vm11470_vm12, %v7286_v12, %v7290_v50  ;;  %v14106_v59 = vpop.permute.xlu0 %8110 }
 0x3a3   : > { %v7335_v32 = vshrl.u32 %v7054_v34, 16  ;;  %v7058_v54 = vld [vmem:[#allocation2 + $0xc8] sm:$0xf]  ;;  %5847 = vst.msk [vmem:[#allocation3 + $0x138] sm:$0xff] %vm1174_vm13, %v11130_v16  ;;  %8744 = vrot.lane.b32.xlu0 %v10483_v10, %s11206_s19  ;;  %v7326_v31 = vrot.slane %v7324_v3, 5  ;;  %v7338_v63 = vshll.u32 %v7054_v34, 16 }
 0x3a4   : > { %v7349_v46 = vshrl.u32 %v7056_v0, 16  ;;  %v7059_v27 = vld [vmem:[#allocation2 + $0xcc] sm:$0x1]  ;;  %v7305_v28 = vsel %vm11470_vm12, %v7300_v37, %v7304_v24  ;;  %v7314_v17 = vrot.slane %v7313_v1, 4  ;;  %v7344_v33 = vshll.u32 %v7055_v25, 16 }
 0x3a5   : > { %v7337_v21 = vrot.slane %v7335_v32, 4  ;;  %v10395_v11 = vcombine.low %v7291_v2, %v7305_v28  ;;  %v7327_v49 = vor.u32 %v7326_v31, %v7323_v39  ;;  %v7332_v19 = vrot.slane %v7330_v51, 5  ;;  %v7060_v48 = vld [vmem:[#allocation2 + $0xd0] sm:$0xf]  ;;  %v7061_v7 = vld [vmem:[#allocation2 + $0xd4] sm:$0x1]  ;;  %v6431_v51 = vpop.permute.xlu1 %6430 }
 0x3a6   : > { %v7340_v14 = vrot.slane %v7338_v63, 5  ;;  %v11131_v20 = vld [vmem:[#allocation2 + $0x110] ss:$8 sps:$4 sm:$0xff]   ;;  %v7319_v22 = vsel %vm11470_vm12, %v7314_v17, %v7318_v42  ;;  %v7351_v34 = vrot.slane %v7349_v46, 4  ;;  %v7352_v12 = vshll.u32 %v7056_v0, 16  ;;  %6468 = vst.msk [vmem:[#allocation3 + $0xf0] sm:$0xff] %vm1802_vm14, %v6431_v51 }
 0x3a7   : > { %v7358_v50 = vshll.u32 %v7057_v6, 16  ;;  %7601 = vst.msk [vmem:[#allocation3 + $0xb0] sm:$0xff] %vm1174_vm13, %v10395_v11  ;;  %v7328_v8 = vrot.slane %v7327_v49, 4  ;;  %v9133_v15 = vld [vmem:[#allocation3 + $0x98] sm:$0xff]  ;;  %v7363_v25 = vshrl.u32 %v7058_v54, 16  ;;  %v7366_v24 = vshll.u32 %v7058_v54, 16 }
 0x3a8   : > { %v7341_v62 = vor.u32 %v7340_v14, %v7337_v21  ;;  %5848 = vst.msk [vmem:[#allocation3 + $0x150] sm:$0xff] %vm1174_vm13, %v11131_v20  ;;  %9441 = vmatprep.mubr.bf16.mxu1 %v9133_v15  ;;  %v7346_v16 = vrot.slane %v7344_v33, 5  ;;  %v7354_v10 = vrot.slane %v7352_v12, 5  ;;  %v7372_v0 = vshll.u32 %v7059_v27, 16  ;;  %v7062_v39 = vld [vmem:[#allocation2 + $0xd8] sm:$0xf] }
 0x3a9   : > { %7969 = vst.msk [vmem:[#allocation3 + $0xb0] sm:$0xff] %vm1802_vm14, %v13948_v38  ;;  %v7377_v42 = vshrl.u32 %v7060_v48, 16  ;;  %v7333_v3 = vsel %vm11470_vm12, %v7328_v8, %v7332_v19  ;;  %9442 = vmatmul.mubr.bf16.gmra.mrb[56].mxu1 %v9132_v29  ;;  %v7365_v37 = vrot.slane %v7363_v25, 4  ;;  %v7368_v1 = vrot.slane %v7366_v24, 5  ;;  %v7063_v32 = vld [vmem:[#allocation2 + $0xdc] sm:$0x1] }
 0x3aa   : > { %8145 = vst.msk [vmem:[#allocation3 + $0xb0] sm:$0xff] %vm2174_vm15, %v13936_v47  ;;  %v7342_v6 = vrot.slane %v7341_v62, 4  ;;  %v10396_v38 = vcombine.low %v7319_v22, %v7333_v3  ;;  %v7355_v54 = vor.u32 %v7354_v10, %v7351_v34  ;;  %v7360_v2 = vrot.slane %v7358_v50, 5  ;;  %v7064_v31 = vld [vmem:[#allocation2 + $0xe0] sm:$0xf]  ;;  %v14118_v63 = vpop.f32.mrb[76].mxu0  ;;  %v8733_v22 = vpop.permute.xlu0 %8732 }
 0x3ab   : > { %8769 = vst.msk [vmem:[#allocation3 + $0xb0] sm:$0xff] %vm2351_vm0, %v13987_v52  ;;  %v7369_v47 = vor.u32 %v7368_v1, %v7365_v37  ;;  %v7379_v46 = vrot.slane %v7377_v42, 4  ;;  %v7380_v27 = vshll.u32 %v7060_v48, 16  ;;  %v7386_v28 = vshll.u32 %v7061_v7, 16  ;;  %v7065_v17 = vld [vmem:[#allocation2 + $0xe4] sm:$0x1] }
 0x3ac   : > { %6836 = vst.msk [vmem:[#allocation3 + $0xf0] sm:$0xff] %vm2174_vm15, %v6799_v61  ;;  %v14121_v21 = vpop.f32.mrb[77].mxu0  ;;  %v11132_v33 = vld [vmem:[#allocation2 + $0x120] ss:$8 sps:$4 sm:$0xff]   ;;  %v7356_v52 = vrot.slane %v7355_v54, 4  ;;  %v7374_v11 = vrot.slane %v7372_v0, 5  ;;  %v7347_v61 = vsel %vm11470_vm12, %v7342_v6, %v7346_v16 }
 0x3ad   : > { %7602 = vst.msk [vmem:[#allocation3 + $0xc8] sm:$0xff] %vm1174_vm13, %v10396_v38  ;;  %v7391_v49 = vshrl.u32 %v7062_v39, 16  ;;  %v7394_v19 = vshll.u32 %v7062_v39, 16  ;;  %v14126_v14 = vpop.f32.mrb[78].mxu0  ;;  %v7370_v48 = vrot.slane %v7369_v47, 4  ;;  %v7382_v20 = vrot.slane %v7380_v27, 5 }
 0x3ae   : > { %7012 = vst.msk [vmem:[#allocation3 + $0xf0] sm:$0xff] %vm2351_vm0, %v14085_v45  ;;  %v7405_v29 = vshrl.u32 %v7064_v31, 16  ;;  %v7066_v34 = vld [vmem:[#allocation2 + $0xf8] sm:$0xf]  ;;  %v7361_v45 = vsel %vm11470_vm12, %v7356_v52, %v7360_v2  ;;  %v7400_v8 = vshll.u32 %v7063_v32, 16  ;;  %v14137_v15 = vpop.f32.mrb[79].mxu0 }
 0x3af   : > { %7970 = vst.msk [vmem:[#allocation3 + $0xc8] sm:$0xff] %vm1802_vm14, %v14009_v40  ;;  %v7393_v12 = vrot.slane %v7391_v49, 4  ;;  %v7396_v50 = vrot.slane %v7394_v19, 5  ;;  %v7068_v40 = vld [vmem:[#allocation2 + $0x100] sm:$0xf]  ;;  %v10397_v62 = vcombine.low %v7347_v61, %v7361_v45  ;;  %v7383_v7 = vor.u32 %v7382_v20, %v7379_v46  ;;  %v9135_v10 = vld [vmem:[#allocation3 + $0xa8] sm:$0xff]  ;;  %v8113_v46 = vpop.permute.xlu0 %8112 }
 0x3b0   : > { %5849 = vst.msk [vmem:[#allocation3 + $0x168] sm:$0xff] %vm1174_vm13, %v11132_v33  ;;  %v7388_v25 = vrot.slane %v7386_v28, 5  ;;  %v7407_v24 = vrot.slane %v7405_v29, 4  ;;  %v7067_v16 = vld [vmem:[#allocation2 + $0xfc] sm:$0x1]  ;;  %v7414_v42 = vshll.u32 %v7065_v17, 16  ;;  %v7375_v6 = vsel %vm11470_vm12, %v7370_v48, %v7374_v11 }
 0x3b1   : > { %8146 = vst.msk [vmem:[#allocation3 + $0xc8] sm:$0xff] %vm2174_vm15, %v14039_v36  ;;  %v7397_v0 = vor.u32 %v7396_v50, %v7393_v12  ;;  %v7408_v36 = vshll.u32 %v7064_v31, 16  ;;  %v7419_v39 = vshrl.u32 %v7066_v34, 16  ;;  %v7384_v37 = vrot.slane %v7383_v7, 4  ;;  %v7069_v1 = vld [vmem:[#allocation2 + $0x104] sm:$0x1] }
 0x3b2   : > { %8770 = vst.msk [vmem:[#allocation3 + $0xc8] sm:$0xff] %vm2351_vm0, %v14078_v30  ;;  %v9136_v3 = vld [vmem:[#allocation3 + $0xb0] sm:$0xff]  ;;  %v7422_v51 = vshll.u32 %v7066_v34, 16  ;;  %v7433_v32 = vshrl.u32 %v7068_v40, 16  ;;  %v7402_v30 = vrot.slane %v7400_v8, 5  ;;  %v7428_v2 = vshll.u32 %v7067_v16, 16 }
 0x3b3   : > { %7603 = vst.msk [vmem:[#allocation3 + $0xe0] sm:$0xff] %vm1174_vm13, %v10397_v62  ;;  %9449 = vmatprep.mubr.bf16.mxu1 %v9136_v3  ;;  %v7410_v38 = vrot.slane %v7408_v36, 5  ;;  %v7421_v54 = vrot.slane %v7419_v39, 4  ;;  %v7070_v31 = vld [vmem:[#allocation2 + $0x108] sm:$0xf]  ;;  %v7389_v47 = vsel %vm11470_vm12, %v7384_v37, %v7388_v25  ;;  %v7398_v27 = vrot.slane %v7397_v0, 4  ;;  %v7937_v3 = vpop.permute.xlu0 %7936 }
 0x3b4   : > { %7971 = vst.msk [vmem:[#allocation3 + $0xe0] sm:$0xff] %vm1802_vm14, %v14046_v35  ;;  %9450 = vmatmul.mubr.bf16.gmra.mrb[60].mxu1 %v9135_v10  ;;  %v7416_v28 = vrot.slane %v7414_v42, 5  ;;  %v7424_v17 = vrot.slane %v7422_v51, 5  ;;  %v7072_v33 = vld [vmem:[#allocation2 + $0x110] sm:$0xf]  ;;  %v10398_v52 = vcombine.low %v7375_v6, %v7389_v47  ;;  %v7435_v11 = vrot.slane %v7433_v32, 4 }
 0x3b5   : > { %8147 = vst.msk [vmem:[#allocation3 + $0xe0] sm:$0xff] %vm2174_vm15, %v14063_v58  ;;  %v7411_v35 = vor.u32 %v7410_v38, %v7407_v24  ;;  %v7436_v49 = vshll.u32 %v7068_v40, 16  ;;  %v7442_v61 = vshll.u32 %v7069_v1, 16  ;;  %v7071_v48 = vld [vmem:[#allocation2 + $0x10c] sm:$0x1]  ;;  %v7447_v20 = vshrl.u32 %v7070_v31, 16 }
 0x3b6   : > { %8771 = vst.msk [vmem:[#allocation3 + $0xe0] sm:$0xff] %vm2351_vm0, %v8733_v22  ;;  %v7425_v19 = vor.u32 %v7424_v17, %v7421_v54  ;;  %v7450_v29 = vshll.u32 %v7070_v31, 16  ;;  %v7430_v45 = vrot.slane %v7428_v2, 5  ;;  %v7073_v50 = vld [vmem:[#allocation2 + $0x114] sm:$0x1]  ;;  %v7461_v8 = vshrl.u32 %v7072_v33, 16 }
 0x3b7   : > { %7604 = vst.msk [vmem:[#allocation3 + $0xf8] sm:$0xff] %vm1174_vm13, %v10398_v52  ;;  %v7412_v34 = vrot.slane %v7411_v35, 4  ;;  %v7438_v12 = vrot.slane %v7436_v49, 5  ;;  %v7403_v22 = vsel %vm11470_vm12, %v7398_v27, %v7402_v30  ;;  %v7449_v62 = vrot.slane %v7447_v20, 4  ;;  %v7074_v25 = vld [vmem:[#allocation2 + $0x118] sm:$0xf] }
 0x3b8   : > { %7972 = vst.msk [vmem:[#allocation3 + $0xf8] sm:$0xff] %vm1802_vm14, %v14095_v26  ;;  %v7426_v40 = vrot.slane %v7425_v19, 4  ;;  %v7452_v7 = vrot.slane %v7450_v29, 5  ;;  %v7444_v10 = vrot.slane %v7442_v61, 5  ;;  %v7456_v0 = vshll.u32 %v7071_v48, 16  ;;  %v14160_v26 = vpop.permute.xlu1 %6976  ;;  %v9138_v51 = vld [vmem:[#allocation3 + $0xc0] sm:$0xff] }
 0x3b9   : > { %v9139_v58 = vld [vmem:[#allocation3 + $0xc8] sm:$0xff]  ;;  %8148 = vst.msk [vmem:[#allocation3 + $0xf8] sm:$0xff] %vm2174_vm15, %v14106_v59  ;;  %v7417_v24 = vsel %vm11470_vm12, %v7412_v34, %v7416_v28  ;;  %v7439_v16 = vor.u32 %v7438_v12, %v7435_v11  ;;  %v7075_v36 = vld [vmem:[#allocation2 + $0x11c] sm:$0x1]  ;;  %v7076_v42 = vld [vmem:[#allocation2 + $0x120] sm:$0xf] }
 0x3ba   : > { %9457 = vmatprep.mubr.bf16.mxu1 %v9139_v58  ;;  %v10399_v39 = vcombine.low %v7403_v22, %v7417_v24  ;;  %v7453_v6 = vor.u32 %v7452_v7, %v7449_v62  ;;  %v7463_v37 = vrot.slane %v7461_v8, 4  ;;  %v7464_v1 = vshll.u32 %v7072_v33, 16  ;;  %v7077_v30 = vld [vmem:[#allocation2 + $0x124] sm:$0x1]  ;;  %v7078_v11 = vld [vmem:[#allocation2 + $0x128] sm:$0xf] }
 0x3bb   : > { %v7431_v32 = vsel %vm11470_vm12, %v7426_v40, %v7430_v45  ;;  %v7440_v59 = vrot.slane %v7439_v16, 4  ;;  %v7475_v38 = vshrl.u32 %v7074_v25, 16  ;;  %v7478_v54 = vshll.u32 %v7074_v25, 16  ;;  %v7080_v20 = vld [vmem:[#allocation2 + $0x130] sm:$0xf] }
 0x3bc   : > { %9458 = vmatmul.mubr.bf16.gmra.mrb[64].mxu1 %v9138_v51  ;;  %7605 = vst.msk [vmem:[#allocation3 + $0x110] sm:$0xff] %vm1174_vm13, %v10399_v39  ;;  %v7466_v31 = vrot.slane %v7464_v1, 5  ;;  %v7470_v47 = vshll.u32 %v7073_v50, 16  ;;  %v7484_v27 = vshll.u32 %v7075_v36, 16  ;;  %v7489_v28 = vshrl.u32 %v7076_v42, 16  ;;  %v6801_v12 = vpop.permute.xlu1 %6800 }
 0x3bd   : > { %v9142_v2 = vld [vmem:[#allocation3 + $0xe0] sm:$0xff]  ;;  %7973 = vst.msk [vmem:[#allocation3 + $0x110] sm:$0xff] %vm1802_vm14, %v7937_v3  ;;  %v7445_v17 = vsel %vm11470_vm12, %v7440_v59, %v7444_v10  ;;  %v7458_v33 = vrot.slane %v7456_v0, 5  ;;  %v7477_v52 = vrot.slane %v7475_v38, 4  ;;  %v7480_v35 = vrot.slane %v7478_v54, 5  ;;  %v8735_v10 = vpop.permute.xlu0 %8734 }
 0x3be   : > { %9465 = vmatprep.mubr.bf16.mxu1 %v9142_v2  ;;  %8149 = vst.msk [vmem:[#allocation3 + $0x110] sm:$0xff] %vm2174_vm15, %v8113_v46  ;;  %v10400_v49 = vcombine.low %v7431_v32, %v7445_v17  ;;  %v7454_v19 = vrot.slane %v7453_v6, 4  ;;  %v7467_v61 = vor.u32 %v7466_v31, %v7463_v37  ;;  %v7486_v48 = vrot.slane %v7484_v27, 5  ;;  %v8834_v62 = vld [vmem:[#allocation2 + $0x120] sm:$0xe]  ;;  %v9141_v37 = vld [vmem:[#allocation3 + $0xd8] sm:$0xff] }
 0x3bf   : > { %v7481_v29 = vor.u32 %v7480_v35, %v7477_v52  ;;  %v7491_v58 = vrot.slane %v7489_v28, 4  ;;  %v7492_v34 = vshll.u32 %v7076_v42, 16  ;;  %v7498_v45 = vshll.u32 %v7077_v30, 16  ;;  %v7079_v46 = vld [vmem:[#allocation2 + $0x12c] sm:$0x1]  ;;  %8772 = vst.msk [vmem:[#allocation3 + $0xf8] sm:$0xff] %vm2351_vm0, %v8735_v10 }
 0x3c0   : > { %7606 = vst.msk [vmem:[#allocation3 + $0x128] sm:$0xff] %vm1174_vm13, %v10400_v49  ;;  %v7468_v50 = vrot.slane %v7467_v61, 4  ;;  %v7472_v8 = vrot.slane %v7470_v47, 5  ;;  %v7503_v22 = vshrl.u32 %v7078_v11, 16  ;;  %v7506_v40 = vshll.u32 %v7078_v11, 16  ;;  %v6433_v11 = vpop.permute.xlu1 %6432 }
 0x3c1   : > { %v7482_v7 = vrot.slane %v7481_v29, 4  ;;  %v7494_v25 = vrot.slane %v7492_v34, 5  ;;  %v7517_v24 = vshrl.u32 %v7080_v20, 16  ;;  %v8835_v16 = vld [vmem:[#allocation2 + $0x124] sm:$0x1]  ;;  %v7459_v0 = vsel %vm11470_vm12, %v7454_v19, %v7458_v33  ;;  %6469 = vst.msk [vmem:[#allocation3 + $0x108] sm:$0xff] %vm1802_vm14, %v6433_v11 }
 0x3c2   : > { %v7473_v36 = vsel %vm11470_vm12, %v7468_v50, %v7472_v8  ;;  %v7505_v42 = vrot.slane %v7503_v22, 4  ;;  %v7508_v39 = vrot.slane %v7506_v40, 5  ;;  %v8836_v3 = vld [vmem:[#allocation2 + $0x128] sm:$0xe]  ;;  %v8837_v6 = vld [vmem:[#allocation2 + $0x12c] sm:$0x1] }
 0x3c3   : > { %v10401_v1 = vcombine.low %v7459_v0, %v7473_v36  ;;  %v7487_v51 = vsel %vm11470_vm12, %v7482_v7, %v7486_v48  ;;  %v7495_v32 = vor.u32 %v7494_v25, %v7491_v58  ;;  %v7500_v59 = vrot.slane %v7498_v45, 5  ;;  %v7081_v30 = vld [vmem:[#allocation2 + $0x134] sm:$0x1]  ;;  %v8838_v38 = vld [vmem:[#allocation2 + $0x130] sm:$0xe]  ;;  %6837 = vst.msk [vmem:[#allocation3 + $0x108] sm:$0xff] %vm2174_vm15, %v6801_v12 }
 0x3c4   : > { %9466 = vmatmul.mubr.bf16.gmra.mrb[68].mxu1 %v9141_v37  ;;  %v7509_v54 = vor.u32 %v7508_v39, %v7505_v42  ;;  %v7519_v2 = vrot.slane %v7517_v24, 4  ;;  %v7520_v31 = vshll.u32 %v7080_v20, 16  ;;  %v10512_v47 = vrot.slane %v8834_v62, 9  ;;  %v8839_v27 = vld [vmem:[#allocation2 + $0x134] sm:$0x1]  ;;  %7013 = vst.msk [vmem:[#allocation3 + $0x108] sm:$0xff] %vm2351_vm0, %v14160_v26  ;;  %v6979_v24 = vpop.permute.xlu1 %6978 }
 0x3c5   : > { %7607 = vst.msk [vmem:[#allocation3 + $0x140] sm:$0xff] %vm1174_vm13, %v10401_v1  ;;  %v7496_v28 = vrot.slane %v7495_v32, 4  ;;  %v9020_v17 = vrot.slane %v8835_v16, 5  ;;  %v10513_v33 = vrot.slane %v8836_v3, 9  ;;  %v9024_v52 = vrot.slane %v8837_v6, 5  ;;  %v9144_v36 = vld [vmem:[#allocation3 + $0xf0] sm:$0xff] }
 0x3c6   : > { %v8840_v35 = vld [vmem:[#allocation2 + $0x138] sm:$0xe]  ;;  %v7512_v49 = vshll.u32 %v7079_v46, 16  ;;  %v7522_v19 = vrot.slane %v7520_v31, 5  ;;  %v7526_v61 = vshll.u32 %v7081_v30, 16  ;;  %v10514_v29 = vrot.slane %v8838_v38, 9  ;;  %v8737_v46 = vpop.permute.xlu0 %8736 }
 0x3c7   : > { %v8841_v48 = vld [vmem:[#allocation2 + $0x13c] sm:$0x1]  ;;  %v7501_v20 = vsel %vm11470_vm12, %v7496_v28, %v7500_v59  ;;  %v9021_v58 = vsel %vm11432_vm11, %v10512_v47, %v9020_v17  ;;  %v9025_v34 = vsel %vm11432_vm11, %v10513_v33, %v9024_v52  ;;  %v9028_v45 = vrot.slane %v8839_v27, 5  ;;  %8773 = vst.msk [vmem:[#allocation3 + $0x110] sm:$0xff] %vm2351_vm0, %v8737_v46 }
 0x3c8   : > { %v10402_v50 = vcombine.low %v7487_v51, %v7501_v20  ;;  %v7510_v8 = vrot.slane %v7509_v54, 4  ;;  %v7523_v22 = vor.u32 %v7522_v19, %v7519_v2  ;;  %v10530_v40 = vcombine.low %v9021_v58, %v9025_v34  ;;  %v9145_v16 = vld [vmem:[#allocation3 + $0xf8] sm:$0xff]  ;;  %v6803_v1 = vpop.permute.xlu1 %6802 }
 0x3c9   : > { %v9029_v62 = vsel %vm11432_vm11, %v10514_v29, %v9028_v45  ;;  %v10515_v7 = vrot.slane %v8840_v35, 9  ;;  %v9032_v25 = vrot.slane %v8841_v48, 5  ;;  %v7514_v10 = vrot.slane %v7512_v49, 5  ;;  %9473 = vmatprep.mubr.bf16.mxu1 %v9145_v16  ;;  %v14230_v45 = vld [vmem:[%s14417_s4] ss:$0 sm:$0xff] }
 0x3ca   : > { %7608 = vst.msk [vmem:[#allocation3 + $0x158] sm:$0xff] %vm1174_vm13, %v10402_v50  ;;  %v7524_v0 = vrot.slane %v7523_v22, 4  ;;  %v7528_v12 = vrot.slane %v7526_v61, 5  ;;  %9112 = vst.msk [vmem:[#allocation3 + $0x160] sm:$0xff] %vm1174_vm13, %v10530_v40  ;;  %v7939_v37 = vpop.permute.xlu0 %7938  ;;  %vm9827_vm2 = vcmask 1041409   ;;  %vm9901_vm6 = vcmask 392192  }
 0x3cb   : > { %v9033_v26 = vsel %vm11432_vm11, %v10515_v7, %v9032_v25  ;;  %v7515_v42 = vsel %vm11470_vm12, %v7510_v8, %v7514_v10  ;;  %7974 = vst.msk [vmem:[#allocation3 + $0x128] sm:$0xff] %vm1802_vm14, %v7939_v37  ;;  %v9147_v32 = vld [vmem:[#allocation3 + $0x108] sm:$0xff] }
 0x3cc   : > { %9474 = vmatmul.mubr.bf16.gmra.mrb[72].mxu1 %v9144_v36  ;;  %v7529_v39 = vsel %vm11470_vm12, %v7524_v0, %v7528_v12  ;;  %v10531_v3 = vcombine.low %v9029_v62, %v9033_v26 }
 0x3cd   : > { %v10403_v6 = vcombine.low %v7515_v42, %v7529_v39 }
 0x3ce   : > { %9113 = vst.msk [vmem:[#allocation3 + $0x178] sm:$0xff] %vm1174_vm13, %v10531_v3  ;;  %v8115_v51 = vpop.permute.xlu0 %8114  ;;  %v9148_v53 = vld [vmem:[#allocation3 + $0x110] sm:$0xff] }
 0x3cf   : > { %7609 = vst.msk [vmem:[#allocation3 + $0x170] sm:$0xff] %vm1174_vm13, %v10403_v6  ;;  %9481 = vmatprep.mubr.bf16.mxu1 %v9148_v53  ;;  %v6435_v59 = vpop.permute.xlu1 %6434 }
 0x3d0   : > { %8150 = vst.msk [vmem:[#allocation3 + $0x128] sm:$0xff] %vm2174_vm15, %v8115_v51 }
 0x3d1   : > { %6470 = vst.msk [vmem:[#allocation3 + $0x120] sm:$0xff] %vm1802_vm14, %v6435_v59 }
 0x3d2   : > { %v7941_v44 = vpop.permute.xlu0 %7940  ;;  %6838 = vst.msk [vmem:[#allocation3 + $0x120] sm:$0xff] %vm2174_vm15, %v6803_v1 }
 0x3d3   : > { %7975 = vst.msk [vmem:[#allocation3 + $0x140] sm:$0xff] %vm1802_vm14, %v7941_v44  ;;  %v6981_v38 = vpop.permute.xlu1 %6980 }
 0x3d4   : > { %9482 = vmatmul.mubr.bf16.gmra.mrb[76].mxu1 %v9147_v32  ;;  %7014 = vst.msk [vmem:[#allocation3 + $0x120] sm:$0xff] %vm2351_vm0, %v6979_v24 }
 0x3d6   : > { %v8117_v30 = vpop.permute.xlu0 %8116 }
 0x3d7   : > { %8151 = vst.msk [vmem:[#allocation3 + $0x140] sm:$0xff] %vm2174_vm15, %v8117_v30  ;;  %v6805_v54 = vpop.permute.xlu1 %6804 }
 0x3db   : > { %v9150_v33 = vld [vmem:[#allocation3 + $0x120] sm:$0xff] }
 0x3df   : > { %v8739_v2 = vpop.permute.xlu0 %8738 }
 0x3e0   : > { %8774 = vst.msk [vmem:[#allocation3 + $0x128] sm:$0xff] %vm2351_vm0, %v8739_v2  ;;  %v14213_v27 = vpop.f32.mrb[80].mxu0 }
 0x3e1   : > { %v14215_v17 = vpop.f32.mrb[81].mxu0 }
 0x3e2   : > { %v14217_v52 = vpop.f32.mrb[82].mxu0 }
 0x3e3   : > { %v14219_v11 = vpop.f32.mrb[83].mxu0 }
 0x3e4   : > { %v6437_v31 = vpop.permute.xlu1 %6436 }
 0x3e5   : > { %6471 = vst.msk [vmem:[#allocation3 + $0x138] sm:$0xff] %vm1802_vm14, %v6437_v31 }
 0x3e6   : > { %6839 = vst.msk [vmem:[#allocation3 + $0x138] sm:$0xff] %vm2174_vm15, %v6805_v54 }
 0x3e7   : > { %v7943_v47 = vpop.permute.xlu0 %7942  ;;  %7015 = vst.msk [vmem:[#allocation3 + $0x138] sm:$0xff] %vm2351_vm0, %v6981_v38  ;;  %v9151_v28 = vld [vmem:[#allocation3 + $0x128] sm:$0xff] }
 0x3e8   : > { %7976 = vst.msk [vmem:[#allocation3 + $0x158] sm:$0xff] %vm1802_vm14, %v7943_v47  ;;  %9489 = vmatprep.mubr.bf16.mxu1 %v9151_v28  ;;  %v6983_v49 = vpop.permute.xlu1 %6982 }
 0x3e9   : > { %9490 = vmatmul.mubr.bf16.gmra.mrb[80].mxu1 %v9150_v33 }
 0x3eb   : > { %v8119_v35 = vpop.permute.xlu0 %8118 }
 0x3ec   : > { %8152 = vst.msk [vmem:[#allocation3 + $0x158] sm:$0xff] %vm2174_vm15, %v8119_v35  ;;  %v6807_v19 = vpop.permute.xlu1 %6806 }
 0x3ee   : > { %v9153_v34 = vld [vmem:[#allocation3 + $0x138] sm:$0xff] }
 0x3f5   : > { %v8741_v61 = vpop.permute.xlu0 %8740 }
 0x3f6   : > { %8775 = vst.msk [vmem:[#allocation3 + $0x140] sm:$0xff] %vm2351_vm0, %v8741_v61 }
 0x3f9   : > { %v10754_v58 = vpop.f32.mrb[32].mxu1 }
 0x3fa   : > { %v10755_v50 = vpop.f32.mrb[33].mxu1 }
 0x3fb   : > { %v7945_v48 = vpop.permute.xlu0 %7944  ;;  %v10756_v8 = vadd.f32 %v10755_v50, %v10754_v58  ;;  %v10757_v22 = vpop.f32.mrb[34].mxu1 }
 0x3fc   : > { %7977 = vst.msk [vmem:[#allocation3 + $0x170] sm:$0xff] %vm1802_vm14, %v7945_v48  ;;  %v10758_v62 = vpop.f32.mrb[35].mxu1 }
 0x3fd   : > { %v6439_v29 = vpop.permute.xlu1 %6438  ;;  %v9154_v20 = vld [vmem:[#allocation3 + $0x140] sm:$0xff]  ;;  %v14232_v40 = vpop.f32.mrb[84].mxu0  ;;  %v9396_v46 = vadd.f32 %v10756_v8, %v14230_v45  ;;  %v10759_v24 = vadd.f32 %v10758_v62, %v10757_v22 }
 0x3fe   : > { %6472 = vst.msk [vmem:[#allocation3 + $0x150] sm:$0xff] %vm1802_vm14, %v6439_v29  ;;  %9497 = vmatprep.mubr.bf16.mxu1 %v9154_v20  ;;  %v14234_v25 = vpop.f32.mrb[85].mxu0 }
 0x3ff   : > { %6840 = vst.msk [vmem:[#allocation3 + $0x150] sm:$0xff] %vm2174_vm15, %v6807_v19  ;;  %9498 = vmatmul.mubr.bf16.gmra.mrb[84].mxu1 %v9153_v34  ;;  %v14237_v16 = vpop.f32.mrb[86].mxu0  ;;  %v9557_v0 = vadd.f32 %v13839_v5, %v9396_v46  ;;  %v9399_v12 = vadd.f32 %v10759_v24, %v14230_v45  ;;  %v9161_v34 = vld [vmem:[#allocation3 + $0x178] sm:$0xff] }
 0x400   : > { %7016 = vst.msk [vmem:[#allocation3 + $0x150] sm:$0xff] %vm2351_vm0, %v6983_v49  ;;  %v14239_v10 = vpop.f32.mrb[87].mxu0 }
 0x401   : > { %v6809_v7 = vpop.permute.xlu1 %6808  ;;  %v9683_v26 = vmax.f32 %v9557_v0, 0.0  ;;  %v9560_v42 = vadd.f32 %v13866_v55, %v9399_v12 }
 0x402   : > { %v10760_v37 = vpop.f32.mrb[36].mxu1 }
 0x403   : > { %v9684_v3 = vmax.f32 %v9560_v42, 0.0  ;;  %v9715_v5 = vsel %vm1174_vm13, %v9683_v26, 0.0  ;;  %v10761_v51 = vpop.f32.mrb[37].mxu1 }
 0x404   : > { %v10762_v32 = vadd.f32 %v10761_v51, %v10760_v37  ;;  %v10763_v59 = vpop.f32.mrb[38].mxu1 }
 0x405   : > { %v9716_v1 = vsel %vm1174_vm13, %v9684_v3, 0.0  ;;  %v10764_v55 = vpop.f32.mrb[39].mxu1 }
 0x406   : > { %v9717_v53 = vadd.f32 %v9716_v1, %v9715_v5  ;;  %v9404_v38 = vadd.f32 %v10762_v32, %v14230_v45  ;;  %v10765_v54 = vadd.f32 %v10764_v55, %v10763_v59 }
 0x407   : > { %v8743_v36 = vpop.permute.xlu0 %8742  ;;  %v9156_v2 = vld [vmem:[#allocation3 + $0x150] sm:$0xff] }
 0x408   : > { %8776 = vst.msk [vmem:[#allocation3 + $0x158] sm:$0xff] %vm2351_vm0, %v8743_v36  ;;  %v9565_v31 = vadd.f32 %v13832_v56, %v9404_v38  ;;  %v9407_v47 = vadd.f32 %v10765_v54, %v14230_v45  ;;  %v9158_v56 = vld [vmem:[#allocation3 + $0x160] sm:$0xff] }
 0x40a   : > { %v6441_v39 = vpop.permute.xlu1 %6440  ;;  %v9685_v28 = vmax.f32 %v9565_v31, 0.0  ;;  %v9568_v33 = vadd.f32 %v13860_v41, %v9407_v47 }
 0x40b   : > { %6473 = vst.msk [vmem:[#allocation3 + $0x168] sm:$0xff] %vm1802_vm14, %v6441_v39  ;;  %v8121_v6 = vpop.permute.xlu0 %8120 }
 0x40c   : > { %6841 = vst.msk [vmem:[#allocation3 + $0x168] sm:$0xff] %vm2174_vm15, %v6809_v7  ;;  %8153 = vst.msk [vmem:[#allocation3 + $0x170] sm:$0xff] %vm2174_vm15, %v8121_v6  ;;  %v9718_v49 = vsel %vm1174_vm13, %v9685_v28, 0.0  ;;  %v9686_v19 = vmax.f32 %v9568_v33, 0.0 }
 0x40d   : > { %v9719_v61 = vadd.f32 %v9718_v49, %v9717_v53 }
 0x40e   : > { %v6985_v44 = vpop.permute.xlu1 %6984  ;;  %v9720_v48 = vsel %vm1174_vm13, %v9686_v19, 0.0 }
 0x40f   : > { %7017 = vst.msk [vmem:[#allocation3 + $0x168] sm:$0xff] %vm2351_vm0, %v6985_v44  ;;  %v9157_v30 = vld [vmem:[#allocation3 + $0x158] sm:$0xff]  ;;  %v9721_v29 = vadd.f32 %v9720_v48, %v9719_v61 }
 0x410   : > { %9505 = vmatprep.mubr.bf16.mxu1 %v9157_v30 }
 0x411   : > { %9506 = vmatmul.mubr.bf16.gmra.mrb[88].mxu1 %v9156_v2 }
 0x415   : > { %v8745_v35 = vpop.permute.xlu0 %8744 }
 0x416   : > { %8777 = vst.msk [vmem:[#allocation3 + $0x170] sm:$0xff] %vm2351_vm0, %v8745_v35  ;;  %v9159_v58 = vld [vmem:[#allocation3 + $0x168] sm:$0xff] }
 0x41d   : > { %v9160_v20 = vld [vmem:[#allocation3 + $0x170] sm:$0xff] }
 0x41e   : > { %9513 = vmatprep.mubr.bf16.mxu1 %v9160_v20 }
 0x41f   : > { %9514 = vmatmul.mubr.bf16.gmra.mrb[92].mxu1 %v9159_v58 }
 0x420   : > { %10939 = vmatprep.mubr.msk.bf16.mxu1 %vm1174_vm13, %v9158_v56 }
 0x422   : > { %v10766_v41 = vpop.f32.mrb[40].mxu1 }
 0x423   : > { %v10767_v50 = vpop.f32.mrb[41].mxu1 }
 0x424   : > { %v10768_v8 = vadd.f32 %v10767_v50, %v10766_v41  ;;  %v10769_v22 = vpop.f32.mrb[42].mxu1 }
 0x425   : > { %v10770_v62 = vpop.f32.mrb[43].mxu1 }
 0x426   : > { %v9412_v7 = vadd.f32 %v10768_v8, %v14230_v45  ;;  %v10771_v46 = vadd.f32 %v10770_v62, %v10769_v22 }
 0x427   : > { %10940 = vmatmul.mubr.msk.bf16.vlgmr.msra.gmra.mrb[96].mxu1 %vm1174_vm13, %v9161_v34 }
 0x428   : > { %v9573_v24 = vadd.f32 %v13880_v57, %v9412_v7  ;;  %v9415_v0 = vadd.f32 %v10771_v46, %v14230_v45 }
 0x42a   : > { %v9687_v12 = vmax.f32 %v9573_v24, 0.0  ;;  %v9576_v36 = vadd.f32 %v13893_v13, %v9415_v0 }
 0x42c   : > { %v9722_v26 = vsel %vm1174_vm13, %v9687_v12, 0.0  ;;  %v9688_v42 = vmax.f32 %v9576_v36, 0.0 }
 0x42d   : > { %v9723_v39 = vadd.f32 %v9722_v26, %v9721_v29 }
 0x42e   : > { %v9724_v3 = vsel %vm1174_vm13, %v9688_v42, 0.0 }
 0x42f   : > { %v9725_v6 = vadd.f32 %v9724_v3, %v9723_v39 }
 0x440   : > { %v14266_v37 = vpop.f32.mrb[88].mxu0 }
 0x441   : > { %v14268_v5 = vpop.f32.mrb[89].mxu0 }
 0x442   : > { %v14270_v1 = vpop.f32.mrb[90].mxu0  ;;  %v10772_v51 = vpop.f32.mrb[44].mxu1 }
 0x443   : > { %v14272_v57 = vpop.f32.mrb[91].mxu0  ;;  %v10773_v53 = vpop.f32.mrb[45].mxu1 }
 0x444   : > { %v10774_v32 = vadd.f32 %v10773_v53, %v10772_v51  ;;  %v10775_v59 = vpop.f32.mrb[46].mxu1 }
 0x445   : > { %v10776_v13 = vpop.f32.mrb[47].mxu1 }
 0x446   : > { %v9420_v44 = vadd.f32 %v10774_v32, %v14230_v45  ;;  %v10777_v55 = vadd.f32 %v10776_v13, %v10775_v59 }
 0x448   : > { %v9581_v30 = vadd.f32 %v13873_v18, %v9420_v44  ;;  %v9423_v38 = vadd.f32 %v10777_v55, %v14230_v45 }
 0x44a   : > { %v9689_v54 = vmax.f32 %v9581_v30, 0.0  ;;  %v9584_v2 = vadd.f32 %v13884_v9, %v9423_v38 }
 0x44c   : > { %v9726_v31 = vsel %vm1174_vm13, %v9689_v54, 0.0  ;;  %v9690_v47 = vmax.f32 %v9584_v2, 0.0 }
 0x44d   : > { %v9727_v28 = vadd.f32 %v9726_v31, %v9725_v6 }
 0x44e   : > { %v9728_v33 = vsel %vm1174_vm13, %v9690_v47, 0.0 }
 0x44f   : > { %v9729_v35 = vadd.f32 %v9728_v33, %v9727_v28 }
 0x451   : > { %v9730_v31 = vrot.slane %v9729_v35, 4 }
 0x45a   : > { %v10778_v49 = vpop.f32.mrb[48].mxu1 }
 0x45b   : > { %v10779_v19 = vpop.f32.mrb[49].mxu1 }
 0x45c   : > { %v10780_v61 = vadd.f32 %v10779_v19, %v10778_v49  ;;  %v10781_v48 = vpop.f32.mrb[50].mxu1 }
 0x45d   : > { %v10782_v29 = vpop.f32.mrb[51].mxu1 }
 0x45e   : > { %v9428_v20 = vadd.f32 %v10780_v61, %v14230_v45  ;;  %v10783_v18 = vadd.f32 %v10782_v29, %v10781_v48 }
 0x460   : > { %v9589_v58 = vadd.f32 %v14065_v60, %v9428_v20  ;;  %v9431_v56 = vadd.f32 %v10783_v18, %v14230_v45  ;;  %v9731_v20 = vadd.f32 %v9730_v31, %v9729_v35 }
 0x462   : > { %v9691_v9 = vmax.f32 %v9589_v58, 0.0  ;;  %v9592_v34 = vadd.f32 %v14074_v23, %v9431_v56  ;;  %v10784_v41 = vpop.f32.mrb[52].mxu1 }
 0x463   : > { %v10785_v50 = vpop.f32.mrb[53].mxu1 }
 0x464   : > { %v9692_v8 = vmax.f32 %v9592_v34, 0.0  ;;  %v10786_v22 = vadd.f32 %v10785_v50, %v10784_v41  ;;  %v10787_v62 = vpop.f32.mrb[54].mxu1  ;;  %v9736_v46 = vsel %vm1174_vm13, %v9691_v9, 0.0  ;;  %v9732_v34 = vrot.slane %v9731_v20, 2  ;;  %v11133_v41 = vld [vmem:[%s14418_s5] sm:$0xff]  }
 0x465   : > { %v10788_v7 = vpop.f32.mrb[55].mxu1 }
 0x466   : > { %v9737_v24 = vsel %vm1174_vm13, %v9692_v8, 0.0  ;;  %v9436_v0 = vadd.f32 %v10786_v22, %v14230_v45  ;;  %v10789_v12 = vadd.f32 %v10788_v7, %v10787_v62  ;;  %v11208_v62 = vmov 0.0  }
 0x467   : > { %v9738_v36 = vadd.f32 %v9737_v24, %v9736_v46  ;;  %10943 = vmatprep.subr.bf16.mxu1 %v11208_v62  ;;  %10947 = vmatprep.mubr.msk.bf16.mxu1 %vm11209_vm1, %v11208_v62 }
 0x468   : > { %v9597_v60 = vadd.f32 %v14058_v4, %v9436_v0  ;;  %v9439_v26 = vadd.f32 %v10789_v12, %v14230_v45  ;;  %10944 = vmatpush3.bf16.msra.mxu1 %v11133_v41  ;;  %v9733_v0 = vadd.f32 %v9732_v34, %v9731_v20 }
 0x469   : > { %10945 = vmatprep.subr.bf16.mxu1 %v11208_v62 }
 0x46a   : > { %v9693_v42 = vmax.f32 %v9597_v60, 0.0  ;;  %v9600_v23 = vadd.f32 %v14071_v43, %v9439_v26 }
 0x46c   : > { %v9739_v39 = vsel %vm1174_vm13, %v9693_v42, 0.0  ;;  %v9694_v3 = vmax.f32 %v9600_v23, 0.0 }
 0x46d   : > { %v9740_v6 = vadd.f32 %v9739_v39, %v9738_v36 }
 0x46e   : > { %v9741_v51 = vsel %vm1174_vm13, %v9694_v3, 0.0  ;;  %v9734_v3 = vrot.slane %v9733_v0, 1 }
 0x46f   : > { %v9742_v53 = vadd.f32 %v9741_v51, %v9740_v6 }
 0x47c   : > { %v10790_v32 = vpop.f32.mrb[56].mxu1 }
 0x47d   : > { %v10791_v59 = vpop.f32.mrb[57].mxu1 }
 0x47e   : > { %v10792_v13 = vadd.f32 %v10791_v59, %v10790_v32  ;;  %v10793_v44 = vpop.f32.mrb[58].mxu1 }
 0x47f   : > { %v10794_v55 = vpop.f32.mrb[59].mxu1 }
 0x480   : > { %v9444_v30 = vadd.f32 %v10792_v13, %v14230_v45  ;;  %v10795_v4 = vadd.f32 %v10794_v55, %v10793_v44 }
 0x482   : > { %v9605_v38 = vadd.f32 %v14121_v21, %v9444_v30  ;;  %v9447_v54 = vadd.f32 %v10795_v4, %v14230_v45 }
 0x484   : > { %v9695_v43 = vmax.f32 %v9605_v38, 0.0  ;;  %v9608_v2 = vadd.f32 %v14137_v15, %v9447_v54  ;;  %v9735_v54 = vadd.f32 %v9734_v3, %v9733_v0 }
 0x486   : > { %v9743_v47 = vsel %vm1174_vm13, %v9695_v43, 0.0  ;;  %v9696_v28 = vmax.f32 %v9608_v2, 0.0 }
 0x487   : > { %v10796_v33 = vpop.f32.mrb[60].mxu1  ;;  %v9744_v49 = vadd.f32 %v9743_v47, %v9742_v53 }
 0x488   : > { %v10797_v19 = vpop.f32.mrb[61].mxu1  ;;  %v9745_v61 = vsel %vm1174_vm13, %v9696_v28, 0.0 }
 0x489   : > { %v10798_v48 = vadd.f32 %v10797_v19, %v10796_v33  ;;  %v10799_v29 = vpop.f32.mrb[62].mxu1  ;;  %v9746_v18 = vadd.f32 %v9745_v61, %v9744_v49  ;;  %v11134_v49 = vld [vmem:[%s14418_s5 + $0x8] sm:$0xff]   ;;  %v9800_v61 = vmul.f32 0.015625, %v9735_v54 }
 0x48a   : > { %v10800_v58 = vpop.f32.mrb[63].mxu1  ;;  %10946 = vmatpush3.bf16.msra.mxu1 %v11134_v49 }
 0x48b   : > { %v9452_v21 = vadd.f32 %v10798_v48, %v14230_v45  ;;  %v10801_v56 = vadd.f32 %v10800_v58, %v10799_v29 }
 0x48d   : > { %v9613_v9 = vadd.f32 %v14118_v63, %v9452_v21  ;;  %v9455_v15 = vadd.f32 %v10801_v56, %v14230_v45 }
 0x48f   : > { %v9697_v50 = vmax.f32 %v9613_v9, 0.0  ;;  %v9616_v8 = vadd.f32 %v14126_v14, %v9455_v15  ;;  %v10802_v22 = vpop.f32.mrb[64].mxu1 }
 0x490   : > { %v10803_v35 = vpop.f32.mrb[65].mxu1 }
 0x491   : > { %v9747_v7 = vsel %vm1174_vm13, %v9697_v50, 0.0  ;;  %v9698_v46 = vmax.f32 %v9616_v8, 0.0  ;;  %v10804_v24 = vadd.f32 %v10803_v35, %v10802_v22  ;;  %v10805_v63 = vpop.f32.mrb[66].mxu1  ;;  %v9804_v50 = vpack.c.bf16 %v9800_v61, %v9800_v61 }
 0x492   : > { %v9748_v12 = vadd.f32 %v9747_v7, %v9746_v18  ;;  %v10806_v36 = vpop.f32.mrb[67].mxu1 }
 0x493   : > { %v9749_v60 = vsel %vm1174_vm13, %v9698_v46, 0.0  ;;  %v9460_v26 = vadd.f32 %v10804_v24, %v14230_v45  ;;  %v10807_v42 = vadd.f32 %v10806_v36, %v10805_v63  ;;  %v9823_v0 = vunpack.c.l.b16 %v9804_v50 }
 0x494   : > { %v9750_v14 = vadd.f32 %v9749_v60, %v9748_v12 }
 0x495   : > { %v9621_v23 = vadd.f32 %v14215_v17, %v9460_v26  ;;  %v9463_v39 = vadd.f32 %v10807_v42, %v14230_v45 }
 0x496   : > { %v9751_v6 = vrot.slane %v9750_v14, 4 }
 0x497   : > { %v9699_v51 = vmax.f32 %v9621_v23, 0.0  ;;  %v9624_v53 = vadd.f32 %v14219_v11, %v9463_v39  ;;  %v10808_v32 = vpop.f32.mrb[68].mxu1 }
 0x498   : > { %v9752_v59 = vadd.f32 %v9751_v6, %v9750_v14  ;;  %v10809_v13 = vpop.f32.mrb[69].mxu1 }
 0x499   : > { %v9700_v44 = vmax.f32 %v9624_v53, 0.0  ;;  %v10810_v55 = vadd.f32 %v10809_v13, %v10808_v32  ;;  %v10811_v30 = vpop.f32.mrb[70].mxu1  ;;  %v9757_v43 = vsel %vm1174_vm13, %v9699_v51, 0.0 }
 0x49a   : > { %v9753_v4 = vrot.slane %v9752_v59, 2  ;;  %v10812_v38 = vpop.f32.mrb[71].mxu1 }
 0x49b   : > { %v9758_v17 = vsel %vm1174_vm13, %v9700_v44, 0.0  ;;  %v9468_v2 = vadd.f32 %v10810_v55, %v14230_v45  ;;  %v10813_v31 = vadd.f32 %v10812_v38, %v10811_v30 }
 0x49c   : > { %v9754_v47 = vadd.f32 %v9753_v4, %v9752_v59  ;;  %v9759_v28 = vadd.f32 %v9758_v17, %v9757_v43 }
 0x49d   : > { %v9629_v11 = vadd.f32 %v14213_v27, %v9468_v2  ;;  %v9471_v33 = vadd.f32 %v10813_v31, %v14230_v45 }
 0x49e   : > { %v9755_v19 = vrot.slane %v9754_v47, 1 }
 0x49f   : > { %v9701_v48 = vmax.f32 %v9629_v11, 0.0  ;;  %v9632_v29 = vadd.f32 %v14217_v52, %v9471_v33  ;;  %v10814_v20 = vpop.f32.mrb[72].mxu1 }
 0x4a0   : > { %v10815_v18 = vpop.f32.mrb[73].mxu1  ;;  %v9756_v58 = vadd.f32 %v9755_v19, %v9754_v47 }
 0x4a1   : > { %v9760_v21 = vsel %vm1174_vm13, %v9701_v48, 0.0  ;;  %v9702_v27 = vmax.f32 %v9632_v29, 0.0  ;;  %v10816_v56 = vadd.f32 %v10815_v18, %v10814_v20  ;;  %v10817_v9 = vpop.f32.mrb[74].mxu1 }
 0x4a2   : > { %v9761_v15 = vadd.f32 %v9760_v21, %v9759_v28  ;;  %v10818_v34 = vpop.f32.mrb[75].mxu1  ;;  %v9801_v41 = vmul.f32 0.015625, %v9756_v58 }
 0x4a3   : > { %v9762_v8 = vsel %vm1174_vm13, %v9702_v27, 0.0  ;;  %v9476_v22 = vadd.f32 %v10816_v56, %v14230_v45  ;;  %v10819_v62 = vadd.f32 %v10818_v34, %v10817_v9 }
 0x4a4   : > { %v9763_v52 = vadd.f32 %v9762_v8, %v9761_v15  ;;  %v9805_v35 = vpack.c.bf16 %v9801_v41, %v9801_v41  ;;  %v9893_v7 = vsel %vm9827_vm2, %v9801_v41, %v9800_v61 }
 0x4a5   : > { %v9637_v46 = vadd.f32 %v14234_v25, %v9476_v22  ;;  %v9479_v24 = vadd.f32 %v10819_v62, %v14230_v45 }
 0x4a6   : > { %v9824_v63 = vunpack.c.l.b16 %v9805_v35 }
 0x4a7   : > { %v9703_v12 = vmax.f32 %v9637_v46, 0.0  ;;  %v9640_v36 = vadd.f32 %v14239_v10, %v9479_v24  ;;  %v10820_v60 = vpop.f32.mrb[76].mxu1 }
 0x4a8   : > { %v10821_v26 = vpop.f32.mrb[77].mxu1  ;;  %v9828_v42 = vsel %vm9827_vm2, %v9824_v63, %v9823_v0 }
 0x4a9   : > { %v9764_v14 = vsel %vm1174_vm13, %v9703_v12, 0.0  ;;  %v9704_v23 = vmax.f32 %v9640_v36, 0.0  ;;  %v10822_v39 = vadd.f32 %v10821_v26, %v10820_v60  ;;  %v10823_v3 = vpop.f32.mrb[78].mxu1 }
 0x4aa   : > { %v9765_v6 = vadd.f32 %v9764_v14, %v9763_v52  ;;  %v10824_v51 = vpop.f32.mrb[79].mxu1 }
 0x4ab   : > { %v9766_v25 = vsel %vm1174_vm13, %v9704_v23, 0.0  ;;  %v9484_v53 = vadd.f32 %v10822_v39, %v14230_v45  ;;  %v10825_v32 = vadd.f32 %v10824_v51, %v10823_v3 }
 0x4ac   : > { %v9767_v59 = vadd.f32 %v9766_v25, %v9765_v6 }
 0x4ad   : > { %v9645_v13 = vadd.f32 %v14232_v40, %v9484_v53  ;;  %v9487_v10 = vadd.f32 %v10825_v32, %v14230_v45 }
 0x4af   : > { %v9705_v44 = vmax.f32 %v9645_v13, 0.0  ;;  %v9648_v55 = vadd.f32 %v14237_v16, %v9487_v10 }
 0x4b1   : > { %v9768_v30 = vsel %vm1174_vm13, %v9705_v44, 0.0  ;;  %v9706_v4 = vmax.f32 %v9648_v55, 0.0 }
 0x4b2   : > { %v9769_v38 = vadd.f32 %v9768_v30, %v9767_v59 }
 0x4b3   : > { %v9770_v54 = vsel %vm1174_vm13, %v9706_v4, 0.0 }
 0x4b4   : > { %v9771_v43 = vadd.f32 %v9770_v54, %v9769_v38 }
 0x4b6   : > { %v9772_v17 = vrot.slane %v9771_v43, 4 }
 0x4b8   : > { %v9773_v2 = vadd.f32 %v9772_v17, %v9771_v43 }
 0x4ba   : > { %v9774_v31 = vrot.slane %v9773_v2, 2 }
 0x4bc   : > { %v9775_v47 = vadd.f32 %v9774_v31, %v9773_v2  ;;  %v10826_v33 = vpop.f32.mrb[80].mxu1 }
 0x4bd   : > { %v10827_v40 = vpop.f32.mrb[81].mxu1 }
 0x4be   : > { %v9776_v28 = vrot.slane %v9775_v47, 1  ;;  %v10828_v19 = vadd.f32 %v10827_v40, %v10826_v33  ;;  %v10829_v61 = vpop.f32.mrb[82].mxu1 }
 0x4bf   : > { %v10830_v16 = vpop.f32.mrb[83].mxu1 }
 0x4c0   : > { %v9777_v11 = vadd.f32 %v9776_v28, %v9775_v47  ;;  %v9492_v20 = vadd.f32 %v10828_v19, %v14230_v45  ;;  %v10831_v18 = vadd.f32 %v10830_v16, %v10829_v61 }
 0x4c2   : > { %v9802_v49 = vmul.f32 0.015625, %v9777_v11  ;;  %v9653_v21 = vadd.f32 %v14268_v5, %v9492_v20  ;;  %v9495_v27 = vadd.f32 %v10831_v18, %v14230_v45 }
 0x4c4   : > { %v9806_v48 = vpack.c.bf16 %v9802_v49, %v9802_v49  ;;  %v14336_v29 = vsel %vm9829_vm3, %v9802_v49, %v9893_v7  ;;  %v9707_v9 = vmax.f32 %v9653_v21, 0.0  ;;  %v9656_v15 = vadd.f32 %v14272_v57, %v9495_v27 }
 0x4c6   : > { %v9825_v58 = vunpack.c.l.b16 %v9806_v48  ;;  %v9708_v34 = vmax.f32 %v9656_v15, 0.0  ;;  %v9778_v41 = vsel %vm1174_vm13, %v9707_v9, 0.0 }
 0x4c8   : > { %v14341_v56 = vsel %vm9829_vm3, %v9825_v58, %v9828_v42  ;;  %v9779_v50 = vsel %vm1174_vm13, %v9708_v34, 0.0 }
 0x4c9   : > { %v9780_v8 = vadd.f32 %v9779_v50, %v9778_v41 }
 0x4d2   : > { %v10832_v22 = vpop.f32.mrb[84].mxu1 }
 0x4d3   : > { %v10833_v62 = vpop.f32.mrb[85].mxu1 }
 0x4d4   : > { %v10834_v52 = vadd.f32 %v10833_v62, %v10832_v22  ;;  %v10835_v35 = vpop.f32.mrb[86].mxu1 }
 0x4d5   : > { %v10836_v7 = vpop.f32.mrb[87].mxu1 }
 0x4d6   : > { %v9500_v5 = vadd.f32 %v10834_v52, %v14230_v45  ;;  %v10837_v46 = vadd.f32 %v10836_v7, %v10835_v35  ;;  %v10567_v52 = vld [vmem:[%s14419_s6] ss:$0 sm:$0xff] }
 0x4d8   : > { %v9661_v24 = vadd.f32 %v14266_v37, %v9500_v5  ;;  %v9503_v63 = vadd.f32 %v10837_v46, %v14230_v45 }
 0x4da   : > { %v9709_v0 = vmax.f32 %v9661_v24, 0.0  ;;  %v9664_v57 = vadd.f32 %v14270_v1, %v9503_v63 }
 0x4dc   : > { %v9781_v12 = vsel %vm1174_vm13, %v9709_v0, 0.0  ;;  %v9710_v36 = vmax.f32 %v9664_v57, 0.0 }
 0x4dd   : > { %v9782_v60 = vadd.f32 %v9781_v12, %v9780_v8 }
 0x4de   : > { %v9783_v26 = vsel %vm1174_vm13, %v9710_v36, 0.0 }
 0x4df   : > { %v9784_v42 = vadd.f32 %v9783_v26, %v9782_v60 }
 0x4e4   : > { %v10838_v14 = vpop.f32.mrb[88].mxu1 }
 0x4e5   : > { %v10839_v23 = vpop.f32.mrb[89].mxu1 }
 0x4e6   : > { %v10840_v39 = vadd.f32 %v10839_v23, %v10838_v14  ;;  %v10841_v3 = vpop.f32.mrb[90].mxu1 }
 0x4e7   : > { %v10842_v6 = vpop.f32.mrb[91].mxu1 }
 0x4e8   : > { %v10843_v51 = vadd.f32 %v10842_v6, %v10841_v3  ;;  %v9508_v44 = vadd.f32 %v10840_v39, %v14230_v45 }
 0x4ea   : > { %v9511_v43 = vadd.f32 %v10843_v51, %v14230_v45 }
 0x4f2   : > { %v10844_v25 = vpop.f32.mrb[92].mxu1 }
 0x4f3   : > { %v10845_v37 = vpop.f32.mrb[93].mxu1 }
 0x4f4   : > { %v10846_v53 = vadd.f32 %v10845_v37, %v10844_v25  ;;  %v10847_v32 = vpop.f32.mrb[94].mxu1 }
 0x4f5   : > { %v10848_v59 = vpop.f32.mrb[95].mxu1 }
 0x4f6   : > { %v10849_v13 = vadd.f32 %v10848_v59, %v10847_v32  ;;  %v9516_v1 = vadd.f32 %v10846_v53, %v14230_v45 }
 0x4f8   : > { %v9519_v4 = vadd.f32 %v10849_v13, %v14230_v45 }
 0x4fa   : > { %v10941_v10 = vpop.f32.mrb[96].mxu1 }
 0x4fb   : > { %v9677_v55 = vadd.f32 %v10941_v10, %v9516_v1  ;;  %v9668_v30 = vpop.f32.mrb[97].mxu1 }
 0x4fc   : > { %v9669_v38 = vadd.f32 %v9668_v30, %v9508_v44  ;;  %v10942_v54 = vpop.f32.mrb[98].mxu1 }
 0x4fd   : > { %v9680_v17 = vadd.f32 %v10942_v54, %v9519_v4  ;;  %v9671_v2 = vpop.f32.mrb[99].mxu1  ;;  %v9713_v28 = vmax.f32 %v9677_v55, 0.0 }
 0x4fe   : > { %v9711_v31 = vmax.f32 %v9669_v38, 0.0  ;;  %v9672_v47 = vadd.f32 %v9671_v2, %v9511_v43 }
 0x4ff   : > { %v9714_v49 = vmax.f32 %v9680_v17, 0.0  ;;  %v9789_v16 = vsel %vm1174_vm13, %v9713_v28, 0.0 }
 0x500   : > { %v9785_v11 = vsel %vm1174_vm13, %v9711_v31, 0.0  ;;  %v9712_v33 = vmax.f32 %v9672_v47, 0.0 }
 0x501   : > { %v9786_v40 = vadd.f32 %v9785_v11, %v9784_v42  ;;  %v9791_v20 = vsel %vm1174_vm13, %v9714_v49, 0.0 }
 0x502   : > { %v9787_v19 = vsel %vm1174_vm13, %v9712_v33, 0.0 }
 0x503   : > { %v9788_v61 = vadd.f32 %v9787_v19, %v9786_v40 }
 0x505   : > { %v9790_v48 = vadd.f32 %v9789_v16, %v9788_v61 }
 0x507   : > { %v9792_v18 = vadd.f32 %v9791_v20, %v9790_v48 }
 0x509   : > { %v9793_v45 = vrot.slane %v9792_v18, 4 }
 0x50b   : > { %v9794_v58 = vadd.f32 %v9793_v45, %v9792_v18 }
 0x50d   : > { %v9795_v21 = vrot.slane %v9794_v58, 2 }
 0x50f   : > { %v9796_v27 = vadd.f32 %v9795_v21, %v9794_v58 }
 0x511   : > { %v9797_v9 = vrot.slane %v9796_v27, 1 }
 0x513   : > { %v9798_v15 = vadd.f32 %v9797_v9, %v9796_v27 }
 0x515   : > { %v9803_v34 = vmul.f32 0.015625, %v9798_v15 }
 0x517   : > { %v9807_v41 = vpack.c.bf16 %v9803_v34, %v9803_v34  ;;  %v9895_v50 = vsel %vm9831_vm4, %v9803_v34, %v14336_v29 }
 0x518   : > { %9896 = vrot.lane.b32.xlu0 %v9895_v50, %s11210_s23  ;;  %s11146_s23 = scalar_lea.vmem %s11145_s22, 128 }
 0x519   : > { %v9826_v8 = vunpack.c.l.b16 %v9807_v41  ;;  %p11148_p1 = scmp.lt.s32.totalorder %s11146_s23, %s11140_s16 }
 0x51b   : > { %v9832_v22 = vsel %vm9831_vm4, %v9826_v8, %v14341_v56  ;;  %p11149_p2 = por %p11148_p1, %p11147_p0 }
 0x51c   : > { %v9833_v62 = vpack.c.b16 %v9832_v22, %v9832_v22 }
 0x51d   : > { %p11150_p3 = pnand %p11149_p2, %p11143_p13 }
 0x51e   : > { %10948 = vmatmul.mubr.msk.bf16.vlgmr.msra.gmra.mrb[100].mxu1 %vm1174_vm13, %v9833_v62 }
 0x58a   : > { %v9897_v5 = vpop.permute.xlu0 %9896 }
 0x5f1   : > { %v9883_v35 = vpop.f32.mrb[100].mxu1 }
 0x5f2   : > { %v9884_v29 = vadd.f32 %v10567_v52, %v9883_v35  ;;  %v10949_v7 = vpop.f32.mrb[101].mxu1 }
 0x5f3   : > { %v9886_v56 = vpop.f32.mrb[102].mxu1 }
 0x5f4   : > { %v9900_v46 = vsel %vm9899_vm5, %v9884_v29, %v9897_v5  ;;  %v10950_v24 = vpop.f32.mrb[103].mxu1 }
 0x5f5   : > { %v9902_v63 = vsel %vm9901_vm6, %v9900_v46, 0.0 }
 0x5f6   : > { %9903 = vst [vmem:[%s274_s14] sm:$0xf] %v9902_v63 }
 0x5f7   : > { %11153 = shalt.err (!%p11150_p3)
}
 0x5f8   : > { %s11154_s29 = scalar_lea.hbm %s14371_s20, 64  ;;  %s11158_s17 = scalar_lea.hbm %s14420_s7, 128 }
 0x5f9   : > { %p11155_p4 = scmp.ne.s32.totalorder %s14371_s20, %s11154_s29  ;;  %p11159_p9 = scmp.lt.u32.totalorder %s14371_s20, %s14420_s7 }
 0x5fa   : > { %p11160_p10 = scmp.lt.u32.totalorder %s11158_s17, %s11154_s29  ;;  %p11162_p12 = scmp.lt.u32.totalorder %s11154_s29, %s14371_s20 }
 0x5fb   : > { %p11156_p7 = pnand %p11155_p4, %p11290_p5 }
 0x5fc   : > { %p11161_p11 = por %p11160_p10, %p11159_p9 }
 0x5fd   : > { %p11157_p8 = pneg %p11156_p7 }
 0x5fe   : > { %p11163_p13 = por %p11162_p12, %p11161_p11 }
 0x600   : > { %p11164_p0 = pnand %p11163_p13, %p11157_p8 }
 0x602   : > { %11167 = shalt.err (!%p11164_p0)
}
 0x603   : > { %10955 = dma.vmem_to_hbm [thread:$0]  (%p11290_p5), %s14373_s15, 64, %s14371_s20, %s9905_s28  }
 0x604 PF: > { %p10961_p1 = scmp.ge.s32.totalorder %s11202_s27, 2  ;;  %s9930_s18 = sand.u32 1, %s11190_s24  }
 0x605   : > { %s9931_s19 = scalar_lea.sflag [#allocation5], %s9930_s18 }
 0x606   : > { %p10958_p2 = pnand %p10961_p1, %p11294_p6 }
 0x608   : > { %11185 = dma.done.wait (!%p10958_p2), %s9931_s19, 64  }
 0x609   : > { %11187 = vsyncadd (!%p10958_p2), %s9931_s19, 4294967232  ;;  %p17_p3 = scmp.ge.s32.totalorder %s11277_s30, 4   ;;  %s14433_s24 = smov %s11194_s25 }
 0x60a   : > { %s14434_s25 = smov %s11198_s26  ;;  %s14435_s26 = smov %s11288_s10 }
 0x60b   : > { %s14436_s27 = smov %s11277_s30  ;;  %19 = sbr.rel (!%p17_p3) target bundleno = 3 (0x3), region = 86 }
 0x612   :  { %9936 = vsyncpa [#allocation5], 1 }
 0x613   :  { %9938 = vsyncpa [#allocation5 + $0x1], 1 }

</bundles_post_ra>
